<compile_context>
chip_gen: v7x
topology: tpu7x:2x2x1
jax: 0.10.0
libtpu: 0.0.40
codegen_flags: <defaults>
</compile_context>

<pallas_src>
import functools
import math

import jax
import jax.numpy as jnp
from jax import lax
from jax.experimental import pallas as pl
from jax.experimental.pallas import tpu as pltpu


# ----------------------------------------------------------------------------
# In-kernel helpers (traced into the fused layer kernels)
# ----------------------------------------------------------------------------
def _layer_norm(y, g, b):
    mean = jnp.mean(y, axis=-1, keepdims=True)
    var = jnp.mean((y - mean) ** 2, axis=-1, keepdims=True)
    return (y - mean) * lax.rsqrt(var + 1e-12) * g + b


def _mha(q, k, v, mask, wo, n_head, scale):
    """All-heads scaled-dot-product attention folded into the output projection.

    q: (Lq, D), k/v: (Lk, D), mask: (Lq, Lk) float 0/1, wo: (D, D).
    Equivalent to concat(heads) @ wo, computed as a sum of per-head partial
    projections so no lane-concatenate is needed.
    """
    d_model = q.shape[-1]
    dh = d_model // n_head
    acc = jnp.zeros((q.shape[0], d_model), jnp.float32)
    for h in range(n_head):                       # static unroll over heads
        lo, hi = h * dh, (h + 1) * dh
        qh, kh, vh = q[:, lo:hi], k[:, lo:hi], v[:, lo:hi]
        # q @ k^T without an explicit transpose: contract the last dims.
        s = lax.dot_general(qh, kh, (((1,), (1,)), ((), ())),
                            preferred_element_type=jnp.float32) * scale
        s = jnp.where(mask == 0.0, -10000.0, s)   # masked_fill(mask == 0, -1e4)
        s = s - jnp.max(s, axis=-1, keepdims=True)
        p = jnp.exp(s)
        p = p * pl.reciprocal(jnp.sum(p, axis=-1, keepdims=True), approx=True)
        oh = jnp.dot(p, vh, preferred_element_type=jnp.float32)          # (Lq, dh)
        acc = acc + jnp.dot(oh, wo[lo:hi, :], preferred_element_type=jnp.float32)
    return acc


def _ffn(x, w1, b1, w2, b2):
    h = jnp.dot(x, w1, preferred_element_type=jnp.float32) + b1
    h = jnp.maximum(h, 0.0)                                              # ReLU
    return jnp.dot(h, w2, preferred_element_type=jnp.float32) + b2


# ----------------------------------------------------------------------------
# Pallas kernels
# ----------------------------------------------------------------------------
def _enc_layer_kernel(x_ref, m_ref,
                      wqkv_ref, bqkv_ref, wo_ref, bo_ref, g1_ref, be1_ref,
                      w1_ref, b1_ref, w2_ref, b2_ref, g2_ref, be2_ref,
                      o_ref, *, n_head, scale):
    """Full encoder layer for one batch element (grid over batch)."""
    x = x_ref[0]                                   # (L, D)
    mask = m_ref[0]                                # (L, L)
    d_model = x.shape[-1]

    # Self-attention: single fused QKV projection (D, 3D).
    qkv = jnp.dot(x, wqkv_ref[...], preferred_element_type=jnp.float32) + bqkv_ref[...]
    q = qkv[:, :d_model]
    k = qkv[:, d_model:2 * d_model]
    v = qkv[:, 2 * d_model:]
    attn = _mha(q, k, v, mask, wo_ref[...], n_head, scale)
    x1 = _layer_norm(attn + bo_ref[...] + x, g1_ref[...], be1_ref[...])

    # Position-wise FFN (hidden activation stays in VMEM).
    y = _ffn(x1, w1_ref[...], b1_ref[...], w2_ref[...], b2_ref[...]) + x1
    o_ref[0] = _layer_norm(y, g2_ref[...], be2_ref[...])


def _dec_layer_kernel(x_ref, enc_ref, tm_ref, sm_ref,
                      wqkv_ref, bqkv_ref, wo_s_ref, bo_s_ref, g1_ref, be1_ref,
                      wq_ref, bq_ref, wkv_ref, bkv_ref, wo_c_ref, bo_c_ref,
                      g2_ref, be2_ref,
                      w1_ref, b1_ref, w2_ref, b2_ref, g3_ref, be3_ref,
                      o_ref, *, n_head, scale):
    """Full decoder layer (self-attn + cross-attn + FFN) for one batch element."""
    x = x_ref[0]                                   # (T, D)
    enc = enc_ref[0]                               # (Ls, D)
    trg_mask = tm_ref[0]                           # (T, T)
    src_mask = sm_ref[0]                           # (T, Ls)
    d_model = x.shape[-1]

    # Masked self-attention (fused QKV).
    qkv = jnp.dot(x, wqkv_ref[...], preferred_element_type=jnp.float32) + bqkv_ref[...]
    q = qkv[:, :d_model]
    k = qkv[:, d_model:2 * d_model]
    v = qkv[:, 2 * d_model:]
    attn = _mha(q, k, v, trg_mask, wo_s_ref[...], n_head, scale)
    x1 = _layer_norm(attn + bo_s_ref[...] + x, g1_ref[...], be1_ref[...])

    # Cross-attention over the encoder output (fused K/V projection).
    qc = jnp.dot(x1, wq_ref[...], preferred_element_type=jnp.float32) + bq_ref[...]
    kvc = jnp.dot(enc, wkv_ref[...], preferred_element_type=jnp.float32) + bkv_ref[...]
    kc = kvc[:, :d_model]
    vc = kvc[:, d_model:]
    attn_c = _mha(qc, kc, vc, src_mask, wo_c_ref[...], n_head, scale)
    x2 = _layer_norm(attn_c + bo_c_ref[...] + x1, g2_ref[...], be2_ref[...])

    # Position-wise FFN.
    y = _ffn(x2, w1_ref[...], b1_ref[...], w2_ref[...], b2_ref[...]) + x2
    o_ref[0] = _layer_norm(y, g3_ref[...], be3_ref[...])


def _linear_kernel(x_ref, w_ref, b_ref, o_ref):
    o_ref[...] = (jnp.dot(x_ref[...], w_ref[...],
                          preferred_element_type=jnp.float32) + b_ref[...])


# ----------------------------------------------------------------------------
# Pallas wrappers
# ----------------------------------------------------------------------------
def _rep(shape):
    # Weight block: same block for every grid step -> fetched once, kept resident.
    return pl.BlockSpec(shape, lambda b: (0,) * len(shape))


def encoder_layer_block(lp, x, mask, n_head):
    B, L, D = x.shape
    F = lp["w1"].shape[1]
    scale = 1.0 / math.sqrt(D // n_head)
    a, n1, n2 = lp["attn"], lp["norm1"], lp["norm2"]
    return pl.pallas_call(
        functools.partial(_enc_layer_kernel, n_head=n_head, scale=scale),
        grid=(B,),
        in_specs=[
            pl.BlockSpec((1, L, D), lambda b: (b, 0, 0)),     # x
            pl.BlockSpec((1, L, L), lambda b: (b, 0, 0)),     # src self mask
            _rep((D, 3 * D)), _rep((1, 3 * D)),               # wqkv, bqkv
            _rep((D, D)), _rep((1, D)),                       # wo, bo
            _rep((1, D)), _rep((1, D)),                       # norm1 g, b
            _rep((D, F)), _rep((1, F)),                       # w1, b1
            _rep((F, D)), _rep((1, D)),                       # w2, b2
            _rep((1, D)), _rep((1, D)),                       # norm2 g, b
        ],
        out_specs=pl.BlockSpec((1, L, D), lambda b: (b, 0, 0)),
        out_shape=jax.ShapeDtypeStruct((B, L, D), jnp.float32),
        compiler_params=pltpu.CompilerParams(dimension_semantics=("parallel",)),
    )(x, mask,
      a["wqkv"], a["bqkv"].reshape(1, 3 * D), a["wo"], a["bo"].reshape(1, D),
      n1["g"].reshape(1, D), n1["b"].reshape(1, D),
      lp["w1"], lp["b1"].reshape(1, F), lp["w2"], lp["b2"].reshape(1, D),
      n2["g"].reshape(1, D), n2["b"].reshape(1, D))


def decoder_layer_block(lp, x, enc_src, trg_mask, src_mask, n_head):
    B, T, D = x.shape
    Ls = enc_src.shape[1]
    F = lp["w1"].shape[1]
    scale = 1.0 / math.sqrt(D // n_head)
    sa, ca = lp["self_attn"], lp["cross_attn"]
    n1, n2, n3 = lp["norm1"], lp["norm2"], lp["norm3"]
    return pl.pallas_call(
        functools.partial(_dec_layer_kernel, n_head=n_head, scale=scale),
        grid=(B,),
        in_specs=[
            pl.BlockSpec((1, T, D), lambda b: (b, 0, 0)),     # x (decoder stream)
            pl.BlockSpec((1, Ls, D), lambda b: (b, 0, 0)),    # encoder output
            pl.BlockSpec((1, T, T), lambda b: (b, 0, 0)),     # causal+pad mask
            pl.BlockSpec((1, T, Ls), lambda b: (b, 0, 0)),    # source key mask
            _rep((D, 3 * D)), _rep((1, 3 * D)),               # self wqkv, bqkv
            _rep((D, D)), _rep((1, D)),                       # self wo, bo
            _rep((1, D)), _rep((1, D)),                       # norm1 g, b
            _rep((D, D)), _rep((1, D)),                       # cross wq, bq
            _rep((D, 2 * D)), _rep((1, 2 * D)),               # cross wkv, bkv
            _rep((D, D)), _rep((1, D)),                       # cross wo, bo
            _rep((1, D)), _rep((1, D)),                       # norm2 g, b
            _rep((D, F)), _rep((1, F)),                       # w1, b1
            _rep((F, D)), _rep((1, D)),                       # w2, b2
            _rep((1, D)), _rep((1, D)),                       # norm3 g, b
        ],
        out_specs=pl.BlockSpec((1, T, D), lambda b: (b, 0, 0)),
        out_shape=jax.ShapeDtypeStruct((B, T, D), jnp.float32),
        compiler_params=pltpu.CompilerParams(dimension_semantics=("parallel",)),
    )(x, enc_src, trg_mask, src_mask,
      sa["wqkv"], sa["bqkv"].reshape(1, 3 * D), sa["wo"], sa["bo"].reshape(1, D),
      n1["g"].reshape(1, D), n1["b"].reshape(1, D),
      ca["wq"], ca["bq"].reshape(1, D), ca["wkv"], ca["bkv"].reshape(1, 2 * D),
      ca["wo"], ca["bo"].reshape(1, D),
      n2["g"].reshape(1, D), n2["b"].reshape(1, D),
      lp["w1"], lp["b1"].reshape(1, F), lp["w2"], lp["b2"].reshape(1, D),
      n3["g"].reshape(1, D), n3["b"].reshape(1, D))


def linear(x2d, w, b):
    m = x2d.shape[0]
    n = w.shape[1]
    # TODO(synk): at realistic vocab sizes, tile this with a (tm, tn, tk) grid +
    # VMEM accumulator; at these shapes one whole-array block is optimal.
    return pl.pallas_call(
        _linear_kernel,
        out_shape=jax.ShapeDtypeStruct((m, n), jnp.float32),
    )(x2d, w, b.reshape(1, n))


# ----------------------------------------------------------------------------
# Parameter construction (deterministic, synthetic)
# ----------------------------------------------------------------------------
def init_linear_params(key, fan_in, fan_out):
    kw, kb = jax.random.split(key)
    bound = 1.0 / math.sqrt(fan_in)
    w = jax.random.uniform(kw, (fan_in, fan_out), jnp.float32, -bound, bound)
    b = jax.random.uniform(kb, (fan_out,), jnp.float32, -bound, bound)
    return {"w": w, "b": b}


def init_norm_params(d_model):
    return {"g": jnp.ones((d_model,), jnp.float32),
            "b": jnp.zeros((d_model,), jnp.float32)}


def init_self_attn_params(key, d_model):
    ks = jax.random.split(key, 4)
    wq = init_linear_params(ks[0], d_model, d_model)
    wk = init_linear_params(ks[1], d_model, d_model)
    wv = init_linear_params(ks[2], d_model, d_model)
    wo = init_linear_params(ks[3], d_model, d_model)
    return {  # Q, K, V fused into one (D, 3D) matmul for the kernel.
        "wqkv": jnp.concatenate([wq["w"], wk["w"], wv["w"]], axis=1),
        "bqkv": jnp.concatenate([wq["b"], wk["b"], wv["b"]], axis=0),
        "wo": wo["w"], "bo": wo["b"],
    }


def init_cross_attn_params(key, d_model):
    ks = jax.random.split(key, 4)
    wq = init_linear_params(ks[0], d_model, d_model)
    wk = init_linear_params(ks[1], d_model, d_model)
    wv = init_linear_params(ks[2], d_model, d_model)
    wo = init_linear_params(ks[3], d_model, d_model)
    return {
        "wq": wq["w"], "bq": wq["b"],
        # K and V projections fused into one (D, 2D) matmul for the kernel.
        "wkv": jnp.concatenate([wk["w"], wv["w"]], axis=1),
        "bkv": jnp.concatenate([wk["b"], wv["b"]], axis=0),
        "wo": wo["w"], "bo": wo["b"],
    }


def positional_encoding(max_len, d_model):
    pos = jnp.arange(max_len, dtype=jnp.float32)[:, None]
    two_i = jnp.arange(0, d_model, 2, dtype=jnp.float32)[None, :]
    angle = pos / jnp.power(10000.0, two_i / d_model)
    pe = jnp.zeros((max_len, d_model), jnp.float32)
    pe = pe.at[:, 0::2].set(jnp.sin(angle))
    pe = pe.at[:, 1::2].set(jnp.cos(angle))
    return pe


def init_transformer_params(key, cfg):
    d, ff, nl = cfg["d_model"], cfg["ffn_hidden"], cfg["n_layers"]
    keys = jax.random.split(key, 8)

    def emb_table(k, vocab):
        t = 0.02 * jax.random.normal(k, (vocab, d), jnp.float32)
        return t.at[1].set(0.0)  # nn.Embedding padding_idx=1 in the reference repo

    def enc_layer(k):
        k1, k2, k3 = jax.random.split(k, 3)
        f1 = init_linear_params(k2, d, ff)
        f2 = init_linear_params(k3, ff, d)
        return {"attn": init_self_attn_params(k1, d),
                "norm1": init_norm_params(d),
                "w1": f1["w"], "b1": f1["b"],
                "w2": f2["w"], "b2": f2["b"],
                "norm2": init_norm_params(d)}

    def dec_layer(k):
        k1, k2, k3, k4 = jax.random.split(k, 4)
        f1 = init_linear_params(k3, d, ff)
        f2 = init_linear_params(k4, ff, d)
        return {"self_attn": init_self_attn_params(k1, d),
                "norm1": init_norm_params(d),
                "cross_attn": init_cross_attn_params(k2, d),
                "norm2": init_norm_params(d),
                "w1": f1["w"], "b1": f1["b"],
                "w2": f2["w"], "b2": f2["b"],
                "norm3": init_norm_params(d)}

    enc_keys = jax.random.split(keys[2], nl)
    dec_keys = jax.random.split(keys[3], nl)
    return {
        "enc_emb": emb_table(keys[0], cfg["enc_voc_size"]),
        "dec_emb": emb_table(keys[1], cfg["dec_voc_size"]),
        "pos": positional_encoding(cfg["max_len"], d),
        "enc_layers": [enc_layer(k) for k in enc_keys],
        "dec_layers": [dec_layer(k) for k in dec_keys],
        "out_linear": init_linear_params(keys[4], d, cfg["dec_voc_size"]),
    }


# ----------------------------------------------------------------------------
# Model forward (composition of fused Pallas layer kernels; glue in plain JAX)
# ----------------------------------------------------------------------------
def make_masks(src, trg, src_pad_idx, trg_pad_idx):
    """Per-batch (Lq, Lk) float masks; heads share them (broadcast in-kernel)."""
    B, Ls = src.shape
    T = trg.shape[1]
    src_valid = (src != src_pad_idx).astype(jnp.float32)                  # (B, Ls)
    enc_self_mask = jnp.broadcast_to(src_valid[:, None, :], (B, Ls, Ls))  # key mask
    cross_mask = jnp.broadcast_to(src_valid[:, None, :], (B, T, Ls))      # key mask
    trg_q_valid = (trg != trg_pad_idx).astype(jnp.float32)                # (B, T)
    causal = jnp.tril(jnp.ones((T, T), jnp.float32))
    dec_self_mask = trg_q_valid[:, :, None] * causal[None]                # pad(q) & tril
    return enc_self_mask, dec_self_mask, cross_mask


def encoder_forward(params, src, enc_self_mask, n_head):
    L = src.shape[1]
    # TODO(synk): embedding gather stays in plain JAX (no worthwhile Pallas
    # gather at this scale).
    x = jnp.take(params["enc_emb"], src, axis=0) + params["pos"][:L][None]
    for lp in params["enc_layers"]:
        x = encoder_layer_block(lp, x, enc_self_mask, n_head)
    return x


def decoder_forward(params, trg, enc_src, dec_self_mask, cross_mask, n_head):
    L = trg.shape[1]
    x = jnp.take(params["dec_emb"], trg, axis=0) + params["pos"][:L][None]
    for lp in params["dec_layers"]:
        x = decoder_layer_block(lp, x, enc_src, dec_self_mask, cross_mask, n_head)
    B, L, D = x.shape
    logits = linear(x.reshape(B * L, D),
                    params["out_linear"]["w"], params["out_linear"]["b"])
    return logits.reshape(B, L, -1)


def transformer_forward(params, src, trg, cfg):
    enc_self_mask, dec_self_mask, cross_mask = make_masks(
        src, trg, cfg["src_pad_idx"], cfg["trg_pad_idx"])
    enc_src = encoder_forward(params, src, enc_self_mask, cfg["n_head"])
    return decoder_forward(params, trg, enc_src, dec_self_mask, cross_mask,
                           cfg["n_head"])


# ----------------------------------------------------------------------------
# Main
# ----------------------------------------------------------------------------
if __name__ == "__main__":
    # d_model / ffn_hidden / vocab chosen as multiples of 128 -> lane-dense stores.
    cfg = dict(
        src_pad_idx=1, trg_pad_idx=1, trg_sos_idx=2,
        enc_voc_size=128, dec_voc_size=128,
        d_model=128, n_head=4, max_len=16,
        ffn_hidden=256, n_layers=2, drop_prob=0.0,
    )
    B, SRC_LEN, TRG_LEN = 2, 10, 8

    root = jax.random.PRNGKey(0)
    k_params, k_src, k_trg = jax.random.split(root, 3)
    params = init_transformer_params(k_params, cfg)

    src = jax.random.randint(k_src, (B, SRC_LEN), 2, cfg["enc_voc_size"], dtype=jnp.int32)
    trg = jax.random.randint(k_trg, (B, TRG_LEN), 2, cfg["dec_voc_size"], dtype=jnp.int32)
    # force some padding tokens so the masks actually do something
    src = src.at[:, -2:].set(cfg["src_pad_idx"])
    trg = trg.at[:, -1:].set(cfg["trg_pad_idx"])

    forward = jax.jit(lambda p, s, t: transformer_forward(p, s, t, cfg))
    out = forward(params, src, trg)
    jax.block_until_ready(out)

    assert out.shape == (B, TRG_LEN, cfg["dec_voc_size"]), out.shape
    assert bool(jnp.all(jnp.isfinite(out)))
    print("KERNEL_OK")
</pallas_src>

<mosaic_0001>
module attributes {stable_mosaic.version = 11 : i64} {
  func.func @_enc_layer_kernel(%arg0: i32, %arg1: memref<1x10x128xf32, #tpu.memory_space<vmem>>, %arg2: memref<1x10x10xf32, #tpu.memory_space<vmem>>, %arg3: memref<128x384xf32, #tpu.memory_space<vmem>>, %arg4: memref<1x384xf32, #tpu.memory_space<vmem>>, %arg5: memref<128x128xf32, #tpu.memory_space<vmem>>, %arg6: memref<1x128xf32, #tpu.memory_space<vmem>>, %arg7: memref<1x128xf32, #tpu.memory_space<vmem>>, %arg8: memref<1x128xf32, #tpu.memory_space<vmem>>, %arg9: memref<128x256xf32, #tpu.memory_space<vmem>>, %arg10: memref<1x256xf32, #tpu.memory_space<vmem>>, %arg11: memref<256x128xf32, #tpu.memory_space<vmem>>, %arg12: memref<1x128xf32, #tpu.memory_space<vmem>>, %arg13: memref<1x128xf32, #tpu.memory_space<vmem>>, %arg14: memref<1x128xf32, #tpu.memory_space<vmem>>, %arg15: memref<1x10x128xf32, #tpu.memory_space<vmem>>) attributes {dimension_semantics = [#tpu.dimension_semantics<parallel>], iteration_bounds = array<i64: 2>, scalar_prefetch = 0 : i64, scratch_operands = 0 : i64, tpu.core_type = #tpu.core_type<tc>, window_params = [{transform_indices = @transform_0, window_bounds = array<i64: 1, 10, 128>}, {transform_indices = @transform_1, window_bounds = array<i64: 1, 10, 10>}, {pipeline_mode = #tpu.pipeline_mode<synchronous>, transform_indices = @transform_2, window_bounds = array<i64: 128, 384>}, {pipeline_mode = #tpu.pipeline_mode<synchronous>, transform_indices = @transform_3, window_bounds = array<i64: 1, 384>}, {pipeline_mode = #tpu.pipeline_mode<synchronous>, transform_indices = @transform_4, window_bounds = array<i64: 128, 128>}, {pipeline_mode = #tpu.pipeline_mode<synchronous>, transform_indices = @transform_5, window_bounds = array<i64: 1, 128>}, {pipeline_mode = #tpu.pipeline_mode<synchronous>, transform_indices = @transform_6, window_bounds = array<i64: 1, 128>}, {pipeline_mode = #tpu.pipeline_mode<synchronous>, transform_indices = @transform_7, window_bounds = array<i64: 1, 128>}, {pipeline_mode = #tpu.pipeline_mode<synchronous>, transform_indices = @transform_8, window_bounds = array<i64: 128, 256>}, {pipeline_mode = #tpu.pipeline_mode<synchronous>, transform_indices = @transform_9, window_bounds = array<i64: 1, 256>}, {pipeline_mode = #tpu.pipeline_mode<synchronous>, transform_indices = @transform_10, window_bounds = array<i64: 256, 128>}, {pipeline_mode = #tpu.pipeline_mode<synchronous>, transform_indices = @transform_11, window_bounds = array<i64: 1, 128>}, {pipeline_mode = #tpu.pipeline_mode<synchronous>, transform_indices = @transform_12, window_bounds = array<i64: 1, 128>}, {pipeline_mode = #tpu.pipeline_mode<synchronous>, transform_indices = @transform_13, window_bounds = array<i64: 1, 128>}, {transform_indices = @transform_14, window_bounds = array<i64: 1, 10, 128>}]} {
    %c0 = arith.constant 0 : index
    %c0_0 = arith.constant 0 : index
    %c0_1 = arith.constant 0 : index
    %0 = vector.load %arg1[%c0, %c0_0, %c0_1] : memref<1x10x128xf32, #tpu.memory_space<vmem>>, vector<1x10x128xf32>
    %1 = vector.shape_cast %0 : vector<1x10x128xf32> to vector<10x128xf32>
    %c0_2 = arith.constant 0 : index
    %c0_3 = arith.constant 0 : index
    %c0_4 = arith.constant 0 : index
    %2 = vector.load %arg2[%c0_2, %c0_3, %c0_4] : memref<1x10x10xf32, #tpu.memory_space<vmem>>, vector<1x10x10xf32>
    %3 = vector.shape_cast %2 : vector<1x10x10xf32> to vector<10x10xf32>
    %c0_5 = arith.constant 0 : index
    %c0_6 = arith.constant 0 : index
    %4 = vector.load %arg3[%c0_5, %c0_6] : memref<128x384xf32, #tpu.memory_space<vmem>>, vector<128x384xf32>
    %cst = arith.constant dense<0.000000e+00> : vector<10x384xf32>
    %5 = tpu.matmul %1, %4, %cst {dimension_numbers = #tpu.dot_dimension_numbers<[1], [0], [0], [1], [0, 0, 1, 1], [], []>} : vector<10x128xf32>, vector<128x384xf32>, vector<10x384xf32> -> vector<10x384xf32>
    %c0_7 = arith.constant 0 : index
    %c0_8 = arith.constant 0 : index
    %6 = vector.load %arg4[%c0_7, %c0_8] : memref<1x384xf32, #tpu.memory_space<vmem>>, vector<1x384xf32>
    %7 = vector.broadcast %6 : vector<1x384xf32> to vector<10x384xf32>
    %8 = arith.addf %5, %7 : vector<10x384xf32>
    %9 = vector.extract_strided_slice %8 {offsets = [0, 0], sizes = [10, 128], strides = [1, 1]} : vector<10x384xf32> to vector<10x128xf32>
    %10 = vector.extract_strided_slice %8 {offsets = [0, 128], sizes = [10, 128], strides = [1, 1]} : vector<10x384xf32> to vector<10x128xf32>
    %11 = vector.extract_strided_slice %8 {offsets = [0, 256], sizes = [10, 128], strides = [1, 1]} : vector<10x384xf32> to vector<10x128xf32>
    %c0_9 = arith.constant 0 : index
    %c0_10 = arith.constant 0 : index
    %12 = vector.load %arg5[%c0_9, %c0_10] : memref<128x128xf32, #tpu.memory_space<vmem>>, vector<128x128xf32>
    %cst_11 = arith.constant 0.000000e+00 : f32
    %13 = vector.broadcast %cst_11 : f32 to vector<10x128xf32>
    %14 = vector.extract_strided_slice %9 {offsets = [0, 0], sizes = [10, 32], strides = [1, 1]} : vector<10x128xf32> to vector<10x32xf32>
    %15 = vector.extract_strided_slice %10 {offsets = [0, 0], sizes = [10, 32], strides = [1, 1]} : vector<10x128xf32> to vector<10x32xf32>
    %16 = vector.extract_strided_slice %11 {offsets = [0, 0], sizes = [10, 32], strides = [1, 1]} : vector<10x128xf32> to vector<10x32xf32>
    %cst_12 = arith.constant dense<0.000000e+00> : vector<10x10xf32>
    %17 = tpu.matmul %14, %15, %cst_12 {dimension_numbers = #tpu.dot_dimension_numbers<[1], [1], [0], [0], [0, 0, 1, 0], [], []>} : vector<10x32xf32>, vector<10x32xf32>, vector<10x10xf32> -> vector<10x10xf32>
    %cst_13 = arith.constant 0.176776692 : f32
    %18 = vector.broadcast %cst_13 : f32 to vector<10x10xf32>
    %19 = arith.mulf %17, %18 : vector<10x10xf32>
    %cst_14 = arith.constant 0.000000e+00 : f32
    %20 = vector.broadcast %cst_14 : f32 to vector<10x10xf32>
    %21 = arith.cmpf oeq, %3, %20 : vector<10x10xf32>
    %cst_15 = arith.constant -1.000000e+04 : f32
    %22 = vector.broadcast %cst_15 : f32 to vector<10x10xf32>
    %23 = arith.select %21, %22, %19 : vector<10x10xi1>, vector<10x10xf32>
    %cst_16 = arith.constant dense<0xFF800000> : vector<10xf32>
    %24 = vector.multi_reduction <maximumf>, %23, %cst_16 [1] : vector<10x10xf32> to vector<10xf32>
    %25 = vector.shape_cast %24 : vector<10xf32> to vector<10x1xf32>
    %26 = vector.broadcast %25 : vector<10x1xf32> to vector<10x10xf32>
    %27 = arith.subf %23, %26 : vector<10x10xf32>
    %28 = math.exp %27 : vector<10x10xf32>
    %cst_17 = arith.constant dense<0.000000e+00> : vector<10xf32>
    %29 = vector.multi_reduction <add>, %28, %cst_17 [1] : vector<10x10xf32> to vector<10xf32>
    %30 = vector.shape_cast %29 : vector<10xf32> to vector<10x1xf32>
    %31 = tpu.reciprocal %30 {approx = true} : vector<10x1xf32> -> vector<10x1xf32>
    %32 = vector.broadcast %31 : vector<10x1xf32> to vector<10x10xf32>
    %33 = arith.mulf %28, %32 : vector<10x10xf32>
    %cst_18 = arith.constant dense<0.000000e+00> : vector<10x32xf32>
    %34 = tpu.matmul %33, %16, %cst_18 {dimension_numbers = #tpu.dot_dimension_numbers<[1], [0], [0], [1], [0, 0, 1, 1], [], []>} : vector<10x10xf32>, vector<10x32xf32>, vector<10x32xf32> -> vector<10x32xf32>
    %35 = vector.extract_strided_slice %12 {offsets = [0, 0], sizes = [32, 128], strides = [1, 1]} : vector<128x128xf32> to vector<32x128xf32>
    %cst_19 = arith.constant dense<0.000000e+00> : vector<10x128xf32>
    %36 = tpu.matmul %34, %35, %cst_19 {dimension_numbers = #tpu.dot_dimension_numbers<[1], [0], [0], [1], [0, 0, 1, 1], [], []>} : vector<10x32xf32>, vector<32x128xf32>, vector<10x128xf32> -> vector<10x128xf32>
    %37 = arith.addf %13, %36 : vector<10x128xf32>
    %38 = vector.extract_strided_slice %9 {offsets = [0, 32], sizes = [10, 32], strides = [1, 1]} : vector<10x128xf32> to vector<10x32xf32>
    %39 = vector.extract_strided_slice %10 {offsets = [0, 32], sizes = [10, 32], strides = [1, 1]} : vector<10x128xf32> to vector<10x32xf32>
    %40 = vector.extract_strided_slice %11 {offsets = [0, 32], sizes = [10, 32], strides = [1, 1]} : vector<10x128xf32> to vector<10x32xf32>
    %cst_20 = arith.constant dense<0.000000e+00> : vector<10x10xf32>
    %41 = tpu.matmul %38, %39, %cst_20 {dimension_numbers = #tpu.dot_dimension_numbers<[1], [1], [0], [0], [0, 0, 1, 0], [], []>} : vector<10x32xf32>, vector<10x32xf32>, vector<10x10xf32> -> vector<10x10xf32>
    %cst_21 = arith.constant 0.176776692 : f32
    %42 = vector.broadcast %cst_21 : f32 to vector<10x10xf32>
    %43 = arith.mulf %41, %42 : vector<10x10xf32>
    %cst_22 = arith.constant 0.000000e+00 : f32
    %44 = vector.broadcast %cst_22 : f32 to vector<10x10xf32>
    %45 = arith.cmpf oeq, %3, %44 : vector<10x10xf32>
    %cst_23 = arith.constant -1.000000e+04 : f32
    %46 = vector.broadcast %cst_23 : f32 to vector<10x10xf32>
    %47 = arith.select %45, %46, %43 : vector<10x10xi1>, vector<10x10xf32>
    %cst_24 = arith.constant dense<0xFF800000> : vector<10xf32>
    %48 = vector.multi_reduction <maximumf>, %47, %cst_24 [1] : vector<10x10xf32> to vector<10xf32>
    %49 = vector.shape_cast %48 : vector<10xf32> to vector<10x1xf32>
    %50 = vector.broadcast %49 : vector<10x1xf32> to vector<10x10xf32>
    %51 = arith.subf %47, %50 : vector<10x10xf32>
    %52 = math.exp %51 : vector<10x10xf32>
    %cst_25 = arith.constant dense<0.000000e+00> : vector<10xf32>
    %53 = vector.multi_reduction <add>, %52, %cst_25 [1] : vector<10x10xf32> to vector<10xf32>
    %54 = vector.shape_cast %53 : vector<10xf32> to vector<10x1xf32>
    %55 = tpu.reciprocal %54 {approx = true} : vector<10x1xf32> -> vector<10x1xf32>
    %56 = vector.broadcast %55 : vector<10x1xf32> to vector<10x10xf32>
    %57 = arith.mulf %52, %56 : vector<10x10xf32>
    %cst_26 = arith.constant dense<0.000000e+00> : vector<10x32xf32>
    %58 = tpu.matmul %57, %40, %cst_26 {dimension_numbers = #tpu.dot_dimension_numbers<[1], [0], [0], [1], [0, 0, 1, 1], [], []>} : vector<10x10xf32>, vector<10x32xf32>, vector<10x32xf32> -> vector<10x32xf32>
    %59 = vector.extract_strided_slice %12 {offsets = [32, 0], sizes = [32, 128], strides = [1, 1]} : vector<128x128xf32> to vector<32x128xf32>
    %cst_27 = arith.constant dense<0.000000e+00> : vector<10x128xf32>
    %60 = tpu.matmul %58, %59, %cst_27 {dimension_numbers = #tpu.dot_dimension_numbers<[1], [0], [0], [1], [0, 0, 1, 1], [], []>} : vector<10x32xf32>, vector<32x128xf32>, vector<10x128xf32> -> vector<10x128xf32>
    %61 = arith.addf %37, %60 : vector<10x128xf32>
    %62 = vector.extract_strided_slice %9 {offsets = [0, 64], sizes = [10, 32], strides = [1, 1]} : vector<10x128xf32> to vector<10x32xf32>
    %63 = vector.extract_strided_slice %10 {offsets = [0, 64], sizes = [10, 32], strides = [1, 1]} : vector<10x128xf32> to vector<10x32xf32>
    %64 = vector.extract_strided_slice %11 {offsets = [0, 64], sizes = [10, 32], strides = [1, 1]} : vector<10x128xf32> to vector<10x32xf32>
    %cst_28 = arith.constant dense<0.000000e+00> : vector<10x10xf32>
    %65 = tpu.matmul %62, %63, %cst_28 {dimension_numbers = #tpu.dot_dimension_numbers<[1], [1], [0], [0], [0, 0, 1, 0], [], []>} : vector<10x32xf32>, vector<10x32xf32>, vector<10x10xf32> -> vector<10x10xf32>
    %cst_29 = arith.constant 0.176776692 : f32
    %66 = vector.broadcast %cst_29 : f32 to vector<10x10xf32>
    %67 = arith.mulf %65, %66 : vector<10x10xf32>
    %cst_30 = arith.constant 0.000000e+00 : f32
    %68 = vector.broadcast %cst_30 : f32 to vector<10x10xf32>
    %69 = arith.cmpf oeq, %3, %68 : vector<10x10xf32>
    %cst_31 = arith.constant -1.000000e+04 : f32
    %70 = vector.broadcast %cst_31 : f32 to vector<10x10xf32>
    %71 = arith.select %69, %70, %67 : vector<10x10xi1>, vector<10x10xf32>
    %cst_32 = arith.constant dense<0xFF800000> : vector<10xf32>
    %72 = vector.multi_reduction <maximumf>, %71, %cst_32 [1] : vector<10x10xf32> to vector<10xf32>
    %73 = vector.shape_cast %72 : vector<10xf32> to vector<10x1xf32>
    %74 = vector.broadcast %73 : vector<10x1xf32> to vector<10x10xf32>
    %75 = arith.subf %71, %74 : vector<10x10xf32>
    %76 = math.exp %75 : vector<10x10xf32>
    %cst_33 = arith.constant dense<0.000000e+00> : vector<10xf32>
    %77 = vector.multi_reduction <add>, %76, %cst_33 [1] : vector<10x10xf32> to vector<10xf32>
    %78 = vector.shape_cast %77 : vector<10xf32> to vector<10x1xf32>
    %79 = tpu.reciprocal %78 {approx = true} : vector<10x1xf32> -> vector<10x1xf32>
    %80 = vector.broadcast %79 : vector<10x1xf32> to vector<10x10xf32>
    %81 = arith.mulf %76, %80 : vector<10x10xf32>
    %cst_34 = arith.constant dense<0.000000e+00> : vector<10x32xf32>
    %82 = tpu.matmul %81, %64, %cst_34 {dimension_numbers = #tpu.dot_dimension_numbers<[1], [0], [0], [1], [0, 0, 1, 1], [], []>} : vector<10x10xf32>, vector<10x32xf32>, vector<10x32xf32> -> vector<10x32xf32>
    %83 = vector.extract_strided_slice %12 {offsets = [64, 0], sizes = [32, 128], strides = [1, 1]} : vector<128x128xf32> to vector<32x128xf32>
    %cst_35 = arith.constant dense<0.000000e+00> : vector<10x128xf32>
    %84 = tpu.matmul %82, %83, %cst_35 {dimension_numbers = #tpu.dot_dimension_numbers<[1], [0], [0], [1], [0, 0, 1, 1], [], []>} : vector<10x32xf32>, vector<32x128xf32>, vector<10x128xf32> -> vector<10x128xf32>
    %85 = arith.addf %61, %84 : vector<10x128xf32>
    %86 = vector.extract_strided_slice %9 {offsets = [0, 96], sizes = [10, 32], strides = [1, 1]} : vector<10x128xf32> to vector<10x32xf32>
    %87 = vector.extract_strided_slice %10 {offsets = [0, 96], sizes = [10, 32], strides = [1, 1]} : vector<10x128xf32> to vector<10x32xf32>
    %88 = vector.extract_strided_slice %11 {offsets = [0, 96], sizes = [10, 32], strides = [1, 1]} : vector<10x128xf32> to vector<10x32xf32>
    %cst_36 = arith.constant dense<0.000000e+00> : vector<10x10xf32>
    %89 = tpu.matmul %86, %87, %cst_36 {dimension_numbers = #tpu.dot_dimension_numbers<[1], [1], [0], [0], [0, 0, 1, 0], [], []>} : vector<10x32xf32>, vector<10x32xf32>, vector<10x10xf32> -> vector<10x10xf32>
    %cst_37 = arith.constant 0.176776692 : f32
    %90 = vector.broadcast %cst_37 : f32 to vector<10x10xf32>
    %91 = arith.mulf %89, %90 : vector<10x10xf32>
    %cst_38 = arith.constant 0.000000e+00 : f32
    %92 = vector.broadcast %cst_38 : f32 to vector<10x10xf32>
    %93 = arith.cmpf oeq, %3, %92 : vector<10x10xf32>
    %cst_39 = arith.constant -1.000000e+04 : f32
    %94 = vector.broadcast %cst_39 : f32 to vector<10x10xf32>
    %95 = arith.select %93, %94, %91 : vector<10x10xi1>, vector<10x10xf32>
    %cst_40 = arith.constant dense<0xFF800000> : vector<10xf32>
    %96 = vector.multi_reduction <maximumf>, %95, %cst_40 [1] : vector<10x10xf32> to vector<10xf32>
    %97 = vector.shape_cast %96 : vector<10xf32> to vector<10x1xf32>
    %98 = vector.broadcast %97 : vector<10x1xf32> to vector<10x10xf32>
    %99 = arith.subf %95, %98 : vector<10x10xf32>
    %100 = math.exp %99 : vector<10x10xf32>
    %cst_41 = arith.constant dense<0.000000e+00> : vector<10xf32>
    %101 = vector.multi_reduction <add>, %100, %cst_41 [1] : vector<10x10xf32> to vector<10xf32>
    %102 = vector.shape_cast %101 : vector<10xf32> to vector<10x1xf32>
    %103 = tpu.reciprocal %102 {approx = true} : vector<10x1xf32> -> vector<10x1xf32>
    %104 = vector.broadcast %103 : vector<10x1xf32> to vector<10x10xf32>
    %105 = arith.mulf %100, %104 : vector<10x10xf32>
    %cst_42 = arith.constant dense<0.000000e+00> : vector<10x32xf32>
    %106 = tpu.matmul %105, %88, %cst_42 {dimension_numbers = #tpu.dot_dimension_numbers<[1], [0], [0], [1], [0, 0, 1, 1], [], []>} : vector<10x10xf32>, vector<10x32xf32>, vector<10x32xf32> -> vector<10x32xf32>
    %107 = vector.extract_strided_slice %12 {offsets = [96, 0], sizes = [32, 128], strides = [1, 1]} : vector<128x128xf32> to vector<32x128xf32>
    %cst_43 = arith.constant dense<0.000000e+00> : vector<10x128xf32>
    %108 = tpu.matmul %106, %107, %cst_43 {dimension_numbers = #tpu.dot_dimension_numbers<[1], [0], [0], [1], [0, 0, 1, 1], [], []>} : vector<10x32xf32>, vector<32x128xf32>, vector<10x128xf32> -> vector<10x128xf32>
    %109 = arith.addf %85, %108 : vector<10x128xf32>
    %c0_44 = arith.constant 0 : index
    %c0_45 = arith.constant 0 : index
    %110 = vector.load %arg6[%c0_44, %c0_45] : memref<1x128xf32, #tpu.memory_space<vmem>>, vector<1x128xf32>
    %111 = vector.broadcast %110 : vector<1x128xf32> to vector<10x128xf32>
    %112 = arith.addf %109, %111 : vector<10x128xf32>
    %113 = arith.addf %112, %1 : vector<10x128xf32>
    %c0_46 = arith.constant 0 : index
    %c0_47 = arith.constant 0 : index
    %114 = vector.load %arg7[%c0_46, %c0_47] : memref<1x128xf32, #tpu.memory_space<vmem>>, vector<1x128xf32>
    %c0_48 = arith.constant 0 : index
    %c0_49 = arith.constant 0 : index
    %115 = vector.load %arg8[%c0_48, %c0_49] : memref<1x128xf32, #tpu.memory_space<vmem>>, vector<1x128xf32>
    %cst_50 = arith.constant dense<0.000000e+00> : vector<10xf32>
    %116 = vector.multi_reduction <add>, %113, %cst_50 [1] : vector<10x128xf32> to vector<10xf32>
    %117 = vector.shape_cast %116 : vector<10xf32> to vector<10x1xf32>
    %cst_51 = arith.constant 1.280000e+02 : f32
    %118 = vector.broadcast %cst_51 : f32 to vector<10x1xf32>
    %119 = arith.divf %117, %118 : vector<10x1xf32>
    %120 = vector.broadcast %119 : vector<10x1xf32> to vector<10x128xf32>
    %121 = arith.subf %113, %120 : vector<10x128xf32>
    %122 = arith.mulf %121, %121 : vector<10x128xf32>
    %cst_52 = arith.constant dense<0.000000e+00> : vector<10xf32>
    %123 = vector.multi_reduction <add>, %122, %cst_52 [1] : vector<10x128xf32> to vector<10xf32>
    %124 = vector.shape_cast %123 : vector<10xf32> to vector<10x1xf32>
    %cst_53 = arith.constant 1.280000e+02 : f32
    %125 = vector.broadcast %cst_53 : f32 to vector<10x1xf32>
    %126 = arith.divf %124, %125 : vector<10x1xf32>
    %127 = vector.broadcast %119 : vector<10x1xf32> to vector<10x128xf32>
    %128 = arith.subf %113, %127 : vector<10x128xf32>
    %cst_54 = arith.constant 9.99999996E-13 : f32
    %129 = vector.broadcast %cst_54 : f32 to vector<10x1xf32>
    %130 = arith.addf %126, %129 : vector<10x1xf32>
    %131 = math.rsqrt %130 : vector<10x1xf32>
    %132 = vector.broadcast %131 : vector<10x1xf32> to vector<10x128xf32>
    %133 = arith.mulf %128, %132 : vector<10x128xf32>
    %134 = vector.broadcast %114 : vector<1x128xf32> to vector<10x128xf32>
    %135 = arith.mulf %133, %134 : vector<10x128xf32>
    %136 = vector.broadcast %115 : vector<1x128xf32> to vector<10x128xf32>
    %137 = arith.addf %135, %136 : vector<10x128xf32>
    %c0_55 = arith.constant 0 : index
    %c0_56 = arith.constant 0 : index
    %138 = vector.load %arg9[%c0_55, %c0_56] : memref<128x256xf32, #tpu.memory_space<vmem>>, vector<128x256xf32>
    %c0_57 = arith.constant 0 : index
    %c0_58 = arith.constant 0 : index
    %139 = vector.load %arg10[%c0_57, %c0_58] : memref<1x256xf32, #tpu.memory_space<vmem>>, vector<1x256xf32>
    %c0_59 = arith.constant 0 : index
    %c0_60 = arith.constant 0 : index
    %140 = vector.load %arg11[%c0_59, %c0_60] : memref<256x128xf32, #tpu.memory_space<vmem>>, vector<256x128xf32>
    %c0_61 = arith.constant 0 : index
    %c0_62 = arith.constant 0 : index
    %141 = vector.load %arg12[%c0_61, %c0_62] : memref<1x128xf32, #tpu.memory_space<vmem>>, vector<1x128xf32>
    %cst_63 = arith.constant dense<0.000000e+00> : vector<10x256xf32>
    %142 = tpu.matmul %137, %138, %cst_63 {dimension_numbers = #tpu.dot_dimension_numbers<[1], [0], [0], [1], [0, 0, 1, 1], [], []>} : vector<10x128xf32>, vector<128x256xf32>, vector<10x256xf32> -> vector<10x256xf32>
    %143 = vector.broadcast %139 : vector<1x256xf32> to vector<10x256xf32>
    %144 = arith.addf %142, %143 : vector<10x256xf32>
    %cst_64 = arith.constant 0.000000e+00 : f32
    %145 = vector.broadcast %cst_64 : f32 to vector<10x256xf32>
    %146 = arith.maximumf %144, %145 : vector<10x256xf32>
    %cst_65 = arith.constant dense<0.000000e+00> : vector<10x128xf32>
    %147 = tpu.matmul %146, %140, %cst_65 {dimension_numbers = #tpu.dot_dimension_numbers<[1], [0], [0], [1], [0, 0, 1, 1], [], []>} : vector<10x256xf32>, vector<256x128xf32>, vector<10x128xf32> -> vector<10x128xf32>
    %148 = vector.broadcast %141 : vector<1x128xf32> to vector<10x128xf32>
    %149 = arith.addf %147, %148 : vector<10x128xf32>
    %150 = arith.addf %149, %137 : vector<10x128xf32>
    %c0_66 = arith.constant 0 : index
    %c0_67 = arith.constant 0 : index
    %151 = vector.load %arg13[%c0_66, %c0_67] : memref<1x128xf32, #tpu.memory_space<vmem>>, vector<1x128xf32>
    %c0_68 = arith.constant 0 : index
    %c0_69 = arith.constant 0 : index
    %152 = vector.load %arg14[%c0_68, %c0_69] : memref<1x128xf32, #tpu.memory_space<vmem>>, vector<1x128xf32>
    %cst_70 = arith.constant dense<0.000000e+00> : vector<10xf32>
    %153 = vector.multi_reduction <add>, %150, %cst_70 [1] : vector<10x128xf32> to vector<10xf32>
    %154 = vector.shape_cast %153 : vector<10xf32> to vector<10x1xf32>
    %cst_71 = arith.constant 1.280000e+02 : f32
    %155 = vector.broadcast %cst_71 : f32 to vector<10x1xf32>
    %156 = arith.divf %154, %155 : vector<10x1xf32>
    %157 = vector.broadcast %156 : vector<10x1xf32> to vector<10x128xf32>
    %158 = arith.subf %150, %157 : vector<10x128xf32>
    %159 = arith.mulf %158, %158 : vector<10x128xf32>
    %cst_72 = arith.constant dense<0.000000e+00> : vector<10xf32>
    %160 = vector.multi_reduction <add>, %159, %cst_72 [1] : vector<10x128xf32> to vector<10xf32>
    %161 = vector.shape_cast %160 : vector<10xf32> to vector<10x1xf32>
    %cst_73 = arith.constant 1.280000e+02 : f32
    %162 = vector.broadcast %cst_73 : f32 to vector<10x1xf32>
    %163 = arith.divf %161, %162 : vector<10x1xf32>
    %164 = vector.broadcast %156 : vector<10x1xf32> to vector<10x128xf32>
    %165 = arith.subf %150, %164 : vector<10x128xf32>
    %cst_74 = arith.constant 9.99999996E-13 : f32
    %166 = vector.broadcast %cst_74 : f32 to vector<10x1xf32>
    %167 = arith.addf %163, %166 : vector<10x1xf32>
    %168 = math.rsqrt %167 : vector<10x1xf32>
    %169 = vector.broadcast %168 : vector<10x1xf32> to vector<10x128xf32>
    %170 = arith.mulf %165, %169 : vector<10x128xf32>
    %171 = vector.broadcast %151 : vector<1x128xf32> to vector<10x128xf32>
    %172 = arith.mulf %170, %171 : vector<10x128xf32>
    %173 = vector.broadcast %152 : vector<1x128xf32> to vector<10x128xf32>
    %174 = arith.addf %172, %173 : vector<10x128xf32>
    %c0_75 = arith.constant 0 : index
    %c0_76 = arith.constant 0 : index
    %c0_77 = arith.constant 0 : index
    %175 = vector.load %arg15[%c0_75, %c0_76, %c0_77] : memref<1x10x128xf32, #tpu.memory_space<vmem>>, vector<1x10x128xf32>
    %176 = vector.shape_cast %175 : vector<1x10x128xf32> to vector<10x128xf32>
    %177 = vector.shape_cast %174 : vector<10x128xf32> to vector<1x10x128xf32>
    tpu.vector_store %arg15[%c0_75, %c0_76, %c0_77], %177 {strides = array<i32>} : memref<1x10x128xf32, #tpu.memory_space<vmem>>, vector<1x10x128xf32>,
    return
  }
  func.func @transform_0(%arg0: i32) -> (i32, i32, i32) {
    %c0_i32 = arith.constant 0 : i32
    %c0_i32_0 = arith.constant 0 : i32
    %c0_i32_1 = arith.constant 0 : i32
    return %arg0, %c0_i32, %c0_i32_0 : i32, i32, i32
  }
  func.func @transform_1(%arg0: i32) -> (i32, i32, i32) {
    %c0_i32 = arith.constant 0 : i32
    %c0_i32_0 = arith.constant 0 : i32
    %c0_i32_1 = arith.constant 0 : i32
    return %arg0, %c0_i32, %c0_i32_0 : i32, i32, i32
  }
  func.func @transform_2(%arg0: i32) -> (i32, i32) {
    %c0_i32 = arith.constant 0 : i32
    %c0_i32_0 = arith.constant 0 : i32
    %c0_i32_1 = arith.constant 0 : i32
    return %c0_i32, %c0_i32_0 : i32, i32
  }
  func.func @transform_3(%arg0: i32) -> (i32, i32) {
    %c0_i32 = arith.constant 0 : i32
    %c0_i32_0 = arith.constant 0 : i32
    %c0_i32_1 = arith.constant 0 : i32
    return %c0_i32, %c0_i32_0 : i32, i32
  }
  func.func @transform_4(%arg0: i32) -> (i32, i32) {
    %c0_i32 = arith.constant 0 : i32
    %c0_i32_0 = arith.constant 0 : i32
    %c0_i32_1 = arith.constant 0 : i32
    return %c0_i32, %c0_i32_0 : i32, i32
  }
  func.func @transform_5(%arg0: i32) -> (i32, i32) {
    %c0_i32 = arith.constant 0 : i32
    %c0_i32_0 = arith.constant 0 : i32
    %c0_i32_1 = arith.constant 0 : i32
    return %c0_i32, %c0_i32_0 : i32, i32
  }
  func.func @transform_6(%arg0: i32) -> (i32, i32) {
    %c0_i32 = arith.constant 0 : i32
    %c0_i32_0 = arith.constant 0 : i32
    %c0_i32_1 = arith.constant 0 : i32
    return %c0_i32, %c0_i32_0 : i32, i32
  }
  func.func @transform_7(%arg0: i32) -> (i32, i32) {
    %c0_i32 = arith.constant 0 : i32
    %c0_i32_0 = arith.constant 0 : i32
    %c0_i32_1 = arith.constant 0 : i32
    return %c0_i32, %c0_i32_0 : i32, i32
  }
  func.func @transform_8(%arg0: i32) -> (i32, i32) {
    %c0_i32 = arith.constant 0 : i32
    %c0_i32_0 = arith.constant 0 : i32
    %c0_i32_1 = arith.constant 0 : i32
    return %c0_i32, %c0_i32_0 : i32, i32
  }
  func.func @transform_9(%arg0: i32) -> (i32, i32) {
    %c0_i32 = arith.constant 0 : i32
    %c0_i32_0 = arith.constant 0 : i32
    %c0_i32_1 = arith.constant 0 : i32
    return %c0_i32, %c0_i32_0 : i32, i32
  }
  func.func @transform_10(%arg0: i32) -> (i32, i32) {
    %c0_i32 = arith.constant 0 : i32
    %c0_i32_0 = arith.constant 0 : i32
    %c0_i32_1 = arith.constant 0 : i32
    return %c0_i32, %c0_i32_0 : i32, i32
  }
  func.func @transform_11(%arg0: i32) -> (i32, i32) {
    %c0_i32 = arith.constant 0 : i32
    %c0_i32_0 = arith.constant 0 : i32
    %c0_i32_1 = arith.constant 0 : i32
    return %c0_i32, %c0_i32_0 : i32, i32
  }
  func.func @transform_12(%arg0: i32) -> (i32, i32) {
    %c0_i32 = arith.constant 0 : i32
    %c0_i32_0 = arith.constant 0 : i32
    %c0_i32_1 = arith.constant 0 : i32
    return %c0_i32, %c0_i32_0 : i32, i32
  }
  func.func @transform_13(%arg0: i32) -> (i32, i32) {
    %c0_i32 = arith.constant 0 : i32
    %c0_i32_0 = arith.constant 0 : i32
    %c0_i32_1 = arith.constant 0 : i32
    return %c0_i32, %c0_i32_0 : i32, i32
  }
  func.func @transform_14(%arg0: i32) -> (i32, i32, i32) {
    %c0_i32 = arith.constant 0 : i32
    %c0_i32_0 = arith.constant 0 : i32
    %c0_i32_1 = arith.constant 0 : i32
    return %arg0, %c0_i32, %c0_i32_0 : i32, i32, i32
  }
}

module attributes {stable_mosaic.version = 11 : i64} {
  func.func @_enc_layer_kernel(%arg0: i32, %arg1: memref<1x10x128xf32, #tpu.memory_space<vmem>>, %arg2: memref<1x10x10xf32, #tpu.memory_space<vmem>>, %arg3: memref<128x384xf32, #tpu.memory_space<vmem>>, %arg4: memref<1x384xf32, #tpu.memory_space<vmem>>, %arg5: memref<128x128xf32, #tpu.memory_space<vmem>>, %arg6: memref<1x128xf32, #tpu.memory_space<vmem>>, %arg7: memref<1x128xf32, #tpu.memory_space<vmem>>, %arg8: memref<1x128xf32, #tpu.memory_space<vmem>>, %arg9: memref<128x256xf32, #tpu.memory_space<vmem>>, %arg10: memref<1x256xf32, #tpu.memory_space<vmem>>, %arg11: memref<256x128xf32, #tpu.memory_space<vmem>>, %arg12: memref<1x128xf32, #tpu.memory_space<vmem>>, %arg13: memref<1x128xf32, #tpu.memory_space<vmem>>, %arg14: memref<1x128xf32, #tpu.memory_space<vmem>>, %arg15: memref<1x10x128xf32, #tpu.memory_space<vmem>>) attributes {dimension_semantics = [#tpu.dimension_semantics<parallel>], iteration_bounds = array<i64: 2>, scalar_prefetch = 0 : i64, scratch_operands = 0 : i64, tpu.core_type = #tpu.core_type<tc>, window_params = [{transform_indices = @transform_0, window_bounds = array<i64: 1, 10, 128>}, {transform_indices = @transform_1, window_bounds = array<i64: 1, 10, 10>}, {pipeline_mode = #tpu.pipeline_mode<synchronous>, transform_indices = @transform_2, window_bounds = array<i64: 128, 384>}, {pipeline_mode = #tpu.pipeline_mode<synchronous>, transform_indices = @transform_3, window_bounds = array<i64: 1, 384>}, {pipeline_mode = #tpu.pipeline_mode<synchronous>, transform_indices = @transform_4, window_bounds = array<i64: 128, 128>}, {pipeline_mode = #tpu.pipeline_mode<synchronous>, transform_indices = @transform_5, window_bounds = array<i64: 1, 128>}, {pipeline_mode = #tpu.pipeline_mode<synchronous>, transform_indices = @transform_6, window_bounds = array<i64: 1, 128>}, {pipeline_mode = #tpu.pipeline_mode<synchronous>, transform_indices = @transform_7, window_bounds = array<i64: 1, 128>}, {pipeline_mode = #tpu.pipeline_mode<synchronous>, transform_indices = @transform_8, window_bounds = array<i64: 128, 256>}, {pipeline_mode = #tpu.pipeline_mode<synchronous>, transform_indices = @transform_9, window_bounds = array<i64: 1, 256>}, {pipeline_mode = #tpu.pipeline_mode<synchronous>, transform_indices = @transform_10, window_bounds = array<i64: 256, 128>}, {pipeline_mode = #tpu.pipeline_mode<synchronous>, transform_indices = @transform_11, window_bounds = array<i64: 1, 128>}, {pipeline_mode = #tpu.pipeline_mode<synchronous>, transform_indices = @transform_12, window_bounds = array<i64: 1, 128>}, {pipeline_mode = #tpu.pipeline_mode<synchronous>, transform_indices = @transform_13, window_bounds = array<i64: 1, 128>}, {transform_indices = @transform_14, window_bounds = array<i64: 1, 10, 128>}]} {
    %c0 = arith.constant 0 : index
    %c0_0 = arith.constant 0 : index
    %c0_1 = arith.constant 0 : index
    %0 = vector.load %arg1[%c0, %c0_0, %c0_1] : memref<1x10x128xf32, #tpu.memory_space<vmem>>, vector<1x10x128xf32>
    %1 = vector.shape_cast %0 : vector<1x10x128xf32> to vector<10x128xf32>
    %c0_2 = arith.constant 0 : index
    %c0_3 = arith.constant 0 : index
    %c0_4 = arith.constant 0 : index
    %2 = vector.load %arg2[%c0_2, %c0_3, %c0_4] : memref<1x10x10xf32, #tpu.memory_space<vmem>>, vector<1x10x10xf32>
    %3 = vector.shape_cast %2 : vector<1x10x10xf32> to vector<10x10xf32>
    %c0_5 = arith.constant 0 : index
    %c0_6 = arith.constant 0 : index
    %4 = vector.load %arg3[%c0_5, %c0_6] : memref<128x384xf32, #tpu.memory_space<vmem>>, vector<128x384xf32>
    %cst = arith.constant dense<0.000000e+00> : vector<10x384xf32>
    %5 = tpu.matmul %1, %4, %cst {dimension_numbers = #tpu.dot_dimension_numbers<[1], [0], [0], [1], [0, 0, 1, 1], [], []>} : vector<10x128xf32>, vector<128x384xf32>, vector<10x384xf32> -> vector<10x384xf32>
    %c0_7 = arith.constant 0 : index
    %c0_8 = arith.constant 0 : index
    %6 = vector.load %arg4[%c0_7, %c0_8] : memref<1x384xf32, #tpu.memory_space<vmem>>, vector<1x384xf32>
    %7 = vector.broadcast %6 : vector<1x384xf32> to vector<10x384xf32>
    %8 = arith.addf %5, %7 : vector<10x384xf32>
    %9 = vector.extract_strided_slice %8 {offsets = [0, 0], sizes = [10, 128], strides = [1, 1]} : vector<10x384xf32> to vector<10x128xf32>
    %10 = vector.extract_strided_slice %8 {offsets = [0, 128], sizes = [10, 128], strides = [1, 1]} : vector<10x384xf32> to vector<10x128xf32>
    %11 = vector.extract_strided_slice %8 {offsets = [0, 256], sizes = [10, 128], strides = [1, 1]} : vector<10x384xf32> to vector<10x128xf32>
    %c0_9 = arith.constant 0 : index
    %c0_10 = arith.constant 0 : index
    %12 = vector.load %arg5[%c0_9, %c0_10] : memref<128x128xf32, #tpu.memory_space<vmem>>, vector<128x128xf32>
    %cst_11 = arith.constant 0.000000e+00 : f32
    %13 = vector.broadcast %cst_11 : f32 to vector<10x128xf32>
    %14 = vector.extract_strided_slice %9 {offsets = [0, 0], sizes = [10, 32], strides = [1, 1]} : vector<10x128xf32> to vector<10x32xf32>
    %15 = vector.extract_strided_slice %10 {offsets = [0, 0], sizes = [10, 32], strides = [1, 1]} : vector<10x128xf32> to vector<10x32xf32>
    %16 = vector.extract_strided_slice %11 {offsets = [0, 0], sizes = [10, 32], strides = [1, 1]} : vector<10x128xf32> to vector<10x32xf32>
    %cst_12 = arith.constant dense<0.000000e+00> : vector<10x10xf32>
    %17 = tpu.matmul %14, %15, %cst_12 {dimension_numbers = #tpu.dot_dimension_numbers<[1], [1], [0], [0], [0, 0, 1, 0], [], []>} : vector<10x32xf32>, vector<10x32xf32>, vector<10x10xf32> -> vector<10x10xf32>
    %cst_13 = arith.constant 0.176776692 : f32
    %18 = vector.broadcast %cst_13 : f32 to vector<10x10xf32>
    %19 = arith.mulf %17, %18 : vector<10x10xf32>
    %cst_14 = arith.constant 0.000000e+00 : f32
    %20 = vector.broadcast %cst_14 : f32 to vector<10x10xf32>
    %21 = arith.cmpf oeq, %3, %20 : vector<10x10xf32>
    %cst_15 = arith.constant -1.000000e+04 : f32
    %22 = vector.broadcast %cst_15 : f32 to vector<10x10xf32>
    %23 = arith.select %21, %22, %19 : vector<10x10xi1>, vector<10x10xf32>
    %cst_16 = arith.constant dense<0xFF800000> : vector<10xf32>
    %24 = vector.multi_reduction <maximumf>, %23, %cst_16 [1] : vector<10x10xf32> to vector<10xf32>
    %25 = vector.shape_cast %24 : vector<10xf32> to vector<10x1xf32>
    %26 = vector.broadcast %25 : vector<10x1xf32> to vector<10x10xf32>
    %27 = arith.subf %23, %26 : vector<10x10xf32>
    %28 = math.exp %27 : vector<10x10xf32>
    %cst_17 = arith.constant dense<0.000000e+00> : vector<10xf32>
    %29 = vector.multi_reduction <add>, %28, %cst_17 [1] : vector<10x10xf32> to vector<10xf32>
    %30 = vector.shape_cast %29 : vector<10xf32> to vector<10x1xf32>
    %31 = tpu.reciprocal %30 {approx = true} : vector<10x1xf32> -> vector<10x1xf32>
    %32 = vector.broadcast %31 : vector<10x1xf32> to vector<10x10xf32>
    %33 = arith.mulf %28, %32 : vector<10x10xf32>
    %cst_18 = arith.constant dense<0.000000e+00> : vector<10x32xf32>
    %34 = tpu.matmul %33, %16, %cst_18 {dimension_numbers = #tpu.dot_dimension_numbers<[1], [0], [0], [1], [0, 0, 1, 1], [], []>} : vector<10x10xf32>, vector<10x32xf32>, vector<10x32xf32> -> vector<10x32xf32>
    %35 = vector.extract_strided_slice %12 {offsets = [0, 0], sizes = [32, 128], strides = [1, 1]} : vector<128x128xf32> to vector<32x128xf32>
    %cst_19 = arith.constant dense<0.000000e+00> : vector<10x128xf32>
    %36 = tpu.matmul %34, %35, %cst_19 {dimension_numbers = #tpu.dot_dimension_numbers<[1], [0], [0], [1], [0, 0, 1, 1], [], []>} : vector<10x32xf32>, vector<32x128xf32>, vector<10x128xf32> -> vector<10x128xf32>
    %37 = arith.addf %13, %36 : vector<10x128xf32>
    %38 = vector.extract_strided_slice %9 {offsets = [0, 32], sizes = [10, 32], strides = [1, 1]} : vector<10x128xf32> to vector<10x32xf32>
    %39 = vector.extract_strided_slice %10 {offsets = [0, 32], sizes = [10, 32], strides = [1, 1]} : vector<10x128xf32> to vector<10x32xf32>
    %40 = vector.extract_strided_slice %11 {offsets = [0, 32], sizes = [10, 32], strides = [1, 1]} : vector<10x128xf32> to vector<10x32xf32>
    %cst_20 = arith.constant dense<0.000000e+00> : vector<10x10xf32>
    %41 = tpu.matmul %38, %39, %cst_20 {dimension_numbers = #tpu.dot_dimension_numbers<[1], [1], [0], [0], [0, 0, 1, 0], [], []>} : vector<10x32xf32>, vector<10x32xf32>, vector<10x10xf32> -> vector<10x10xf32>
    %cst_21 = arith.constant 0.176776692 : f32
    %42 = vector.broadcast %cst_21 : f32 to vector<10x10xf32>
    %43 = arith.mulf %41, %42 : vector<10x10xf32>
    %cst_22 = arith.constant 0.000000e+00 : f32
    %44 = vector.broadcast %cst_22 : f32 to vector<10x10xf32>
    %45 = arith.cmpf oeq, %3, %44 : vector<10x10xf32>
    %cst_23 = arith.constant -1.000000e+04 : f32
    %46 = vector.broadcast %cst_23 : f32 to vector<10x10xf32>
    %47 = arith.select %45, %46, %43 : vector<10x10xi1>, vector<10x10xf32>
    %cst_24 = arith.constant dense<0xFF800000> : vector<10xf32>
    %48 = vector.multi_reduction <maximumf>, %47, %cst_24 [1] : vector<10x10xf32> to vector<10xf32>
    %49 = vector.shape_cast %48 : vector<10xf32> to vector<10x1xf32>
    %50 = vector.broadcast %49 : vector<10x1xf32> to vector<10x10xf32>
    %51 = arith.subf %47, %50 : vector<10x10xf32>
    %52 = math.exp %51 : vector<10x10xf32>
    %cst_25 = arith.constant dense<0.000000e+00> : vector<10xf32>
    %53 = vector.multi_reduction <add>, %52, %cst_25 [1] : vector<10x10xf32> to vector<10xf32>
    %54 = vector.shape_cast %53 : vector<10xf32> to vector<10x1xf32>
    %55 = tpu.reciprocal %54 {approx = true} : vector<10x1xf32> -> vector<10x1xf32>
    %56 = vector.broadcast %55 : vector<10x1xf32> to vector<10x10xf32>
    %57 = arith.mulf %52, %56 : vector<10x10xf32>
    %cst_26 = arith.constant dense<0.000000e+00> : vector<10x32xf32>
    %58 = tpu.matmul %57, %40, %cst_26 {dimension_numbers = #tpu.dot_dimension_numbers<[1], [0], [0], [1], [0, 0, 1, 1], [], []>} : vector<10x10xf32>, vector<10x32xf32>, vector<10x32xf32> -> vector<10x32xf32>
    %59 = vector.extract_strided_slice %12 {offsets = [32, 0], sizes = [32, 128], strides = [1, 1]} : vector<128x128xf32> to vector<32x128xf32>
    %cst_27 = arith.constant dense<0.000000e+00> : vector<10x128xf32>
    %60 = tpu.matmul %58, %59, %cst_27 {dimension_numbers = #tpu.dot_dimension_numbers<[1], [0], [0], [1], [0, 0, 1, 1], [], []>} : vector<10x32xf32>, vector<32x128xf32>, vector<10x128xf32> -> vector<10x128xf32>
    %61 = arith.addf %37, %60 : vector<10x128xf32>
    %62 = vector.extract_strided_slice %9 {offsets = [0, 64], sizes = [10, 32], strides = [1, 1]} : vector<10x128xf32> to vector<10x32xf32>
    %63 = vector.extract_strided_slice %10 {offsets = [0, 64], sizes = [10, 32], strides = [1, 1]} : vector<10x128xf32> to vector<10x32xf32>
    %64 = vector.extract_strided_slice %11 {offsets = [0, 64], sizes = [10, 32], strides = [1, 1]} : vector<10x128xf32> to vector<10x32xf32>
    %cst_28 = arith.constant dense<0.000000e+00> : vector<10x10xf32>
    %65 = tpu.matmul %62, %63, %cst_28 {dimension_numbers = #tpu.dot_dimension_numbers<[1], [1], [0], [0], [0, 0, 1, 0], [], []>} : vector<10x32xf32>, vector<10x32xf32>, vector<10x10xf32> -> vector<10x10xf32>
    %cst_29 = arith.constant 0.176776692 : f32
    %66 = vector.broadcast %cst_29 : f32 to vector<10x10xf32>
    %67 = arith.mulf %65, %66 : vector<10x10xf32>
    %cst_30 = arith.constant 0.000000e+00 : f32
    %68 = vector.broadcast %cst_30 : f32 to vector<10x10xf32>
    %69 = arith.cmpf oeq, %3, %68 : vector<10x10xf32>
    %cst_31 = arith.constant -1.000000e+04 : f32
    %70 = vector.broadcast %cst_31 : f32 to vector<10x10xf32>
    %71 = arith.select %69, %70, %67 : vector<10x10xi1>, vector<10x10xf32>
    %cst_32 = arith.constant dense<0xFF800000> : vector<10xf32>
    %72 = vector.multi_reduction <maximumf>, %71, %cst_32 [1] : vector<10x10xf32> to vector<10xf32>
    %73 = vector.shape_cast %72 : vector<10xf32> to vector<10x1xf32>
    %74 = vector.broadcast %73 : vector<10x1xf32> to vector<10x10xf32>
    %75 = arith.subf %71, %74 : vector<10x10xf32>
    %76 = math.exp %75 : vector<10x10xf32>
    %cst_33 = arith.constant dense<0.000000e+00> : vector<10xf32>
    %77 = vector.multi_reduction <add>, %76, %cst_33 [1] : vector<10x10xf32> to vector<10xf32>
    %78 = vector.shape_cast %77 : vector<10xf32> to vector<10x1xf32>
    %79 = tpu.reciprocal %78 {approx = true} : vector<10x1xf32> -> vector<10x1xf32>
    %80 = vector.broadcast %79 : vector<10x1xf32> to vector<10x10xf32>
    %81 = arith.mulf %76, %80 : vector<10x10xf32>
    %cst_34 = arith.constant dense<0.000000e+00> : vector<10x32xf32>
    %82 = tpu.matmul %81, %64, %cst_34 {dimension_numbers = #tpu.dot_dimension_numbers<[1], [0], [0], [1], [0, 0, 1, 1], [], []>} : vector<10x10xf32>, vector<10x32xf32>, vector<10x32xf32> -> vector<10x32xf32>
    %83 = vector.extract_strided_slice %12 {offsets = [64, 0], sizes = [32, 128], strides = [1, 1]} : vector<128x128xf32> to vector<32x128xf32>
    %cst_35 = arith.constant dense<0.000000e+00> : vector<10x128xf32>
    %84 = tpu.matmul %82, %83, %cst_35 {dimension_numbers = #tpu.dot_dimension_numbers<[1], [0], [0], [1], [0, 0, 1, 1], [], []>} : vector<10x32xf32>, vector<32x128xf32>, vector<10x128xf32> -> vector<10x128xf32>
    %85 = arith.addf %61, %84 : vector<10x128xf32>
    %86 = vector.extract_strided_slice %9 {offsets = [0, 96], sizes = [10, 32], strides = [1, 1]} : vector<10x128xf32> to vector<10x32xf32>
    %87 = vector.extract_strided_slice %10 {offsets = [0, 96], sizes = [10, 32], strides = [1, 1]} : vector<10x128xf32> to vector<10x32xf32>
    %88 = vector.extract_strided_slice %11 {offsets = [0, 96], sizes = [10, 32], strides = [1, 1]} : vector<10x128xf32> to vector<10x32xf32>
    %cst_36 = arith.constant dense<0.000000e+00> : vector<10x10xf32>
    %89 = tpu.matmul %86, %87, %cst_36 {dimension_numbers = #tpu.dot_dimension_numbers<[1], [1], [0], [0], [0, 0, 1, 0], [], []>} : vector<10x32xf32>, vector<10x32xf32>, vector<10x10xf32> -> vector<10x10xf32>
    %cst_37 = arith.constant 0.176776692 : f32
    %90 = vector.broadcast %cst_37 : f32 to vector<10x10xf32>
    %91 = arith.mulf %89, %90 : vector<10x10xf32>
    %cst_38 = arith.constant 0.000000e+00 : f32
    %92 = vector.broadcast %cst_38 : f32 to vector<10x10xf32>
    %93 = arith.cmpf oeq, %3, %92 : vector<10x10xf32>
    %cst_39 = arith.constant -1.000000e+04 : f32
    %94 = vector.broadcast %cst_39 : f32 to vector<10x10xf32>
    %95 = arith.select %93, %94, %91 : vector<10x10xi1>, vector<10x10xf32>
    %cst_40 = arith.constant dense<0xFF800000> : vector<10xf32>
    %96 = vector.multi_reduction <maximumf>, %95, %cst_40 [1] : vector<10x10xf32> to vector<10xf32>
    %97 = vector.shape_cast %96 : vector<10xf32> to vector<10x1xf32>
    %98 = vector.broadcast %97 : vector<10x1xf32> to vector<10x10xf32>
    %99 = arith.subf %95, %98 : vector<10x10xf32>
    %100 = math.exp %99 : vector<10x10xf32>
    %cst_41 = arith.constant dense<0.000000e+00> : vector<10xf32>
    %101 = vector.multi_reduction <add>, %100, %cst_41 [1] : vector<10x10xf32> to vector<10xf32>
    %102 = vector.shape_cast %101 : vector<10xf32> to vector<10x1xf32>
    %103 = tpu.reciprocal %102 {approx = true} : vector<10x1xf32> -> vector<10x1xf32>
    %104 = vector.broadcast %103 : vector<10x1xf32> to vector<10x10xf32>
    %105 = arith.mulf %100, %104 : vector<10x10xf32>
    %cst_42 = arith.constant dense<0.000000e+00> : vector<10x32xf32>
    %106 = tpu.matmul %105, %88, %cst_42 {dimension_numbers = #tpu.dot_dimension_numbers<[1], [0], [0], [1], [0, 0, 1, 1], [], []>} : vector<10x10xf32>, vector<10x32xf32>, vector<10x32xf32> -> vector<10x32xf32>
    %107 = vector.extract_strided_slice %12 {offsets = [96, 0], sizes = [32, 128], strides = [1, 1]} : vector<128x128xf32> to vector<32x128xf32>
    %cst_43 = arith.constant dense<0.000000e+00> : vector<10x128xf32>
    %108 = tpu.matmul %106, %107, %cst_43 {dimension_numbers = #tpu.dot_dimension_numbers<[1], [0], [0], [1], [0, 0, 1, 1], [], []>} : vector<10x32xf32>, vector<32x128xf32>, vector<10x128xf32> -> vector<10x128xf32>
    %109 = arith.addf %85, %108 : vector<10x128xf32>
    %c0_44 = arith.constant 0 : index
    %c0_45 = arith.constant 0 : index
    %110 = vector.load %arg6[%c0_44, %c0_45] : memref<1x128xf32, #tpu.memory_space<vmem>>, vector<1x128xf32>
    %111 = vector.broadcast %110 : vector<1x128xf32> to vector<10x128xf32>
    %112 = arith.addf %109, %111 : vector<10x128xf32>
    %113 = arith.addf %112, %1 : vector<10x128xf32>
    %c0_46 = arith.constant 0 : index
    %c0_47 = arith.constant 0 : index
    %114 = vector.load %arg7[%c0_46, %c0_47] : memref<1x128xf32, #tpu.memory_space<vmem>>, vector<1x128xf32>
    %c0_48 = arith.constant 0 : index
    %c0_49 = arith.constant 0 : index
    %115 = vector.load %arg8[%c0_48, %c0_49] : memref<1x128xf32, #tpu.memory_space<vmem>>, vector<1x128xf32>
    %cst_50 = arith.constant dense<0.000000e+00> : vector<10xf32>
    %116 = vector.multi_reduction <add>, %113, %cst_50 [1] : vector<10x128xf32> to vector<10xf32>
    %117 = vector.shape_cast %116 : vector<10xf32> to vector<10x1xf32>
    %cst_51 = arith.constant 1.280000e+02 : f32
    %118 = vector.broadcast %cst_51 : f32 to vector<10x1xf32>
    %119 = arith.divf %117, %118 : vector<10x1xf32>
    %120 = vector.broadcast %119 : vector<10x1xf32> to vector<10x128xf32>
    %121 = arith.subf %113, %120 : vector<10x128xf32>
    %122 = arith.mulf %121, %121 : vector<10x128xf32>
    %cst_52 = arith.constant dense<0.000000e+00> : vector<10xf32>
    %123 = vector.multi_reduction <add>, %122, %cst_52 [1] : vector<10x128xf32> to vector<10xf32>
    %124 = vector.shape_cast %123 : vector<10xf32> to vector<10x1xf32>
    %cst_53 = arith.constant 1.280000e+02 : f32
    %125 = vector.broadcast %cst_53 : f32 to vector<10x1xf32>
    %126 = arith.divf %124, %125 : vector<10x1xf32>
    %127 = vector.broadcast %119 : vector<10x1xf32> to vector<10x128xf32>
    %128 = arith.subf %113, %127 : vector<10x128xf32>
    %cst_54 = arith.constant 9.99999996E-13 : f32
    %129 = vector.broadcast %cst_54 : f32 to vector<10x1xf32>
    %130 = arith.addf %126, %129 : vector<10x1xf32>
    %131 = math.rsqrt %130 : vector<10x1xf32>
    %132 = vector.broadcast %131 : vector<10x1xf32> to vector<10x128xf32>
    %133 = arith.mulf %128, %132 : vector<10x128xf32>
    %134 = vector.broadcast %114 : vector<1x128xf32> to vector<10x128xf32>
    %135 = arith.mulf %133, %134 : vector<10x128xf32>
    %136 = vector.broadcast %115 : vector<1x128xf32> to vector<10x128xf32>
    %137 = arith.addf %135, %136 : vector<10x128xf32>
    %c0_55 = arith.constant 0 : index
    %c0_56 = arith.constant 0 : index
    %138 = vector.load %arg9[%c0_55, %c0_56] : memref<128x256xf32, #tpu.memory_space<vmem>>, vector<128x256xf32>
    %c0_57 = arith.constant 0 : index
    %c0_58 = arith.constant 0 : index
    %139 = vector.load %arg10[%c0_57, %c0_58] : memref<1x256xf32, #tpu.memory_space<vmem>>, vector<1x256xf32>
    %c0_59 = arith.constant 0 : index
    %c0_60 = arith.constant 0 : index
    %140 = vector.load %arg11[%c0_59, %c0_60] : memref<256x128xf32, #tpu.memory_space<vmem>>, vector<256x128xf32>
    %c0_61 = arith.constant 0 : index
    %c0_62 = arith.constant 0 : index
    %141 = vector.load %arg12[%c0_61, %c0_62] : memref<1x128xf32, #tpu.memory_space<vmem>>, vector<1x128xf32>
    %cst_63 = arith.constant dense<0.000000e+00> : vector<10x256xf32>
    %142 = tpu.matmul %137, %138, %cst_63 {dimension_numbers = #tpu.dot_dimension_numbers<[1], [0], [0], [1], [0, 0, 1, 1], [], []>} : vector<10x128xf32>, vector<128x256xf32>, vector<10x256xf32> -> vector<10x256xf32>
    %143 = vector.broadcast %139 : vector<1x256xf32> to vector<10x256xf32>
    %144 = arith.addf %142, %143 : vector<10x256xf32>
    %cst_64 = arith.constant 0.000000e+00 : f32
    %145 = vector.broadcast %cst_64 : f32 to vector<10x256xf32>
    %146 = arith.maximumf %144, %145 : vector<10x256xf32>
    %cst_65 = arith.constant dense<0.000000e+00> : vector<10x128xf32>
    %147 = tpu.matmul %146, %140, %cst_65 {dimension_numbers = #tpu.dot_dimension_numbers<[1], [0], [0], [1], [0, 0, 1, 1], [], []>} : vector<10x256xf32>, vector<256x128xf32>, vector<10x128xf32> -> vector<10x128xf32>
    %148 = vector.broadcast %141 : vector<1x128xf32> to vector<10x128xf32>
    %149 = arith.addf %147, %148 : vector<10x128xf32>
    %150 = arith.addf %149, %137 : vector<10x128xf32>
    %c0_66 = arith.constant 0 : index
    %c0_67 = arith.constant 0 : index
    %151 = vector.load %arg13[%c0_66, %c0_67] : memref<1x128xf32, #tpu.memory_space<vmem>>, vector<1x128xf32>
    %c0_68 = arith.constant 0 : index
    %c0_69 = arith.constant 0 : index
    %152 = vector.load %arg14[%c0_68, %c0_69] : memref<1x128xf32, #tpu.memory_space<vmem>>, vector<1x128xf32>
    %cst_70 = arith.constant dense<0.000000e+00> : vector<10xf32>
    %153 = vector.multi_reduction <add>, %150, %cst_70 [1] : vector<10x128xf32> to vector<10xf32>
    %154 = vector.shape_cast %153 : vector<10xf32> to vector<10x1xf32>
    %cst_71 = arith.constant 1.280000e+02 : f32
    %155 = vector.broadcast %cst_71 : f32 to vector<10x1xf32>
    %156 = arith.divf %154, %155 : vector<10x1xf32>
    %157 = vector.broadcast %156 : vector<10x1xf32> to vector<10x128xf32>
    %158 = arith.subf %150, %157 : vector<10x128xf32>
    %159 = arith.mulf %158, %158 : vector<10x128xf32>
    %cst_72 = arith.constant dense<0.000000e+00> : vector<10xf32>
    %160 = vector.multi_reduction <add>, %159, %cst_72 [1] : vector<10x128xf32> to vector<10xf32>
    %161 = vector.shape_cast %160 : vector<10xf32> to vector<10x1xf32>
    %cst_73 = arith.constant 1.280000e+02 : f32
    %162 = vector.broadcast %cst_73 : f32 to vector<10x1xf32>
    %163 = arith.divf %161, %162 : vector<10x1xf32>
    %164 = vector.broadcast %156 : vector<10x1xf32> to vector<10x128xf32>
    %165 = arith.subf %150, %164 : vector<10x128xf32>
    %cst_74 = arith.constant 9.99999996E-13 : f32
    %166 = vector.broadcast %cst_74 : f32 to vector<10x1xf32>
    %167 = arith.addf %163, %166 : vector<10x1xf32>
    %168 = math.rsqrt %167 : vector<10x1xf32>
    %169 = vector.broadcast %168 : vector<10x1xf32> to vector<10x128xf32>
    %170 = arith.mulf %165, %169 : vector<10x128xf32>
    %171 = vector.broadcast %151 : vector<1x128xf32> to vector<10x128xf32>
    %172 = arith.mulf %170, %171 : vector<10x128xf32>
    %173 = vector.broadcast %152 : vector<1x128xf32> to vector<10x128xf32>
    %174 = arith.addf %172, %173 : vector<10x128xf32>
    %c0_75 = arith.constant 0 : index
    %c0_76 = arith.constant 0 : index
    %c0_77 = arith.constant 0 : index
    %175 = vector.load %arg15[%c0_75, %c0_76, %c0_77] : memref<1x10x128xf32, #tpu.memory_space<vmem>>, vector<1x10x128xf32>
    %176 = vector.shape_cast %175 : vector<1x10x128xf32> to vector<10x128xf32>
    %177 = vector.shape_cast %174 : vector<10x128xf32> to vector<1x10x128xf32>
    tpu.vector_store %arg15[%c0_75, %c0_76, %c0_77], %177 {strides = array<i32>} : memref<1x10x128xf32, #tpu.memory_space<vmem>>, vector<1x10x128xf32>,
    return
  }
  func.func @transform_0(%arg0: i32) -> (i32, i32, i32) {
    %c0_i32 = arith.constant 0 : i32
    %c0_i32_0 = arith.constant 0 : i32
    %c0_i32_1 = arith.constant 0 : i32
    return %arg0, %c0_i32, %c0_i32_0 : i32, i32, i32
  }
  func.func @transform_1(%arg0: i32) -> (i32, i32, i32) {
    %c0_i32 = arith.constant 0 : i32
    %c0_i32_0 = arith.constant 0 : i32
    %c0_i32_1 = arith.constant 0 : i32
    return %arg0, %c0_i32, %c0_i32_0 : i32, i32, i32
  }
  func.func @transform_2(%arg0: i32) -> (i32, i32) {
    %c0_i32 = arith.constant 0 : i32
    %c0_i32_0 = arith.constant 0 : i32
    %c0_i32_1 = arith.constant 0 : i32
    return %c0_i32, %c0_i32_0 : i32, i32
  }
  func.func @transform_3(%arg0: i32) -> (i32, i32) {
    %c0_i32 = arith.constant 0 : i32
    %c0_i32_0 = arith.constant 0 : i32
    %c0_i32_1 = arith.constant 0 : i32
    return %c0_i32, %c0_i32_0 : i32, i32
  }
  func.func @transform_4(%arg0: i32) -> (i32, i32) {
    %c0_i32 = arith.constant 0 : i32
    %c0_i32_0 = arith.constant 0 : i32
    %c0_i32_1 = arith.constant 0 : i32
    return %c0_i32, %c0_i32_0 : i32, i32
  }
  func.func @transform_5(%arg0: i32) -> (i32, i32) {
    %c0_i32 = arith.constant 0 : i32
    %c0_i32_0 = arith.constant 0 : i32
    %c0_i32_1 = arith.constant 0 : i32
    return %c0_i32, %c0_i32_0 : i32, i32
  }
  func.func @transform_6(%arg0: i32) -> (i32, i32) {
    %c0_i32 = arith.constant 0 : i32
    %c0_i32_0 = arith.constant 0 : i32
    %c0_i32_1 = arith.constant 0 : i32
    return %c0_i32, %c0_i32_0 : i32, i32
  }
  func.func @transform_7(%arg0: i32) -> (i32, i32) {
    %c0_i32 = arith.constant 0 : i32
    %c0_i32_0 = arith.constant 0 : i32
    %c0_i32_1 = arith.constant 0 : i32
    return %c0_i32, %c0_i32_0 : i32, i32
  }
  func.func @transform_8(%arg0: i32) -> (i32, i32) {
    %c0_i32 = arith.constant 0 : i32
    %c0_i32_0 = arith.constant 0 : i32
    %c0_i32_1 = arith.constant 0 : i32
    return %c0_i32, %c0_i32_0 : i32, i32
  }
  func.func @transform_9(%arg0: i32) -> (i32, i32) {
    %c0_i32 = arith.constant 0 : i32
    %c0_i32_0 = arith.constant 0 : i32
    %c0_i32_1 = arith.constant 0 : i32
    return %c0_i32, %c0_i32_0 : i32, i32
  }
  func.func @transform_10(%arg0: i32) -> (i32, i32) {
    %c0_i32 = arith.constant 0 : i32
    %c0_i32_0 = arith.constant 0 : i32
    %c0_i32_1 = arith.constant 0 : i32
    return %c0_i32, %c0_i32_0 : i32, i32
  }
  func.func @transform_11(%arg0: i32) -> (i32, i32) {
    %c0_i32 = arith.constant 0 : i32
    %c0_i32_0 = arith.constant 0 : i32
    %c0_i32_1 = arith.constant 0 : i32
    return %c0_i32, %c0_i32_0 : i32, i32
  }
  func.func @transform_12(%arg0: i32) -> (i32, i32) {
    %c0_i32 = arith.constant 0 : i32
    %c0_i32_0 = arith.constant 0 : i32
    %c0_i32_1 = arith.constant 0 : i32
    return %c0_i32, %c0_i32_0 : i32, i32
  }
  func.func @transform_13(%arg0: i32) -> (i32, i32) {
    %c0_i32 = arith.constant 0 : i32
    %c0_i32_0 = arith.constant 0 : i32
    %c0_i32_1 = arith.constant 0 : i32
    return %c0_i32, %c0_i32_0 : i32, i32
  }
  func.func @transform_14(%arg0: i32) -> (i32, i32, i32) {
    %c0_i32 = arith.constant 0 : i32
    %c0_i32_0 = arith.constant 0 : i32
    %c0_i32_1 = arith.constant 0 : i32
    return %arg0, %c0_i32, %c0_i32_0 : i32, i32, i32
  }
}

module attributes {stable_mosaic.version = 11 : i64} {
  func.func @_dec_layer_kernel(%arg0: i32, %arg1: memref<1x8x128xf32, #tpu.memory_space<vmem>>, %arg2: memref<1x10x128xf32, #tpu.memory_space<vmem>>, %arg3: memref<1x8x8xf32, #tpu.memory_space<vmem>>, %arg4: memref<1x8x10xf32, #tpu.memory_space<vmem>>, %arg5: memref<128x384xf32, #tpu.memory_space<vmem>>, %arg6: memref<1x384xf32, #tpu.memory_space<vmem>>, %arg7: memref<128x128xf32, #tpu.memory_space<vmem>>, %arg8: memref<1x128xf32, #tpu.memory_space<vmem>>, %arg9: memref<1x128xf32, #tpu.memory_space<vmem>>, %arg10: memref<1x128xf32, #tpu.memory_space<vmem>>, %arg11: memref<128x128xf32, #tpu.memory_space<vmem>>, %arg12: memref<1x128xf32, #tpu.memory_space<vmem>>, %arg13: memref<128x256xf32, #tpu.memory_space<vmem>>, %arg14: memref<1x256xf32, #tpu.memory_space<vmem>>, %arg15: memref<128x128xf32, #tpu.memory_space<vmem>>, %arg16: memref<1x128xf32, #tpu.memory_space<vmem>>, %arg17: memref<1x128xf32, #tpu.memory_space<vmem>>, %arg18: memref<1x128xf32, #tpu.memory_space<vmem>>, %arg19: memref<128x256xf32, #tpu.memory_space<vmem>>, %arg20: memref<1x256xf32, #tpu.memory_space<vmem>>, %arg21: memref<256x128xf32, #tpu.memory_space<vmem>>, %arg22: memref<1x128xf32, #tpu.memory_space<vmem>>, %arg23: memref<1x128xf32, #tpu.memory_space<vmem>>, %arg24: memref<1x128xf32, #tpu.memory_space<vmem>>, %arg25: memref<1x8x128xf32, #tpu.memory_space<vmem>>) attributes {dimension_semantics = [#tpu.dimension_semantics<parallel>], iteration_bounds = array<i64: 2>, scalar_prefetch = 0 : i64, scratch_operands = 0 : i64, tpu.core_type = #tpu.core_type<tc>, window_params = [{transform_indices = @transform_0, window_bounds = array<i64: 1, 8, 128>}, {transform_indices = @transform_1, window_bounds = array<i64: 1, 10, 128>}, {transform_indices = @transform_2, window_bounds = array<i64: 1, 8, 8>}, {transform_indices = @transform_3, window_bounds = array<i64: 1, 8, 10>}, {pipeline_mode = #tpu.pipeline_mode<synchronous>, transform_indices = @transform_4, window_bounds = array<i64: 128, 384>}, {pipeline_mode = #tpu.pipeline_mode<synchronous>, transform_indices = @transform_5, window_bounds = array<i64: 1, 384>}, {pipeline_mode = #tpu.pipeline_mode<synchronous>, transform_indices = @transform_6, window_bounds = array<i64: 128, 128>}, {pipeline_mode = #tpu.pipeline_mode<synchronous>, transform_indices = @transform_7, window_bounds = array<i64: 1, 128>}, {pipeline_mode = #tpu.pipeline_mode<synchronous>, transform_indices = @transform_8, window_bounds = array<i64: 1, 128>}, {pipeline_mode = #tpu.pipeline_mode<synchronous>, transform_indices = @transform_9, window_bounds = array<i64: 1, 128>}, {pipeline_mode = #tpu.pipeline_mode<synchronous>, transform_indices = @transform_10, window_bounds = array<i64: 128, 128>}, {pipeline_mode = #tpu.pipeline_mode<synchronous>, transform_indices = @transform_11, window_bounds = array<i64: 1, 128>}, {pipeline_mode = #tpu.pipeline_mode<synchronous>, transform_indices = @transform_12, window_bounds = array<i64: 128, 256>}, {pipeline_mode = #tpu.pipeline_mode<synchronous>, transform_indices = @transform_13, window_bounds = array<i64: 1, 256>}, {pipeline_mode = #tpu.pipeline_mode<synchronous>, transform_indices = @transform_14, window_bounds = array<i64: 128, 128>}, {pipeline_mode = #tpu.pipeline_mode<synchronous>, transform_indices = @transform_15, window_bounds = array<i64: 1, 128>}, {pipeline_mode = #tpu.pipeline_mode<synchronous>, transform_indices = @transform_16, window_bounds = array<i64: 1, 128>}, {pipeline_mode = #tpu.pipeline_mode<synchronous>, transform_indices = @transform_17, window_bounds = array<i64: 1, 128>}, {pipeline_mode = #tpu.pipeline_mode<synchronous>, transform_indices = @transform_18, window_bounds = array<i64: 128, 256>}, {pipeline_mode = #tpu.pipeline_mode<synchronous>, transform_indices = @transform_19, window_bounds = array<i64: 1, 256>}, {pipeline_mode = #tpu.pipeline_mode<synchronous>, transform_indices = @transform_20, window_bounds = array<i64: 256, 128>}, {pipeline_mode = #tpu.pipeline_mode<synchronous>, transform_indices = @transform_21, window_bounds = array<i64: 1, 128>}, {pipeline_mode = #tpu.pipeline_mode<synchronous>, transform_indices = @transform_22, window_bounds = array<i64: 1, 128>}, {pipeline_mode = #tpu.pipeline_mode<synchronous>, transform_indices = @transform_23, window_bounds = array<i64: 1, 128>}, {transform_indices = @transform_24, window_bounds = array<i64: 1, 8, 128>}]} {
    %c0 = arith.constant 0 : index
    %c0_0 = arith.constant 0 : index
    %c0_1 = arith.constant 0 : index
    %0 = vector.load %arg1[%c0, %c0_0, %c0_1] : memref<1x8x128xf32, #tpu.memory_space<vmem>>, vector<1x8x128xf32>
    %1 = vector.shape_cast %0 : vector<1x8x128xf32> to vector<8x128xf32>
    %c0_2 = arith.constant 0 : index
    %c0_3 = arith.constant 0 : index
    %c0_4 = arith.constant 0 : index
    %2 = vector.load %arg2[%c0_2, %c0_3, %c0_4] : memref<1x10x128xf32, #tpu.memory_space<vmem>>, vector<1x10x128xf32>
    %3 = vector.shape_cast %2 : vector<1x10x128xf32> to vector<10x128xf32>
    %c0_5 = arith.constant 0 : index
    %c0_6 = arith.constant 0 : index
    %c0_7 = arith.constant 0 : index
    %4 = vector.load %arg3[%c0_5, %c0_6, %c0_7] : memref<1x8x8xf32, #tpu.memory_space<vmem>>, vector<1x8x8xf32>
    %5 = vector.shape_cast %4 : vector<1x8x8xf32> to vector<8x8xf32>
    %c0_8 = arith.constant 0 : index
    %c0_9 = arith.constant 0 : index
    %c0_10 = arith.constant 0 : index
    %6 = vector.load %arg4[%c0_8, %c0_9, %c0_10] : memref<1x8x10xf32, #tpu.memory_space<vmem>>, vector<1x8x10xf32>
    %7 = vector.shape_cast %6 : vector<1x8x10xf32> to vector<8x10xf32>
    %c0_11 = arith.constant 0 : index
    %c0_12 = arith.constant 0 : index
    %8 = vector.load %arg5[%c0_11, %c0_12] : memref<128x384xf32, #tpu.memory_space<vmem>>, vector<128x384xf32>
    %cst = arith.constant dense<0.000000e+00> : vector<8x384xf32>
    %9 = tpu.matmul %1, %8, %cst {dimension_numbers = #tpu.dot_dimension_numbers<[1], [0], [0], [1], [0, 0, 1, 1], [], []>} : vector<8x128xf32>, vector<128x384xf32>, vector<8x384xf32> -> vector<8x384xf32>
    %c0_13 = arith.constant 0 : index
    %c0_14 = arith.constant 0 : index
    %10 = vector.load %arg6[%c0_13, %c0_14] : memref<1x384xf32, #tpu.memory_space<vmem>>, vector<1x384xf32>
    %11 = vector.broadcast %10 : vector<1x384xf32> to vector<8x384xf32>
    %12 = arith.addf %9, %11 : vector<8x384xf32>
    %13 = vector.extract_strided_slice %12 {offsets = [0, 0], sizes = [8, 128], strides = [1, 1]} : vector<8x384xf32> to vector<8x128xf32>
    %14 = vector.extract_strided_slice %12 {offsets = [0, 128], sizes = [8, 128], strides = [1, 1]} : vector<8x384xf32> to vector<8x128xf32>
    %15 = vector.extract_strided_slice %12 {offsets = [0, 256], sizes = [8, 128], strides = [1, 1]} : vector<8x384xf32> to vector<8x128xf32>
    %c0_15 = arith.constant 0 : index
    %c0_16 = arith.constant 0 : index
    %16 = vector.load %arg7[%c0_15, %c0_16] : memref<128x128xf32, #tpu.memory_space<vmem>>, vector<128x128xf32>
    %cst_17 = arith.constant 0.000000e+00 : f32
    %17 = vector.broadcast %cst_17 : f32 to vector<8x128xf32>
    %18 = vector.extract_strided_slice %13 {offsets = [0, 0], sizes = [8, 32], strides = [1, 1]} : vector<8x128xf32> to vector<8x32xf32>
    %19 = vector.extract_strided_slice %14 {offsets = [0, 0], sizes = [8, 32], strides = [1, 1]} : vector<8x128xf32> to vector<8x32xf32>
    %20 = vector.extract_strided_slice %15 {offsets = [0, 0], sizes = [8, 32], strides = [1, 1]} : vector<8x128xf32> to vector<8x32xf32>
    %cst_18 = arith.constant dense<0.000000e+00> : vector<8x8xf32>
    %21 = tpu.matmul %18, %19, %cst_18 {dimension_numbers = #tpu.dot_dimension_numbers<[1], [1], [0], [0], [0, 0, 1, 0], [], []>} : vector<8x32xf32>, vector<8x32xf32>, vector<8x8xf32> -> vector<8x8xf32>
    %cst_19 = arith.constant 0.176776692 : f32
    %22 = vector.broadcast %cst_19 : f32 to vector<8x8xf32>
    %23 = arith.mulf %21, %22 : vector<8x8xf32>
    %cst_20 = arith.constant 0.000000e+00 : f32
    %24 = vector.broadcast %cst_20 : f32 to vector<8x8xf32>
    %25 = arith.cmpf oeq, %5, %24 : vector<8x8xf32>
    %cst_21 = arith.constant -1.000000e+04 : f32
    %26 = vector.broadcast %cst_21 : f32 to vector<8x8xf32>
    %27 = arith.select %25, %26, %23 : vector<8x8xi1>, vector<8x8xf32>
    %cst_22 = arith.constant dense<0xFF800000> : vector<8xf32>
    %28 = vector.multi_reduction <maximumf>, %27, %cst_22 [1] : vector<8x8xf32> to vector<8xf32>
    %29 = vector.shape_cast %28 : vector<8xf32> to vector<8x1xf32>
    %30 = vector.broadcast %29 : vector<8x1xf32> to vector<8x8xf32>
    %31 = arith.subf %27, %30 : vector<8x8xf32>
    %32 = math.exp %31 : vector<8x8xf32>
    %cst_23 = arith.constant dense<0.000000e+00> : vector<8xf32>
    %33 = vector.multi_reduction <add>, %32, %cst_23 [1] : vector<8x8xf32> to vector<8xf32>
    %34 = vector.shape_cast %33 : vector<8xf32> to vector<8x1xf32>
    %35 = tpu.reciprocal %34 {approx = true} : vector<8x1xf32> -> vector<8x1xf32>
    %36 = vector.broadcast %35 : vector<8x1xf32> to vector<8x8xf32>
    %37 = arith.mulf %32, %36 : vector<8x8xf32>
    %cst_24 = arith.constant dense<0.000000e+00> : vector<8x32xf32>
    %38 = tpu.matmul %37, %20, %cst_24 {dimension_numbers = #tpu.dot_dimension_numbers<[1], [0], [0], [1], [0, 0, 1, 1], [], []>} : vector<8x8xf32>, vector<8x32xf32>, vector<8x32xf32> -> vector<8x32xf32>
    %39 = vector.extract_strided_slice %16 {offsets = [0, 0], sizes = [32, 128], strides = [1, 1]} : vector<128x128xf32> to vector<32x128xf32>
    %cst_25 = arith.constant dense<0.000000e+00> : vector<8x128xf32>
    %40 = tpu.matmul %38, %39, %cst_25 {dimension_numbers = #tpu.dot_dimension_numbers<[1], [0], [0], [1], [0, 0, 1, 1], [], []>} : vector<8x32xf32>, vector<32x128xf32>, vector<8x128xf32> -> vector<8x128xf32>
    %41 = arith.addf %17, %40 : vector<8x128xf32>
    %42 = vector.extract_strided_slice %13 {offsets = [0, 32], sizes = [8, 32], strides = [1, 1]} : vector<8x128xf32> to vector<8x32xf32>
    %43 = vector.extract_strided_slice %14 {offsets = [0, 32], sizes = [8, 32], strides = [1, 1]} : vector<8x128xf32> to vector<8x32xf32>
    %44 = vector.extract_strided_slice %15 {offsets = [0, 32], sizes = [8, 32], strides = [1, 1]} : vector<8x128xf32> to vector<8x32xf32>
    %cst_26 = arith.constant dense<0.000000e+00> : vector<8x8xf32>
    %45 = tpu.matmul %42, %43, %cst_26 {dimension_numbers = #tpu.dot_dimension_numbers<[1], [1], [0], [0], [0, 0, 1, 0], [], []>} : vector<8x32xf32>, vector<8x32xf32>, vector<8x8xf32> -> vector<8x8xf32>
    %cst_27 = arith.constant 0.176776692 : f32
    %46 = vector.broadcast %cst_27 : f32 to vector<8x8xf32>
    %47 = arith.mulf %45, %46 : vector<8x8xf32>
    %cst_28 = arith.constant 0.000000e+00 : f32
    %48 = vector.broadcast %cst_28 : f32 to vector<8x8xf32>
    %49 = arith.cmpf oeq, %5, %48 : vector<8x8xf32>
    %cst_29 = arith.constant -1.000000e+04 : f32
    %50 = vector.broadcast %cst_29 : f32 to vector<8x8xf32>
    %51 = arith.select %49, %50, %47 : vector<8x8xi1>, vector<8x8xf32>
    %cst_30 = arith.constant dense<0xFF800000> : vector<8xf32>
    %52 = vector.multi_reduction <maximumf>, %51, %cst_30 [1] : vector<8x8xf32> to vector<8xf32>
    %53 = vector.shape_cast %52 : vector<8xf32> to vector<8x1xf32>
    %54 = vector.broadcast %53 : vector<8x1xf32> to vector<8x8xf32>
    %55 = arith.subf %51, %54 : vector<8x8xf32>
    %56 = math.exp %55 : vector<8x8xf32>
    %cst_31 = arith.constant dense<0.000000e+00> : vector<8xf32>
    %57 = vector.multi_reduction <add>, %56, %cst_31 [1] : vector<8x8xf32> to vector<8xf32>
    %58 = vector.shape_cast %57 : vector<8xf32> to vector<8x1xf32>
    %59 = tpu.reciprocal %58 {approx = true} : vector<8x1xf32> -> vector<8x1xf32>
    %60 = vector.broadcast %59 : vector<8x1xf32> to vector<8x8xf32>
    %61 = arith.mulf %56, %60 : vector<8x8xf32>
    %cst_32 = arith.constant dense<0.000000e+00> : vector<8x32xf32>
    %62 = tpu.matmul %61, %44, %cst_32 {dimension_numbers = #tpu.dot_dimension_numbers<[1], [0], [0], [1], [0, 0, 1, 1], [], []>} : vector<8x8xf32>, vector<8x32xf32>, vector<8x32xf32> -> vector<8x32xf32>
    %63 = vector.extract_strided_slice %16 {offsets = [32, 0], sizes = [32, 128], strides = [1, 1]} : vector<128x128xf32> to vector<32x128xf32>
    %cst_33 = arith.constant dense<0.000000e+00> : vector<8x128xf32>
    %64 = tpu.matmul %62, %63, %cst_33 {dimension_numbers = #tpu.dot_dimension_numbers<[1], [0], [0], [1], [0, 0, 1, 1], [], []>} : vector<8x32xf32>, vector<32x128xf32>, vector<8x128xf32> -> vector<8x128xf32>
    %65 = arith.addf %41, %64 : vector<8x128xf32>
    %66 = vector.extract_strided_slice %13 {offsets = [0, 64], sizes = [8, 32], strides = [1, 1]} : vector<8x128xf32> to vector<8x32xf32>
    %67 = vector.extract_strided_slice %14 {offsets = [0, 64], sizes = [8, 32], strides = [1, 1]} : vector<8x128xf32> to vector<8x32xf32>
    %68 = vector.extract_strided_slice %15 {offsets = [0, 64], sizes = [8, 32], strides = [1, 1]} : vector<8x128xf32> to vector<8x32xf32>
    %cst_34 = arith.constant dense<0.000000e+00> : vector<8x8xf32>
    %69 = tpu.matmul %66, %67, %cst_34 {dimension_numbers = #tpu.dot_dimension_numbers<[1], [1], [0], [0], [0, 0, 1, 0], [], []>} : vector<8x32xf32>, vector<8x32xf32>, vector<8x8xf32> -> vector<8x8xf32>
    %cst_35 = arith.constant 0.176776692 : f32
    %70 = vector.broadcast %cst_35 : f32 to vector<8x8xf32>
    %71 = arith.mulf %69, %70 : vector<8x8xf32>
    %cst_36 = arith.constant 0.000000e+00 : f32
    %72 = vector.broadcast %cst_36 : f32 to vector<8x8xf32>
    %73 = arith.cmpf oeq, %5, %72 : vector<8x8xf32>
    %cst_37 = arith.constant -1.000000e+04 : f32
    %74 = vector.broadcast %cst_37 : f32 to vector<8x8xf32>
    %75 = arith.select %73, %74, %71 : vector<8x8xi1>, vector<8x8xf32>
    %cst_38 = arith.constant dense<0xFF800000> : vector<8xf32>
    %76 = vector.multi_reduction <maximumf>, %75, %cst_38 [1] : vector<8x8xf32> to vector<8xf32>
    %77 = vector.shape_cast %76 : vector<8xf32> to vector<8x1xf32>
    %78 = vector.broadcast %77 : vector<8x1xf32> to vector<8x8xf32>
    %79 = arith.subf %75, %78 : vector<8x8xf32>
    %80 = math.exp %79 : vector<8x8xf32>
    %cst_39 = arith.constant dense<0.000000e+00> : vector<8xf32>
    %81 = vector.multi_reduction <add>, %80, %cst_39 [1] : vector<8x8xf32> to vector<8xf32>
    %82 = vector.shape_cast %81 : vector<8xf32> to vector<8x1xf32>
    %83 = tpu.reciprocal %82 {approx = true} : vector<8x1xf32> -> vector<8x1xf32>
    %84 = vector.broadcast %83 : vector<8x1xf32> to vector<8x8xf32>
    %85 = arith.mulf %80, %84 : vector<8x8xf32>
    %cst_40 = arith.constant dense<0.000000e+00> : vector<8x32xf32>
    %86 = tpu.matmul %85, %68, %cst_40 {dimension_numbers = #tpu.dot_dimension_numbers<[1], [0], [0], [1], [0, 0, 1, 1], [], []>} : vector<8x8xf32>, vector<8x32xf32>, vector<8x32xf32> -> vector<8x32xf32>
    %87 = vector.extract_strided_slice %16 {offsets = [64, 0], sizes = [32, 128], strides = [1, 1]} : vector<128x128xf32> to vector<32x128xf32>
    %cst_41 = arith.constant dense<0.000000e+00> : vector<8x128xf32>
    %88 = tpu.matmul %86, %87, %cst_41 {dimension_numbers = #tpu.dot_dimension_numbers<[1], [0], [0], [1], [0, 0, 1, 1], [], []>} : vector<8x32xf32>, vector<32x128xf32>, vector<8x128xf32> -> vector<8x128xf32>
    %89 = arith.addf %65, %88 : vector<8x128xf32>
    %90 = vector.extract_strided_slice %13 {offsets = [0, 96], sizes = [8, 32], strides = [1, 1]} : vector<8x128xf32> to vector<8x32xf32>
    %91 = vector.extract_strided_slice %14 {offsets = [0, 96], sizes = [8, 32], strides = [1, 1]} : vector<8x128xf32> to vector<8x32xf32>
    %92 = vector.extract_strided_slice %15 {offsets = [0, 96], sizes = [8, 32], strides = [1, 1]} : vector<8x128xf32> to vector<8x32xf32>
    %cst_42 = arith.constant dense<0.000000e+00> : vector<8x8xf32>
    %93 = tpu.matmul %90, %91, %cst_42 {dimension_numbers = #tpu.dot_dimension_numbers<[1], [1], [0], [0], [0, 0, 1, 0], [], []>} : vector<8x32xf32>, vector<8x32xf32>, vector<8x8xf32> -> vector<8x8xf32>
    %cst_43 = arith.constant 0.176776692 : f32
    %94 = vector.broadcast %cst_43 : f32 to vector<8x8xf32>
    %95 = arith.mulf %93, %94 : vector<8x8xf32>
    %cst_44 = arith.constant 0.000000e+00 : f32
    %96 = vector.broadcast %cst_44 : f32 to vector<8x8xf32>
    %97 = arith.cmpf oeq, %5, %96 : vector<8x8xf32>
    %cst_45 = arith.constant -1.000000e+04 : f32
    %98 = vector.broadcast %cst_45 : f32 to vector<8x8xf32>
    %99 = arith.select %97, %98, %95 : vector<8x8xi1>, vector<8x8xf32>
    %cst_46 = arith.constant dense<0xFF800000> : vector<8xf32>
    %100 = vector.multi_reduction <maximumf>, %99, %cst_46 [1] : vector<8x8xf32> to vector<8xf32>
    %101 = vector.shape_cast %100 : vector<8xf32> to vector<8x1xf32>
    %102 = vector.broadcast %101 : vector<8x1xf32> to vector<8x8xf32>
    %103 = arith.subf %99, %102 : vector<8x8xf32>
    %104 = math.exp %103 : vector<8x8xf32>
    %cst_47 = arith.constant dense<0.000000e+00> : vector<8xf32>
    %105 = vector.multi_reduction <add>, %104, %cst_47 [1] : vector<8x8xf32> to vector<8xf32>
    %106 = vector.shape_cast %105 : vector<8xf32> to vector<8x1xf32>
    %107 = tpu.reciprocal %106 {approx = true} : vector<8x1xf32> -> vector<8x1xf32>
    %108 = vector.broadcast %107 : vector<8x1xf32> to vector<8x8xf32>
    %109 = arith.mulf %104, %108 : vector<8x8xf32>
    %cst_48 = arith.constant dense<0.000000e+00> : vector<8x32xf32>
    %110 = tpu.matmul %109, %92, %cst_48 {dimension_numbers = #tpu.dot_dimension_numbers<[1], [0], [0], [1], [0, 0, 1, 1], [], []>} : vector<8x8xf32>, vector<8x32xf32>, vector<8x32xf32> -> vector<8x32xf32>
    %111 = vector.extract_strided_slice %16 {offsets = [96, 0], sizes = [32, 128], strides = [1, 1]} : vector<128x128xf32> to vector<32x128xf32>
    %cst_49 = arith.constant dense<0.000000e+00> : vector<8x128xf32>
    %112 = tpu.matmul %110, %111, %cst_49 {dimension_numbers = #tpu.dot_dimension_numbers<[1], [0], [0], [1], [0, 0, 1, 1], [], []>} : vector<8x32xf32>, vector<32x128xf32>, vector<8x128xf32> -> vector<8x128xf32>
    %113 = arith.addf %89, %112 : vector<8x128xf32>
    %c0_50 = arith.constant 0 : index
    %c0_51 = arith.constant 0 : index
    %114 = vector.load %arg8[%c0_50, %c0_51] : memref<1x128xf32, #tpu.memory_space<vmem>>, vector<1x128xf32>
    %115 = vector.broadcast %114 : vector<1x128xf32> to vector<8x128xf32>
    %116 = arith.addf %113, %115 : vector<8x128xf32>
    %117 = arith.addf %116, %1 : vector<8x128xf32>
    %c0_52 = arith.constant 0 : index
    %c0_53 = arith.constant 0 : index
    %118 = vector.load %arg9[%c0_52, %c0_53] : memref<1x128xf32, #tpu.memory_space<vmem>>, vector<1x128xf32>
    %c0_54 = arith.constant 0 : index
    %c0_55 = arith.constant 0 : index
    %119 = vector.load %arg10[%c0_54, %c0_55] : memref<1x128xf32, #tpu.memory_space<vmem>>, vector<1x128xf32>
    %cst_56 = arith.constant dense<0.000000e+00> : vector<8xf32>
    %120 = vector.multi_reduction <add>, %117, %cst_56 [1] : vector<8x128xf32> to vector<8xf32>
    %121 = vector.shape_cast %120 : vector<8xf32> to vector<8x1xf32>
    %cst_57 = arith.constant 1.280000e+02 : f32
    %122 = vector.broadcast %cst_57 : f32 to vector<8x1xf32>
    %123 = arith.divf %121, %122 : vector<8x1xf32>
    %124 = vector.broadcast %123 : vector<8x1xf32> to vector<8x128xf32>
    %125 = arith.subf %117, %124 : vector<8x128xf32>
    %126 = arith.mulf %125, %125 : vector<8x128xf32>
    %cst_58 = arith.constant dense<0.000000e+00> : vector<8xf32>
    %127 = vector.multi_reduction <add>, %126, %cst_58 [1] : vector<8x128xf32> to vector<8xf32>
    %128 = vector.shape_cast %127 : vector<8xf32> to vector<8x1xf32>
    %cst_59 = arith.constant 1.280000e+02 : f32
    %129 = vector.broadcast %cst_59 : f32 to vector<8x1xf32>
    %130 = arith.divf %128, %129 : vector<8x1xf32>
    %131 = vector.broadcast %123 : vector<8x1xf32> to vector<8x128xf32>
    %132 = arith.subf %117, %131 : vector<8x128xf32>
    %cst_60 = arith.constant 9.99999996E-13 : f32
    %133 = vector.broadcast %cst_60 : f32 to vector<8x1xf32>
    %134 = arith.addf %130, %133 : vector<8x1xf32>
    %135 = math.rsqrt %134 : vector<8x1xf32>
    %136 = vector.broadcast %135 : vector<8x1xf32> to vector<8x128xf32>
    %137 = arith.mulf %132, %136 : vector<8x128xf32>
    %138 = vector.broadcast %118 : vector<1x128xf32> to vector<8x128xf32>
    %139 = arith.mulf %137, %138 : vector<8x128xf32>
    %140 = vector.broadcast %119 : vector<1x128xf32> to vector<8x128xf32>
    %141 = arith.addf %139, %140 : vector<8x128xf32>
    %c0_61 = arith.constant 0 : index
    %c0_62 = arith.constant 0 : index
    %142 = vector.load %arg11[%c0_61, %c0_62] : memref<128x128xf32, #tpu.memory_space<vmem>>, vector<128x128xf32>
    %cst_63 = arith.constant dense<0.000000e+00> : vector<8x128xf32>
    %143 = tpu.matmul %141, %142, %cst_63 {dimension_numbers = #tpu.dot_dimension_numbers<[1], [0], [0], [1], [0, 0, 1, 1], [], []>} : vector<8x128xf32>, vector<128x128xf32>, vector<8x128xf32> -> vector<8x128xf32>
    %c0_64 = arith.constant 0 : index
    %c0_65 = arith.constant 0 : index
    %144 = vector.load %arg12[%c0_64, %c0_65] : memref<1x128xf32, #tpu.memory_space<vmem>>, vector<1x128xf32>
    %145 = vector.broadcast %144 : vector<1x128xf32> to vector<8x128xf32>
    %146 = arith.addf %143, %145 : vector<8x128xf32>
    %c0_66 = arith.constant 0 : index
    %c0_67 = arith.constant 0 : index
    %147 = vector.load %arg13[%c0_66, %c0_67] : memref<128x256xf32, #tpu.memory_space<vmem>>, vector<128x256xf32>
    %cst_68 = arith.constant dense<0.000000e+00> : vector<10x256xf32>
    %148 = tpu.matmul %3, %147, %cst_68 {dimension_numbers = #tpu.dot_dimension_numbers<[1], [0], [0], [1], [0, 0, 1, 1], [], []>} : vector<10x128xf32>, vector<128x256xf32>, vector<10x256xf32> -> vector<10x256xf32>
    %c0_69 = arith.constant 0 : index
    %c0_70 = arith.constant 0 : index
    %149 = vector.load %arg14[%c0_69, %c0_70] : memref<1x256xf32, #tpu.memory_space<vmem>>, vector<1x256xf32>
    %150 = vector.broadcast %149 : vector<1x256xf32> to vector<10x256xf32>
    %151 = arith.addf %148, %150 : vector<10x256xf32>
    %152 = vector.extract_strided_slice %151 {offsets = [0, 0], sizes = [10, 128], strides = [1, 1]} : vector<10x256xf32> to vector<10x128xf32>
    %153 = vector.extract_strided_slice %151 {offsets = [0, 128], sizes = [10, 128], strides = [1, 1]} : vector<10x256xf32> to vector<10x128xf32>
    %c0_71 = arith.constant 0 : index
    %c0_72 = arith.constant 0 : index
    %154 = vector.load %arg15[%c0_71, %c0_72] : memref<128x128xf32, #tpu.memory_space<vmem>>, vector<128x128xf32>
    %cst_73 = arith.constant 0.000000e+00 : f32
    %155 = vector.broadcast %cst_73 : f32 to vector<8x128xf32>
    %156 = vector.extract_strided_slice %146 {offsets = [0, 0], sizes = [8, 32], strides = [1, 1]} : vector<8x128xf32> to vector<8x32xf32>
    %157 = vector.extract_strided_slice %152 {offsets = [0, 0], sizes = [10, 32], strides = [1, 1]} : vector<10x128xf32> to vector<10x32xf32>
    %158 = vector.extract_strided_slice %153 {offsets = [0, 0], sizes = [10, 32], strides = [1, 1]} : vector<10x128xf32> to vector<10x32xf32>
    %cst_74 = arith.constant dense<0.000000e+00> : vector<8x10xf32>
    %159 = tpu.matmul %156, %157, %cst_74 {dimension_numbers = #tpu.dot_dimension_numbers<[1], [1], [0], [0], [0, 0, 1, 0], [], []>} : vector<8x32xf32>, vector<10x32xf32>, vector<8x10xf32> -> vector<8x10xf32>
    %cst_75 = arith.constant 0.176776692 : f32
    %160 = vector.broadcast %cst_75 : f32 to vector<8x10xf32>
    %161 = arith.mulf %159, %160 : vector<8x10xf32>
    %cst_76 = arith.constant 0.000000e+00 : f32
    %162 = vector.broadcast %cst_76 : f32 to vector<8x10xf32>
    %163 = arith.cmpf oeq, %7, %162 : vector<8x10xf32>
    %cst_77 = arith.constant -1.000000e+04 : f32
    %164 = vector.broadcast %cst_77 : f32 to vector<8x10xf32>
    %165 = arith.select %163, %164, %161 : vector<8x10xi1>, vector<8x10xf32>
    %cst_78 = arith.constant dense<0xFF800000> : vector<8xf32>
    %166 = vector.multi_reduction <maximumf>, %165, %cst_78 [1] : vector<8x10xf32> to vector<8xf32>
    %167 = vector.shape_cast %166 : vector<8xf32> to vector<8x1xf32>
    %168 = vector.broadcast %167 : vector<8x1xf32> to vector<8x10xf32>
    %169 = arith.subf %165, %168 : vector<8x10xf32>
    %170 = math.exp %169 : vector<8x10xf32>
    %cst_79 = arith.constant dense<0.000000e+00> : vector<8xf32>
    %171 = vector.multi_reduction <add>, %170, %cst_79 [1] : vector<8x10xf32> to vector<8xf32>
    %172 = vector.shape_cast %171 : vector<8xf32> to vector<8x1xf32>
    %173 = tpu.reciprocal %172 {approx = true} : vector<8x1xf32> -> vector<8x1xf32>
    %174 = vector.broadcast %173 : vector<8x1xf32> to vector<8x10xf32>
    %175 = arith.mulf %170, %174 : vector<8x10xf32>
    %cst_80 = arith.constant dense<0.000000e+00> : vector<8x32xf32>
    %176 = tpu.matmul %175, %158, %cst_80 {dimension_numbers = #tpu.dot_dimension_numbers<[1], [0], [0], [1], [0, 0, 1, 1], [], []>} : vector<8x10xf32>, vector<10x32xf32>, vector<8x32xf32> -> vector<8x32xf32>
    %177 = vector.extract_strided_slice %154 {offsets = [0, 0], sizes = [32, 128], strides = [1, 1]} : vector<128x128xf32> to vector<32x128xf32>
    %cst_81 = arith.constant dense<0.000000e+00> : vector<8x128xf32>
    %178 = tpu.matmul %176, %177, %cst_81 {dimension_numbers = #tpu.dot_dimension_numbers<[1], [0], [0], [1], [0, 0, 1, 1], [], []>} : vector<8x32xf32>, vector<32x128xf32>, vector<8x128xf32> -> vector<8x128xf32>
    %179 = arith.addf %155, %178 : vector<8x128xf32>
    %180 = vector.extract_strided_slice %146 {offsets = [0, 32], sizes = [8, 32], strides = [1, 1]} : vector<8x128xf32> to vector<8x32xf32>
    %181 = vector.extract_strided_slice %152 {offsets = [0, 32], sizes = [10, 32], strides = [1, 1]} : vector<10x128xf32> to vector<10x32xf32>
    %182 = vector.extract_strided_slice %153 {offsets = [0, 32], sizes = [10, 32], strides = [1, 1]} : vector<10x128xf32> to vector<10x32xf32>
    %cst_82 = arith.constant dense<0.000000e+00> : vector<8x10xf32>
    %183 = tpu.matmul %180, %181, %cst_82 {dimension_numbers = #tpu.dot_dimension_numbers<[1], [1], [0], [0], [0, 0, 1, 0], [], []>} : vector<8x32xf32>, vector<10x32xf32>, vector<8x10xf32> -> vector<8x10xf32>
    %cst_83 = arith.constant 0.176776692 : f32
    %184 = vector.broadcast %cst_83 : f32 to vector<8x10xf32>
    %185 = arith.mulf %183, %184 : vector<8x10xf32>
    %cst_84 = arith.constant 0.000000e+00 : f32
    %186 = vector.broadcast %cst_84 : f32 to vector<8x10xf32>
    %187 = arith.cmpf oeq, %7, %186 : vector<8x10xf32>
    %cst_85 = arith.constant -1.000000e+04 : f32
    %188 = vector.broadcast %cst_85 : f32 to vector<8x10xf32>
    %189 = arith.select %187, %188, %185 : vector<8x10xi1>, vector<8x10xf32>
    %cst_86 = arith.constant dense<0xFF800000> : vector<8xf32>
    %190 = vector.multi_reduction <maximumf>, %189, %cst_86 [1] : vector<8x10xf32> to vector<8xf32>
    %191 = vector.shape_cast %190 : vector<8xf32> to vector<8x1xf32>
    %192 = vector.broadcast %191 : vector<8x1xf32> to vector<8x10xf32>
    %193 = arith.subf %189, %192 : vector<8x10xf32>
    %194 = math.exp %193 : vector<8x10xf32>
    %cst_87 = arith.constant dense<0.000000e+00> : vector<8xf32>
    %195 = vector.multi_reduction <add>, %194, %cst_87 [1] : vector<8x10xf32> to vector<8xf32>
    %196 = vector.shape_cast %195 : vector<8xf32> to vector<8x1xf32>
    %197 = tpu.reciprocal %196 {approx = true} : vector<8x1xf32> -> vector<8x1xf32>
    %198 = vector.broadcast %197 : vector<8x1xf32> to vector<8x10xf32>
    %199 = arith.mulf %194, %198 : vector<8x10xf32>
    %cst_88 = arith.constant dense<0.000000e+00> : vector<8x32xf32>
    %200 = tpu.matmul %199, %182, %cst_88 {dimension_numbers = #tpu.dot_dimension_numbers<[1], [0], [0], [1], [0, 0, 1, 1], [], []>} : vector<8x10xf32>, vector<10x32xf32>, vector<8x32xf32> -> vector<8x32xf32>
    %201 = vector.extract_strided_slice %154 {offsets = [32, 0], sizes = [32, 128], strides = [1, 1]} : vector<128x128xf32> to vector<32x128xf32>
    %cst_89 = arith.constant dense<0.000000e+00> : vector<8x128xf32>
    %202 = tpu.matmul %200, %201, %cst_89 {dimension_numbers = #tpu.dot_dimension_numbers<[1], [0], [0], [1], [0, 0, 1, 1], [], []>} : vector<8x32xf32>, vector<32x128xf32>, vector<8x128xf32> -> vector<8x128xf32>
    %203 = arith.addf %179, %202 : vector<8x128xf32>
    %204 = vector.extract_strided_slice %146 {offsets = [0, 64], sizes = [8, 32], strides = [1, 1]} : vector<8x128xf32> to vector<8x32xf32>
    %205 = vector.extract_strided_slice %152 {offsets = [0, 64], sizes = [10, 32], strides = [1, 1]} : vector<10x128xf32> to vector<10x32xf32>
    %206 = vector.extract_strided_slice %153 {offsets = [0, 64], sizes = [10, 32], strides = [1, 1]} : vector<10x128xf32> to vector<10x32xf32>
    %cst_90 = arith.constant dense<0.000000e+00> : vector<8x10xf32>
    %207 = tpu.matmul %204, %205, %cst_90 {dimension_numbers = #tpu.dot_dimension_numbers<[1], [1], [0], [0], [0, 0, 1, 0], [], []>} : vector<8x32xf32>, vector<10x32xf32>, vector<8x10xf32> -> vector<8x10xf32>
    %cst_91 = arith.constant 0.176776692 : f32
    %208 = vector.broadcast %cst_91 : f32 to vector<8x10xf32>
    %209 = arith.mulf %207, %208 : vector<8x10xf32>
    %cst_92 = arith.constant 0.000000e+00 : f32
    %210 = vector.broadcast %cst_92 : f32 to vector<8x10xf32>
    %211 = arith.cmpf oeq, %7, %210 : vector<8x10xf32>
    %cst_93 = arith.constant -1.000000e+04 : f32
    %212 = vector.broadcast %cst_93 : f32 to vector<8x10xf32>
    %213 = arith.select %211, %212, %209 : vector<8x10xi1>, vector<8x10xf32>
    %cst_94 = arith.constant dense<0xFF800000> : vector<8xf32>
    %214 = vector.multi_reduction <maximumf>, %213, %cst_94 [1] : vector<8x10xf32> to vector<8xf32>
    %215 = vector.shape_cast %214 : vector<8xf32> to vector<8x1xf32>
    %216 = vector.broadcast %215 : vector<8x1xf32> to vector<8x10xf32>
    %217 = arith.subf %213, %216 : vector<8x10xf32>
    %218 = math.exp %217 : vector<8x10xf32>
    %cst_95 = arith.constant dense<0.000000e+00> : vector<8xf32>
    %219 = vector.multi_reduction <add>, %218, %cst_95 [1] : vector<8x10xf32> to vector<8xf32>
    %220 = vector.shape_cast %219 : vector<8xf32> to vector<8x1xf32>
    %221 = tpu.reciprocal %220 {approx = true} : vector<8x1xf32> -> vector<8x1xf32>
    %222 = vector.broadcast %221 : vector<8x1xf32> to vector<8x10xf32>
    %223 = arith.mulf %218, %222 : vector<8x10xf32>
    %cst_96 = arith.constant dense<0.000000e+00> : vector<8x32xf32>
    %224 = tpu.matmul %223, %206, %cst_96 {dimension_numbers = #tpu.dot_dimension_numbers<[1], [0], [0], [1], [0, 0, 1, 1], [], []>} : vector<8x10xf32>, vector<10x32xf32>, vector<8x32xf32> -> vector<8x32xf32>
    %225 = vector.extract_strided_slice %154 {offsets = [64, 0], sizes = [32, 128], strides = [1, 1]} : vector<128x128xf32> to vector<32x128xf32>
    %cst_97 = arith.constant dense<0.000000e+00> : vector<8x128xf32>
    %226 = tpu.matmul %224, %225, %cst_97 {dimension_numbers = #tpu.dot_dimension_numbers<[1], [0], [0], [1], [0, 0, 1, 1], [], []>} : vector<8x32xf32>, vector<32x128xf32>, vector<8x128xf32> -> vector<8x128xf32>
    %227 = arith.addf %203, %226 : vector<8x128xf32>
    %228 = vector.extract_strided_slice %146 {offsets = [0, 96], sizes = [8, 32], strides = [1, 1]} : vector<8x128xf32> to vector<8x32xf32>
    %229 = vector.extract_strided_slice %152 {offsets = [0, 96], sizes = [10, 32], strides = [1, 1]} : vector<10x128xf32> to vector<10x32xf32>
    %230 = vector.extract_strided_slice %153 {offsets = [0, 96], sizes = [10, 32], strides = [1, 1]} : vector<10x128xf32> to vector<10x32xf32>
    %cst_98 = arith.constant dense<0.000000e+00> : vector<8x10xf32>
    %231 = tpu.matmul %228, %229, %cst_98 {dimension_numbers = #tpu.dot_dimension_numbers<[1], [1], [0], [0], [0, 0, 1, 0], [], []>} : vector<8x32xf32>, vector<10x32xf32>, vector<8x10xf32> -> vector<8x10xf32>
    %cst_99 = arith.constant 0.176776692 : f32
    %232 = vector.broadcast %cst_99 : f32 to vector<8x10xf32>
    %233 = arith.mulf %231, %232 : vector<8x10xf32>
    %cst_100 = arith.constant 0.000000e+00 : f32
    %234 = vector.broadcast %cst_100 : f32 to vector<8x10xf32>
    %235 = arith.cmpf oeq, %7, %234 : vector<8x10xf32>
    %cst_101 = arith.constant -1.000000e+04 : f32
    %236 = vector.broadcast %cst_101 : f32 to vector<8x10xf32>
    %237 = arith.select %235, %236, %233 : vector<8x10xi1>, vector<8x10xf32>
    %cst_102 = arith.constant dense<0xFF800000> : vector<8xf32>
    %238 = vector.multi_reduction <maximumf>, %237, %cst_102 [1] : vector<8x10xf32> to vector<8xf32>
    %239 = vector.shape_cast %238 : vector<8xf32> to vector<8x1xf32>
    %240 = vector.broadcast %239 : vector<8x1xf32> to vector<8x10xf32>
    %241 = arith.subf %237, %240 : vector<8x10xf32>
    %242 = math.exp %241 : vector<8x10xf32>
    %cst_103 = arith.constant dense<0.000000e+00> : vector<8xf32>
    %243 = vector.multi_reduction <add>, %242, %cst_103 [1] : vector<8x10xf32> to vector<8xf32>
    %244 = vector.shape_cast %243 : vector<8xf32> to vector<8x1xf32>
    %245 = tpu.reciprocal %244 {approx = true} : vector<8x1xf32> -> vector<8x1xf32>
    %246 = vector.broadcast %245 : vector<8x1xf32> to vector<8x10xf32>
    %247 = arith.mulf %242, %246 : vector<8x10xf32>
    %cst_104 = arith.constant dense<0.000000e+00> : vector<8x32xf32>
    %248 = tpu.matmul %247, %230, %cst_104 {dimension_numbers = #tpu.dot_dimension_numbers<[1], [0], [0], [1], [0, 0, 1, 1], [], []>} : vector<8x10xf32>, vector<10x32xf32>, vector<8x32xf32> -> vector<8x32xf32>
    %249 = vector.extract_strided_slice %154 {offsets = [96, 0], sizes = [32, 128], strides = [1, 1]} : vector<128x128xf32> to vector<32x128xf32>
    %cst_105 = arith.constant dense<0.000000e+00> : vector<8x128xf32>
    %250 = tpu.matmul %248, %249, %cst_105 {dimension_numbers = #tpu.dot_dimension_numbers<[1], [0], [0], [1], [0, 0, 1, 1], [], []>} : vector<8x32xf32>, vector<32x128xf32>, vector<8x128xf32> -> vector<8x128xf32>
    %251 = arith.addf %227, %250 : vector<8x128xf32>
    %c0_106 = arith.constant 0 : index
    %c0_107 = arith.constant 0 : index
    %252 = vector.load %arg16[%c0_106, %c0_107] : memref<1x128xf32, #tpu.memory_space<vmem>>, vector<1x128xf32>
    %253 = vector.broadcast %252 : vector<1x128xf32> to vector<8x128xf32>
    %254 = arith.addf %251, %253 : vector<8x128xf32>
    %255 = arith.addf %254, %141 : vector<8x128xf32>
    %c0_108 = arith.constant 0 : index
    %c0_109 = arith.constant 0 : index
    %256 = vector.load %arg17[%c0_108, %c0_109] : memref<1x128xf32, #tpu.memory_space<vmem>>, vector<1x128xf32>
    %c0_110 = arith.constant 0 : index
    %c0_111 = arith.constant 0 : index
    %257 = vector.load %arg18[%c0_110, %c0_111] : memref<1x128xf32, #tpu.memory_space<vmem>>, vector<1x128xf32>
    %cst_112 = arith.constant dense<0.000000e+00> : vector<8xf32>
    %258 = vector.multi_reduction <add>, %255, %cst_112 [1] : vector<8x128xf32> to vector<8xf32>
    %259 = vector.shape_cast %258 : vector<8xf32> to vector<8x1xf32>
    %cst_113 = arith.constant 1.280000e+02 : f32
    %260 = vector.broadcast %cst_113 : f32 to vector<8x1xf32>
    %261 = arith.divf %259, %260 : vector<8x1xf32>
    %262 = vector.broadcast %261 : vector<8x1xf32> to vector<8x128xf32>
    %263 = arith.subf %255, %262 : vector<8x128xf32>
    %264 = arith.mulf %263, %263 : vector<8x128xf32>
    %cst_114 = arith.constant dense<0.000000e+00> : vector<8xf32>
    %265 = vector.multi_reduction <add>, %264, %cst_114 [1] : vector<8x128xf32> to vector<8xf32>
    %266 = vector.shape_cast %265 : vector<8xf32> to vector<8x1xf32>
    %cst_115 = arith.constant 1.280000e+02 : f32
    %267 = vector.broadcast %cst_115 : f32 to vector<8x1xf32>
    %268 = arith.divf %266, %267 : vector<8x1xf32>
    %269 = vector.broadcast %261 : vector<8x1xf32> to vector<8x128xf32>
    %270 = arith.subf %255, %269 : vector<8x128xf32>
    %cst_116 = arith.constant 9.99999996E-13 : f32
    %271 = vector.broadcast %cst_116 : f32 to vector<8x1xf32>
    %272 = arith.addf %268, %271 : vector<8x1xf32>
    %273 = math.rsqrt %272 : vector<8x1xf32>
    %274 = vector.broadcast %273 : vector<8x1xf32> to vector<8x128xf32>
    %275 = arith.mulf %270, %274 : vector<8x128xf32>
    %276 = vector.broadcast %256 : vector<1x128xf32> to vector<8x128xf32>
    %277 = arith.mulf %275, %276 : vector<8x128xf32>
    %278 = vector.broadcast %257 : vector<1x128xf32> to vector<8x128xf32>
    %279 = arith.addf %277, %278 : vector<8x128xf32>
    %c0_117 = arith.constant 0 : index
    %c0_118 = arith.constant 0 : index
    %280 = vector.load %arg19[%c0_117, %c0_118] : memref<128x256xf32, #tpu.memory_space<vmem>>, vector<128x256xf32>
    %c0_119 = arith.constant 0 : index
    %c0_120 = arith.constant 0 : index
    %281 = vector.load %arg20[%c0_119, %c0_120] : memref<1x256xf32, #tpu.memory_space<vmem>>, vector<1x256xf32>
    %c0_121 = arith.constant 0 : index
    %c0_122 = arith.constant 0 : index
    %282 = vector.load %arg21[%c0_121, %c0_122] : memref<256x128xf32, #tpu.memory_space<vmem>>, vector<256x128xf32>
    %c0_123 = arith.constant 0 : index
    %c0_124 = arith.constant 0 : index
    %283 = vector.load %arg22[%c0_123, %c0_124] : memref<1x128xf32, #tpu.memory_space<vmem>>, vector<1x128xf32>
    %cst_125 = arith.constant dense<0.000000e+00> : vector<8x256xf32>
    %284 = tpu.matmul %279, %280, %cst_125 {dimension_numbers = #tpu.dot_dimension_numbers<[1], [0], [0], [1], [0, 0, 1, 1], [], []>} : vector<8x128xf32>, vector<128x256xf32>, vector<8x256xf32> -> vector<8x256xf32>
    %285 = vector.broadcast %281 : vector<1x256xf32> to vector<8x256xf32>
    %286 = arith.addf %284, %285 : vector<8x256xf32>
    %cst_126 = arith.constant 0.000000e+00 : f32
    %287 = vector.broadcast %cst_126 : f32 to vector<8x256xf32>
    %288 = arith.maximumf %286, %287 : vector<8x256xf32>
    %cst_127 = arith.constant dense<0.000000e+00> : vector<8x128xf32>
    %289 = tpu.matmul %288, %282, %cst_127 {dimension_numbers = #tpu.dot_dimension_numbers<[1], [0], [0], [1], [0, 0, 1, 1], [], []>} : vector<8x256xf32>, vector<256x128xf32>, vector<8x128xf32> -> vector<8x128xf32>
    %290 = vector.broadcast %283 : vector<1x128xf32> to vector<8x128xf32>
    %291 = arith.addf %289, %290 : vector<8x128xf32>
    %292 = arith.addf %291, %279 : vector<8x128xf32>
    %c0_128 = arith.constant 0 : index
    %c0_129 = arith.constant 0 : index
    %293 = vector.load %arg23[%c0_128, %c0_129] : memref<1x128xf32, #tpu.memory_space<vmem>>, vector<1x128xf32>
    %c0_130 = arith.constant 0 : index
    %c0_131 = arith.constant 0 : index
    %294 = vector.load %arg24[%c0_130, %c0_131] : memref<1x128xf32, #tpu.memory_space<vmem>>, vector<1x128xf32>
    %cst_132 = arith.constant dense<0.000000e+00> : vector<8xf32>
    %295 = vector.multi_reduction <add>, %292, %cst_132 [1] : vector<8x128xf32> to vector<8xf32>
    %296 = vector.shape_cast %295 : vector<8xf32> to vector<8x1xf32>
    %cst_133 = arith.constant 1.280000e+02 : f32
    %297 = vector.broadcast %cst_133 : f32 to vector<8x1xf32>
    %298 = arith.divf %296, %297 : vector<8x1xf32>
    %299 = vector.broadcast %298 : vector<8x1xf32> to vector<8x128xf32>
    %300 = arith.subf %292, %299 : vector<8x128xf32>
    %301 = arith.mulf %300, %300 : vector<8x128xf32>
    %cst_134 = arith.constant dense<0.000000e+00> : vector<8xf32>
    %302 = vector.multi_reduction <add>, %301, %cst_134 [1] : vector<8x128xf32> to vector<8xf32>
    %303 = vector.shape_cast %302 : vector<8xf32> to vector<8x1xf32>
    %cst_135 = arith.constant 1.280000e+02 : f32
    %304 = vector.broadcast %cst_135 : f32 to vector<8x1xf32>
    %305 = arith.divf %303, %304 : vector<8x1xf32>
    %306 = vector.broadcast %298 : vector<8x1xf32> to vector<8x128xf32>
    %307 = arith.subf %292, %306 : vector<8x128xf32>
    %cst_136 = arith.constant 9.99999996E-13 : f32
    %308 = vector.broadcast %cst_136 : f32 to vector<8x1xf32>
    %309 = arith.addf %305, %308 : vector<8x1xf32>
    %310 = math.rsqrt %309 : vector<8x1xf32>
    %311 = vector.broadcast %310 : vector<8x1xf32> to vector<8x128xf32>
    %312 = arith.mulf %307, %311 : vector<8x128xf32>
    %313 = vector.broadcast %293 : vector<1x128xf32> to vector<8x128xf32>
    %314 = arith.mulf %312, %313 : vector<8x128xf32>
    %315 = vector.broadcast %294 : vector<1x128xf32> to vector<8x128xf32>
    %316 = arith.addf %314, %315 : vector<8x128xf32>
    %c0_137 = arith.constant 0 : index
    %c0_138 = arith.constant 0 : index
    %c0_139 = arith.constant 0 : index
    %317 = vector.load %arg25[%c0_137, %c0_138, %c0_139] : memref<1x8x128xf32, #tpu.memory_space<vmem>>, vector<1x8x128xf32>
    %318 = vector.shape_cast %317 : vector<1x8x128xf32> to vector<8x128xf32>
    %319 = vector.shape_cast %316 : vector<8x128xf32> to vector<1x8x128xf32>
    tpu.vector_store %arg25[%c0_137, %c0_138, %c0_139], %319 {strides = array<i32>} : memref<1x8x128xf32, #tpu.memory_space<vmem>>, vector<1x8x128xf32>,
    return
  }
  func.func @transform_0(%arg0: i32) -> (i32, i32, i32) {
    %c0_i32 = arith.constant 0 : i32
    %c0_i32_0 = arith.constant 0 : i32
    %c0_i32_1 = arith.constant 0 : i32
    return %arg0, %c0_i32, %c0_i32_0 : i32, i32, i32
  }
  func.func @transform_1(%arg0: i32) -> (i32, i32, i32) {
    %c0_i32 = arith.constant 0 : i32
    %c0_i32_0 = arith.constant 0 : i32
    %c0_i32_1 = arith.constant 0 : i32
    return %arg0, %c0_i32, %c0_i32_0 : i32, i32, i32
  }
  func.func @transform_2(%arg0: i32) -> (i32, i32, i32) {
    %c0_i32 = arith.constant 0 : i32
    %c0_i32_0 = arith.constant 0 : i32
    %c0_i32_1 = arith.constant 0 : i32
    return %arg0, %c0_i32, %c0_i32_0 : i32, i32, i32
  }
  func.func @transform_3(%arg0: i32) -> (i32, i32, i32) {
    %c0_i32 = arith.constant 0 : i32
    %c0_i32_0 = arith.constant 0 : i32
    %c0_i32_1 = arith.constant 0 : i32
    return %arg0, %c0_i32, %c0_i32_0 : i32, i32, i32
  }
  func.func @transform_4(%arg0: i32) -> (i32, i32) {
    %c0_i32 = arith.constant 0 : i32
    %c0_i32_0 = arith.constant 0 : i32
    %c0_i32_1 = arith.constant 0 : i32
    return %c0_i32, %c0_i32_0 : i32, i32
  }
  func.func @transform_5(%arg0: i32) -> (i32, i32) {
    %c0_i32 = arith.constant 0 : i32
    %c0_i32_0 = arith.constant 0 : i32
    %c0_i32_1 = arith.constant 0 : i32
    return %c0_i32, %c0_i32_0 : i32, i32
  }
  func.func @transform_6(%arg0: i32) -> (i32, i32) {
    %c0_i32 = arith.constant 0 : i32
    %c0_i32_0 = arith.constant 0 : i32
    %c0_i32_1 = arith.constant 0 : i32
    return %c0_i32, %c0_i32_0 : i32, i32
  }
  func.func @transform_7(%arg0: i32) -> (i32, i32) {
    %c0_i32 = arith.constant 0 : i32
    %c0_i32_0 = arith.constant 0 : i32
    %c0_i32_1 = arith.constant 0 : i32
    return %c0_i32, %c0_i32_0 : i32, i32
  }
  func.func @transform_8(%arg0: i32) -> (i32, i32) {
    %c0_i32 = arith.constant 0 : i32
    %c0_i32_0 = arith.constant 0 : i32
    %c0_i32_1 = arith.constant 0 : i32
    return %c0_i32, %c0_i32_0 : i32, i32
  }
  func.func @transform_9(%arg0: i32) -> (i32, i32) {
    %c0_i32 = arith.constant 0 : i32
    %c0_i32_0 = arith.constant 0 : i32
    %c0_i32_1 = arith.constant 0 : i32
    return %c0_i32, %c0_i32_0 : i32, i32
  }
  func.func @transform_10(%arg0: i32) -> (i32, i32) {
    %c0_i32 = arith.constant 0 : i32
    %c0_i32_0 = arith.constant 0 : i32
    %c0_i32_1 = arith.constant 0 : i32
    return %c0_i32, %c0_i32_0 : i32, i32
  }
  func.func @transform_11(%arg0: i32) -> (i32, i32) {
    %c0_i32 = arith.constant 0 : i32
    %c0_i32_0 = arith.constant 0 : i32
    %c0_i32_1 = arith.constant 0 : i32
    return %c0_i32, %c0_i32_0 : i32, i32
  }
  func.func @transform_12(%arg0: i32) -> (i32, i32) {
    %c0_i32 = arith.constant 0 : i32
    %c0_i32_0 = arith.constant 0 : i32
    %c0_i32_1 = arith.constant 0 : i32
    return %c0_i32, %c0_i32_0 : i32, i32
  }
  func.func @transform_13(%arg0: i32) -> (i32, i32) {
    %c0_i32 = arith.constant 0 : i32
    %c0_i32_0 = arith.constant 0 : i32
    %c0_i32_1 = arith.constant 0 : i32
    return %c0_i32, %c0_i32_0 : i32, i32
  }
  func.func @transform_14(%arg0: i32) -> (i32, i32) {
    %c0_i32 = arith.constant 0 : i32
    %c0_i32_0 = arith.constant 0 : i32
    %c0_i32_1 = arith.constant 0 : i32
    return %c0_i32, %c0_i32_0 : i32, i32
  }
  func.func @transform_15(%arg0: i32) -> (i32, i32) {
    %c0_i32 = arith.constant 0 : i32
    %c0_i32_0 = arith.constant 0 : i32
    %c0_i32_1 = arith.constant 0 : i32
    return %c0_i32, %c0_i32_0 : i32, i32
  }
  func.func @transform_16(%arg0: i32) -> (i32, i32) {
    %c0_i32 = arith.constant 0 : i32
    %c0_i32_0 = arith.constant 0 : i32
    %c0_i32_1 = arith.constant 0 : i32
    return %c0_i32, %c0_i32_0 : i32, i32
  }
  func.func @transform_17(%arg0: i32) -> (i32, i32) {
    %c0_i32 = arith.constant 0 : i32
    %c0_i32_0 = arith.constant 0 : i32
    %c0_i32_1 = arith.constant 0 : i32
    return %c0_i32, %c0_i32_0 : i32, i32
  }
  func.func @transform_18(%arg0: i32) -> (i32, i32) {
    %c0_i32 = arith.constant 0 : i32
    %c0_i32_0 = arith.constant 0 : i32
    %c0_i32_1 = arith.constant 0 : i32
    return %c0_i32, %c0_i32_0 : i32, i32
  }
  func.func @transform_19(%arg0: i32) -> (i32, i32) {
    %c0_i32 = arith.constant 0 : i32
    %c0_i32_0 = arith.constant 0 : i32
    %c0_i32_1 = arith.constant 0 : i32
    return %c0_i32, %c0_i32_0 : i32, i32
  }
  func.func @transform_20(%arg0: i32) -> (i32, i32) {
    %c0_i32 = arith.constant 0 : i32
    %c0_i32_0 = arith.constant 0 : i32
    %c0_i32_1 = arith.constant 0 : i32
    return %c0_i32, %c0_i32_0 : i32, i32
  }
  func.func @transform_21(%arg0: i32) -> (i32, i32) {
    %c0_i32 = arith.constant 0 : i32
    %c0_i32_0 = arith.constant 0 : i32
    %c0_i32_1 = arith.constant 0 : i32
    return %c0_i32, %c0_i32_0 : i32, i32
  }
  func.func @transform_22(%arg0: i32) -> (i32, i32) {
    %c0_i32 = arith.constant 0 : i32
    %c0_i32_0 = arith.constant 0 : i32
    %c0_i32_1 = arith.constant 0 : i32
    return %c0_i32, %c0_i32_0 : i32, i32
  }
  func.func @transform_23(%arg0: i32) -> (i32, i32) {
    %c0_i32 = arith.constant 0 : i32
    %c0_i32_0 = arith.constant 0 : i32
    %c0_i32_1 = arith.constant 0 : i32
    return %c0_i32, %c0_i32_0 : i32, i32
  }
  func.func @transform_24(%arg0: i32) -> (i32, i32, i32) {
    %c0_i32 = arith.constant 0 : i32
    %c0_i32_0 = arith.constant 0 : i32
    %c0_i32_1 = arith.constant 0 : i32
    return %arg0, %c0_i32, %c0_i32_0 : i32, i32, i32
  }
}

module attributes {stable_mosaic.version = 11 : i64} {
  func.func @_dec_layer_kernel(%arg0: i32, %arg1: memref<1x8x128xf32, #tpu.memory_space<vmem>>, %arg2: memref<1x10x128xf32, #tpu.memory_space<vmem>>, %arg3: memref<1x8x8xf32, #tpu.memory_space<vmem>>, %arg4: memref<1x8x10xf32, #tpu.memory_space<vmem>>, %arg5: memref<128x384xf32, #tpu.memory_space<vmem>>, %arg6: memref<1x384xf32, #tpu.memory_space<vmem>>, %arg7: memref<128x128xf32, #tpu.memory_space<vmem>>, %arg8: memref<1x128xf32, #tpu.memory_space<vmem>>, %arg9: memref<1x128xf32, #tpu.memory_space<vmem>>, %arg10: memref<1x128xf32, #tpu.memory_space<vmem>>, %arg11: memref<128x128xf32, #tpu.memory_space<vmem>>, %arg12: memref<1x128xf32, #tpu.memory_space<vmem>>, %arg13: memref<128x256xf32, #tpu.memory_space<vmem>>, %arg14: memref<1x256xf32, #tpu.memory_space<vmem>>, %arg15: memref<128x128xf32, #tpu.memory_space<vmem>>, %arg16: memref<1x128xf32, #tpu.memory_space<vmem>>, %arg17: memref<1x128xf32, #tpu.memory_space<vmem>>, %arg18: memref<1x128xf32, #tpu.memory_space<vmem>>, %arg19: memref<128x256xf32, #tpu.memory_space<vmem>>, %arg20: memref<1x256xf32, #tpu.memory_space<vmem>>, %arg21: memref<256x128xf32, #tpu.memory_space<vmem>>, %arg22: memref<1x128xf32, #tpu.memory_space<vmem>>, %arg23: memref<1x128xf32, #tpu.memory_space<vmem>>, %arg24: memref<1x128xf32, #tpu.memory_space<vmem>>, %arg25: memref<1x8x128xf32, #tpu.memory_space<vmem>>) attributes {dimension_semantics = [#tpu.dimension_semantics<parallel>], iteration_bounds = array<i64: 2>, scalar_prefetch = 0 : i64, scratch_operands = 0 : i64, tpu.core_type = #tpu.core_type<tc>, window_params = [{transform_indices = @transform_0, window_bounds = array<i64: 1, 8, 128>}, {transform_indices = @transform_1, window_bounds = array<i64: 1, 10, 128>}, {transform_indices = @transform_2, window_bounds = array<i64: 1, 8, 8>}, {transform_indices = @transform_3, window_bounds = array<i64: 1, 8, 10>}, {pipeline_mode = #tpu.pipeline_mode<synchronous>, transform_indices = @transform_4, window_bounds = array<i64: 128, 384>}, {pipeline_mode = #tpu.pipeline_mode<synchronous>, transform_indices = @transform_5, window_bounds = array<i64: 1, 384>}, {pipeline_mode = #tpu.pipeline_mode<synchronous>, transform_indices = @transform_6, window_bounds = array<i64: 128, 128>}, {pipeline_mode = #tpu.pipeline_mode<synchronous>, transform_indices = @transform_7, window_bounds = array<i64: 1, 128>}, {pipeline_mode = #tpu.pipeline_mode<synchronous>, transform_indices = @transform_8, window_bounds = array<i64: 1, 128>}, {pipeline_mode = #tpu.pipeline_mode<synchronous>, transform_indices = @transform_9, window_bounds = array<i64: 1, 128>}, {pipeline_mode = #tpu.pipeline_mode<synchronous>, transform_indices = @transform_10, window_bounds = array<i64: 128, 128>}, {pipeline_mode = #tpu.pipeline_mode<synchronous>, transform_indices = @transform_11, window_bounds = array<i64: 1, 128>}, {pipeline_mode = #tpu.pipeline_mode<synchronous>, transform_indices = @transform_12, window_bounds = array<i64: 128, 256>}, {pipeline_mode = #tpu.pipeline_mode<synchronous>, transform_indices = @transform_13, window_bounds = array<i64: 1, 256>}, {pipeline_mode = #tpu.pipeline_mode<synchronous>, transform_indices = @transform_14, window_bounds = array<i64: 128, 128>}, {pipeline_mode = #tpu.pipeline_mode<synchronous>, transform_indices = @transform_15, window_bounds = array<i64: 1, 128>}, {pipeline_mode = #tpu.pipeline_mode<synchronous>, transform_indices = @transform_16, window_bounds = array<i64: 1, 128>}, {pipeline_mode = #tpu.pipeline_mode<synchronous>, transform_indices = @transform_17, window_bounds = array<i64: 1, 128>}, {pipeline_mode = #tpu.pipeline_mode<synchronous>, transform_indices = @transform_18, window_bounds = array<i64: 128, 256>}, {pipeline_mode = #tpu.pipeline_mode<synchronous>, transform_indices = @transform_19, window_bounds = array<i64: 1, 256>}, {pipeline_mode = #tpu.pipeline_mode<synchronous>, transform_indices = @transform_20, window_bounds = array<i64: 256, 128>}, {pipeline_mode = #tpu.pipeline_mode<synchronous>, transform_indices = @transform_21, window_bounds = array<i64: 1, 128>}, {pipeline_mode = #tpu.pipeline_mode<synchronous>, transform_indices = @transform_22, window_bounds = array<i64: 1, 128>}, {pipeline_mode = #tpu.pipeline_mode<synchronous>, transform_indices = @transform_23, window_bounds = array<i64: 1, 128>}, {transform_indices = @transform_24, window_bounds = array<i64: 1, 8, 128>}]} {
    %c0 = arith.constant 0 : index
    %c0_0 = arith.constant 0 : index
    %c0_1 = arith.constant 0 : index
    %0 = vector.load %arg1[%c0, %c0_0, %c0_1] : memref<1x8x128xf32, #tpu.memory_space<vmem>>, vector<1x8x128xf32>
    %1 = vector.shape_cast %0 : vector<1x8x128xf32> to vector<8x128xf32>
    %c0_2 = arith.constant 0 : index
    %c0_3 = arith.constant 0 : index
    %c0_4 = arith.constant 0 : index
    %2 = vector.load %arg2[%c0_2, %c0_3, %c0_4] : memref<1x10x128xf32, #tpu.memory_space<vmem>>, vector<1x10x128xf32>
    %3 = vector.shape_cast %2 : vector<1x10x128xf32> to vector<10x128xf32>
    %c0_5 = arith.constant 0 : index
    %c0_6 = arith.constant 0 : index
    %c0_7 = arith.constant 0 : index
    %4 = vector.load %arg3[%c0_5, %c0_6, %c0_7] : memref<1x8x8xf32, #tpu.memory_space<vmem>>, vector<1x8x8xf32>
    %5 = vector.shape_cast %4 : vector<1x8x8xf32> to vector<8x8xf32>
    %c0_8 = arith.constant 0 : index
    %c0_9 = arith.constant 0 : index
    %c0_10 = arith.constant 0 : index
    %6 = vector.load %arg4[%c0_8, %c0_9, %c0_10] : memref<1x8x10xf32, #tpu.memory_space<vmem>>, vector<1x8x10xf32>
    %7 = vector.shape_cast %6 : vector<1x8x10xf32> to vector<8x10xf32>
    %c0_11 = arith.constant 0 : index
    %c0_12 = arith.constant 0 : index
    %8 = vector.load %arg5[%c0_11, %c0_12] : memref<128x384xf32, #tpu.memory_space<vmem>>, vector<128x384xf32>
    %cst = arith.constant dense<0.000000e+00> : vector<8x384xf32>
    %9 = tpu.matmul %1, %8, %cst {dimension_numbers = #tpu.dot_dimension_numbers<[1], [0], [0], [1], [0, 0, 1, 1], [], []>} : vector<8x128xf32>, vector<128x384xf32>, vector<8x384xf32> -> vector<8x384xf32>
    %c0_13 = arith.constant 0 : index
    %c0_14 = arith.constant 0 : index
    %10 = vector.load %arg6[%c0_13, %c0_14] : memref<1x384xf32, #tpu.memory_space<vmem>>, vector<1x384xf32>
    %11 = vector.broadcast %10 : vector<1x384xf32> to vector<8x384xf32>
    %12 = arith.addf %9, %11 : vector<8x384xf32>
    %13 = vector.extract_strided_slice %12 {offsets = [0, 0], sizes = [8, 128], strides = [1, 1]} : vector<8x384xf32> to vector<8x128xf32>
    %14 = vector.extract_strided_slice %12 {offsets = [0, 128], sizes = [8, 128], strides = [1, 1]} : vector<8x384xf32> to vector<8x128xf32>
    %15 = vector.extract_strided_slice %12 {offsets = [0, 256], sizes = [8, 128], strides = [1, 1]} : vector<8x384xf32> to vector<8x128xf32>
    %c0_15 = arith.constant 0 : index
    %c0_16 = arith.constant 0 : index
    %16 = vector.load %arg7[%c0_15, %c0_16] : memref<128x128xf32, #tpu.memory_space<vmem>>, vector<128x128xf32>
    %cst_17 = arith.constant 0.000000e+00 : f32
    %17 = vector.broadcast %cst_17 : f32 to vector<8x128xf32>
    %18 = vector.extract_strided_slice %13 {offsets = [0, 0], sizes = [8, 32], strides = [1, 1]} : vector<8x128xf32> to vector<8x32xf32>
    %19 = vector.extract_strided_slice %14 {offsets = [0, 0], sizes = [8, 32], strides = [1, 1]} : vector<8x128xf32> to vector<8x32xf32>
    %20 = vector.extract_strided_slice %15 {offsets = [0, 0], sizes = [8, 32], strides = [1, 1]} : vector<8x128xf32> to vector<8x32xf32>
    %cst_18 = arith.constant dense<0.000000e+00> : vector<8x8xf32>
    %21 = tpu.matmul %18, %19, %cst_18 {dimension_numbers = #tpu.dot_dimension_numbers<[1], [1], [0], [0], [0, 0, 1, 0], [], []>} : vector<8x32xf32>, vector<8x32xf32>, vector<8x8xf32> -> vector<8x8xf32>
    %cst_19 = arith.constant 0.176776692 : f32
    %22 = vector.broadcast %cst_19 : f32 to vector<8x8xf32>
    %23 = arith.mulf %21, %22 : vector<8x8xf32>
    %cst_20 = arith.constant 0.000000e+00 : f32
    %24 = vector.broadcast %cst_20 : f32 to vector<8x8xf32>
    %25 = arith.cmpf oeq, %5, %24 : vector<8x8xf32>
    %cst_21 = arith.constant -1.000000e+04 : f32
    %26 = vector.broadcast %cst_21 : f32 to vector<8x8xf32>
    %27 = arith.select %25, %26, %23 : vector<8x8xi1>, vector<8x8xf32>
    %cst_22 = arith.constant dense<0xFF800000> : vector<8xf32>
    %28 = vector.multi_reduction <maximumf>, %27, %cst_22 [1] : vector<8x8xf32> to vector<8xf32>
    %29 = vector.shape_cast %28 : vector<8xf32> to vector<8x1xf32>
    %30 = vector.broadcast %29 : vector<8x1xf32> to vector<8x8xf32>
    %31 = arith.subf %27, %30 : vector<8x8xf32>
    %32 = math.exp %31 : vector<8x8xf32>
    %cst_23 = arith.constant dense<0.000000e+00> : vector<8xf32>
    %33 = vector.multi_reduction <add>, %32, %cst_23 [1] : vector<8x8xf32> to vector<8xf32>
    %34 = vector.shape_cast %33 : vector<8xf32> to vector<8x1xf32>
    %35 = tpu.reciprocal %34 {approx = true} : vector<8x1xf32> -> vector<8x1xf32>
    %36 = vector.broadcast %35 : vector<8x1xf32> to vector<8x8xf32>
    %37 = arith.mulf %32, %36 : vector<8x8xf32>
    %cst_24 = arith.constant dense<0.000000e+00> : vector<8x32xf32>
    %38 = tpu.matmul %37, %20, %cst_24 {dimension_numbers = #tpu.dot_dimension_numbers<[1], [0], [0], [1], [0, 0, 1, 1], [], []>} : vector<8x8xf32>, vector<8x32xf32>, vector<8x32xf32> -> vector<8x32xf32>
    %39 = vector.extract_strided_slice %16 {offsets = [0, 0], sizes = [32, 128], strides = [1, 1]} : vector<128x128xf32> to vector<32x128xf32>
    %cst_25 = arith.constant dense<0.000000e+00> : vector<8x128xf32>
    %40 = tpu.matmul %38, %39, %cst_25 {dimension_numbers = #tpu.dot_dimension_numbers<[1], [0], [0], [1], [0, 0, 1, 1], [], []>} : vector<8x32xf32>, vector<32x128xf32>, vector<8x128xf32> -> vector<8x128xf32>
    %41 = arith.addf %17, %40 : vector<8x128xf32>
    %42 = vector.extract_strided_slice %13 {offsets = [0, 32], sizes = [8, 32], strides = [1, 1]} : vector<8x128xf32> to vector<8x32xf32>
    %43 = vector.extract_strided_slice %14 {offsets = [0, 32], sizes = [8, 32], strides = [1, 1]} : vector<8x128xf32> to vector<8x32xf32>
    %44 = vector.extract_strided_slice %15 {offsets = [0, 32], sizes = [8, 32], strides = [1, 1]} : vector<8x128xf32> to vector<8x32xf32>
    %cst_26 = arith.constant dense<0.000000e+00> : vector<8x8xf32>
    %45 = tpu.matmul %42, %43, %cst_26 {dimension_numbers = #tpu.dot_dimension_numbers<[1], [1], [0], [0], [0, 0, 1, 0], [], []>} : vector<8x32xf32>, vector<8x32xf32>, vector<8x8xf32> -> vector<8x8xf32>
    %cst_27 = arith.constant 0.176776692 : f32
    %46 = vector.broadcast %cst_27 : f32 to vector<8x8xf32>
    %47 = arith.mulf %45, %46 : vector<8x8xf32>
    %cst_28 = arith.constant 0.000000e+00 : f32
    %48 = vector.broadcast %cst_28 : f32 to vector<8x8xf32>
    %49 = arith.cmpf oeq, %5, %48 : vector<8x8xf32>
    %cst_29 = arith.constant -1.000000e+04 : f32
    %50 = vector.broadcast %cst_29 : f32 to vector<8x8xf32>
    %51 = arith.select %49, %50, %47 : vector<8x8xi1>, vector<8x8xf32>
    %cst_30 = arith.constant dense<0xFF800000> : vector<8xf32>
    %52 = vector.multi_reduction <maximumf>, %51, %cst_30 [1] : vector<8x8xf32> to vector<8xf32>
    %53 = vector.shape_cast %52 : vector<8xf32> to vector<8x1xf32>
    %54 = vector.broadcast %53 : vector<8x1xf32> to vector<8x8xf32>
    %55 = arith.subf %51, %54 : vector<8x8xf32>
    %56 = math.exp %55 : vector<8x8xf32>
    %cst_31 = arith.constant dense<0.000000e+00> : vector<8xf32>
    %57 = vector.multi_reduction <add>, %56, %cst_31 [1] : vector<8x8xf32> to vector<8xf32>
    %58 = vector.shape_cast %57 : vector<8xf32> to vector<8x1xf32>
    %59 = tpu.reciprocal %58 {approx = true} : vector<8x1xf32> -> vector<8x1xf32>
    %60 = vector.broadcast %59 : vector<8x1xf32> to vector<8x8xf32>
    %61 = arith.mulf %56, %60 : vector<8x8xf32>
    %cst_32 = arith.constant dense<0.000000e+00> : vector<8x32xf32>
    %62 = tpu.matmul %61, %44, %cst_32 {dimension_numbers = #tpu.dot_dimension_numbers<[1], [0], [0], [1], [0, 0, 1, 1], [], []>} : vector<8x8xf32>, vector<8x32xf32>, vector<8x32xf32> -> vector<8x32xf32>
    %63 = vector.extract_strided_slice %16 {offsets = [32, 0], sizes = [32, 128], strides = [1, 1]} : vector<128x128xf32> to vector<32x128xf32>
    %cst_33 = arith.constant dense<0.000000e+00> : vector<8x128xf32>
    %64 = tpu.matmul %62, %63, %cst_33 {dimension_numbers = #tpu.dot_dimension_numbers<[1], [0], [0], [1], [0, 0, 1, 1], [], []>} : vector<8x32xf32>, vector<32x128xf32>, vector<8x128xf32> -> vector<8x128xf32>
    %65 = arith.addf %41, %64 : vector<8x128xf32>
    %66 = vector.extract_strided_slice %13 {offsets = [0, 64], sizes = [8, 32], strides = [1, 1]} : vector<8x128xf32> to vector<8x32xf32>
    %67 = vector.extract_strided_slice %14 {offsets = [0, 64], sizes = [8, 32], strides = [1, 1]} : vector<8x128xf32> to vector<8x32xf32>
    %68 = vector.extract_strided_slice %15 {offsets = [0, 64], sizes = [8, 32], strides = [1, 1]} : vector<8x128xf32> to vector<8x32xf32>
    %cst_34 = arith.constant dense<0.000000e+00> : vector<8x8xf32>
    %69 = tpu.matmul %66, %67, %cst_34 {dimension_numbers = #tpu.dot_dimension_numbers<[1], [1], [0], [0], [0, 0, 1, 0], [], []>} : vector<8x32xf32>, vector<8x32xf32>, vector<8x8xf32> -> vector<8x8xf32>
    %cst_35 = arith.constant 0.176776692 : f32
    %70 = vector.broadcast %cst_35 : f32 to vector<8x8xf32>
    %71 = arith.mulf %69, %70 : vector<8x8xf32>
    %cst_36 = arith.constant 0.000000e+00 : f32
    %72 = vector.broadcast %cst_36 : f32 to vector<8x8xf32>
    %73 = arith.cmpf oeq, %5, %72 : vector<8x8xf32>
    %cst_37 = arith.constant -1.000000e+04 : f32
    %74 = vector.broadcast %cst_37 : f32 to vector<8x8xf32>
    %75 = arith.select %73, %74, %71 : vector<8x8xi1>, vector<8x8xf32>
    %cst_38 = arith.constant dense<0xFF800000> : vector<8xf32>
    %76 = vector.multi_reduction <maximumf>, %75, %cst_38 [1] : vector<8x8xf32> to vector<8xf32>
    %77 = vector.shape_cast %76 : vector<8xf32> to vector<8x1xf32>
    %78 = vector.broadcast %77 : vector<8x1xf32> to vector<8x8xf32>
    %79 = arith.subf %75, %78 : vector<8x8xf32>
    %80 = math.exp %79 : vector<8x8xf32>
    %cst_39 = arith.constant dense<0.000000e+00> : vector<8xf32>
    %81 = vector.multi_reduction <add>, %80, %cst_39 [1] : vector<8x8xf32> to vector<8xf32>
    %82 = vector.shape_cast %81 : vector<8xf32> to vector<8x1xf32>
    %83 = tpu.reciprocal %82 {approx = true} : vector<8x1xf32> -> vector<8x1xf32>
    %84 = vector.broadcast %83 : vector<8x1xf32> to vector<8x8xf32>
    %85 = arith.mulf %80, %84 : vector<8x8xf32>
    %cst_40 = arith.constant dense<0.000000e+00> : vector<8x32xf32>
    %86 = tpu.matmul %85, %68, %cst_40 {dimension_numbers = #tpu.dot_dimension_numbers<[1], [0], [0], [1], [0, 0, 1, 1], [], []>} : vector<8x8xf32>, vector<8x32xf32>, vector<8x32xf32> -> vector<8x32xf32>
    %87 = vector.extract_strided_slice %16 {offsets = [64, 0], sizes = [32, 128], strides = [1, 1]} : vector<128x128xf32> to vector<32x128xf32>
    %cst_41 = arith.constant dense<0.000000e+00> : vector<8x128xf32>
    %88 = tpu.matmul %86, %87, %cst_41 {dimension_numbers = #tpu.dot_dimension_numbers<[1], [0], [0], [1], [0, 0, 1, 1], [], []>} : vector<8x32xf32>, vector<32x128xf32>, vector<8x128xf32> -> vector<8x128xf32>
    %89 = arith.addf %65, %88 : vector<8x128xf32>
    %90 = vector.extract_strided_slice %13 {offsets = [0, 96], sizes = [8, 32], strides = [1, 1]} : vector<8x128xf32> to vector<8x32xf32>
    %91 = vector.extract_strided_slice %14 {offsets = [0, 96], sizes = [8, 32], strides = [1, 1]} : vector<8x128xf32> to vector<8x32xf32>
    %92 = vector.extract_strided_slice %15 {offsets = [0, 96], sizes = [8, 32], strides = [1, 1]} : vector<8x128xf32> to vector<8x32xf32>
    %cst_42 = arith.constant dense<0.000000e+00> : vector<8x8xf32>
    %93 = tpu.matmul %90, %91, %cst_42 {dimension_numbers = #tpu.dot_dimension_numbers<[1], [1], [0], [0], [0, 0, 1, 0], [], []>} : vector<8x32xf32>, vector<8x32xf32>, vector<8x8xf32> -> vector<8x8xf32>
    %cst_43 = arith.constant 0.176776692 : f32
    %94 = vector.broadcast %cst_43 : f32 to vector<8x8xf32>
    %95 = arith.mulf %93, %94 : vector<8x8xf32>
    %cst_44 = arith.constant 0.000000e+00 : f32
    %96 = vector.broadcast %cst_44 : f32 to vector<8x8xf32>
    %97 = arith.cmpf oeq, %5, %96 : vector<8x8xf32>
    %cst_45 = arith.constant -1.000000e+04 : f32
    %98 = vector.broadcast %cst_45 : f32 to vector<8x8xf32>
    %99 = arith.select %97, %98, %95 : vector<8x8xi1>, vector<8x8xf32>
    %cst_46 = arith.constant dense<0xFF800000> : vector<8xf32>
    %100 = vector.multi_reduction <maximumf>, %99, %cst_46 [1] : vector<8x8xf32> to vector<8xf32>
    %101 = vector.shape_cast %100 : vector<8xf32> to vector<8x1xf32>
    %102 = vector.broadcast %101 : vector<8x1xf32> to vector<8x8xf32>
    %103 = arith.subf %99, %102 : vector<8x8xf32>
    %104 = math.exp %103 : vector<8x8xf32>
    %cst_47 = arith.constant dense<0.000000e+00> : vector<8xf32>
    %105 = vector.multi_reduction <add>, %104, %cst_47 [1] : vector<8x8xf32> to vector<8xf32>
    %106 = vector.shape_cast %105 : vector<8xf32> to vector<8x1xf32>
    %107 = tpu.reciprocal %106 {approx = true} : vector<8x1xf32> -> vector<8x1xf32>
    %108 = vector.broadcast %107 : vector<8x1xf32> to vector<8x8xf32>
    %109 = arith.mulf %104, %108 : vector<8x8xf32>
    %cst_48 = arith.constant dense<0.000000e+00> : vector<8x32xf32>
    %110 = tpu.matmul %109, %92, %cst_48 {dimension_numbers = #tpu.dot_dimension_numbers<[1], [0], [0], [1], [0, 0, 1, 1], [], []>} : vector<8x8xf32>, vector<8x32xf32>, vector<8x32xf32> -> vector<8x32xf32>
    %111 = vector.extract_strided_slice %16 {offsets = [96, 0], sizes = [32, 128], strides = [1, 1]} : vector<128x128xf32> to vector<32x128xf32>
    %cst_49 = arith.constant dense<0.000000e+00> : vector<8x128xf32>
    %112 = tpu.matmul %110, %111, %cst_49 {dimension_numbers = #tpu.dot_dimension_numbers<[1], [0], [0], [1], [0, 0, 1, 1], [], []>} : vector<8x32xf32>, vector<32x128xf32>, vector<8x128xf32> -> vector<8x128xf32>
    %113 = arith.addf %89, %112 : vector<8x128xf32>
    %c0_50 = arith.constant 0 : index
    %c0_51 = arith.constant 0 : index
    %114 = vector.load %arg8[%c0_50, %c0_51] : memref<1x128xf32, #tpu.memory_space<vmem>>, vector<1x128xf32>
    %115 = vector.broadcast %114 : vector<1x128xf32> to vector<8x128xf32>
    %116 = arith.addf %113, %115 : vector<8x128xf32>
    %117 = arith.addf %116, %1 : vector<8x128xf32>
    %c0_52 = arith.constant 0 : index
    %c0_53 = arith.constant 0 : index
    %118 = vector.load %arg9[%c0_52, %c0_53] : memref<1x128xf32, #tpu.memory_space<vmem>>, vector<1x128xf32>
    %c0_54 = arith.constant 0 : index
    %c0_55 = arith.constant 0 : index
    %119 = vector.load %arg10[%c0_54, %c0_55] : memref<1x128xf32, #tpu.memory_space<vmem>>, vector<1x128xf32>
    %cst_56 = arith.constant dense<0.000000e+00> : vector<8xf32>
    %120 = vector.multi_reduction <add>, %117, %cst_56 [1] : vector<8x128xf32> to vector<8xf32>
    %121 = vector.shape_cast %120 : vector<8xf32> to vector<8x1xf32>
    %cst_57 = arith.constant 1.280000e+02 : f32
    %122 = vector.broadcast %cst_57 : f32 to vector<8x1xf32>
    %123 = arith.divf %121, %122 : vector<8x1xf32>
    %124 = vector.broadcast %123 : vector<8x1xf32> to vector<8x128xf32>
    %125 = arith.subf %117, %124 : vector<8x128xf32>
    %126 = arith.mulf %125, %125 : vector<8x128xf32>
    %cst_58 = arith.constant dense<0.000000e+00> : vector<8xf32>
    %127 = vector.multi_reduction <add>, %126, %cst_58 [1] : vector<8x128xf32> to vector<8xf32>
    %128 = vector.shape_cast %127 : vector<8xf32> to vector<8x1xf32>
    %cst_59 = arith.constant 1.280000e+02 : f32
    %129 = vector.broadcast %cst_59 : f32 to vector<8x1xf32>
    %130 = arith.divf %128, %129 : vector<8x1xf32>
    %131 = vector.broadcast %123 : vector<8x1xf32> to vector<8x128xf32>
    %132 = arith.subf %117, %131 : vector<8x128xf32>
    %cst_60 = arith.constant 9.99999996E-13 : f32
    %133 = vector.broadcast %cst_60 : f32 to vector<8x1xf32>
    %134 = arith.addf %130, %133 : vector<8x1xf32>
    %135 = math.rsqrt %134 : vector<8x1xf32>
    %136 = vector.broadcast %135 : vector<8x1xf32> to vector<8x128xf32>
    %137 = arith.mulf %132, %136 : vector<8x128xf32>
    %138 = vector.broadcast %118 : vector<1x128xf32> to vector<8x128xf32>
    %139 = arith.mulf %137, %138 : vector<8x128xf32>
    %140 = vector.broadcast %119 : vector<1x128xf32> to vector<8x128xf32>
    %141 = arith.addf %139, %140 : vector<8x128xf32>
    %c0_61 = arith.constant 0 : index
    %c0_62 = arith.constant 0 : index
    %142 = vector.load %arg11[%c0_61, %c0_62] : memref<128x128xf32, #tpu.memory_space<vmem>>, vector<128x128xf32>
    %cst_63 = arith.constant dense<0.000000e+00> : vector<8x128xf32>
    %143 = tpu.matmul %141, %142, %cst_63 {dimension_numbers = #tpu.dot_dimension_numbers<[1], [0], [0], [1], [0, 0, 1, 1], [], []>} : vector<8x128xf32>, vector<128x128xf32>, vector<8x128xf32> -> vector<8x128xf32>
    %c0_64 = arith.constant 0 : index
    %c0_65 = arith.constant 0 : index
    %144 = vector.load %arg12[%c0_64, %c0_65] : memref<1x128xf32, #tpu.memory_space<vmem>>, vector<1x128xf32>
    %145 = vector.broadcast %144 : vector<1x128xf32> to vector<8x128xf32>
    %146 = arith.addf %143, %145 : vector<8x128xf32>
    %c0_66 = arith.constant 0 : index
    %c0_67 = arith.constant 0 : index
    %147 = vector.load %arg13[%c0_66, %c0_67] : memref<128x256xf32, #tpu.memory_space<vmem>>, vector<128x256xf32>
    %cst_68 = arith.constant dense<0.000000e+00> : vector<10x256xf32>
    %148 = tpu.matmul %3, %147, %cst_68 {dimension_numbers = #tpu.dot_dimension_numbers<[1], [0], [0], [1], [0, 0, 1, 1], [], []>} : vector<10x128xf32>, vector<128x256xf32>, vector<10x256xf32> -> vector<10x256xf32>
    %c0_69 = arith.constant 0 : index
    %c0_70 = arith.constant 0 : index
    %149 = vector.load %arg14[%c0_69, %c0_70] : memref<1x256xf32, #tpu.memory_space<vmem>>, vector<1x256xf32>
    %150 = vector.broadcast %149 : vector<1x256xf32> to vector<10x256xf32>
    %151 = arith.addf %148, %150 : vector<10x256xf32>
    %152 = vector.extract_strided_slice %151 {offsets = [0, 0], sizes = [10, 128], strides = [1, 1]} : vector<10x256xf32> to vector<10x128xf32>
    %153 = vector.extract_strided_slice %151 {offsets = [0, 128], sizes = [10, 128], strides = [1, 1]} : vector<10x256xf32> to vector<10x128xf32>
    %c0_71 = arith.constant 0 : index
    %c0_72 = arith.constant 0 : index
    %154 = vector.load %arg15[%c0_71, %c0_72] : memref<128x128xf32, #tpu.memory_space<vmem>>, vector<128x128xf32>
    %cst_73 = arith.constant 0.000000e+00 : f32
    %155 = vector.broadcast %cst_73 : f32 to vector<8x128xf32>
    %156 = vector.extract_strided_slice %146 {offsets = [0, 0], sizes = [8, 32], strides = [1, 1]} : vector<8x128xf32> to vector<8x32xf32>
    %157 = vector.extract_strided_slice %152 {offsets = [0, 0], sizes = [10, 32], strides = [1, 1]} : vector<10x128xf32> to vector<10x32xf32>
    %158 = vector.extract_strided_slice %153 {offsets = [0, 0], sizes = [10, 32], strides = [1, 1]} : vector<10x128xf32> to vector<10x32xf32>
    %cst_74 = arith.constant dense<0.000000e+00> : vector<8x10xf32>
    %159 = tpu.matmul %156, %157, %cst_74 {dimension_numbers = #tpu.dot_dimension_numbers<[1], [1], [0], [0], [0, 0, 1, 0], [], []>} : vector<8x32xf32>, vector<10x32xf32>, vector<8x10xf32> -> vector<8x10xf32>
    %cst_75 = arith.constant 0.176776692 : f32
    %160 = vector.broadcast %cst_75 : f32 to vector<8x10xf32>
    %161 = arith.mulf %159, %160 : vector<8x10xf32>
    %cst_76 = arith.constant 0.000000e+00 : f32
    %162 = vector.broadcast %cst_76 : f32 to vector<8x10xf32>
    %163 = arith.cmpf oeq, %7, %162 : vector<8x10xf32>
    %cst_77 = arith.constant -1.000000e+04 : f32
    %164 = vector.broadcast %cst_77 : f32 to vector<8x10xf32>
    %165 = arith.select %163, %164, %161 : vector<8x10xi1>, vector<8x10xf32>
    %cst_78 = arith.constant dense<0xFF800000> : vector<8xf32>
    %166 = vector.multi_reduction <maximumf>, %165, %cst_78 [1] : vector<8x10xf32> to vector<8xf32>
    %167 = vector.shape_cast %166 : vector<8xf32> to vector<8x1xf32>
    %168 = vector.broadcast %167 : vector<8x1xf32> to vector<8x10xf32>
    %169 = arith.subf %165, %168 : vector<8x10xf32>
    %170 = math.exp %169 : vector<8x10xf32>
    %cst_79 = arith.constant dense<0.000000e+00> : vector<8xf32>
    %171 = vector.multi_reduction <add>, %170, %cst_79 [1] : vector<8x10xf32> to vector<8xf32>
    %172 = vector.shape_cast %171 : vector<8xf32> to vector<8x1xf32>
    %173 = tpu.reciprocal %172 {approx = true} : vector<8x1xf32> -> vector<8x1xf32>
    %174 = vector.broadcast %173 : vector<8x1xf32> to vector<8x10xf32>
    %175 = arith.mulf %170, %174 : vector<8x10xf32>
    %cst_80 = arith.constant dense<0.000000e+00> : vector<8x32xf32>
    %176 = tpu.matmul %175, %158, %cst_80 {dimension_numbers = #tpu.dot_dimension_numbers<[1], [0], [0], [1], [0, 0, 1, 1], [], []>} : vector<8x10xf32>, vector<10x32xf32>, vector<8x32xf32> -> vector<8x32xf32>
    %177 = vector.extract_strided_slice %154 {offsets = [0, 0], sizes = [32, 128], strides = [1, 1]} : vector<128x128xf32> to vector<32x128xf32>
    %cst_81 = arith.constant dense<0.000000e+00> : vector<8x128xf32>
    %178 = tpu.matmul %176, %177, %cst_81 {dimension_numbers = #tpu.dot_dimension_numbers<[1], [0], [0], [1], [0, 0, 1, 1], [], []>} : vector<8x32xf32>, vector<32x128xf32>, vector<8x128xf32> -> vector<8x128xf32>
    %179 = arith.addf %155, %178 : vector<8x128xf32>
    %180 = vector.extract_strided_slice %146 {offsets = [0, 32], sizes = [8, 32], strides = [1, 1]} : vector<8x128xf32> to vector<8x32xf32>
    %181 = vector.extract_strided_slice %152 {offsets = [0, 32], sizes = [10, 32], strides = [1, 1]} : vector<10x128xf32> to vector<10x32xf32>
    %182 = vector.extract_strided_slice %153 {offsets = [0, 32], sizes = [10, 32], strides = [1, 1]} : vector<10x128xf32> to vector<10x32xf32>
    %cst_82 = arith.constant dense<0.000000e+00> : vector<8x10xf32>
    %183 = tpu.matmul %180, %181, %cst_82 {dimension_numbers = #tpu.dot_dimension_numbers<[1], [1], [0], [0], [0, 0, 1, 0], [], []>} : vector<8x32xf32>, vector<10x32xf32>, vector<8x10xf32> -> vector<8x10xf32>
    %cst_83 = arith.constant 0.176776692 : f32
    %184 = vector.broadcast %cst_83 : f32 to vector<8x10xf32>
    %185 = arith.mulf %183, %184 : vector<8x10xf32>
    %cst_84 = arith.constant 0.000000e+00 : f32
    %186 = vector.broadcast %cst_84 : f32 to vector<8x10xf32>
    %187 = arith.cmpf oeq, %7, %186 : vector<8x10xf32>
    %cst_85 = arith.constant -1.000000e+04 : f32
    %188 = vector.broadcast %cst_85 : f32 to vector<8x10xf32>
    %189 = arith.select %187, %188, %185 : vector<8x10xi1>, vector<8x10xf32>
    %cst_86 = arith.constant dense<0xFF800000> : vector<8xf32>
    %190 = vector.multi_reduction <maximumf>, %189, %cst_86 [1] : vector<8x10xf32> to vector<8xf32>
    %191 = vector.shape_cast %190 : vector<8xf32> to vector<8x1xf32>
    %192 = vector.broadcast %191 : vector<8x1xf32> to vector<8x10xf32>
    %193 = arith.subf %189, %192 : vector<8x10xf32>
    %194 = math.exp %193 : vector<8x10xf32>
    %cst_87 = arith.constant dense<0.000000e+00> : vector<8xf32>
    %195 = vector.multi_reduction <add>, %194, %cst_87 [1] : vector<8x10xf32> to vector<8xf32>
    %196 = vector.shape_cast %195 : vector<8xf32> to vector<8x1xf32>
    %197 = tpu.reciprocal %196 {approx = true} : vector<8x1xf32> -> vector<8x1xf32>
    %198 = vector.broadcast %197 : vector<8x1xf32> to vector<8x10xf32>
    %199 = arith.mulf %194, %198 : vector<8x10xf32>
    %cst_88 = arith.constant dense<0.000000e+00> : vector<8x32xf32>
    %200 = tpu.matmul %199, %182, %cst_88 {dimension_numbers = #tpu.dot_dimension_numbers<[1], [0], [0], [1], [0, 0, 1, 1], [], []>} : vector<8x10xf32>, vector<10x32xf32>, vector<8x32xf32> -> vector<8x32xf32>
    %201 = vector.extract_strided_slice %154 {offsets = [32, 0], sizes = [32, 128], strides = [1, 1]} : vector<128x128xf32> to vector<32x128xf32>
    %cst_89 = arith.constant dense<0.000000e+00> : vector<8x128xf32>
    %202 = tpu.matmul %200, %201, %cst_89 {dimension_numbers = #tpu.dot_dimension_numbers<[1], [0], [0], [1], [0, 0, 1, 1], [], []>} : vector<8x32xf32>, vector<32x128xf32>, vector<8x128xf32> -> vector<8x128xf32>
    %203 = arith.addf %179, %202 : vector<8x128xf32>
    %204 = vector.extract_strided_slice %146 {offsets = [0, 64], sizes = [8, 32], strides = [1, 1]} : vector<8x128xf32> to vector<8x32xf32>
    %205 = vector.extract_strided_slice %152 {offsets = [0, 64], sizes = [10, 32], strides = [1, 1]} : vector<10x128xf32> to vector<10x32xf32>
    %206 = vector.extract_strided_slice %153 {offsets = [0, 64], sizes = [10, 32], strides = [1, 1]} : vector<10x128xf32> to vector<10x32xf32>
    %cst_90 = arith.constant dense<0.000000e+00> : vector<8x10xf32>
    %207 = tpu.matmul %204, %205, %cst_90 {dimension_numbers = #tpu.dot_dimension_numbers<[1], [1], [0], [0], [0, 0, 1, 0], [], []>} : vector<8x32xf32>, vector<10x32xf32>, vector<8x10xf32> -> vector<8x10xf32>
    %cst_91 = arith.constant 0.176776692 : f32
    %208 = vector.broadcast %cst_91 : f32 to vector<8x10xf32>
    %209 = arith.mulf %207, %208 : vector<8x10xf32>
    %cst_92 = arith.constant 0.000000e+00 : f32
    %210 = vector.broadcast %cst_92 : f32 to vector<8x10xf32>
    %211 = arith.cmpf oeq, %7, %210 : vector<8x10xf32>
    %cst_93 = arith.constant -1.000000e+04 : f32
    %212 = vector.broadcast %cst_93 : f32 to vector<8x10xf32>
    %213 = arith.select %211, %212, %209 : vector<8x10xi1>, vector<8x10xf32>
    %cst_94 = arith.constant dense<0xFF800000> : vector<8xf32>
    %214 = vector.multi_reduction <maximumf>, %213, %cst_94 [1] : vector<8x10xf32> to vector<8xf32>
    %215 = vector.shape_cast %214 : vector<8xf32> to vector<8x1xf32>
    %216 = vector.broadcast %215 : vector<8x1xf32> to vector<8x10xf32>
    %217 = arith.subf %213, %216 : vector<8x10xf32>
    %218 = math.exp %217 : vector<8x10xf32>
    %cst_95 = arith.constant dense<0.000000e+00> : vector<8xf32>
    %219 = vector.multi_reduction <add>, %218, %cst_95 [1] : vector<8x10xf32> to vector<8xf32>
    %220 = vector.shape_cast %219 : vector<8xf32> to vector<8x1xf32>
    %221 = tpu.reciprocal %220 {approx = true} : vector<8x1xf32> -> vector<8x1xf32>
    %222 = vector.broadcast %221 : vector<8x1xf32> to vector<8x10xf32>
    %223 = arith.mulf %218, %222 : vector<8x10xf32>
    %cst_96 = arith.constant dense<0.000000e+00> : vector<8x32xf32>
    %224 = tpu.matmul %223, %206, %cst_96 {dimension_numbers = #tpu.dot_dimension_numbers<[1], [0], [0], [1], [0, 0, 1, 1], [], []>} : vector<8x10xf32>, vector<10x32xf32>, vector<8x32xf32> -> vector<8x32xf32>
    %225 = vector.extract_strided_slice %154 {offsets = [64, 0], sizes = [32, 128], strides = [1, 1]} : vector<128x128xf32> to vector<32x128xf32>
    %cst_97 = arith.constant dense<0.000000e+00> : vector<8x128xf32>
    %226 = tpu.matmul %224, %225, %cst_97 {dimension_numbers = #tpu.dot_dimension_numbers<[1], [0], [0], [1], [0, 0, 1, 1], [], []>} : vector<8x32xf32>, vector<32x128xf32>, vector<8x128xf32> -> vector<8x128xf32>
    %227 = arith.addf %203, %226 : vector<8x128xf32>
    %228 = vector.extract_strided_slice %146 {offsets = [0, 96], sizes = [8, 32], strides = [1, 1]} : vector<8x128xf32> to vector<8x32xf32>
    %229 = vector.extract_strided_slice %152 {offsets = [0, 96], sizes = [10, 32], strides = [1, 1]} : vector<10x128xf32> to vector<10x32xf32>
    %230 = vector.extract_strided_slice %153 {offsets = [0, 96], sizes = [10, 32], strides = [1, 1]} : vector<10x128xf32> to vector<10x32xf32>
    %cst_98 = arith.constant dense<0.000000e+00> : vector<8x10xf32>
    %231 = tpu.matmul %228, %229, %cst_98 {dimension_numbers = #tpu.dot_dimension_numbers<[1], [1], [0], [0], [0, 0, 1, 0], [], []>} : vector<8x32xf32>, vector<10x32xf32>, vector<8x10xf32> -> vector<8x10xf32>
    %cst_99 = arith.constant 0.176776692 : f32
    %232 = vector.broadcast %cst_99 : f32 to vector<8x10xf32>
    %233 = arith.mulf %231, %232 : vector<8x10xf32>
    %cst_100 = arith.constant 0.000000e+00 : f32
    %234 = vector.broadcast %cst_100 : f32 to vector<8x10xf32>
    %235 = arith.cmpf oeq, %7, %234 : vector<8x10xf32>
    %cst_101 = arith.constant -1.000000e+04 : f32
    %236 = vector.broadcast %cst_101 : f32 to vector<8x10xf32>
    %237 = arith.select %235, %236, %233 : vector<8x10xi1>, vector<8x10xf32>
    %cst_102 = arith.constant dense<0xFF800000> : vector<8xf32>
    %238 = vector.multi_reduction <maximumf>, %237, %cst_102 [1] : vector<8x10xf32> to vector<8xf32>
    %239 = vector.shape_cast %238 : vector<8xf32> to vector<8x1xf32>
    %240 = vector.broadcast %239 : vector<8x1xf32> to vector<8x10xf32>
    %241 = arith.subf %237, %240 : vector<8x10xf32>
    %242 = math.exp %241 : vector<8x10xf32>
    %cst_103 = arith.constant dense<0.000000e+00> : vector<8xf32>
    %243 = vector.multi_reduction <add>, %242, %cst_103 [1] : vector<8x10xf32> to vector<8xf32>
    %244 = vector.shape_cast %243 : vector<8xf32> to vector<8x1xf32>
    %245 = tpu.reciprocal %244 {approx = true} : vector<8x1xf32> -> vector<8x1xf32>
    %246 = vector.broadcast %245 : vector<8x1xf32> to vector<8x10xf32>
    %247 = arith.mulf %242, %246 : vector<8x10xf32>
    %cst_104 = arith.constant dense<0.000000e+00> : vector<8x32xf32>
    %248 = tpu.matmul %247, %230, %cst_104 {dimension_numbers = #tpu.dot_dimension_numbers<[1], [0], [0], [1], [0, 0, 1, 1], [], []>} : vector<8x10xf32>, vector<10x32xf32>, vector<8x32xf32> -> vector<8x32xf32>
    %249 = vector.extract_strided_slice %154 {offsets = [96, 0], sizes = [32, 128], strides = [1, 1]} : vector<128x128xf32> to vector<32x128xf32>
    %cst_105 = arith.constant dense<0.000000e+00> : vector<8x128xf32>
    %250 = tpu.matmul %248, %249, %cst_105 {dimension_numbers = #tpu.dot_dimension_numbers<[1], [0], [0], [1], [0, 0, 1, 1], [], []>} : vector<8x32xf32>, vector<32x128xf32>, vector<8x128xf32> -> vector<8x128xf32>
    %251 = arith.addf %227, %250 : vector<8x128xf32>
    %c0_106 = arith.constant 0 : index
    %c0_107 = arith.constant 0 : index
    %252 = vector.load %arg16[%c0_106, %c0_107] : memref<1x128xf32, #tpu.memory_space<vmem>>, vector<1x128xf32>
    %253 = vector.broadcast %252 : vector<1x128xf32> to vector<8x128xf32>
    %254 = arith.addf %251, %253 : vector<8x128xf32>
    %255 = arith.addf %254, %141 : vector<8x128xf32>
    %c0_108 = arith.constant 0 : index
    %c0_109 = arith.constant 0 : index
    %256 = vector.load %arg17[%c0_108, %c0_109] : memref<1x128xf32, #tpu.memory_space<vmem>>, vector<1x128xf32>
    %c0_110 = arith.constant 0 : index
    %c0_111 = arith.constant 0 : index
    %257 = vector.load %arg18[%c0_110, %c0_111] : memref<1x128xf32, #tpu.memory_space<vmem>>, vector<1x128xf32>
    %cst_112 = arith.constant dense<0.000000e+00> : vector<8xf32>
    %258 = vector.multi_reduction <add>, %255, %cst_112 [1] : vector<8x128xf32> to vector<8xf32>
    %259 = vector.shape_cast %258 : vector<8xf32> to vector<8x1xf32>
    %cst_113 = arith.constant 1.280000e+02 : f32
    %260 = vector.broadcast %cst_113 : f32 to vector<8x1xf32>
    %261 = arith.divf %259, %260 : vector<8x1xf32>
    %262 = vector.broadcast %261 : vector<8x1xf32> to vector<8x128xf32>
    %263 = arith.subf %255, %262 : vector<8x128xf32>
    %264 = arith.mulf %263, %263 : vector<8x128xf32>
    %cst_114 = arith.constant dense<0.000000e+00> : vector<8xf32>
    %265 = vector.multi_reduction <add>, %264, %cst_114 [1] : vector<8x128xf32> to vector<8xf32>
    %266 = vector.shape_cast %265 : vector<8xf32> to vector<8x1xf32>
    %cst_115 = arith.constant 1.280000e+02 : f32
    %267 = vector.broadcast %cst_115 : f32 to vector<8x1xf32>
    %268 = arith.divf %266, %267 : vector<8x1xf32>
    %269 = vector.broadcast %261 : vector<8x1xf32> to vector<8x128xf32>
    %270 = arith.subf %255, %269 : vector<8x128xf32>
    %cst_116 = arith.constant 9.99999996E-13 : f32
    %271 = vector.broadcast %cst_116 : f32 to vector<8x1xf32>
    %272 = arith.addf %268, %271 : vector<8x1xf32>
    %273 = math.rsqrt %272 : vector<8x1xf32>
    %274 = vector.broadcast %273 : vector<8x1xf32> to vector<8x128xf32>
    %275 = arith.mulf %270, %274 : vector<8x128xf32>
    %276 = vector.broadcast %256 : vector<1x128xf32> to vector<8x128xf32>
    %277 = arith.mulf %275, %276 : vector<8x128xf32>
    %278 = vector.broadcast %257 : vector<1x128xf32> to vector<8x128xf32>
    %279 = arith.addf %277, %278 : vector<8x128xf32>
    %c0_117 = arith.constant 0 : index
    %c0_118 = arith.constant 0 : index
    %280 = vector.load %arg19[%c0_117, %c0_118] : memref<128x256xf32, #tpu.memory_space<vmem>>, vector<128x256xf32>
    %c0_119 = arith.constant 0 : index
    %c0_120 = arith.constant 0 : index
    %281 = vector.load %arg20[%c0_119, %c0_120] : memref<1x256xf32, #tpu.memory_space<vmem>>, vector<1x256xf32>
    %c0_121 = arith.constant 0 : index
    %c0_122 = arith.constant 0 : index
    %282 = vector.load %arg21[%c0_121, %c0_122] : memref<256x128xf32, #tpu.memory_space<vmem>>, vector<256x128xf32>
    %c0_123 = arith.constant 0 : index
    %c0_124 = arith.constant 0 : index
    %283 = vector.load %arg22[%c0_123, %c0_124] : memref<1x128xf32, #tpu.memory_space<vmem>>, vector<1x128xf32>
    %cst_125 = arith.constant dense<0.000000e+00> : vector<8x256xf32>
    %284 = tpu.matmul %279, %280, %cst_125 {dimension_numbers = #tpu.dot_dimension_numbers<[1], [0], [0], [1], [0, 0, 1, 1], [], []>} : vector<8x128xf32>, vector<128x256xf32>, vector<8x256xf32> -> vector<8x256xf32>
    %285 = vector.broadcast %281 : vector<1x256xf32> to vector<8x256xf32>
    %286 = arith.addf %284, %285 : vector<8x256xf32>
    %cst_126 = arith.constant 0.000000e+00 : f32
    %287 = vector.broadcast %cst_126 : f32 to vector<8x256xf32>
    %288 = arith.maximumf %286, %287 : vector<8x256xf32>
    %cst_127 = arith.constant dense<0.000000e+00> : vector<8x128xf32>
    %289 = tpu.matmul %288, %282, %cst_127 {dimension_numbers = #tpu.dot_dimension_numbers<[1], [0], [0], [1], [0, 0, 1, 1], [], []>} : vector<8x256xf32>, vector<256x128xf32>, vector<8x128xf32> -> vector<8x128xf32>
    %290 = vector.broadcast %283 : vector<1x128xf32> to vector<8x128xf32>
    %291 = arith.addf %289, %290 : vector<8x128xf32>
    %292 = arith.addf %291, %279 : vector<8x128xf32>
    %c0_128 = arith.constant 0 : index
    %c0_129 = arith.constant 0 : index
    %293 = vector.load %arg23[%c0_128, %c0_129] : memref<1x128xf32, #tpu.memory_space<vmem>>, vector<1x128xf32>
    %c0_130 = arith.constant 0 : index
    %c0_131 = arith.constant 0 : index
    %294 = vector.load %arg24[%c0_130, %c0_131] : memref<1x128xf32, #tpu.memory_space<vmem>>, vector<1x128xf32>
    %cst_132 = arith.constant dense<0.000000e+00> : vector<8xf32>
    %295 = vector.multi_reduction <add>, %292, %cst_132 [1] : vector<8x128xf32> to vector<8xf32>
    %296 = vector.shape_cast %295 : vector<8xf32> to vector<8x1xf32>
    %cst_133 = arith.constant 1.280000e+02 : f32
    %297 = vector.broadcast %cst_133 : f32 to vector<8x1xf32>
    %298 = arith.divf %296, %297 : vector<8x1xf32>
    %299 = vector.broadcast %298 : vector<8x1xf32> to vector<8x128xf32>
    %300 = arith.subf %292, %299 : vector<8x128xf32>
    %301 = arith.mulf %300, %300 : vector<8x128xf32>
    %cst_134 = arith.constant dense<0.000000e+00> : vector<8xf32>
    %302 = vector.multi_reduction <add>, %301, %cst_134 [1] : vector<8x128xf32> to vector<8xf32>
    %303 = vector.shape_cast %302 : vector<8xf32> to vector<8x1xf32>
    %cst_135 = arith.constant 1.280000e+02 : f32
    %304 = vector.broadcast %cst_135 : f32 to vector<8x1xf32>
    %305 = arith.divf %303, %304 : vector<8x1xf32>
    %306 = vector.broadcast %298 : vector<8x1xf32> to vector<8x128xf32>
    %307 = arith.subf %292, %306 : vector<8x128xf32>
    %cst_136 = arith.constant 9.99999996E-13 : f32
    %308 = vector.broadcast %cst_136 : f32 to vector<8x1xf32>
    %309 = arith.addf %305, %308 : vector<8x1xf32>
    %310 = math.rsqrt %309 : vector<8x1xf32>
    %311 = vector.broadcast %310 : vector<8x1xf32> to vector<8x128xf32>
    %312 = arith.mulf %307, %311 : vector<8x128xf32>
    %313 = vector.broadcast %293 : vector<1x128xf32> to vector<8x128xf32>
    %314 = arith.mulf %312, %313 : vector<8x128xf32>
    %315 = vector.broadcast %294 : vector<1x128xf32> to vector<8x128xf32>
    %316 = arith.addf %314, %315 : vector<8x128xf32>
    %c0_137 = arith.constant 0 : index
    %c0_138 = arith.constant 0 : index
    %c0_139 = arith.constant 0 : index
    %317 = vector.load %arg25[%c0_137, %c0_138, %c0_139] : memref<1x8x128xf32, #tpu.memory_space<vmem>>, vector<1x8x128xf32>
    %318 = vector.shape_cast %317 : vector<1x8x128xf32> to vector<8x128xf32>
    %319 = vector.shape_cast %316 : vector<8x128xf32> to vector<1x8x128xf32>
    tpu.vector_store %arg25[%c0_137, %c0_138, %c0_139], %319 {strides = array<i32>} : memref<1x8x128xf32, #tpu.memory_space<vmem>>, vector<1x8x128xf32>,
    return
  }
  func.func @transform_0(%arg0: i32) -> (i32, i32, i32) {
    %c0_i32 = arith.constant 0 : i32
    %c0_i32_0 = arith.constant 0 : i32
    %c0_i32_1 = arith.constant 0 : i32
    return %arg0, %c0_i32, %c0_i32_0 : i32, i32, i32
  }
  func.func @transform_1(%arg0: i32) -> (i32, i32, i32) {
    %c0_i32 = arith.constant 0 : i32
    %c0_i32_0 = arith.constant 0 : i32
    %c0_i32_1 = arith.constant 0 : i32
    return %arg0, %c0_i32, %c0_i32_0 : i32, i32, i32
  }
  func.func @transform_2(%arg0: i32) -> (i32, i32, i32) {
    %c0_i32 = arith.constant 0 : i32
    %c0_i32_0 = arith.constant 0 : i32
    %c0_i32_1 = arith.constant 0 : i32
    return %arg0, %c0_i32, %c0_i32_0 : i32, i32, i32
  }
  func.func @transform_3(%arg0: i32) -> (i32, i32, i32) {
    %c0_i32 = arith.constant 0 : i32
    %c0_i32_0 = arith.constant 0 : i32
    %c0_i32_1 = arith.constant 0 : i32
    return %arg0, %c0_i32, %c0_i32_0 : i32, i32, i32
  }
  func.func @transform_4(%arg0: i32) -> (i32, i32) {
    %c0_i32 = arith.constant 0 : i32
    %c0_i32_0 = arith.constant 0 : i32
    %c0_i32_1 = arith.constant 0 : i32
    return %c0_i32, %c0_i32_0 : i32, i32
  }
  func.func @transform_5(%arg0: i32) -> (i32, i32) {
    %c0_i32 = arith.constant 0 : i32
    %c0_i32_0 = arith.constant 0 : i32
    %c0_i32_1 = arith.constant 0 : i32
    return %c0_i32, %c0_i32_0 : i32, i32
  }
  func.func @transform_6(%arg0: i32) -> (i32, i32) {
    %c0_i32 = arith.constant 0 : i32
    %c0_i32_0 = arith.constant 0 : i32
    %c0_i32_1 = arith.constant 0 : i32
    return %c0_i32, %c0_i32_0 : i32, i32
  }
  func.func @transform_7(%arg0: i32) -> (i32, i32) {
    %c0_i32 = arith.constant 0 : i32
    %c0_i32_0 = arith.constant 0 : i32
    %c0_i32_1 = arith.constant 0 : i32
    return %c0_i32, %c0_i32_0 : i32, i32
  }
  func.func @transform_8(%arg0: i32) -> (i32, i32) {
    %c0_i32 = arith.constant 0 : i32
    %c0_i32_0 = arith.constant 0 : i32
    %c0_i32_1 = arith.constant 0 : i32
    return %c0_i32, %c0_i32_0 : i32, i32
  }
  func.func @transform_9(%arg0: i32) -> (i32, i32) {
    %c0_i32 = arith.constant 0 : i32
    %c0_i32_0 = arith.constant 0 : i32
    %c0_i32_1 = arith.constant 0 : i32
    return %c0_i32, %c0_i32_0 : i32, i32
  }
  func.func @transform_10(%arg0: i32) -> (i32, i32) {
    %c0_i32 = arith.constant 0 : i32
    %c0_i32_0 = arith.constant 0 : i32
    %c0_i32_1 = arith.constant 0 : i32
    return %c0_i32, %c0_i32_0 : i32, i32
  }
  func.func @transform_11(%arg0: i32) -> (i32, i32) {
    %c0_i32 = arith.constant 0 : i32
    %c0_i32_0 = arith.constant 0 : i32
    %c0_i32_1 = arith.constant 0 : i32
    return %c0_i32, %c0_i32_0 : i32, i32
  }
  func.func @transform_12(%arg0: i32) -> (i32, i32) {
    %c0_i32 = arith.constant 0 : i32
    %c0_i32_0 = arith.constant 0 : i32
    %c0_i32_1 = arith.constant 0 : i32
    return %c0_i32, %c0_i32_0 : i32, i32
  }
  func.func @transform_13(%arg0: i32) -> (i32, i32) {
    %c0_i32 = arith.constant 0 : i32
    %c0_i32_0 = arith.constant 0 : i32
    %c0_i32_1 = arith.constant 0 : i32
    return %c0_i32, %c0_i32_0 : i32, i32
  }
  func.func @transform_14(%arg0: i32) -> (i32, i32) {
    %c0_i32 = arith.constant 0 : i32
    %c0_i32_0 = arith.constant 0 : i32
    %c0_i32_1 = arith.constant 0 : i32
    return %c0_i32, %c0_i32_0 : i32, i32
  }
  func.func @transform_15(%arg0: i32) -> (i32, i32) {
    %c0_i32 = arith.constant 0 : i32
    %c0_i32_0 = arith.constant 0 : i32
    %c0_i32_1 = arith.constant 0 : i32
    return %c0_i32, %c0_i32_0 : i32, i32
  }
  func.func @transform_16(%arg0: i32) -> (i32, i32) {
    %c0_i32 = arith.constant 0 : i32
    %c0_i32_0 = arith.constant 0 : i32
    %c0_i32_1 = arith.constant 0 : i32
    return %c0_i32, %c0_i32_0 : i32, i32
  }
  func.func @transform_17(%arg0: i32) -> (i32, i32) {
    %c0_i32 = arith.constant 0 : i32
    %c0_i32_0 = arith.constant 0 : i32
    %c0_i32_1 = arith.constant 0 : i32
    return %c0_i32, %c0_i32_0 : i32, i32
  }
  func.func @transform_18(%arg0: i32) -> (i32, i32) {
    %c0_i32 = arith.constant 0 : i32
    %c0_i32_0 = arith.constant 0 : i32
    %c0_i32_1 = arith.constant 0 : i32
    return %c0_i32, %c0_i32_0 : i32, i32
  }
  func.func @transform_19(%arg0: i32) -> (i32, i32) {
    %c0_i32 = arith.constant 0 : i32
    %c0_i32_0 = arith.constant 0 : i32
    %c0_i32_1 = arith.constant 0 : i32
    return %c0_i32, %c0_i32_0 : i32, i32
  }
  func.func @transform_20(%arg0: i32) -> (i32, i32) {
    %c0_i32 = arith.constant 0 : i32
    %c0_i32_0 = arith.constant 0 : i32
    %c0_i32_1 = arith.constant 0 : i32
    return %c0_i32, %c0_i32_0 : i32, i32
  }
  func.func @transform_21(%arg0: i32) -> (i32, i32) {
    %c0_i32 = arith.constant 0 : i32
    %c0_i32_0 = arith.constant 0 : i32
    %c0_i32_1 = arith.constant 0 : i32
    return %c0_i32, %c0_i32_0 : i32, i32
  }
  func.func @transform_22(%arg0: i32) -> (i32, i32) {
    %c0_i32 = arith.constant 0 : i32
    %c0_i32_0 = arith.constant 0 : i32
    %c0_i32_1 = arith.constant 0 : i32
    return %c0_i32, %c0_i32_0 : i32, i32
  }
  func.func @transform_23(%arg0: i32) -> (i32, i32) {
    %c0_i32 = arith.constant 0 : i32
    %c0_i32_0 = arith.constant 0 : i32
    %c0_i32_1 = arith.constant 0 : i32
    return %c0_i32, %c0_i32_0 : i32, i32
  }
  func.func @transform_24(%arg0: i32) -> (i32, i32, i32) {
    %c0_i32 = arith.constant 0 : i32
    %c0_i32_0 = arith.constant 0 : i32
    %c0_i32_1 = arith.constant 0 : i32
    return %arg0, %c0_i32, %c0_i32_0 : i32, i32, i32
  }
}

module attributes {stable_mosaic.version = 11 : i64} {
  func.func @_linear_kernel(%arg0: memref<16x128xf32, #tpu.memory_space<vmem>>, %arg1: memref<128x128xf32, #tpu.memory_space<vmem>>, %arg2: memref<1x128xf32, #tpu.memory_space<vmem>>, %arg3: memref<16x128xf32, #tpu.memory_space<vmem>>) attributes {dimension_semantics = [], scalar_prefetch = 0 : i64, scratch_operands = 0 : i64, tpu.core_type = #tpu.core_type<tc>} {
    %c0 = arith.constant 0 : index
    %c0_0 = arith.constant 0 : index
    %0 = vector.load %arg0[%c0, %c0_0] : memref<16x128xf32, #tpu.memory_space<vmem>>, vector<16x128xf32>
    %c0_1 = arith.constant 0 : index
    %c0_2 = arith.constant 0 : index
    %1 = vector.load %arg1[%c0_1, %c0_2] : memref<128x128xf32, #tpu.memory_space<vmem>>, vector<128x128xf32>
    %cst = arith.constant dense<0.000000e+00> : vector<16x128xf32>
    %2 = tpu.matmul %0, %1, %cst {dimension_numbers = #tpu.dot_dimension_numbers<[1], [0], [0], [1], [0, 0, 1, 1], [], []>} : vector<16x128xf32>, vector<128x128xf32>, vector<16x128xf32> -> vector<16x128xf32>
    %c0_3 = arith.constant 0 : index
    %c0_4 = arith.constant 0 : index
    %3 = vector.load %arg2[%c0_3, %c0_4] : memref<1x128xf32, #tpu.memory_space<vmem>>, vector<1x128xf32>
    %4 = vector.broadcast %3 : vector<1x128xf32> to vector<16x128xf32>
    %5 = arith.addf %2, %4 : vector<16x128xf32>
    %c0_5 = arith.constant 0 : index
    %c0_6 = arith.constant 0 : index
    %6 = vector.load %arg3[%c0_5, %c0_6] : memref<16x128xf32, #tpu.memory_space<vmem>>, vector<16x128xf32>
    tpu.vector_store %arg3[%c0_5, %c0_6], %5 {strides = array<i32>} : memref<16x128xf32, #tpu.memory_space<vmem>>, vector<16x128xf32>,
    return
  }
}

</mosaic_0001>

<bundles_post_ra>
// kernel: _lambda_.5
= control target key start
LH: loop header
LB: loop body
LE: loop exit
PB: predicated region body
PF: predicated region fallthrough
CT: control target
= control target key end

     0   :  { %19 = vsyncpa [#allocation3], 0  ;;  %s3675_s0 = inlined_call_operand.vmem [shape: f32[2,10,128], index: 0, kind: input, shape index: {}]   ;;  %s3676_s1 = inlined_call_operand.vmem [shape: f32[2,10,10], index: 1, kind: input, shape index: {}]   ;;  %s3677_s2 = inlined_call_operand.vmem [shape: f32[128,384], index: 2, kind: input, shape index: {}]   ;;  %s3678_s3 = inlined_call_operand.vmem [shape: f32[1,384], index: 3, kind: input, shape index: {}]   ;;  %s3679_s4 = inlined_call_operand.hbm [shape: f32[128,128], index: 4, kind: input, shape index: {}]   ;;  %s3680_s5 = inlined_call_operand.vmem [shape: f32[1,128], index: 5, kind: input, shape index: {}]   ;;  %s3681_s6 = inlined_call_operand.vmem [shape: f32[1,128], index: 6, kind: input, shape index: {}]   ;;  %s3682_s7 = inlined_call_operand.vmem [shape: f32[1,128], index: 7, kind: input, shape index: {}]   ;;  %s3683_s8 = inlined_call_operand.vmem [shape: f32[128,256], index: 8, kind: input, shape index: {}]   ;;  %s3684_s9 = inlined_call_operand.vmem [shape: f32[1,256], index: 9, kind: input, shape index: {}]   ;;  %s3685_s10 = inlined_call_operand.hbm [shape: f32[256,128], index: 10, kind: input, shape index: {}]   ;;  %s3686_s11 = inlined_call_operand.vmem [shape: f32[1,128], index: 11, kind: input, shape index: {}]   ;;  %s3687_s12 = inlined_call_operand.vmem [shape: f32[1,128], index: 12, kind: input, shape index: {}]   ;;  %s3688_s13 = inlined_call_operand.vmem [shape: f32[1,128], index: 13, kind: input, shape index: {}]   ;;  %s3689_s14 = inlined_call_operand.vmem [shape: f32[2,10,128], index: 14, kind: output, shape index: {}]  }
   0x1   :  { %20 = vsyncpa [#allocation5], 0  ;;  %s3115_s29 = smov 0  }
   0x2 LB: > { %3693 = sst [smem:[#allocation8_spill]] %s3029_s29  ;;  %s3121_s30 = sadd.s32 4294967295, %s3029_s29   ;;  %s3029_s29 = sphi %s3115_s29, %s26_s29  }
   0x3   : > { %p2332_p0 = scmp.ge.s32.totalorder %s3029_s29, 1  ;;  %p361_p1 = scmp.lt.s32.totalorder %s3029_s29, 3 }
   0x4   : > { %s3031_s15 = smov [#allocation2]   ;;  %p3690_p3 = scmp.eq.s32.totalorder %s3121_s30, 0 }
   0x5   : > { %s379_s16 = sshll.u32 %s3031_s15, 4  ;;  %p3125_p2 = pnand %p2332_p0, %p361_p1  ;;  %s380_s16 = int_to_ptr.vmem [resolvable:$true] %s379_s16 }
   0x6   : > { %s3032_s18 = smov [#allocation4]   ;;  %s2959_s23 = scalar_lea.hbm %s3679_s4, 2048 }
   0x7   : > { %s3694_s17 = scalar_select %p3125_p2, 1, 0 }
   0x8   : > { %p2861_p4 = pneg %p3125_p2  ;;  %s407_s19 = sshll.u32 %s3032_s18, 4  ;;  %s3138_s19 = int_to_ptr.vmem [resolvable:$true] %s407_s19 }
   0x9   : > { %p2960_p6 = scmp.ne.s32.totalorder %s3679_s4, %s2959_s23  ;;  %p2966_p10 = scmp.lt.u32.totalorder %s2959_s23, %s3679_s4 }
   0xa   : > { %p3134_p5 = pnand %p3690_p3, %p2861_p4 }
   0xc   : > { %p2961_p7 = pneg %p3134_p5 }
   0xe   : > { %p2962_p8 = pnand %p2961_p7, %p2960_p6 }
  0x10   : > { %p2963_p9 = pneg %p2962_p8 }
  0x12   : > { %p2968_p11 = pnand %p2966_p10, %p2963_p9 }
  0x14   : > { %2971 = shalt.err (!%p2968_p11)
}
  0x15   : > { %s2972_s28 = scalar_lea.vmem %s380_s16, 2048  ;;  %p2980_p1 = scmp.lt.s32.totalorder %s380_s16, %s380_s16 }
  0x16   : > { %p2973_p12 = scmp.ne.s32.totalorder %s380_s16, %s2972_s28  ;;  %p2981_p4 = scmp.lt.s32.totalorder %s2972_s28, %s2972_s28 }
  0x18   : > { %p2975_p13 = pnand %p2973_p12, %p2961_p7  ;;  %p2982_p3 = por %p2981_p4, %p2980_p1 }
  0x1a   : > { %p2976_p0 = pneg %p2975_p13 }
  0x1c   : > { %p2983_p2 = pnand %p2982_p3, %p2976_p0 }
  0x1e   : > { %2986 = shalt.err (!%p2983_p2)
}
  0x1f   : > { %s3033_s15 = smov 128   ;;  %s3034_s18 = smov 8  }
  0x20   : > { %2864 = dma.hbm_to_vmem [thread:$0]  (!%p3134_p5), %s3679_s4, 2048, %s380_s16, [#allocation3], %s3033_s15, %s3033_s15, %s3034_s18  }
  0x21   : > { %s2987_s25 = scalar_lea.hbm %s3685_s10, 4096 }
  0x22   : > { %p2988_p6 = scmp.ne.s32.totalorder %s3685_s10, %s2987_s25  ;;  %p2994_p8 = scmp.lt.u32.totalorder %s2987_s25, %s3685_s10 }
  0x24   : > { %p2990_p2 = pnand %p2988_p6, %p2961_p7 }
  0x26   : > { %p2991_p3 = pneg %p2990_p2 }
  0x28   : > { %p2996_p9 = pnand %p2994_p8, %p2991_p3 }
  0x2a   : > { %2999 = shalt.err (!%p2996_p9)
}
  0x2b   : > { %s3000_s16 = scalar_lea.vmem %s3138_s19, 4096  ;;  %p3008_p13 = scmp.lt.s32.totalorder %s3138_s19, %s3138_s19 }
  0x2c   : > { %p3001_p10 = scmp.ne.s32.totalorder %s3138_s19, %s3000_s16  ;;  %p3009_p0 = scmp.lt.s32.totalorder %s3000_s16, %s3000_s16 }
  0x2e   : > { %p3003_p11 = pnand %p3001_p10, %p2961_p7  ;;  %p3010_p1 = por %p3009_p0, %p3008_p13 }
  0x30   : > { %p3004_p12 = pneg %p3003_p11 }
  0x32   : > { %p3011_p4 = pnand %p3010_p1, %p3004_p12 }
  0x34   : > { %3014 = shalt.err (!%p3011_p4)
}
  0x35   : > { %2867 = dma.hbm_to_vmem [thread:$0]  (!%p3134_p5), %s3685_s10, 4096, %s3138_s19, [#allocation5], %s3033_s15, %s3033_s15, %s3034_s18  }
  0x36   : > { %p3696_p6 = scmp.ne.s32.totalorder %s3694_s17, 0 }
  0x37   : > { %p3697_p2 = scmp.eq.s32.totalorder (!%p3696_p6), %s3121_s30, 0 }
  0x38   : > { %448 = sbr.rel (%p3696_p6) target bundleno = 3994 (0xf9a), region = 76 }
  0x3f   : > { %3020 = dma.done.wait (%p3697_p2), [#allocation3], 2048   ;;  %p3698_p7 = pmov %p3697_p2 }
  0x40   : > { %p3699_p3 = pmov %p3697_p2 }
  0x41   : > { %3022 = vsyncadd (%p3698_p7), [#allocation3], 4294965248 }
  0x42   : > { %3024 = dma.done.wait (%p3699_p3), [#allocation5], 4096   ;;  %p3700_p8 = pmov %p3697_p2 }
  0x43   : > { %v3035_v0 = vmov 0.0   ;;  %p503_p5 = scmp.lt.s32.totalorder %s3121_s30, 1  ;;  %v523_v1 = vld [vmem:[%s3677_s2 + $0x8] sm:$0xff]  ;;  %v526_v2 = vld [vmem:[%s3677_s2 + $0x20] sm:$0xff]  ;;  %v525_v5 = vld [vmem:[%s3677_s2 + $0x18] sm:$0xff]  ;;  %v572_v51 = vlaneseq  ;;  %vm755_vm0 = vcmask 261120  }
  0x44   : > { %3026 = vsyncadd (%p3700_p8), [#allocation5], 4294963200  ;;  %651 = vmatprep.mubr.f32.mxu0 %v3035_v0  ;;  %v522_v3 = vld [vmem:[%s3677_s2] sm:$0xff]  ;;  %v2639_v4 = vpack.c.bf16 %v526_v2, %v523_v1  ;;  %v529_v6 = vld [vmem:[%s3677_s2 + $0x38] sm:$0xff]  ;;  %s3036_s19 = smov 96   ;;  %vm849_vm3 = vcmask 80896  }
  0x45   : > { %s3707_s30 = smov (!%p503_p5, %s3121_s30), 1  ;;  %v532_v7 = vld [vmem:[%s3677_s2 + $0x50] sm:$0xff]  ;;  %v2641_v8 = vpack.c.bf16 %v525_v5, %v522_v3  ;;  %v531_v11 = vld [vmem:[%s3677_s2 + $0x48] sm:$0xff]  ;;  %v538_v13 = vld [vmem:[%s3677_s2 + $0x80] sm:$0xff]  ;;  %v3314_v52 = vshrl.u32 %v572_v51, 7  ;;  %vm853_vm5 = vcmask 74752  }
  0x46   : > { %v2643_v9 = vpack.c.bf16 %v532_v7, %v529_v6  ;;  %v528_v10 = vld [vmem:[%s3677_s2 + $0x30] sm:$0xff]  ;;  %v535_v12 = vld [vmem:[%s3677_s2 + $0x68] sm:$0xff]  ;;  %2640 = vmatprep.subr.bf16.mxu0 %v2639_v4  ;;  %s3230_s22 = sshll.u32 %s3707_s30, 4  ;;  %v534_v16 = vld [vmem:[%s3677_s2 + $0x60] sm:$0xff]  ;;  %vm879_vm6 = vcmask 1041408   ;;  %vm3037_vm7 = vmmov 1  }
  0x47   : > { %2642 = vmatpush1.bf16.msra.mxu0 %v2641_v8  ;;  %v2645_v14 = vpack.c.bf16 %v531_v11, %v528_v10  ;;  %v2647_v15 = vpack.c.bf16 %v538_v13, %v535_v12  ;;  %v537_v17 = vld [vmem:[%s3677_s2 + $0x78] sm:$0xff]  ;;  %v544_v19 = vld [vmem:[%s3677_s2 + $0xb0] sm:$0xff]  ;;  %s3248_s17 = scalar_lea.vmem %s3675_s0, %s3230_s22  ;;  %v543_v23 = vld [vmem:[%s3677_s2 + $0xa8] sm:$0xff]  ;;  %v574_v61 = vsub.s32 0, %v3314_v52  ;;  %v578_v4 = vsub.s32 1, %v3314_v52  ;;  %s512_s20 = scalar_lea.vmem %s3676_s1, %s3230_s22 }
  0x48   : > { %2644 = vmatprep.subr.bf16.mxu0 %v2643_v9  ;;  %v541_v18 = vld [vmem:[%s3677_s2 + $0x98] sm:$0xff]  ;;  %v2649_v20 = vpack.c.bf16 %v537_v17, %v534_v16  ;;  %v540_v22 = vld [vmem:[%s3677_s2 + $0x90] sm:$0xff]  ;;  %v547_v24 = vld [vmem:[%s3677_s2 + $0xc8] sm:$0xff]  ;;  %s3038_s15 = smov 64   ;;  %s517_s27 = scalar_lea.vmem %s3689_s14, %s3230_s22 }
  0x49   : > { %v2651_v21 = vpack.c.bf16 %v544_v19, %v541_v18  ;;  %v550_v25 = vld [vmem:[%s3677_s2 + $0xe0] sm:$0xff]  ;;  %v2653_v27 = vpack.c.bf16 %v543_v23, %v540_v22  ;;  %v549_v30 = vld [vmem:[%s3677_s2 + $0xd8] sm:$0xff]  ;;  %v556_v32 = vld [vmem:[%s3677_s2 + $0x110] sm:$0xff] }
  0x4a   : > { %v3263_v26 = vld [vmem:[%s3248_s17] sm:$0xff]  ;;  %v2655_v28 = vpack.c.bf16 %v550_v25, %v547_v24  ;;  %v553_v31 = vld [vmem:[%s3677_s2 + $0xf8] sm:$0xff]  ;;  %v552_v35 = vld [vmem:[%s3677_s2 + $0xf0] sm:$0xff] }
  0x4b   : > { %2646 = vmatpush1.bf16.msra.mxu0 %v2645_v14  ;;  %2536 = vmatprep.mubr.f32.mxu1 %v3263_v26  ;;  %v546_v29 = vld [vmem:[%s3677_s2 + $0xc0] sm:$0xff]  ;;  %v2659_v34 = vpack.c.bf16 %v556_v32, %v553_v31  ;;  %v555_v36 = vld [vmem:[%s3677_s2 + $0x108] sm:$0xff]  ;;  %v561_v42 = vld [vmem:[%s3677_s2 + $0x138] sm:$0xff] }
  0x4c   : > { %2648 = vmatprep.subr.bf16.mxu0 %v2647_v15  ;;  %v2657_v33 = vpack.c.bf16 %v549_v30, %v546_v29  ;;  %v559_v37 = vld [vmem:[%s3677_s2 + $0x128] sm:$0xff]  ;;  %v562_v38 = vld [vmem:[%s3677_s2 + $0x140] sm:$0xff]  ;;  %v2661_v39 = vpack.c.bf16 %v555_v36, %v552_v35  ;;  %v565_v43 = vld [vmem:[%s3677_s2 + $0x158] sm:$0xff] }
  0x4d   : > { %v2663_v40 = vpack.c.bf16 %v562_v38, %v559_v37  ;;  %v558_v41 = vld [vmem:[%s3677_s2 + $0x120] sm:$0xff]  ;;  %v568_v44 = vld [vmem:[%s3677_s2 + $0x170] sm:$0xff]  ;;  %v567_v48 = vld [vmem:[%s3677_s2 + $0x168] sm:$0xff] }
  0x4e   : > { %v2665_v45 = vpack.c.bf16 %v561_v42, %v558_v41  ;;  %v2667_v46 = vpack.c.bf16 %v568_v44, %v565_v43  ;;  %v564_v47 = vld [vmem:[%s3677_s2 + $0x150] sm:$0xff]  ;;  %v3311_v50 = vld [vmem:[%s3248_s17 + $0x8] sm:$0x3]  ;;  %v530_v55 = vld [vmem:[%s3677_s2 + $0x40] sm:$0xff]  ;;  %v582_v41 = vsub.s32 2, %v3314_v52 }
  0x4f   : > { %2650 = vmatpush1.bf16.msra.mxu0 %v2649_v20  ;;  %v2669_v49 = vpack.c.bf16 %v567_v48, %v564_v47  ;;  %v524_v53 = vld [vmem:[%s3677_s2 + $0x10] sm:$0xff]  ;;  %v527_v54 = vld [vmem:[%s3677_s2 + $0x28] sm:$0xff]  ;;  %v533_v57 = vld [vmem:[%s3677_s2 + $0x58] sm:$0xff] }
  0x50   : > { %2652 = vmatprep.subr.bf16.mxu0 %v2651_v21  ;;  %v2671_v56 = vpack.c.bf16 %v527_v54, %v524_v53  ;;  %v2675_v58 = vpack.c.bf16 %v533_v57, %v530_v55  ;;  %v536_v59 = vld [vmem:[%s3677_s2 + $0x70] sm:$0xff]  ;;  %v539_v60 = vld [vmem:[%s3677_s2 + $0x88] sm:$0xff]  ;;  %v3338_v62 = vld [vmem:[%s3678_s3] sm:$0x7] }
  0x51   : > { %v2679_v63 = vpack.c.bf16 %v539_v60, %v536_v59  ;;  %v542_v1 = vld [vmem:[%s3677_s2 + $0xa0] sm:$0xff]  ;;  %v545_v2 = vld [vmem:[%s3677_s2 + $0xb8] sm:$0xff]  ;;  %v575_v3 = vrot.slane %v3338_v62, %v574_v61  ;;  %v548_v6 = vld [vmem:[%s3677_s2 + $0xd0] sm:$0xff]  ;;  %v579_v11 = vrot.slane %v3338_v62, %v578_v4  ;;  %v583_v42 = vrot.slane %v3338_v62, %v582_v41 }
  0x52   : > { %2672 = vmatprep.subr.bf16.mxu1 %v2671_v56  ;;  %v2683_v5 = vpack.c.bf16 %v545_v2, %v542_v1  ;;  %v551_v7 = vld [vmem:[%s3677_s2 + $0xe8] sm:$0xff]  ;;  %v554_v13 = vld [vmem:[%s3677_s2 + $0x100] sm:$0xff]  ;;  %v557_v14 = vld [vmem:[%s3677_s2 + $0x118] sm:$0xff] }
  0x53   : > { %2654 = vmatpush1.bf16.msra.mxu0 %v2653_v27  ;;  %2674 = vmatpush3.bf16.msra.mxu1 %v2671_v56  ;;  %v2687_v12 = vpack.c.bf16 %v551_v7, %v548_v6  ;;  %v2691_v19 = vpack.c.bf16 %v557_v14, %v554_v13  ;;  %vm3373_vm1 = vmpackc.low %vm755_vm0, %vm755_vm0  ;;  %v560_v21 = vld [vmem:[%s3677_s2 + $0x130] sm:$0xff]  ;;  %v563_v22 = vld [vmem:[%s3677_s2 + $0x148] sm:$0xff] }
  0x54   : > { %2656 = vmatprep.subr.bf16.mxu0 %v2655_v28  ;;  %2676 = vmatprep.subr.bf16.mxu1 %v2675_v58  ;;  %v2695_v25 = vpack.c.bf16 %v563_v22, %v560_v21  ;;  %v566_v27 = vld [vmem:[%s3677_s2 + $0x160] sm:$0xff]  ;;  %v569_v28 = vld [vmem:[%s3677_s2 + $0x178] sm:$0xff]  ;;  %vm3419_vm8 = vmpackc.low %vm879_vm6, %vm3037_vm7 }
  0x55   : > { %v2699_v29 = vpack.c.bf16 %v569_v28, %v566_v27  ;;  %v3404_v31 = vld [vmem:[%s512_s20] sm:$0xff] }
  0x56   : > { %vm845_vm2 = vcmp.eq.f32.partialorder %v3404_v31, 0.0  ;;  %v2384_v52 = vld [vmem:[%s3686_s11] ss:$0 sm:$0xff] }
  0x57   : > { %2658 = vmatpush1.bf16.msra.mxu0 %v2657_v33  ;;  %2678 = vmatpush3.bf16.msra.mxu1 %v2675_v58  ;;  %v3406_v33 = vld [vmem:[%s512_s20 + $0x8] sm:$0x3] }
  0x58   : > { %2660 = vmatprep.subr.bf16.mxu0 %v2659_v34  ;;  %2680 = vmatprep.subr.bf16.mxu1 %v2679_v63  ;;  %vm846_vm4 = vcmp.eq.f32.partialorder %v3406_v33, 0.0 }
  0x5b   : > { %2662 = vmatpush1.bf16.msra.mxu0 %v2661_v39  ;;  %2682 = vmatpush3.bf16.msra.mxu1 %v2679_v63 }
  0x5c   : > { %2664 = vmatprep.subr.bf16.mxu0 %v2663_v40  ;;  %2684 = vmatprep.subr.bf16.mxu1 %v2683_v5 }
  0x5f   : > { %2666 = vmatpush1.bf16.msra.mxu0 %v2665_v45  ;;  %2686 = vmatpush3.bf16.msra.mxu1 %v2683_v5 }
  0x60   : > { %2668 = vmatprep.subr.bf16.mxu0 %v2667_v46  ;;  %2688 = vmatprep.subr.bf16.mxu1 %v2687_v12 }
  0x63   : > { %2670 = vmatpush1.bf16.msra.mxu0 %v2669_v49  ;;  %2690 = vmatpush3.bf16.msra.mxu1 %v2687_v12 }
  0x64   : > { %2692 = vmatprep.subr.bf16.mxu1 %v2691_v19 }
  0x66   : > { %652 = vmatmul.mubr.f32.vlgmr.msra.gmra.mrb[0].mxu0 %v3263_v26 }
  0x67   : > { %657 = vmatprep.mubr.f32.mxu0 %v3035_v0  ;;  %2694 = vmatpush3.bf16.msra.mxu1 %v2691_v19 }
  0x68   : > { %2696 = vmatprep.subr.bf16.mxu1 %v2695_v25 }
  0x6a   : > { %658 = vmatmul.mubr.f32.gmra.mrb[2].mxu0 %v3311_v50 }
  0x6b   : > { %2698 = vmatpush3.bf16.msra.mxu1 %v2695_v25 }
  0x6c   : > { %2700 = vmatprep.subr.bf16.mxu1 %v2699_v29 }
  0x6f   : > { %2702 = vmatpush3.bf16.msra.mxu1 %v2699_v29 }
  0x72   : > { %2537 = vmatmul.mubr.f32.vlgmr.msra.gmra.mrb[0].mxu1 %v3311_v50 }
 0x139   : > { %v653_v8 = vpop.f32.mrb[0].mxu0 }
 0x13a   : > { %v3356_v9 = vadd.f32 %v653_v8, %v575_v3  ;;  %v655_v10 = vpop.f32.mrb[1].mxu0 }
 0x13b   : > { %v656_v17 = vadd.f32 %v655_v10, %v579_v11 }
 0x13c   : > { %958 = vrot.lane.b32.xlu1 %v3356_v9, %s3036_s19  ;;  %2543 = vmatprep.mubr.msk.f32.mxu0 %vm755_vm0, %v3356_v9 }
 0x13d   : > { %v659_v15 = vpop.f32.mrb[2].mxu0 }
 0x13e   : > { %v661_v16 = vpop.f32.mrb[3].mxu0  ;;  %v3395_v30 = vadd.f32 %v659_v15, %v575_v3 }
 0x13f   : > { %v662_v18 = vadd.f32 %v661_v16, %v579_v11 }
 0x141   : > { %v2703_v23 = vpack.c.bf16 %v662_v18, %v656_v17  ;;  %v3383_v24 = vpack.i.bf16 %v662_v18, %v656_v17 }
 0x143   : > { %2705 = vmatprep.subr.msk.bf16.mxu0 %vm3373_vm1, %v2703_v23 }
 0x144   : > { %2708 = vmatpush3.bf16.xpose.msk.msra.mxu0 %vm3373_vm1, %v2703_v23 }
 0x145   : > { %v2538_v43 = vpop.f32.mrb[0].mxu1 }
 0x146   : > { %v730_v44 = vpop.f32.mrb[1].mxu1  ;;  %v736_v45 = vadd.f32 %v2538_v43, %v583_v42 }
 0x147   : > { %v731_v46 = vadd.f32 %v730_v44, %v583_v42  ;;  %v743_v44 = vld [vmem:[#allocation2 + $0x20] sm:$0xff] }
 0x149   : > { %v2709_v47 = vpack.c.bf16 %v736_v45, %v731_v46  ;;  %v3451_v25 = vpack.i.bf16 %v736_v45, %v731_v46  ;;  %v744_v45 = vld [vmem:[#allocation2 + $0x28] sm:$0xff]  ;;  %v745_v46 = vld [vmem:[#allocation2 + $0x30] sm:$0xff] }
 0x14b   : > { %2544 = vmatmul.mubr.msk.f32.vlgmr.msra.gmra.mrb[4].mxu0 %vm755_vm0, %v3395_v30  ;;  %2711 = vmatprep.subr.msk.bf16.mxu1 %vm3419_vm8, %v2709_v47 }
 0x14c   : > { %2714 = vmatpush3.bf16.msk.msra.mxu1 %vm3419_vm8, %v2709_v47  ;;  %v2727_v47 = vpack.c.bf16 %v744_v45, %v743_v44  ;;  %v750_v44 = vld [vmem:[#allocation2 + $0x58] sm:$0xff] }
 0x14e   : > { %2728 = vmatprep.subr.bf16.mxu0 %v2727_v47 }
 0x14f   : > { %2730 = vmatpush3.bf16.msra.mxu0 %v2727_v47 }
 0x1ae   : > { %v959_v3 = vpop.permute.xlu1 %958 }
 0x21e   : > { %v2545_v32 = vpop.f32.mrb[4].mxu0 }
 0x21f   : > { %v834_v34 = vpop.f32.mrb[5].mxu0  ;;  %v844_v35 = vmul.f32 0.17677669, %v2545_v32 }
 0x220   : > { %v843_v36 = vmul.f32 0.17677669, %v834_v34 }
 0x221   : > { %v848_v39 = vsel %vm846_vm4, -10000.0, %v844_v35 }
 0x222   : > { %v847_v37 = vsel %vm845_vm2, -10000.0, %v843_v36  ;;  %v854_v40 = vsel %vm853_vm5, %v848_v39, -inf }
 0x223   : > { %v850_v38 = vsel %vm849_vm3, %v847_v37, -inf }
 0x224   : > { %851 = vmax.xlane.f32.xlu0 %v850_v38 }
 0x228   : > { %855 = vmax.xlane.f32.xlu0 %v854_v40 }
 0x23e   : > { %2890 = vrot.lane.b32.xlu0 %v3383_v24, %s3036_s19 }
 0x2b1   : > { %v852_v49 = vpop.xlane.xlu0 %851 }
 0x2b2   : > { %v857_v51 = vsub.f32 %v847_v37, %v852_v49  ;;  %v746_v49 = vld [vmem:[#allocation2 + $0x38] sm:$0xff] }
 0x2b4   : > { %v859_v55 = vmul.f32 1.442695, %v857_v51  ;;  %v2731_v51 = vpack.c.bf16 %v746_v49, %v745_v46 }
 0x2b5   : > { %v856_v53 = vpop.xlane.xlu0 %855 }
 0x2b6   : > { %v858_v54 = vsub.f32 %v848_v39, %v856_v53  ;;  %2732 = vmatprep.subr.bf16.mxu0 %v2731_v51 }
 0x2b7   : > { %2734 = vmatpush3.bf16.msra.mxu0 %v2731_v51 }
 0x2b8   : > { %v861_v56 = vmul.f32 1.442695, %v858_v54 }
 0x2b9   : > { %v2891_v57 = vpop.permute.xlu0 %2890 }
 0x2ba   : > { %2919 = vpow2.f32 %v861_v56  ;;  %v2893_v58 = vunpack.i.h.bf16 %v2891_v57  ;;  %v2892_v59 = vunpack.i.l.bf16 %v2891_v57 }
 0x2bb   : > { %2921 = vpow2.f32 %v859_v55 }
 0x2bc   : > { %v2715_v60 = vpack.c.bf16 %v2893_v58, %v2892_v59 }
 0x2be   : > { %2717 = vmatprep.subr.msk.bf16.mxu1 %vm3373_vm1, %v2715_v60 }
 0x2c4   : > { %v2920_v62 = vpop.eup %2919 }
 0x2c5   : > { %v866_v63 = vsel %vm853_vm5, %v2920_v62, 0.0  ;;  %v2922_v1 = vpop.eup %2921 }
 0x2c6   : > { %867 = vadd.xlane.f32.xlu1 %v866_v63  ;;  %v863_v2 = vsel %vm849_vm3, %v2922_v1, 0.0 }
 0x2ca   : > { %864 = vadd.xlane.f32.xlu1 %v863_v2 }
 0x2db   : > { %960 = vrot.lane.b32.xlu1 %v3395_v30, %s3036_s19 }
 0x353   : > { %v868_v5 = vpop.xlane.xlu1 %867 }
 0x354   : > { %2923 = vrcp.f32 %v868_v5  ;;  %v740_v5 = vld [vmem:[#allocation2 + $0x8] sm:$0xff] }
 0x357   : > { %v865_v6 = vpop.xlane.xlu1 %864 }
 0x358   : > { %2925 = vrcp.f32 %v865_v6 }
 0x35b   : > { %v961_v12 = vpop.permute.xlu1 %960 }
 0x35e   : > { %v2924_v7 = vpop.eup %2923 }
 0x35f   : > { %v872_v11 = vmul.f32 %v2924_v7, %v2920_v62  ;;  %v741_v7 = vld [vmem:[#allocation2 + $0x10] sm:$0xff] }
 0x362   : > { %v2926_v8 = vpop.eup %2925 }
 0x363   : > { %v871_v10 = vmul.f32 %v2926_v8, %v2922_v1  ;;  %v742_v8 = vld [vmem:[#allocation2 + $0x18] sm:$0xff] }
 0x365   : > { %2550 = vmatprep.mubr.msk.f32.mxu1 %vm849_vm3, %v871_v10 }
 0x366   : > { %2551 = vmatmul.mubr.msk.f32.vlgmr.msra.gmra.mrb[2].mxu1 %vm849_vm3, %v872_v11 }
 0x367   : > { %2720 = vmatpush3.bf16.xpose.msk.msra.mxu1 %vm3373_vm1, %v2715_v60  ;;  %2557 = vmatprep.mubr.msk.f32.mxu1 %vm755_vm0, %v959_v3  ;;  %v739_v3 = vld [vmem:[#allocation2] sm:$0xff] }
 0x368   : > { %v2735_v6 = vpack.c.bf16 %v740_v5, %v739_v3 }
 0x36a   : > { %2736 = vmatprep.subr.bf16.mxu0 %v2735_v6 }
 0x36e   : > { %2558 = vmatmul.mubr.msk.f32.vlgmr.msra.gmra.mrb[4].mxu1 %vm755_vm0, %v961_v12  ;;  %v2739_v12 = vpack.c.bf16 %v742_v8, %v741_v7 }
 0x439   : > { %v3441_v13 = vpop.f32.mrb[2].mxu1 }
 0x43a   : > { %v3443_v14 = vpop.f32.mrb[3].mxu1 }
 0x441   : > { %v2559_v15 = vpop.f32.mrb[4].mxu1 }
 0x442   : > { %v1050_v16 = vmul.f32 0.17677669, %v2559_v15  ;;  %v1040_v17 = vpop.f32.mrb[5].mxu1 }
 0x443   : > { %v1049_v18 = vmul.f32 0.17677669, %v1040_v17 }
 0x444   : > { %v1052_v19 = vsel %vm846_vm4, -10000.0, %v1050_v16 }
 0x445   : > { %v1056_v21 = vsel %vm853_vm5, %v1052_v19, -inf  ;;  %v1051_v22 = vsel %vm845_vm2, -10000.0, %v1049_v18 }
 0x446   : > { %1057 = vmax.xlane.f32.xlu0 %v1056_v21  ;;  %v1053_v23 = vsel %vm849_vm3, %v1051_v22, -inf }
 0x447   : > { %1054 = vmax.xlane.f32.xlu1 %v1053_v23 }
 0x458   : > { %2895 = vrot.lane.b32.xlu1 %v3451_v25, %s3036_s19  ;;  %s3039_s19 = smov 32  }
 0x45c   : > { %1326 = vrot.lane.b32.xlu1 %v3356_v9, %s3038_s15 }
 0x460   : > { %1328 = vrot.lane.b32.xlu1 %v3395_v30, %s3038_s15 }
 0x4d3   : > { %v1058_v27 = vpop.xlane.xlu0 %1057 }
 0x4d4   : > { %v1060_v28 = vsub.f32 %v1052_v19, %v1058_v27  ;;  %v1055_v29 = vpop.xlane.xlu1 %1054 }
 0x4d5   : > { %v1059_v32 = vsub.f32 %v1051_v22, %v1055_v29 }
 0x4d6   : > { %v1063_v34 = vmul.f32 1.442695, %v1060_v28 }
 0x4d7   : > { %v1061_v35 = vmul.f32 1.442695, %v1059_v32 }
 0x4d8   : > { %2927 = vpow2.f32 %v1063_v34  ;;  %v2896_v36 = vpop.permute.xlu1 %2895 }
 0x4d9   : > { %v2898_v37 = vunpack.i.h.bf16 %v2896_v36  ;;  %v2897_v38 = vunpack.i.l.bf16 %v2896_v36  ;;  %2929 = vpow2.f32 %v1061_v35 }
 0x4db   : > { %v2721_v39 = vpack.c.bf16 %v2898_v37, %v2897_v38 }
 0x4dc   : > { %v1327_v1 = vpop.permute.xlu1 %1326 }
 0x4dd   : > { %2723 = vmatprep.subr.msk.bf16.mxu1 %vm3419_vm8, %v2721_v39 }
 0x4de   : > { %2726 = vmatpush3.bf16.msk.msra.mxu1 %vm3419_vm8, %v2721_v39 }
 0x4e0   : > { %v1329_v2 = vpop.permute.xlu1 %1328 }
 0x4e2   : > { %v2928_v40 = vpop.eup %2927 }
 0x4e3   : > { %v1068_v41 = vsel %vm853_vm5, %v2928_v40, 0.0  ;;  %v2930_v42 = vpop.eup %2929 }
 0x4e4   : > { %1069 = vadd.xlane.f32.xlu0 %v1068_v41  ;;  %v1065_v43 = vsel %vm849_vm3, %v2930_v42, 0.0  ;;  %v748_v41 = vld [vmem:[#allocation2 + $0x48] sm:$0xff] }
 0x4e8   : > { %1066 = vadd.xlane.f32.xlu0 %v1065_v43 }
 0x4fe   : > { %2900 = vrot.lane.b32.xlu0 %v3383_v24, %s3038_s15 }
 0x571   : > { %v1070_v53 = vpop.xlane.xlu0 %1069 }
 0x572   : > { %2931 = vrcp.f32 %v1070_v53 }
 0x575   : > { %v1067_v54 = vpop.xlane.xlu0 %1066 }
 0x576   : > { %2933 = vrcp.f32 %v1067_v54 }
 0x579   : > { %v2901_v55 = vpop.permute.xlu0 %2900 }
 0x57a   : > { %v2903_v56 = vunpack.i.h.bf16 %v2901_v55  ;;  %v2902_v57 = vunpack.i.l.bf16 %v2901_v55 }
 0x57c   : > { %v2743_v58 = vpack.c.bf16 %v2903_v56, %v2902_v57  ;;  %v2932_v59 = vpop.eup %2931 }
 0x57d   : > { %v1074_v63 = vmul.f32 %v2932_v59, %v2928_v40  ;;  %v747_v40 = vld [vmem:[#allocation2 + $0x40] sm:$0xff] }
 0x57e   : > { %2745 = vmatprep.subr.msk.bf16.mxu1 %vm3373_vm1, %v2743_v58  ;;  %v2755_v43 = vpack.c.bf16 %v748_v41, %v747_v40 }
 0x580   : > { %v2934_v60 = vpop.eup %2933 }
 0x581   : > { %v1073_v62 = vmul.f32 %v2934_v60, %v2930_v42  ;;  %v749_v42 = vld [vmem:[#allocation2 + $0x50] sm:$0xff] }
 0x582   : > { %v2759_v45 = vpack.c.bf16 %v750_v44, %v749_v42 }
 0x583   : > { %2564 = vmatprep.mubr.msk.f32.mxu1 %vm849_vm3, %v1073_v62 }
 0x584   : > { %2565 = vmatmul.mubr.msk.f32.vlgmr.msra.gmra.mrb[6].mxu1 %vm849_vm3, %v1074_v63 }
 0x585   : > { %2748 = vmatpush3.bf16.xpose.msk.msra.mxu1 %vm3373_vm1, %v2743_v58  ;;  %2593 = vmatprep.mubr.msk.f32.mxu1 %vm755_vm0, %v1327_v1 }
 0x58c   : > { %2594 = vmatmul.mubr.msk.f32.vlgmr.msra.gmra.mrb[8].mxu1 %vm755_vm0, %v1329_v2 }
 0x657   : > { %v2566_v10 = vpop.f32.mrb[6].mxu1 }
 0x658   : > { %v1155_v11 = vpop.f32.mrb[7].mxu1 }
 0x659   : > { %2575 = vmatprep.mubr.msk.f32.mxu0 %vm755_vm0, %v1155_v11 }
 0x65a   : > { %2576 = vmatmul.mubr.msk.f32.vlgmr.msra.gmra.mrb[6].mxu0 %vm755_vm0, %v2566_v10 }
 0x65b   : > { %2738 = vmatpush3.bf16.msra.mxu0 %v2735_v6  ;;  %2586 = vmatprep.mubr.msk.f32.mxu0 %vm755_vm0, %v3443_v14 }
 0x65c   : > { %2740 = vmatprep.subr.bf16.mxu0 %v2739_v12 }
 0x65f   : > { %v2595_v15 = vpop.f32.mrb[8].mxu1  ;;  %2742 = vmatpush3.bf16.msra.mxu0 %v2739_v12 }
 0x660   : > { %v1418_v16 = vmul.f32 0.17677669, %v2595_v15  ;;  %v1408_v17 = vpop.f32.mrb[9].mxu1  ;;  %2756 = vmatprep.subr.bf16.mxu0 %v2755_v43 }
 0x661   : > { %v1417_v18 = vmul.f32 0.17677669, %v1408_v17 }
 0x662   : > { %2587 = vmatmul.mubr.msk.f32.vlgmr.msra.gmra.mrb[6].mxu0 %vm755_vm0, %v3441_v13  ;;  %v1420_v19 = vsel %vm846_vm4, -10000.0, %v1418_v16 }
 0x663   : > { %v1424_v21 = vsel %vm853_vm5, %v1420_v19, -inf  ;;  %v1419_v22 = vsel %vm845_vm2, -10000.0, %v1417_v18  ;;  %2758 = vmatpush3.bf16.msra.mxu0 %v2755_v43 }
 0x664   : > { %1425 = vmax.xlane.f32.xlu0 %v1424_v21  ;;  %v1421_v14 = vsel %vm849_vm3, %v1419_v22, -inf  ;;  %2760 = vmatprep.subr.bf16.mxu0 %v2759_v45 }
 0x665   : > { %1422 = vmax.xlane.f32.xlu1 %v1421_v14  ;;  %v751_v14 = vld [vmem:[#allocation2 + $0x60] sm:$0xff] }
 0x667   : > { %2762 = vmatpush3.bf16.msra.mxu0 %v2759_v45 }
 0x676   : > { %2905 = vrot.lane.b32.xlu1 %v3451_v25, %s3038_s15 }
 0x67a   : > { %1614 = vrot.lane.b32.xlu1 %v3356_v9, %s3039_s19 }
 0x67e   : > { %1616 = vrot.lane.b32.xlu1 %v3395_v30, %s3039_s19 }
 0x6f1   : > { %v1426_v13 = vpop.xlane.xlu0 %1425 }
 0x6f2   : > { %v1428_v23 = vsub.f32 %v1420_v19, %v1426_v13  ;;  %v1423_v27 = vpop.xlane.xlu1 %1422  ;;  %v752_v13 = vld [vmem:[#allocation2 + $0x68] sm:$0xff] }
 0x6f3   : > { %v1427_v28 = vsub.f32 %v1419_v22, %v1423_v27  ;;  %v2775_v27 = vpack.c.bf16 %v752_v13, %v751_v14  ;;  %v1977_v13 = vld [vmem:[%s3683_s8 + $0xa8] sm:$0xff] }
 0x6f4   : > { %v1431_v29 = vmul.f32 1.442695, %v1428_v23  ;;  %v753_v23 = vld [vmem:[#allocation2 + $0x70] sm:$0xff] }
 0x6f5   : > { %v1429_v32 = vmul.f32 1.442695, %v1427_v28  ;;  %v754_v28 = vld [vmem:[#allocation2 + $0x78] sm:$0xff]  ;;  %2776 = vmatprep.subr.bf16.mxu0 %v2775_v27 }
 0x6f6   : > { %2935 = vpow2.f32 %v1431_v29  ;;  %v2906_v34 = vpop.permute.xlu1 %2905  ;;  %v2779_v29 = vpack.c.bf16 %v754_v28, %v753_v23  ;;  %v1979_v23 = vld [vmem:[%s3683_s8 + $0xb8] sm:$0xff]  ;;  %v1976_v28 = vld [vmem:[%s3683_s8 + $0xa0] sm:$0xff] }
 0x6f7   : > { %v2908_v35 = vunpack.i.h.bf16 %v2906_v34  ;;  %v2907_v36 = vunpack.i.l.bf16 %v2906_v34  ;;  %2937 = vpow2.f32 %v1429_v32 }
 0x6f9   : > { %v2749_v37 = vpack.c.bf16 %v2908_v35, %v2907_v36 }
 0x6fa   : > { %v1615_v58 = vpop.permute.xlu1 %1614 }
 0x6fb   : > { %2751 = vmatprep.subr.msk.bf16.mxu1 %vm3419_vm8, %v2749_v37 }
 0x6fc   : > { %2754 = vmatpush3.bf16.msk.msra.mxu1 %vm3419_vm8, %v2749_v37 }
 0x6fe   : > { %v1617_v59 = vpop.permute.xlu1 %1616 }
 0x700   : > { %v2936_v9 = vpop.eup %2935 }
 0x701   : > { %v1436_v30 = vsel %vm853_vm5, %v2936_v9, 0.0  ;;  %v2938_v38 = vpop.eup %2937 }
 0x702   : > { %1437 = vadd.xlane.f32.xlu0 %v1436_v30  ;;  %v1433_v39 = vsel %vm849_vm3, %v2938_v38, 0.0 }
 0x706   : > { %1434 = vadd.xlane.f32.xlu0 %v1433_v39 }
 0x71c   : > { %2910 = vrot.lane.b32.xlu0 %v3383_v24, %s3039_s19 }
 0x78f   : > { %v1438_v46 = vpop.xlane.xlu0 %1437 }
 0x790   : > { %2939 = vrcp.f32 %v1438_v46  ;;  %v1957_v46 = vld [vmem:[%s3683_s8 + $0x8] sm:$0xff] }
 0x793   : > { %v1435_v47 = vpop.xlane.xlu0 %1434 }
 0x794   : > { %2941 = vrcp.f32 %v1435_v47  ;;  %v1959_v47 = vld [vmem:[%s3683_s8 + $0x18] sm:$0xff] }
 0x797   : > { %v2911_v49 = vpop.permute.xlu0 %2910 }
 0x798   : > { %v2913_v51 = vunpack.i.h.bf16 %v2911_v49  ;;  %v2912_v53 = vunpack.i.l.bf16 %v2911_v49  ;;  %v1956_v49 = vld [vmem:[%s3683_s8] sm:$0xff] }
 0x79a   : > { %v2763_v54 = vpack.c.bf16 %v2913_v51, %v2912_v53  ;;  %v2940_v24 = vpop.eup %2939  ;;  %v2783_v51 = vpack.c.bf16 %v1959_v47, %v1957_v46  ;;  %v1963_v53 = vld [vmem:[%s3683_s8 + $0x38] sm:$0xff]  ;;  %v1990_v47 = vld [vmem:[#allocation4 + $0x8] sm:$0xff] }
 0x79b   : > { %v1442_v57 = vmul.f32 %v2940_v24, %v2936_v9 }
 0x79c   : > { %2765 = vmatprep.subr.msk.bf16.mxu1 %vm3373_vm1, %v2763_v54 }
 0x79e   : > { %v2942_v55 = vpop.eup %2941 }
 0x79f   : > { %v1441_v56 = vmul.f32 %v2942_v55, %v2938_v38  ;;  %v2381_v38 = vld [vmem:[%s3680_s5] ss:$0 sm:$0xff] }
 0x7a0   : > { %v1960_v55 = vld [vmem:[%s3683_s8 + $0x20] sm:$0xff] }
 0x7a1   : > { %2600 = vmatprep.mubr.msk.f32.mxu1 %vm849_vm3, %v1441_v56  ;;  %v1962_v56 = vld [vmem:[%s3683_s8 + $0x30] sm:$0xff] }
 0x7a2   : > { %2601 = vmatmul.mubr.msk.f32.vlgmr.msra.gmra.mrb[10].mxu1 %vm849_vm3, %v1442_v57  ;;  %v1965_v57 = vld [vmem:[%s3683_s8 + $0x48] sm:$0xff] }
 0x7a3   : > { %2768 = vmatpush3.bf16.xpose.msk.msra.mxu1 %vm3373_vm1, %v2763_v54  ;;  %2618 = vmatprep.mubr.msk.f32.mxu1 %vm755_vm0, %v1615_v58  ;;  %v1967_v58 = vld [vmem:[%s3683_s8 + $0x58] sm:$0xff] }
 0x7aa   : > { %2619 = vmatmul.mubr.msk.f32.vlgmr.msra.gmra.mrb[12].mxu1 %vm755_vm0, %v1617_v59  ;;  %v2789_v59 = vpack.c.bf16 %v1962_v56, %v1960_v55  ;;  %v2010_v55 = vld [vmem:[#allocation4 + $0xa8] sm:$0xff] }
 0x875   : > { %v2602_v60 = vpop.f32.mrb[10].mxu1 }
 0x876   : > { %v1522_v62 = vpop.f32.mrb[11].mxu1 }
 0x877   : > { %2611 = vmatprep.mubr.msk.f32.mxu0 %vm755_vm0, %v1522_v62  ;;  %v1964_v62 = vld [vmem:[%s3683_s8 + $0x40] sm:$0xff] }
 0x878   : > { %2612 = vmatmul.mubr.msk.f32.vlgmr.msra.gmra.mrb[6].mxu0 %vm755_vm0, %v2602_v60  ;;  %v2791_v60 = vpack.c.bf16 %v1967_v58, %v1965_v57  ;;  %v1993_v58 = vld [vmem:[#allocation4 + $0x20] sm:$0xff] }
 0x879   : > { %2778 = vmatpush3.bf16.msra.mxu0 %v2775_v27  ;;  %v2803_v27 = vpack.c.bf16 %v1979_v23, %v1977_v13 }
 0x87a   : > { %2780 = vmatprep.subr.bf16.mxu0 %v2779_v29 }
 0x87d   : > { %v2620_v63 = vpop.f32.mrb[12].mxu1  ;;  %2782 = vmatpush3.bf16.msra.mxu0 %v2779_v29  ;;  %v1978_v29 = vld [vmem:[%s3683_s8 + $0xb0] sm:$0xff] }
 0x87e   : > { %v1706_v1 = vmul.f32 0.17677669, %v2620_v63  ;;  %v1696_v2 = vpop.f32.mrb[13].mxu1  ;;  %v1966_v63 = vld [vmem:[%s3683_s8 + $0x50] sm:$0xff] }
 0x87f   : > { %v1705_v3 = vmul.f32 0.17677669, %v1696_v2 }
 0x880   : > { %v1708_v5 = vsel %vm846_vm4, -10000.0, %v1706_v1  ;;  %v2793_v1 = vpack.c.bf16 %v1966_v63, %v1964_v62  ;;  %v2012_v62 = vld [vmem:[#allocation4 + $0xb8] sm:$0xff] }
 0x881   : > { %v1712_v20 = vsel %vm853_vm5, %v1708_v5, -inf  ;;  %v1707_v6 = vsel %vm845_vm2, -10000.0, %v1705_v3 }
 0x882   : > { %1713 = vmax.xlane.f32.xlu0 %v1712_v20  ;;  %v1709_v7 = vsel %vm849_vm3, %v1707_v6, -inf }
 0x883   : > { %1710 = vmax.xlane.f32.xlu1 %v1709_v7 }
 0x894   : > { %2915 = vrot.lane.b32.xlu1 %v3451_v25, %s3039_s19 }
 0x90f   : > { %v1714_v8 = vpop.xlane.xlu0 %1713 }
 0x910   : > { %v1716_v10 = vsub.f32 %v1708_v5, %v1714_v8  ;;  %v1711_v11 = vpop.xlane.xlu1 %1710 }
 0x911   : > { %v1715_v12 = vsub.f32 %v1707_v6, %v1711_v11 }
 0x912   : > { %v1719_v15 = vmul.f32 1.442695, %v1716_v10 }
 0x913   : > { %v1717_v16 = vmul.f32 1.442695, %v1715_v12  ;;  %v1969_v12 = vld [vmem:[%s3683_s8 + $0x68] sm:$0xff] }
 0x914   : > { %v2916_v33 = vpop.permute.xlu1 %2915 }
 0x915   : > { %2943 = vpow2.f32 %v1717_v16  ;;  %v2918_v17 = vunpack.i.h.bf16 %v2916_v33  ;;  %v2917_v18 = vunpack.i.l.bf16 %v2916_v33  ;;  %v1968_v33 = vld [vmem:[%s3683_s8 + $0x60] sm:$0xff] }
 0x916   : > { %2945 = vpow2.f32 %v1719_v15  ;;  %v1971_v15 = vld [vmem:[%s3683_s8 + $0x78] sm:$0xff] }
 0x917   : > { %v2769_v31 = vpack.c.bf16 %v2918_v17, %v2917_v18  ;;  %v2795_v16 = vpack.c.bf16 %v1971_v15, %v1969_v12  ;;  %v1970_v17 = vld [vmem:[%s3683_s8 + $0x70] sm:$0xff]  ;;  %v1998_v12 = vld [vmem:[#allocation4 + $0x48] sm:$0xff] }
 0x918   : > { %v2797_v18 = vpack.c.bf16 %v1970_v17, %v1968_v33  ;;  %v2015_v15 = vld [vmem:[#allocation4 + $0xd0] sm:$0xff] }
 0x919   : > { %2771 = vmatprep.subr.msk.bf16.mxu1 %vm3419_vm8, %v2769_v31 }
 0x91a   : > { %2774 = vmatpush3.bf16.msk.msra.mxu1 %vm3419_vm8, %v2769_v31  ;;  %v1973_v31 = vld [vmem:[%s3683_s8 + $0x88] sm:$0xff] }
 0x91b   : > { %2784 = vmatprep.subr.bf16.mxu1 %v2783_v51  ;;  %v2008_v51 = vld [vmem:[#allocation4 + $0x98] sm:$0xff] }
 0x91f   : > { %v2944_v19 = vpop.eup %2943 }
 0x920   : > { %v1721_v25 = vsel %vm849_vm3, %v2944_v19, 0.0  ;;  %v2946_v21 = vpop.eup %2945 }
 0x921   : > { %1722 = vadd.xlane.f32.xlu0 %v1721_v25  ;;  %v1724_v22 = vsel %vm853_vm5, %v2946_v21, 0.0 }
 0x925   : > { %1725 = vadd.xlane.f32.xlu0 %v1724_v22  ;;  %v1974_v22 = vld [vmem:[%s3683_s8 + $0x90] sm:$0xff] }
 0x9ae   : > { %v1723_v48 = vpop.xlane.xlu0 %1722 }
 0x9af   : > { %2947 = vrcp.f32 %v1723_v48  ;;  %v2805_v48 = vpack.c.bf16 %v1978_v29, %v1976_v28 }
 0x9b2   : > { %v1726_v32 = vpop.xlane.xlu0 %1725 }
 0x9b3   : > { %2949 = vrcp.f32 %v1726_v32  ;;  %v1981_v32 = vld [vmem:[%s3683_s8 + $0xc8] sm:$0xff] }
 0x9b9   : > { %v2948_v34 = vpop.eup %2947 }
 0x9ba   : > { %v1729_v35 = vmul.f32 %v2948_v34, %v2944_v19  ;;  %v1975_v19 = vld [vmem:[%s3683_s8 + $0x98] sm:$0xff] }
 0x9bb   : > { %v2799_v25 = vpack.c.bf16 %v1975_v19, %v1973_v31  ;;  %v1983_v34 = vld [vmem:[%s3683_s8 + $0xd8] sm:$0xff]  ;;  %v2017_v19 = vld [vmem:[#allocation4 + $0xe0] sm:$0xff] }
 0x9bc   : > { %2625 = vmatprep.mubr.msk.f32.mxu1 %vm849_vm3, %v1729_v35  ;;  %v1980_v35 = vld [vmem:[%s3683_s8 + $0xc0] sm:$0xff]  ;;  %v2000_v31 = vld [vmem:[#allocation4 + $0x58] sm:$0xff] }
 0x9bd   : > { %v2950_v36 = vpop.eup %2949 }
 0x9be   : > { %v1730_v37 = vmul.f32 %v2950_v36, %v2946_v21  ;;  %v1972_v21 = vld [vmem:[%s3683_s8 + $0x80] sm:$0xff]  ;;  %v2807_v36 = vpack.c.bf16 %v1983_v34, %v1981_v32 }
 0x9bf   : > { %v2801_v14 = vpack.c.bf16 %v1974_v22, %v1972_v21  ;;  %v2382_v32 = vld [vmem:[%s3681_s6] ss:$0 sm:$0xff] }
 0x9c0   : > { %2626 = vmatmul.mubr.msk.f32.vlgmr.msra.gmra.mrb[14].mxu1 %vm849_vm3, %v1730_v37  ;;  %v1982_v37 = vld [vmem:[%s3683_s8 + $0xd0] sm:$0xff] }
 0x9c1   : > { %2097 = vmatprep.mubr.f32.mxu1 %v3035_v0 }
 0xa93   : > { %v2627_v9 = vpop.f32.mrb[14].mxu1 }
 0xa94   : > { %v1810_v30 = vpop.f32.mrb[15].mxu1 }
 0xa95   : > { %2636 = vmatprep.mubr.msk.f32.mxu0 %vm755_vm0, %v1810_v30  ;;  %v1987_v30 = vld [vmem:[%s3683_s8 + $0xf8] sm:$0xff] }
 0xa96   : > { %2637 = vmatmul.mubr.msk.f32.vlgmr.msra.gmra.mrb[6].mxu0 %vm755_vm0, %v2627_v9  ;;  %v1985_v9 = vld [vmem:[%s3683_s8 + $0xe8] sm:$0xff] }
 0xb69   : > { %v2638_v39 = vpop.f32.mrb[6].mxu0 }
 0xb6a   : > { %v1910_v40 = vadd.f32 %v2638_v39, %v2381_v38  ;;  %v1891_v41 = vpop.f32.mrb[7].mxu0  ;;  %v2811_v39 = vpack.c.bf16 %v1987_v30, %v1985_v9 }
 0xb6b   : > { %v1909_v42 = vadd.f32 %v2381_v38, %v1891_v41  ;;  %v2809_v38 = vpack.c.bf16 %v1982_v37, %v1980_v35  ;;  %v1986_v41 = vld [vmem:[%s3683_s8 + $0xf0] sm:$0xff]  ;;  %v2383_v35 = vld [vmem:[%s3682_s7] ss:$0 sm:$0xff] }
 0xb6c   : > { %v1912_v44 = vadd.f32 %v1910_v40, %v3311_v50  ;;  %v1961_v50 = vld [vmem:[%s3683_s8 + $0x28] sm:$0xff]  ;;  %v1984_v40 = vld [vmem:[%s3683_s8 + $0xe0] sm:$0xff] }
 0xb6d   : > { %v1911_v43 = vadd.f32 %v1909_v42, %v3263_v26  ;;  %v1958_v26 = vld [vmem:[%s3683_s8 + $0x10] sm:$0xff]  ;;  %v2787_v24 = vpack.c.bf16 %v1963_v53, %v1961_v50  ;;  %v2813_v42 = vpack.c.bf16 %v1986_v41, %v1984_v40  ;;  %v2001_v40 = vld [vmem:[#allocation4 + $0x60] sm:$0xff]  ;;  %v2002_v41 = vld [vmem:[#allocation4 + $0x68] sm:$0xff] }
 0xb6e   : > { %v1917_v45 = vsel %vm879_vm6, %v1912_v44, 0.0  ;;  %v2785_v54 = vpack.c.bf16 %v1958_v26, %v1956_v49  ;;  %v2007_v49 = vld [vmem:[#allocation4 + $0x90] sm:$0xff] }
 0xb6f   : > { %1915 = vadd.xlane.f32.xlu0 %v1911_v43  ;;  %v2819_v50 = vpack.c.bf16 %v2008_v51, %v2007_v49  ;;  %v1991_v53 = vld [vmem:[#allocation4 + $0x10] sm:$0xff] }
 0xb70   : > { %2786 = vmatpush1.bf16.msra.mxu1 %v2785_v54  ;;  %v1992_v54 = vld [vmem:[#allocation4 + $0x18] sm:$0xff] }
 0xb71   : > { %2788 = vmatprep.subr.bf16.mxu1 %v2787_v24  ;;  %v2009_v24 = vld [vmem:[#allocation4 + $0xa0] sm:$0xff]  ;;  %v2821_v56 = vpack.c.bf16 %v1992_v54, %v1991_v53 }
 0xb72   : > { %v2823_v57 = vpack.c.bf16 %v2010_v55, %v2009_v24 }
 0xb73   : > { %1918 = vadd.xlane.f32.xlu0 %v1917_v45  ;;  %v1989_v45 = vld [vmem:[#allocation4] sm:$0xff] }
 0xb74   : > { %2790 = vmatpush1.bf16.msra.mxu1 %v2789_v59  ;;  %v2817_v26 = vpack.c.bf16 %v1990_v47, %v1989_v45  ;;  %v1994_v59 = vld [vmem:[#allocation4 + $0x28] sm:$0xff]  ;;  %v2003_v45 = vld [vmem:[#allocation4 + $0x70] sm:$0xff] }
 0xb75   : > { %2792 = vmatprep.subr.bf16.mxu1 %v2791_v60  ;;  %v2011_v60 = vld [vmem:[#allocation4 + $0xb0] sm:$0xff]  ;;  %v2825_v63 = vpack.c.bf16 %v1994_v59, %v1993_v58 }
 0xb78   : > { %2794 = vmatpush1.bf16.msra.mxu1 %v2793_v1  ;;  %v2827_v1 = vpack.c.bf16 %v2012_v62, %v2011_v60 }
 0xb79   : > { %2796 = vmatprep.subr.bf16.mxu1 %v2795_v16  ;;  %v2016_v16 = vld [vmem:[#allocation4 + $0xd8] sm:$0xff] }
 0xb7a   : > { %v2835_v17 = vpack.c.bf16 %v2016_v16, %v2015_v15 }
 0xb7c   : > { %2798 = vmatpush1.bf16.msra.mxu1 %v2797_v18  ;;  %v1999_v18 = vld [vmem:[#allocation4 + $0x50] sm:$0xff] }
 0xb7d   : > { %2800 = vmatprep.subr.bf16.mxu1 %v2799_v25  ;;  %v2018_v25 = vld [vmem:[#allocation4 + $0xe8] sm:$0xff]  ;;  %v2837_v21 = vpack.c.bf16 %v2000_v31, %v1999_v18 }
 0xb7e   : > { %v2839_v22 = vpack.c.bf16 %v2018_v25, %v2017_v19 }
 0xb80   : > { %2802 = vmatpush1.bf16.msra.mxu1 %v2801_v14 }
 0xb81   : > { %2804 = vmatprep.subr.bf16.mxu1 %v2803_v27 }
 0xb84   : > { %2806 = vmatpush1.bf16.msra.mxu1 %v2805_v48 }
 0xb85   : > { %2808 = vmatprep.subr.bf16.mxu1 %v2807_v36 }
 0xb88   : > { %2810 = vmatpush1.bf16.msra.mxu1 %v2809_v38 }
 0xb89   : > { %2812 = vmatprep.subr.bf16.mxu1 %v2811_v39 }
 0xb8c   : > { %2814 = vmatpush1.bf16.msra.mxu1 %v2813_v42  ;;  %v2841_v42 = vpack.c.bf16 %v2002_v41, %v2001_v40 }
 0xbfc   : > { %v1916_v2 = vpop.xlane.xlu0 %1915 }
 0xbfd   : > { %v1921_v3 = vmul.f32 0.0078125, %v1916_v2  ;;  %v1995_v2 = vld [vmem:[#allocation4 + $0x30] sm:$0xff] }
 0xbff   : > { %v3572_v5 = vsub.f32 %v1911_v43, %v1921_v3  ;;  %v2005_v43 = vld [vmem:[#allocation4 + $0x80] sm:$0xff]  ;;  %v1996_v3 = vld [vmem:[#allocation4 + $0x38] sm:$0xff] }
 0xc00   : > { %v1919_v20 = vpop.xlane.xlu0 %1918 }
 0xc01   : > { %v1922_v6 = vmul.f32 0.0078125, %v1919_v20  ;;  %v1925_v7 = vmul.f32 %v3572_v5, %v3572_v5  ;;  %v2013_v20 = vld [vmem:[#allocation4 + $0xc0] sm:$0xff] }
 0xc03   : > { %v3576_v8 = vsub.f32 %v1912_v44, %v1922_v6  ;;  %1927 = vadd.xlane.f32.xlu0 %v1925_v7  ;;  %v2006_v44 = vld [vmem:[#allocation4 + $0x88] sm:$0xff]  ;;  %v2829_v7 = vpack.c.bf16 %v1996_v3, %v1995_v2 }
 0xc04   : > { %v2815_v46 = vpack.c.bf16 %v2006_v44, %v2005_v43  ;;  %v2014_v6 = vld [vmem:[#allocation4 + $0xc8] sm:$0xff]  ;;  %v2020_v43 = vld [vmem:[#allocation4 + $0xf8] sm:$0xff] }
 0xc05   : > { %v1926_v10 = vmul.f32 %v3576_v8, %v3576_v8 }
 0xc06   : > { %2816 = vmatprep.subr.bf16.mxu0 %v2815_v46  ;;  %v2004_v46 = vld [vmem:[#allocation4 + $0x78] sm:$0xff] }
 0xc07   : > { %v1929_v11 = vsel %vm879_vm6, %v1926_v10, 0.0  ;;  %2818 = vmatpush3.bf16.msra.mxu0 %v2817_v26  ;;  %v2831_v10 = vpack.c.bf16 %v2014_v6, %v2013_v20  ;;  %v2845_v47 = vpack.c.bf16 %v2004_v46, %v2003_v45 }
 0xc08   : > { %1930 = vadd.xlane.f32.xlu0 %v1929_v11  ;;  %2820 = vmatprep.subr.bf16.mxu0 %v2819_v50  ;;  %v1997_v11 = vld [vmem:[#allocation4 + $0x40] sm:$0xff] }
 0xc09   : > { %v2833_v33 = vpack.c.bf16 %v1998_v12, %v1997_v11 }
 0xc0b   : > { %2822 = vmatpush3.bf16.msra.mxu0 %v2821_v56 }
 0xc0c   : > { %2824 = vmatprep.subr.bf16.mxu0 %v2823_v57 }
 0xc0f   : > { %2826 = vmatpush3.bf16.msra.mxu0 %v2825_v63 }
 0xc10   : > { %2828 = vmatprep.subr.bf16.mxu0 %v2827_v1 }
 0xc13   : > { %2830 = vmatpush3.bf16.msra.mxu0 %v2829_v7 }
 0xc14   : > { %2832 = vmatprep.subr.bf16.mxu0 %v2831_v10 }
 0xc17   : > { %2834 = vmatpush3.bf16.msra.mxu0 %v2833_v33 }
 0xc18   : > { %2836 = vmatprep.subr.bf16.mxu0 %v2835_v17 }
 0xc1b   : > { %2838 = vmatpush3.bf16.msra.mxu0 %v2837_v21 }
 0xc1c   : > { %2840 = vmatprep.subr.bf16.mxu0 %v2839_v22 }
 0xc1f   : > { %2842 = vmatpush3.bf16.msra.mxu0 %v2841_v42 }
 0xc90   : > { %v1928_v14 = vpop.xlane.xlu0 %1927 }
 0xc91   : > { %v1932_v13 = vmul.f32 0.0078125, %v1928_v14 }
 0xc93   : > { %v1934_v23 = vadd.f32 1e-12, %v1932_v13 }
 0xc95   : > { %2951 = vrsqrt.f32 %v1934_v23  ;;  %v1931_v27 = vpop.xlane.xlu0 %1930 }
 0xc96   : > { %v1933_v28 = vmul.f32 0.0078125, %v1931_v27 }
 0xc98   : > { %v1935_v29 = vadd.f32 1e-12, %v1933_v28  ;;  %v2385_v28 = vld [vmem:[%s3687_s12] ss:$0 sm:$0xff] }
 0xc9a   : > { %2953 = vrsqrt.f32 %v1935_v29 }
 0xc9f   : > { %v2952_v48 = vpop.eup %2951 }
 0xca0   : > { %v1938_v34 = vmul.f32 %v2952_v48, %v3572_v5  ;;  %v2019_v5 = vld [vmem:[#allocation4 + $0xf0] sm:$0xff]  ;;  %v2386_v48 = vld [vmem:[%s3688_s13] ss:$0 sm:$0xff] }
 0xca1   : > { %v2843_v44 = vpack.c.bf16 %v2020_v43, %v2019_v5 }
 0xca2   : > { %v1946_v36 = vmul.f32 %v2382_v32, %v1938_v34 }
 0xca3   : > { %2844 = vmatprep.subr.bf16.mxu0 %v2843_v44 }
 0xca4   : > { %v2954_v37 = vpop.eup %2953  ;;  %v1954_v9 = vadd.f32 %v2383_v35, %v1946_v36  ;;  %2846 = vmatpush3.bf16.msra.mxu0 %v2845_v47 }
 0xca5   : > { %v1939_v30 = vmul.f32 %v2954_v37, %v3576_v8  ;;  %v1988_v8 = vld [vmem:[%s3684_s9] sm:$0x3] }
 0xca6   : > { %2098 = vmatmul.mubr.f32.vlgmr.msra.gmra.mrb[16].mxu1 %v1954_v9  ;;  %v2030_v49 = vrot.slane %v1988_v8, %v578_v4 }
 0xca7   : > { %2103 = vmatprep.mubr.f32.mxu1 %v3035_v0  ;;  %v1947_v38 = vmul.f32 %v2382_v32, %v1939_v30  ;;  %v2026_v0 = vrot.slane %v1988_v8, %v574_v61 }
 0xca9   : > { %v1955_v39 = vadd.f32 %v2383_v35, %v1947_v38 }
 0xcab   : > { %2104 = vmatmul.mubr.f32.gmra.mrb[18].mxu1 %v1955_v39 }
 0xd79   : > { %v2099_v51 = vpop.f32.mrb[16].mxu1 }
 0xd7a   : > { %v2100_v26 = vadd.f32 %v2099_v51, %v2026_v0  ;;  %v2101_v50 = vpop.f32.mrb[17].mxu1 }
 0xd7b   : > { %v2102_v53 = vadd.f32 %v2101_v50, %v2030_v49 }
 0xd7c   : > { %v2110_v24 = vmax.f32 %v2100_v26, 0.0 }
 0xd7d   : > { %v2111_v54 = vmax.f32 %v2102_v53, 0.0 }
 0xd7e   : > { %v2105_v55 = vpop.f32.mrb[18].mxu1 }
 0xd7f   : > { %v2106_v56 = vadd.f32 %v2105_v55, %v2026_v0  ;;  %v2107_v57 = vpop.f32.mrb[19].mxu1  ;;  %2184 = vmatprep.mubr.f32.mxu0 %v2111_v54 }
 0xd80   : > { %v2108_v58 = vadd.f32 %v2107_v57, %v2030_v49  ;;  %2185 = vmatmul.mubr.f32.vlgmr.msra.gmra.mrb[8].mxu0 %v2110_v24 }
 0xd81   : > { %v2112_v60 = vmax.f32 %v2106_v56, 0.0 }
 0xd82   : > { %v2113_v59 = vmax.f32 %v2108_v58, 0.0 }
 0xd84   : > { %2189 = vmatprep.mubr.f32.mxu0 %v2113_v59 }
 0xd85   : > { %2190 = vmatmul.mubr.f32.gmra.mrb[10].mxu0 %v2112_v60 }
 0xe53   : > { %v2498_v61 = vpop.f32.mrb[8].mxu0 }
 0xe54   : > { %v2499_v4 = vpop.f32.mrb[9].mxu0 }
 0xe55   : > { %v2500_v62 = vadd.f32 %v2499_v4, %v2498_v61 }
 0xe57   : > { %v2187_v63 = vadd.f32 %v2500_v62, %v2384_v52 }
 0xe58   : > { %v2501_v1 = vpop.f32.mrb[10].mxu0 }
 0xe59   : > { %v2502_v2 = vpop.f32.mrb[11].mxu0  ;;  %v2195_v3 = vadd.f32 %v2187_v63, %v1954_v9 }
 0xe5a   : > { %v2503_v20 = vadd.f32 %v2502_v2, %v2501_v1 }
 0xe5b   : > { %2199 = vadd.xlane.f32.xlu0 %v2195_v3 }
 0xe5c   : > { %v2192_v6 = vadd.f32 %v2503_v20, %v2384_v52 }
 0xe5e   : > { %v2196_v7 = vadd.f32 %v2192_v6, %v1955_v39 }
 0xe60   : > { %v2201_v10 = vsel %vm879_vm6, %v2196_v7, 0.0 }
 0xe61   : > { %2202 = vadd.xlane.f32.xlu1 %v2201_v10 }
 0xee8   : > { %v2200_v11 = vpop.xlane.xlu0 %2199 }
 0xee9   : > { %v2204_v12 = vmul.f32 0.0078125, %v2200_v11 }
 0xeeb   : > { %v2206_v15 = vsub.f32 %v2195_v3, %v2204_v12 }
 0xeed   : > { %v2208_v16 = vmul.f32 %v2206_v15, %v2206_v15 }
 0xeee   : > { %v2203_v33 = vpop.xlane.xlu1 %2202 }
 0xeef   : > { %v2205_v17 = vmul.f32 0.0078125, %v2203_v33  ;;  %2210 = vadd.xlane.f32.xlu0 %v2208_v16 }
 0xef1   : > { %v2207_v18 = vsub.f32 %v2196_v7, %v2205_v17 }
 0xef3   : > { %v2209_v31 = vmul.f32 %v2207_v18, %v2207_v18 }
 0xef5   : > { %v2212_v19 = vsel %vm879_vm6, %v2209_v31, 0.0 }
 0xef6   : > { %2213 = vadd.xlane.f32.xlu0 %v2212_v19 }
 0xf7c   : > { %v2211_v25 = vpop.xlane.xlu0 %2210 }
 0xf7d   : > { %v2215_v21 = vmul.f32 0.0078125, %v2211_v25 }
 0xf7f   : > { %v2217_v22 = vadd.f32 1e-12, %v2215_v21 }
 0xf81   : > { %2955 = vrsqrt.f32 %v2217_v22 }
 0xf83   : > { %v2214_v14 = vpop.xlane.xlu0 %2213 }
 0xf84   : > { %v2216_v13 = vmul.f32 0.0078125, %v2214_v14 }
 0xf86   : > { %v2218_v23 = vadd.f32 1e-12, %v2216_v13 }
 0xf88   : > { %2957 = vrsqrt.f32 %v2218_v23 }
 0xf8b   : > { %v2956_v27 = vpop.eup %2955 }
 0xf8c   : > { %v2221_v29 = vmul.f32 %v2956_v27, %v2206_v15 }
 0xf8e   : > { %v2229_v32 = vmul.f32 %v2385_v28, %v2221_v29 }
 0xf90   : > { %v2237_v34 = vadd.f32 %v2386_v48, %v2229_v32 }
 0xf92   : > { %v2958_v35 = vpop.eup %2957  ;;  %2239 = vst [vmem:[%s517_s27] sm:$0xff] %v2237_v34 }
 0xf93   : > { %v2222_v36 = vmul.f32 %v2958_v35, %v2207_v18 }
 0xf95   : > { %v2230_v37 = vmul.f32 %v2385_v28, %v2222_v36 }
 0xf97   : > { %v2238_v9 = vadd.f32 %v2386_v48, %v2230_v37 }
 0xf99   : > { %2240 = vst [vmem:[%s517_s27 + $0x8] sm:$0x3] %v2238_v9 }
 0xf9a PF: > { %s3705_s28 = sld [smem:[#allocation8_spill]] }
 0xfa0   : > { %s26_s29 = sadd.s32 1, %s3705_s28  }
 0xfa1   : > { %p23_p9 = scmp.ge.s32.totalorder %s26_s29, 4  }
 0xfa3   :  { %25 = sbr.rel (!%p23_p9) target bundleno = 2 (0x2), region = 118 }
 0xfaa   :  { %2262 = vsyncpa [#allocation3], 1 }
 0xfab   :  { %2264 = vsyncpa [#allocation3 + $0x1], 1 }
 0xfac   :  { %2265 = vsyncpa [#allocation5], 1 }

// kernel: _lambda_.6
= control target key start
LH: loop header
LB: loop body
LE: loop exit
PB: predicated region body
PF: predicated region fallthrough
CT: control target
= control target key end

     0   :  { %s2968_s29 = smov 0   ;;  %s3596_s0 = inlined_call_operand.vmem [shape: f32[2,10,128], index: 0, kind: input, shape index: {}]   ;;  %s3597_s1 = inlined_call_operand.vmem [shape: f32[2,10,10], index: 1, kind: input, shape index: {}]   ;;  %s3598_s2 = inlined_call_operand.vmem [shape: f32[128,384], index: 2, kind: input, shape index: {}]   ;;  %s3599_s3 = inlined_call_operand.vmem [shape: f32[1,384], index: 3, kind: input, shape index: {}]   ;;  %s3600_s4 = inlined_call_operand.vmem [shape: f32[128,128], index: 4, kind: input, shape index: {}]   ;;  %s3601_s5 = inlined_call_operand.vmem [shape: f32[1,128], index: 5, kind: input, shape index: {}]   ;;  %s3602_s6 = inlined_call_operand.vmem [shape: f32[1,128], index: 6, kind: input, shape index: {}]   ;;  %s3603_s7 = inlined_call_operand.vmem [shape: f32[1,128], index: 7, kind: input, shape index: {}]   ;;  %s3604_s8 = inlined_call_operand.vmem [shape: f32[128,256], index: 8, kind: input, shape index: {}]   ;;  %s3605_s9 = inlined_call_operand.vmem [shape: f32[1,256], index: 9, kind: input, shape index: {}]   ;;  %s3606_s10 = inlined_call_operand.vmem [shape: f32[256,128], index: 10, kind: input, shape index: {}]   ;;  %s3607_s11 = inlined_call_operand.vmem [shape: f32[1,128], index: 11, kind: input, shape index: {}]   ;;  %s3608_s12 = inlined_call_operand.vmem [shape: f32[1,128], index: 12, kind: input, shape index: {}]   ;;  %s3609_s13 = inlined_call_operand.vmem [shape: f32[1,128], index: 13, kind: input, shape index: {}]   ;;  %s3610_s14 = inlined_call_operand.vmem [shape: f32[2,10,128], index: 14, kind: output, shape index: {}]  }
   0x1 LB: > { %s2278_s30 = sadd.s32 4294967295, %s2886_s29   ;;  %p2282_p0 = scmp.ge.s32.totalorder %s2886_s29, 1  ;;  %s2886_s29 = sphi %s2968_s29, %s24_s29  }
   0x2   : > { %p422_p1 = scmp.lt.s32.totalorder %s2886_s29, 3 }
   0x4   : > { %p423_p2 = pnand %p2282_p0, %p422_p1 }
   0x5   : > { %v493_v0 = vld [vmem:[%s3598_s2 + $0x8] sm:$0xff] (!%p423_p2)  ;;  %v496_v1 = vld [vmem:[%s3598_s2 + $0x20] sm:$0xff] (!%p423_p2)  ;;  %p473_p3 = scmp.lt.s32.totalorder (!%p423_p2), %s2278_s30, 1  ;;  %v495_v4 = vld [vmem:[%s3598_s2 + $0x18] sm:$0xff] (!%p423_p2)  ;;  %v2888_v7 = vmov (!%p423_p2), 0.0   ;;  %v542_v51 = vlaneseq (!%p423_p2)  ;;  %vm725_vm0 = vcmask (!%p423_p2), 261120  }
   0x6   : > { %426 = sbr.rel (%p423_p2) target bundleno = 3932 (0xf5c), region = 76  ;;  %v492_v2 = vld [vmem:[%s3598_s2] sm:$0xff] (!%p423_p2)  ;;  %v2583_v3 = vpack.c.bf16 (!%p423_p2), %v496_v1, %v493_v0  ;;  %v499_v5 = vld [vmem:[%s3598_s2 + $0x38] sm:$0xff] (!%p423_p2)  ;;  %v502_v6 = vld [vmem:[%s3598_s2 + $0x50] sm:$0xff] (!%p423_p2)  ;;  %621 = vmatprep.mubr.f32.mxu0 (!%p423_p2), %v2888_v7  ;;  %s2889_s23 = smov (!%p423_p2), 96   ;;  %vm819_vm3 = vcmask (!%p423_p2), 80896  }
   0x7   : > { %v2585_v8 = vpack.c.bf16 (!%p423_p2), %v495_v4, %v492_v2  ;;  %v2587_v9 = vpack.c.bf16 (!%p423_p2), %v502_v6, %v499_v5  ;;  %v498_v10 = vld [vmem:[%s3598_s2 + $0x30] sm:$0xff] (!%p423_p2)  ;;  %v501_v11 = vld [vmem:[%s3598_s2 + $0x48] sm:$0xff] (!%p423_p2)  ;;  %v508_v13 = vld [vmem:[%s3598_s2 + $0x80] sm:$0xff] (!%p423_p2)  ;;  %v3091_v52 = vshrl.u32 (!%p423_p2), %v542_v51, 7  ;;  %vm823_vm5 = vcmask (!%p423_p2), 74752   ;;  %s2891_s26 = smov (!%p423_p2), 64  }
   0x8   : > { %v505_v12 = vld [vmem:[%s3598_s2 + $0x68] sm:$0xff] (!%p423_p2)  ;;  %2584 = vmatprep.subr.bf16.mxu0 (!%p423_p2), %v2583_v3  ;;  %v2589_v14 = vpack.c.bf16 (!%p423_p2), %v501_v11, %v498_v10  ;;  %v504_v16 = vld [vmem:[%s3598_s2 + $0x60] sm:$0xff] (!%p423_p2)  ;;  %v507_v17 = vld [vmem:[%s3598_s2 + $0x78] sm:$0xff] (!%p423_p2)  ;;  %vm849_vm6 = vcmask (!%p423_p2), 1041408   ;;  %vm2890_vm7 = vmmov (!%p423_p2), 1   ;;  %s2892_s15 = smov (!%p423_p2), 32  }
   0x9   : > { %2586 = vmatpush1.bf16.msra.mxu0 (!%p423_p2), %v2585_v8  ;;  %v2591_v15 = vpack.c.bf16 (!%p423_p2), %v508_v13, %v505_v12  ;;  %v511_v18 = vld [vmem:[%s3598_s2 + $0x98] sm:$0xff] (!%p423_p2)  ;;  %v514_v19 = vld [vmem:[%s3598_s2 + $0xb0] sm:$0xff] (!%p423_p2)  ;;  %v2593_v20 = vpack.c.bf16 (!%p423_p2), %v507_v17, %v504_v16  ;;  %v513_v23 = vld [vmem:[%s3598_s2 + $0xa8] sm:$0xff] (!%p423_p2)  ;;  %v544_v61 = vsub.s32 (!%p423_p2), 0, %v3091_v52  ;;  %v548_v3 = vsub.s32 (!%p423_p2), 1, %v3091_v52 }
   0xa   : > { %2588 = vmatprep.subr.bf16.mxu0 (!%p423_p2), %v2587_v9  ;;  %v2595_v21 = vpack.c.bf16 (!%p423_p2), %v514_v19, %v511_v18  ;;  %v510_v22 = vld [vmem:[%s3598_s2 + $0x90] sm:$0xff] (!%p423_p2)  ;;  %v517_v24 = vld [vmem:[%s3598_s2 + $0xc8] sm:$0xff] (!%p423_p2)  ;;  %v520_v25 = vld [vmem:[%s3598_s2 + $0xe0] sm:$0xff] (!%p423_p2) }
   0xb   : > { %v2597_v27 = vpack.c.bf16 (!%p423_p2), %v513_v23, %v510_v22  ;;  %v2599_v28 = vpack.c.bf16 (!%p423_p2), %v520_v25, %v517_v24  ;;  %v516_v29 = vld [vmem:[%s3598_s2 + $0xc0] sm:$0xff] (!%p423_p2)  ;;  %v519_v30 = vld [vmem:[%s3598_s2 + $0xd8] sm:$0xff] (!%p423_p2)  ;;  %v526_v32 = vld [vmem:[%s3598_s2 + $0x110] sm:$0xff] (!%p423_p2) }
   0xc   : > { %v523_v31 = vld [vmem:[%s3598_s2 + $0xf8] sm:$0xff] (!%p423_p2)  ;;  %v2601_v33 = vpack.c.bf16 (!%p423_p2), %v519_v30, %v516_v29  ;;  %v522_v35 = vld [vmem:[%s3598_s2 + $0xf0] sm:$0xff] (!%p423_p2)  ;;  %v525_v36 = vld [vmem:[%s3598_s2 + $0x108] sm:$0xff] (!%p423_p2) }
   0xd   : > { %s3616_s30 = smov (!%p473_p3, %s2278_s30), 1  ;;  %2590 = vmatpush1.bf16.msra.mxu0 %v2589_v14  ;;  %v2603_v34 = vpack.c.bf16 %v526_v32, %v523_v31  ;;  %v529_v37 = vld [vmem:[%s3598_s2 + $0x128] sm:$0xff]  ;;  %v532_v38 = vld [vmem:[%s3598_s2 + $0x140] sm:$0xff]  ;;  %v2605_v39 = vpack.c.bf16 %v525_v36, %v522_v35  ;;  %v531_v42 = vld [vmem:[%s3598_s2 + $0x138] sm:$0xff] }
   0xe   : > { %s3007_s21 = sshll.u32 %s3616_s30, 4  ;;  %2592 = vmatprep.subr.bf16.mxu0 %v2591_v15  ;;  %v2607_v40 = vpack.c.bf16 %v532_v38, %v529_v37  ;;  %v528_v41 = vld [vmem:[%s3598_s2 + $0x120] sm:$0xff]  ;;  %v535_v43 = vld [vmem:[%s3598_s2 + $0x158] sm:$0xff]  ;;  %v538_v44 = vld [vmem:[%s3598_s2 + $0x170] sm:$0xff] }
   0xf   : > { %s3025_s17 = scalar_lea.vmem %s3596_s0, %s3007_s21  ;;  %v2609_v45 = vpack.c.bf16 %v531_v42, %v528_v41  ;;  %v2611_v46 = vpack.c.bf16 %v538_v44, %v535_v43  ;;  %v534_v47 = vld [vmem:[%s3598_s2 + $0x150] sm:$0xff]  ;;  %v537_v48 = vld [vmem:[%s3598_s2 + $0x168] sm:$0xff]  ;;  %v500_v55 = vld [vmem:[%s3598_s2 + $0x40] sm:$0xff]  ;;  %s482_s25 = scalar_lea.vmem %s3597_s1, %s3007_s21  ;;  %v552_v41 = vsub.s32 2, %v3091_v52 }
  0x10   : > { %v3040_v26 = vld [vmem:[%s3025_s17] sm:$0xff]  ;;  %v2613_v49 = vpack.c.bf16 %v537_v48, %v534_v47  ;;  %v3088_v50 = vld [vmem:[%s3025_s17 + $0x8] sm:$0x3]  ;;  %v494_v53 = vld [vmem:[%s3598_s2 + $0x10] sm:$0xff]  ;;  %s487_s17 = scalar_lea.vmem %s3610_s14, %s3007_s21 }
  0x11   : > { %2480 = vmatprep.mubr.f32.mxu1 %v3040_v26  ;;  %2594 = vmatpush1.bf16.msra.mxu0 %v2593_v20  ;;  %v497_v54 = vld [vmem:[%s3598_s2 + $0x28] sm:$0xff]  ;;  %v503_v57 = vld [vmem:[%s3598_s2 + $0x58] sm:$0xff]  ;;  %v506_v59 = vld [vmem:[%s3598_s2 + $0x70] sm:$0xff] }
  0x12   : > { %2596 = vmatprep.subr.bf16.mxu0 %v2595_v21  ;;  %v2615_v56 = vpack.c.bf16 %v497_v54, %v494_v53  ;;  %v2619_v58 = vpack.c.bf16 %v503_v57, %v500_v55  ;;  %v509_v60 = vld [vmem:[%s3598_s2 + $0x88] sm:$0xff]  ;;  %v3115_v62 = vld [vmem:[%s3599_s3] sm:$0x7]  ;;  %v515_v1 = vld [vmem:[%s3598_s2 + $0xb8] sm:$0xff] }
  0x13   : > { %v2623_v63 = vpack.c.bf16 %v509_v60, %v506_v59  ;;  %v512_v0 = vld [vmem:[%s3598_s2 + $0xa0] sm:$0xff]  ;;  %v545_v2 = vrot.slane %v3115_v62, %v544_v61  ;;  %v518_v5 = vld [vmem:[%s3598_s2 + $0xd0] sm:$0xff]  ;;  %v521_v6 = vld [vmem:[%s3598_s2 + $0xe8] sm:$0xff]  ;;  %v549_v11 = vrot.slane %v3115_v62, %v548_v3  ;;  %v553_v42 = vrot.slane %v3115_v62, %v552_v41 }
  0x14   : > { %2616 = vmatprep.subr.bf16.mxu1 %v2615_v56  ;;  %v2627_v4 = vpack.c.bf16 %v515_v1, %v512_v0  ;;  %v2631_v12 = vpack.c.bf16 %v521_v6, %v518_v5  ;;  %v524_v13 = vld [vmem:[%s3598_s2 + $0x100] sm:$0xff]  ;;  %v527_v14 = vld [vmem:[%s3598_s2 + $0x118] sm:$0xff]  ;;  %vm3150_vm1 = vmpackc.low %vm725_vm0, %vm725_vm0 }
  0x15   : > { %2598 = vmatpush1.bf16.msra.mxu0 %v2597_v27  ;;  %2618 = vmatpush3.bf16.msra.mxu1 %v2615_v56  ;;  %v2635_v19 = vpack.c.bf16 %v527_v14, %v524_v13  ;;  %v530_v21 = vld [vmem:[%s3598_s2 + $0x130] sm:$0xff]  ;;  %v533_v22 = vld [vmem:[%s3598_s2 + $0x148] sm:$0xff]  ;;  %v536_v27 = vld [vmem:[%s3598_s2 + $0x160] sm:$0xff] }
  0x16   : > { %2600 = vmatprep.subr.bf16.mxu0 %v2599_v28  ;;  %2620 = vmatprep.subr.bf16.mxu1 %v2619_v58  ;;  %v2639_v25 = vpack.c.bf16 %v533_v22, %v530_v21  ;;  %v539_v28 = vld [vmem:[%s3598_s2 + $0x178] sm:$0xff]  ;;  %v3181_v31 = vld [vmem:[%s482_s25] sm:$0xff]  ;;  %vm3196_vm8 = vmpackc.low %vm849_vm6, %vm2890_vm7 }
  0x17   : > { %v2643_v29 = vpack.c.bf16 %v539_v28, %v536_v27  ;;  %vm815_vm2 = vcmp.eq.f32.partialorder %v3181_v31, 0.0  ;;  %v723_v48 = vld [vmem:[%s3600_s4 + $0x70] sm:$0xff]  ;;  %v2328_v52 = vld [vmem:[%s3607_s11] ss:$0 sm:$0xff] }
  0x19   : > { %2602 = vmatpush1.bf16.msra.mxu0 %v2601_v33  ;;  %2622 = vmatpush3.bf16.msra.mxu1 %v2619_v58  ;;  %v3183_v33 = vld [vmem:[%s482_s25 + $0x8] sm:$0x3] }
  0x1a   : > { %2604 = vmatprep.subr.bf16.mxu0 %v2603_v34  ;;  %2624 = vmatprep.subr.bf16.mxu1 %v2623_v63  ;;  %vm816_vm4 = vcmp.eq.f32.partialorder %v3183_v33, 0.0 }
  0x1d   : > { %2606 = vmatpush1.bf16.msra.mxu0 %v2605_v39  ;;  %2626 = vmatpush3.bf16.msra.mxu1 %v2623_v63 }
  0x1e   : > { %2608 = vmatprep.subr.bf16.mxu0 %v2607_v40  ;;  %2628 = vmatprep.subr.bf16.mxu1 %v2627_v4 }
  0x21   : > { %2610 = vmatpush1.bf16.msra.mxu0 %v2609_v45  ;;  %2630 = vmatpush3.bf16.msra.mxu1 %v2627_v4 }
  0x22   : > { %2612 = vmatprep.subr.bf16.mxu0 %v2611_v46  ;;  %2632 = vmatprep.subr.bf16.mxu1 %v2631_v12 }
  0x25   : > { %2614 = vmatpush1.bf16.msra.mxu0 %v2613_v49  ;;  %2634 = vmatpush3.bf16.msra.mxu1 %v2631_v12 }
  0x26   : > { %2636 = vmatprep.subr.bf16.mxu1 %v2635_v19 }
  0x28   : > { %622 = vmatmul.mubr.f32.vlgmr.msra.gmra.mrb[0].mxu0 %v3040_v26 }
  0x29   : > { %627 = vmatprep.mubr.f32.mxu0 %v2888_v7  ;;  %2638 = vmatpush3.bf16.msra.mxu1 %v2635_v19 }
  0x2a   : > { %2640 = vmatprep.subr.bf16.mxu1 %v2639_v25 }
  0x2c   : > { %628 = vmatmul.mubr.f32.gmra.mrb[2].mxu0 %v3088_v50 }
  0x2d   : > { %2642 = vmatpush3.bf16.msra.mxu1 %v2639_v25 }
  0x2e   : > { %2644 = vmatprep.subr.bf16.mxu1 %v2643_v29 }
  0x31   : > { %2646 = vmatpush3.bf16.msra.mxu1 %v2643_v29 }
  0x34   : > { %2481 = vmatmul.mubr.f32.vlgmr.msra.gmra.mrb[0].mxu1 %v3088_v50 }
  0xfb   : > { %v623_v8 = vpop.f32.mrb[0].mxu0 }
  0xfc   : > { %v3133_v9 = vadd.f32 %v623_v8, %v545_v2  ;;  %v625_v10 = vpop.f32.mrb[1].mxu0 }
  0xfd   : > { %v626_v17 = vadd.f32 %v625_v10, %v549_v11 }
  0xfe   : > { %928 = vrot.lane.b32.xlu1 %v3133_v9, %s2889_s23  ;;  %2487 = vmatprep.mubr.msk.f32.mxu0 %vm725_vm0, %v3133_v9 }
  0xff   : > { %v629_v15 = vpop.f32.mrb[2].mxu0 }
 0x100   : > { %v631_v16 = vpop.f32.mrb[3].mxu0  ;;  %v3172_v30 = vadd.f32 %v629_v15, %v545_v2 }
 0x101   : > { %v632_v18 = vadd.f32 %v631_v16, %v549_v11 }
 0x103   : > { %v2647_v23 = vpack.c.bf16 %v632_v18, %v626_v17  ;;  %v3160_v24 = vpack.i.bf16 %v632_v18, %v626_v17 }
 0x105   : > { %2649 = vmatprep.subr.msk.bf16.mxu0 %vm3150_vm1, %v2647_v23 }
 0x106   : > { %2652 = vmatpush3.bf16.xpose.msk.msra.mxu0 %vm3150_vm1, %v2647_v23 }
 0x107   : > { %v2482_v43 = vpop.f32.mrb[0].mxu1 }
 0x108   : > { %v700_v44 = vpop.f32.mrb[1].mxu1  ;;  %v706_v45 = vadd.f32 %v2482_v43, %v553_v42 }
 0x109   : > { %v701_v46 = vadd.f32 %v700_v44, %v553_v42  ;;  %v713_v44 = vld [vmem:[%s3600_s4 + $0x20] sm:$0xff] }
 0x10b   : > { %v2653_v47 = vpack.c.bf16 %v706_v45, %v701_v46  ;;  %v3228_v25 = vpack.i.bf16 %v706_v45, %v701_v46  ;;  %v714_v45 = vld [vmem:[%s3600_s4 + $0x28] sm:$0xff]  ;;  %v715_v46 = vld [vmem:[%s3600_s4 + $0x30] sm:$0xff] }
 0x10d   : > { %2488 = vmatmul.mubr.msk.f32.vlgmr.msra.gmra.mrb[4].mxu0 %vm725_vm0, %v3172_v30  ;;  %2655 = vmatprep.subr.msk.bf16.mxu1 %vm3196_vm8, %v2653_v47 }
 0x10e   : > { %2658 = vmatpush3.bf16.msk.msra.mxu1 %vm3196_vm8, %v2653_v47  ;;  %v2671_v47 = vpack.c.bf16 %v714_v45, %v713_v44  ;;  %v720_v44 = vld [vmem:[%s3600_s4 + $0x58] sm:$0xff] }
 0x110   : > { %2672 = vmatprep.subr.bf16.mxu0 %v2671_v47 }
 0x111   : > { %2674 = vmatpush3.bf16.msra.mxu0 %v2671_v47 }
 0x170   : > { %v929_v2 = vpop.permute.xlu1 %928 }
 0x1e0   : > { %v2489_v32 = vpop.f32.mrb[4].mxu0 }
 0x1e1   : > { %v804_v34 = vpop.f32.mrb[5].mxu0  ;;  %v814_v35 = vmul.f32 0.17677669, %v2489_v32 }
 0x1e2   : > { %v813_v36 = vmul.f32 0.17677669, %v804_v34 }
 0x1e3   : > { %v818_v39 = vsel %vm816_vm4, -10000.0, %v814_v35 }
 0x1e4   : > { %v817_v37 = vsel %vm815_vm2, -10000.0, %v813_v36  ;;  %v824_v40 = vsel %vm823_vm5, %v818_v39, -inf }
 0x1e5   : > { %v820_v38 = vsel %vm819_vm3, %v817_v37, -inf }
 0x1e6   : > { %821 = vmax.xlane.f32.xlu0 %v820_v38 }
 0x1ea   : > { %825 = vmax.xlane.f32.xlu0 %v824_v40 }
 0x200   : > { %2811 = vrot.lane.b32.xlu0 %v3160_v24, %s2889_s23 }
 0x273   : > { %v822_v49 = vpop.xlane.xlu0 %821 }
 0x274   : > { %v827_v51 = vsub.f32 %v817_v37, %v822_v49  ;;  %v716_v49 = vld [vmem:[%s3600_s4 + $0x38] sm:$0xff] }
 0x276   : > { %v829_v55 = vmul.f32 1.442695, %v827_v51  ;;  %v2675_v51 = vpack.c.bf16 %v716_v49, %v715_v46 }
 0x277   : > { %v826_v53 = vpop.xlane.xlu0 %825 }
 0x278   : > { %v828_v54 = vsub.f32 %v818_v39, %v826_v53  ;;  %2676 = vmatprep.subr.bf16.mxu0 %v2675_v51 }
 0x279   : > { %2678 = vmatpush3.bf16.msra.mxu0 %v2675_v51 }
 0x27a   : > { %v831_v56 = vmul.f32 1.442695, %v828_v54 }
 0x27b   : > { %v2812_v57 = vpop.permute.xlu0 %2811 }
 0x27c   : > { %2840 = vpow2.f32 %v831_v56  ;;  %v2814_v58 = vunpack.i.h.bf16 %v2812_v57  ;;  %v2813_v59 = vunpack.i.l.bf16 %v2812_v57 }
 0x27d   : > { %2842 = vpow2.f32 %v829_v55 }
 0x27e   : > { %v2659_v60 = vpack.c.bf16 %v2814_v58, %v2813_v59 }
 0x280   : > { %2661 = vmatprep.subr.msk.bf16.mxu1 %vm3150_vm1, %v2659_v60 }
 0x286   : > { %v2841_v62 = vpop.eup %2840 }
 0x287   : > { %v836_v63 = vsel %vm823_vm5, %v2841_v62, 0.0  ;;  %v2843_v0 = vpop.eup %2842 }
 0x288   : > { %837 = vadd.xlane.f32.xlu1 %v836_v63  ;;  %v833_v1 = vsel %vm819_vm3, %v2843_v0, 0.0 }
 0x28c   : > { %834 = vadd.xlane.f32.xlu1 %v833_v1 }
 0x29d   : > { %930 = vrot.lane.b32.xlu1 %v3172_v30, %s2889_s23 }
 0x315   : > { %v838_v4 = vpop.xlane.xlu1 %837 }
 0x316   : > { %2844 = vrcp.f32 %v838_v4  ;;  %v710_v4 = vld [vmem:[%s3600_s4 + $0x8] sm:$0xff] }
 0x319   : > { %v835_v5 = vpop.xlane.xlu1 %834 }
 0x31a   : > { %2846 = vrcp.f32 %v835_v5 }
 0x31d   : > { %v931_v12 = vpop.permute.xlu1 %930 }
 0x320   : > { %v2845_v6 = vpop.eup %2844 }
 0x321   : > { %v842_v11 = vmul.f32 %v2845_v6, %v2841_v62  ;;  %v711_v6 = vld [vmem:[%s3600_s4 + $0x10] sm:$0xff] }
 0x324   : > { %v2847_v8 = vpop.eup %2846 }
 0x325   : > { %v841_v10 = vmul.f32 %v2847_v8, %v2843_v0  ;;  %v712_v8 = vld [vmem:[%s3600_s4 + $0x18] sm:$0xff] }
 0x327   : > { %2494 = vmatprep.mubr.msk.f32.mxu1 %vm819_vm3, %v841_v10 }
 0x328   : > { %2495 = vmatmul.mubr.msk.f32.vlgmr.msra.gmra.mrb[2].mxu1 %vm819_vm3, %v842_v11 }
 0x329   : > { %2664 = vmatpush3.bf16.xpose.msk.msra.mxu1 %vm3150_vm1, %v2659_v60  ;;  %2501 = vmatprep.mubr.msk.f32.mxu1 %vm725_vm0, %v929_v2  ;;  %v709_v2 = vld [vmem:[%s3600_s4] sm:$0xff] }
 0x32a   : > { %v2679_v5 = vpack.c.bf16 %v710_v4, %v709_v2 }
 0x32c   : > { %2680 = vmatprep.subr.bf16.mxu0 %v2679_v5 }
 0x330   : > { %2502 = vmatmul.mubr.msk.f32.vlgmr.msra.gmra.mrb[4].mxu1 %vm725_vm0, %v931_v12  ;;  %v2683_v12 = vpack.c.bf16 %v712_v8, %v711_v6 }
 0x3fb   : > { %v3218_v13 = vpop.f32.mrb[2].mxu1 }
 0x3fc   : > { %v3220_v14 = vpop.f32.mrb[3].mxu1 }
 0x403   : > { %v2503_v15 = vpop.f32.mrb[4].mxu1 }
 0x404   : > { %v1020_v16 = vmul.f32 0.17677669, %v2503_v15  ;;  %v1010_v17 = vpop.f32.mrb[5].mxu1 }
 0x405   : > { %v1019_v18 = vmul.f32 0.17677669, %v1010_v17 }
 0x406   : > { %v1022_v19 = vsel %vm816_vm4, -10000.0, %v1020_v16 }
 0x407   : > { %v1026_v21 = vsel %vm823_vm5, %v1022_v19, -inf  ;;  %v1021_v22 = vsel %vm815_vm2, -10000.0, %v1019_v18 }
 0x408   : > { %1027 = vmax.xlane.f32.xlu0 %v1026_v21  ;;  %v1023_v23 = vsel %vm819_vm3, %v1021_v22, -inf }
 0x409   : > { %1024 = vmax.xlane.f32.xlu1 %v1023_v23 }
 0x41a   : > { %2816 = vrot.lane.b32.xlu1 %v3228_v25, %s2889_s23 }
 0x41e   : > { %1296 = vrot.lane.b32.xlu1 %v3133_v9, %s2891_s26 }
 0x422   : > { %1298 = vrot.lane.b32.xlu1 %v3172_v30, %s2891_s26 }
 0x495   : > { %v1028_v27 = vpop.xlane.xlu0 %1027 }
 0x496   : > { %v1030_v28 = vsub.f32 %v1022_v19, %v1028_v27  ;;  %v1025_v29 = vpop.xlane.xlu1 %1024 }
 0x497   : > { %v1029_v32 = vsub.f32 %v1021_v22, %v1025_v29 }
 0x498   : > { %v1033_v34 = vmul.f32 1.442695, %v1030_v28 }
 0x499   : > { %v1031_v35 = vmul.f32 1.442695, %v1029_v32 }
 0x49a   : > { %2848 = vpow2.f32 %v1033_v34  ;;  %v2817_v36 = vpop.permute.xlu1 %2816 }
 0x49b   : > { %v2819_v37 = vunpack.i.h.bf16 %v2817_v36  ;;  %v2818_v38 = vunpack.i.l.bf16 %v2817_v36  ;;  %2850 = vpow2.f32 %v1031_v35 }
 0x49d   : > { %v2665_v39 = vpack.c.bf16 %v2819_v37, %v2818_v38 }
 0x49e   : > { %v1297_v0 = vpop.permute.xlu1 %1296 }
 0x49f   : > { %2667 = vmatprep.subr.msk.bf16.mxu1 %vm3196_vm8, %v2665_v39 }
 0x4a0   : > { %2670 = vmatpush3.bf16.msk.msra.mxu1 %vm3196_vm8, %v2665_v39 }
 0x4a2   : > { %v1299_v1 = vpop.permute.xlu1 %1298 }
 0x4a4   : > { %v2849_v40 = vpop.eup %2848 }
 0x4a5   : > { %v1038_v41 = vsel %vm823_vm5, %v2849_v40, 0.0  ;;  %v2851_v42 = vpop.eup %2850 }
 0x4a6   : > { %1039 = vadd.xlane.f32.xlu0 %v1038_v41  ;;  %v1035_v43 = vsel %vm819_vm3, %v2851_v42, 0.0  ;;  %v718_v41 = vld [vmem:[%s3600_s4 + $0x48] sm:$0xff] }
 0x4aa   : > { %1036 = vadd.xlane.f32.xlu0 %v1035_v43 }
 0x4c0   : > { %2821 = vrot.lane.b32.xlu0 %v3160_v24, %s2891_s26 }
 0x533   : > { %v1040_v53 = vpop.xlane.xlu0 %1039 }
 0x534   : > { %2852 = vrcp.f32 %v1040_v53 }
 0x537   : > { %v1037_v54 = vpop.xlane.xlu0 %1036 }
 0x538   : > { %2854 = vrcp.f32 %v1037_v54 }
 0x53b   : > { %v2822_v55 = vpop.permute.xlu0 %2821 }
 0x53c   : > { %v2824_v56 = vunpack.i.h.bf16 %v2822_v55  ;;  %v2823_v57 = vunpack.i.l.bf16 %v2822_v55 }
 0x53e   : > { %v2687_v58 = vpack.c.bf16 %v2824_v56, %v2823_v57  ;;  %v2853_v59 = vpop.eup %2852 }
 0x53f   : > { %v1044_v63 = vmul.f32 %v2853_v59, %v2849_v40  ;;  %v717_v40 = vld [vmem:[%s3600_s4 + $0x40] sm:$0xff] }
 0x540   : > { %2689 = vmatprep.subr.msk.bf16.mxu1 %vm3150_vm1, %v2687_v58  ;;  %v2699_v43 = vpack.c.bf16 %v718_v41, %v717_v40 }
 0x542   : > { %v2855_v60 = vpop.eup %2854 }
 0x543   : > { %v1043_v62 = vmul.f32 %v2855_v60, %v2851_v42  ;;  %v719_v42 = vld [vmem:[%s3600_s4 + $0x50] sm:$0xff] }
 0x544   : > { %v2703_v45 = vpack.c.bf16 %v720_v44, %v719_v42 }
 0x545   : > { %2508 = vmatprep.mubr.msk.f32.mxu1 %vm819_vm3, %v1043_v62 }
 0x546   : > { %2509 = vmatmul.mubr.msk.f32.vlgmr.msra.gmra.mrb[6].mxu1 %vm819_vm3, %v1044_v63 }
 0x547   : > { %2692 = vmatpush3.bf16.xpose.msk.msra.mxu1 %vm3150_vm1, %v2687_v58  ;;  %2537 = vmatprep.mubr.msk.f32.mxu1 %vm725_vm0, %v1297_v0 }
 0x54e   : > { %2538 = vmatmul.mubr.msk.f32.vlgmr.msra.gmra.mrb[8].mxu1 %vm725_vm0, %v1299_v1 }
 0x619   : > { %v2510_v10 = vpop.f32.mrb[6].mxu1 }
 0x61a   : > { %v1125_v11 = vpop.f32.mrb[7].mxu1 }
 0x61b   : > { %2519 = vmatprep.mubr.msk.f32.mxu0 %vm725_vm0, %v1125_v11 }
 0x61c   : > { %2520 = vmatmul.mubr.msk.f32.vlgmr.msra.gmra.mrb[6].mxu0 %vm725_vm0, %v2510_v10 }
 0x61d   : > { %2682 = vmatpush3.bf16.msra.mxu0 %v2679_v5  ;;  %2530 = vmatprep.mubr.msk.f32.mxu0 %vm725_vm0, %v3220_v14 }
 0x61e   : > { %2684 = vmatprep.subr.bf16.mxu0 %v2683_v12 }
 0x621   : > { %v2539_v15 = vpop.f32.mrb[8].mxu1  ;;  %2686 = vmatpush3.bf16.msra.mxu0 %v2683_v12 }
 0x622   : > { %v1388_v16 = vmul.f32 0.17677669, %v2539_v15  ;;  %v1378_v17 = vpop.f32.mrb[9].mxu1  ;;  %2700 = vmatprep.subr.bf16.mxu0 %v2699_v43 }
 0x623   : > { %v1387_v18 = vmul.f32 0.17677669, %v1378_v17 }
 0x624   : > { %2531 = vmatmul.mubr.msk.f32.vlgmr.msra.gmra.mrb[6].mxu0 %vm725_vm0, %v3218_v13  ;;  %v1390_v19 = vsel %vm816_vm4, -10000.0, %v1388_v16 }
 0x625   : > { %v1394_v21 = vsel %vm823_vm5, %v1390_v19, -inf  ;;  %v1389_v22 = vsel %vm815_vm2, -10000.0, %v1387_v18  ;;  %2702 = vmatpush3.bf16.msra.mxu0 %v2699_v43 }
 0x626   : > { %1395 = vmax.xlane.f32.xlu0 %v1394_v21  ;;  %v1391_v14 = vsel %vm819_vm3, %v1389_v22, -inf  ;;  %2704 = vmatprep.subr.bf16.mxu0 %v2703_v45 }
 0x627   : > { %1392 = vmax.xlane.f32.xlu1 %v1391_v14  ;;  %v721_v14 = vld [vmem:[%s3600_s4 + $0x60] sm:$0xff] }
 0x629   : > { %2706 = vmatpush3.bf16.msra.mxu0 %v2703_v45 }
 0x638   : > { %2826 = vrot.lane.b32.xlu1 %v3228_v25, %s2891_s26 }
 0x63c   : > { %1584 = vrot.lane.b32.xlu1 %v3133_v9, %s2892_s15 }
 0x640   : > { %1586 = vrot.lane.b32.xlu1 %v3172_v30, %s2892_s15 }
 0x6b3   : > { %v1396_v13 = vpop.xlane.xlu0 %1395 }
 0x6b4   : > { %v1398_v23 = vsub.f32 %v1390_v19, %v1396_v13  ;;  %v1393_v27 = vpop.xlane.xlu1 %1392  ;;  %v722_v13 = vld [vmem:[%s3600_s4 + $0x68] sm:$0xff] }
 0x6b5   : > { %v1397_v28 = vsub.f32 %v1389_v22, %v1393_v27  ;;  %v724_v27 = vld [vmem:[%s3600_s4 + $0x78] sm:$0xff] }
 0x6b6   : > { %v1401_v29 = vmul.f32 1.442695, %v1398_v23  ;;  %v2719_v23 = vpack.c.bf16 %v722_v13, %v721_v14  ;;  %v1947_v13 = vld [vmem:[%s3604_s8 + $0xa8] sm:$0xff] }
 0x6b7   : > { %v1399_v32 = vmul.f32 1.442695, %v1397_v28  ;;  %v2723_v28 = vpack.c.bf16 %v724_v27, %v723_v48  ;;  %v1949_v48 = vld [vmem:[%s3604_s8 + $0xb8] sm:$0xff]  ;;  %v1946_v27 = vld [vmem:[%s3604_s8 + $0xa0] sm:$0xff] }
 0x6b8   : > { %2856 = vpow2.f32 %v1401_v29  ;;  %v2827_v34 = vpop.permute.xlu1 %2826  ;;  %2720 = vmatprep.subr.bf16.mxu0 %v2719_v23 }
 0x6b9   : > { %v2829_v35 = vunpack.i.h.bf16 %v2827_v34  ;;  %v2828_v36 = vunpack.i.l.bf16 %v2827_v34  ;;  %2858 = vpow2.f32 %v1399_v32 }
 0x6bb   : > { %v2693_v37 = vpack.c.bf16 %v2829_v35, %v2828_v36 }
 0x6bc   : > { %v1585_v58 = vpop.permute.xlu1 %1584 }
 0x6bd   : > { %2695 = vmatprep.subr.msk.bf16.mxu1 %vm3196_vm8, %v2693_v37 }
 0x6be   : > { %2698 = vmatpush3.bf16.msk.msra.mxu1 %vm3196_vm8, %v2693_v37 }
 0x6c0   : > { %v1587_v59 = vpop.permute.xlu1 %1586 }
 0x6c2   : > { %v2857_v9 = vpop.eup %2856 }
 0x6c3   : > { %v1406_v30 = vsel %vm823_vm5, %v2857_v9, 0.0  ;;  %v2859_v38 = vpop.eup %2858 }
 0x6c4   : > { %1407 = vadd.xlane.f32.xlu0 %v1406_v30  ;;  %v1403_v39 = vsel %vm819_vm3, %v2859_v38, 0.0 }
 0x6c8   : > { %1404 = vadd.xlane.f32.xlu0 %v1403_v39 }
 0x6de   : > { %2831 = vrot.lane.b32.xlu0 %v3160_v24, %s2892_s15 }
 0x751   : > { %v1408_v24 = vpop.xlane.xlu0 %1407 }
 0x752   : > { %2860 = vrcp.f32 %v1408_v24  ;;  %v1927_v24 = vld [vmem:[%s3604_s8 + $0x8] sm:$0xff] }
 0x755   : > { %v1405_v46 = vpop.xlane.xlu0 %1404 }
 0x756   : > { %2862 = vrcp.f32 %v1405_v46  ;;  %v1929_v46 = vld [vmem:[%s3604_s8 + $0x18] sm:$0xff] }
 0x759   : > { %v2832_v47 = vpop.permute.xlu0 %2831 }
 0x75a   : > { %v2834_v49 = vunpack.i.h.bf16 %v2832_v47  ;;  %v2833_v51 = vunpack.i.l.bf16 %v2832_v47  ;;  %v1926_v47 = vld [vmem:[%s3604_s8] sm:$0xff] }
 0x75c   : > { %v2707_v53 = vpack.c.bf16 %v2834_v49, %v2833_v51  ;;  %v2861_v54 = vpop.eup %2860  ;;  %v2727_v49 = vpack.c.bf16 %v1929_v46, %v1927_v24  ;;  %v1933_v51 = vld [vmem:[%s3604_s8 + $0x38] sm:$0xff]  ;;  %v1960_v46 = vld [vmem:[%s3606_s10 + $0x8] sm:$0xff] }
 0x75d   : > { %v1412_v57 = vmul.f32 %v2861_v54, %v2857_v9 }
 0x75e   : > { %2709 = vmatprep.subr.msk.bf16.mxu1 %vm3150_vm1, %v2707_v53 }
 0x760   : > { %v2863_v55 = vpop.eup %2862 }
 0x761   : > { %v1411_v56 = vmul.f32 %v2863_v55, %v2859_v38  ;;  %v2325_v38 = vld [vmem:[%s3601_s5] ss:$0 sm:$0xff] }
 0x762   : > { %v1930_v55 = vld [vmem:[%s3604_s8 + $0x20] sm:$0xff] }
 0x763   : > { %2544 = vmatprep.mubr.msk.f32.mxu1 %vm819_vm3, %v1411_v56  ;;  %v1932_v56 = vld [vmem:[%s3604_s8 + $0x30] sm:$0xff] }
 0x764   : > { %2545 = vmatmul.mubr.msk.f32.vlgmr.msra.gmra.mrb[10].mxu1 %vm819_vm3, %v1412_v57  ;;  %v1935_v57 = vld [vmem:[%s3604_s8 + $0x48] sm:$0xff] }
 0x765   : > { %2712 = vmatpush3.bf16.xpose.msk.msra.mxu1 %vm3150_vm1, %v2707_v53  ;;  %2562 = vmatprep.mubr.msk.f32.mxu1 %vm725_vm0, %v1585_v58  ;;  %v1937_v58 = vld [vmem:[%s3604_s8 + $0x58] sm:$0xff] }
 0x76c   : > { %2563 = vmatmul.mubr.msk.f32.vlgmr.msra.gmra.mrb[12].mxu1 %vm725_vm0, %v1587_v59  ;;  %v2733_v59 = vpack.c.bf16 %v1932_v56, %v1930_v55  ;;  %v1980_v55 = vld [vmem:[%s3606_s10 + $0xa8] sm:$0xff] }
 0x837   : > { %v2546_v60 = vpop.f32.mrb[10].mxu1 }
 0x838   : > { %v1492_v62 = vpop.f32.mrb[11].mxu1 }
 0x839   : > { %2555 = vmatprep.mubr.msk.f32.mxu0 %vm725_vm0, %v1492_v62  ;;  %v1934_v62 = vld [vmem:[%s3604_s8 + $0x40] sm:$0xff] }
 0x83a   : > { %2556 = vmatmul.mubr.msk.f32.vlgmr.msra.gmra.mrb[6].mxu0 %vm725_vm0, %v2546_v60  ;;  %v2735_v60 = vpack.c.bf16 %v1937_v58, %v1935_v57  ;;  %v1963_v58 = vld [vmem:[%s3606_s10 + $0x20] sm:$0xff] }
 0x83b   : > { %2722 = vmatpush3.bf16.msra.mxu0 %v2719_v23  ;;  %v2747_v23 = vpack.c.bf16 %v1949_v48, %v1947_v13 }
 0x83c   : > { %2724 = vmatprep.subr.bf16.mxu0 %v2723_v28 }
 0x83f   : > { %v2564_v63 = vpop.f32.mrb[12].mxu1  ;;  %2726 = vmatpush3.bf16.msra.mxu0 %v2723_v28  ;;  %v1948_v28 = vld [vmem:[%s3604_s8 + $0xb0] sm:$0xff] }
 0x840   : > { %v1676_v0 = vmul.f32 0.17677669, %v2564_v63  ;;  %v1666_v1 = vpop.f32.mrb[13].mxu1  ;;  %v1936_v63 = vld [vmem:[%s3604_s8 + $0x50] sm:$0xff] }
 0x841   : > { %v1675_v2 = vmul.f32 0.17677669, %v1666_v1 }
 0x842   : > { %v1678_v4 = vsel %vm816_vm4, -10000.0, %v1676_v0  ;;  %v2737_v0 = vpack.c.bf16 %v1936_v63, %v1934_v62  ;;  %v1982_v62 = vld [vmem:[%s3606_s10 + $0xb8] sm:$0xff] }
 0x843   : > { %v1682_v20 = vsel %vm823_vm5, %v1678_v4, -inf  ;;  %v1677_v5 = vsel %vm815_vm2, -10000.0, %v1675_v2 }
 0x844   : > { %1683 = vmax.xlane.f32.xlu0 %v1682_v20  ;;  %v1679_v6 = vsel %vm819_vm3, %v1677_v5, -inf }
 0x845   : > { %1680 = vmax.xlane.f32.xlu1 %v1679_v6 }
 0x856   : > { %2836 = vrot.lane.b32.xlu1 %v3228_v25, %s2892_s15 }
 0x8d1   : > { %v1684_v8 = vpop.xlane.xlu0 %1683 }
 0x8d2   : > { %v1686_v10 = vsub.f32 %v1678_v4, %v1684_v8  ;;  %v1681_v11 = vpop.xlane.xlu1 %1680 }
 0x8d3   : > { %v1685_v12 = vsub.f32 %v1677_v5, %v1681_v11 }
 0x8d4   : > { %v1689_v15 = vmul.f32 1.442695, %v1686_v10 }
 0x8d5   : > { %v1687_v16 = vmul.f32 1.442695, %v1685_v12  ;;  %v1939_v12 = vld [vmem:[%s3604_s8 + $0x68] sm:$0xff] }
 0x8d6   : > { %v2837_v33 = vpop.permute.xlu1 %2836 }
 0x8d7   : > { %2864 = vpow2.f32 %v1687_v16  ;;  %v2839_v17 = vunpack.i.h.bf16 %v2837_v33  ;;  %v2838_v18 = vunpack.i.l.bf16 %v2837_v33  ;;  %v1938_v33 = vld [vmem:[%s3604_s8 + $0x60] sm:$0xff] }
 0x8d8   : > { %2866 = vpow2.f32 %v1689_v15  ;;  %v1941_v15 = vld [vmem:[%s3604_s8 + $0x78] sm:$0xff] }
 0x8d9   : > { %v2713_v31 = vpack.c.bf16 %v2839_v17, %v2838_v18  ;;  %v2739_v16 = vpack.c.bf16 %v1941_v15, %v1939_v12  ;;  %v1940_v17 = vld [vmem:[%s3604_s8 + $0x70] sm:$0xff]  ;;  %v1968_v12 = vld [vmem:[%s3606_s10 + $0x48] sm:$0xff] }
 0x8da   : > { %v2741_v18 = vpack.c.bf16 %v1940_v17, %v1938_v33  ;;  %v1985_v15 = vld [vmem:[%s3606_s10 + $0xd0] sm:$0xff] }
 0x8db   : > { %2715 = vmatprep.subr.msk.bf16.mxu1 %vm3196_vm8, %v2713_v31 }
 0x8dc   : > { %2718 = vmatpush3.bf16.msk.msra.mxu1 %vm3196_vm8, %v2713_v31  ;;  %v1943_v31 = vld [vmem:[%s3604_s8 + $0x88] sm:$0xff] }
 0x8dd   : > { %2728 = vmatprep.subr.bf16.mxu1 %v2727_v49  ;;  %v1978_v49 = vld [vmem:[%s3606_s10 + $0x98] sm:$0xff] }
 0x8e1   : > { %v2865_v19 = vpop.eup %2864 }
 0x8e2   : > { %v1691_v25 = vsel %vm819_vm3, %v2865_v19, 0.0  ;;  %v2867_v21 = vpop.eup %2866 }
 0x8e3   : > { %1692 = vadd.xlane.f32.xlu0 %v1691_v25  ;;  %v1694_v22 = vsel %vm823_vm5, %v2867_v21, 0.0 }
 0x8e7   : > { %1695 = vadd.xlane.f32.xlu0 %v1694_v22  ;;  %v1944_v22 = vld [vmem:[%s3604_s8 + $0x90] sm:$0xff] }
 0x970   : > { %v1693_v29 = vpop.xlane.xlu0 %1692 }
 0x971   : > { %2868 = vrcp.f32 %v1693_v29  ;;  %v2749_v29 = vpack.c.bf16 %v1948_v28, %v1946_v27 }
 0x974   : > { %v1696_v32 = vpop.xlane.xlu0 %1695 }
 0x975   : > { %2870 = vrcp.f32 %v1696_v32  ;;  %v1951_v32 = vld [vmem:[%s3604_s8 + $0xc8] sm:$0xff] }
 0x97b   : > { %v2869_v34 = vpop.eup %2868 }
 0x97c   : > { %v1699_v35 = vmul.f32 %v2869_v34, %v2865_v19  ;;  %v1945_v19 = vld [vmem:[%s3604_s8 + $0x98] sm:$0xff] }
 0x97d   : > { %v2743_v25 = vpack.c.bf16 %v1945_v19, %v1943_v31  ;;  %v1953_v34 = vld [vmem:[%s3604_s8 + $0xd8] sm:$0xff]  ;;  %v1987_v19 = vld [vmem:[%s3606_s10 + $0xe0] sm:$0xff] }
 0x97e   : > { %2569 = vmatprep.mubr.msk.f32.mxu1 %vm819_vm3, %v1699_v35  ;;  %v1950_v35 = vld [vmem:[%s3604_s8 + $0xc0] sm:$0xff]  ;;  %v1970_v31 = vld [vmem:[%s3606_s10 + $0x58] sm:$0xff] }
 0x97f   : > { %v2871_v36 = vpop.eup %2870 }
 0x980   : > { %v1700_v37 = vmul.f32 %v2871_v36, %v2867_v21  ;;  %v1942_v21 = vld [vmem:[%s3604_s8 + $0x80] sm:$0xff]  ;;  %v2751_v36 = vpack.c.bf16 %v1953_v34, %v1951_v32 }
 0x981   : > { %v2745_v14 = vpack.c.bf16 %v1944_v22, %v1942_v21  ;;  %v2326_v32 = vld [vmem:[%s3602_s6] ss:$0 sm:$0xff] }
 0x982   : > { %2570 = vmatmul.mubr.msk.f32.vlgmr.msra.gmra.mrb[14].mxu1 %vm819_vm3, %v1700_v37  ;;  %v1952_v37 = vld [vmem:[%s3604_s8 + $0xd0] sm:$0xff] }
 0x983   : > { %2067 = vmatprep.mubr.f32.mxu1 %v2888_v7 }
 0xa55   : > { %v2571_v9 = vpop.f32.mrb[14].mxu1 }
 0xa56   : > { %v1780_v30 = vpop.f32.mrb[15].mxu1 }
 0xa57   : > { %2580 = vmatprep.mubr.msk.f32.mxu0 %vm725_vm0, %v1780_v30  ;;  %v1957_v30 = vld [vmem:[%s3604_s8 + $0xf8] sm:$0xff] }
 0xa58   : > { %2581 = vmatmul.mubr.msk.f32.vlgmr.msra.gmra.mrb[6].mxu0 %vm725_vm0, %v2571_v9  ;;  %v1955_v9 = vld [vmem:[%s3604_s8 + $0xe8] sm:$0xff] }
 0xb2b   : > { %v2582_v39 = vpop.f32.mrb[6].mxu0 }
 0xb2c   : > { %v1880_v40 = vadd.f32 %v2582_v39, %v2325_v38  ;;  %v1861_v41 = vpop.f32.mrb[7].mxu0  ;;  %v2755_v39 = vpack.c.bf16 %v1957_v30, %v1955_v9 }
 0xb2d   : > { %v1879_v42 = vadd.f32 %v2325_v38, %v1861_v41  ;;  %v2753_v38 = vpack.c.bf16 %v1952_v37, %v1950_v35  ;;  %v1956_v41 = vld [vmem:[%s3604_s8 + $0xf0] sm:$0xff]  ;;  %v2327_v35 = vld [vmem:[%s3603_s7] ss:$0 sm:$0xff] }
 0xb2e   : > { %v1882_v44 = vadd.f32 %v1880_v40, %v3088_v50  ;;  %v1931_v50 = vld [vmem:[%s3604_s8 + $0x28] sm:$0xff]  ;;  %v1954_v40 = vld [vmem:[%s3604_s8 + $0xe0] sm:$0xff] }
 0xb2f   : > { %v1881_v43 = vadd.f32 %v1879_v42, %v3040_v26  ;;  %v1928_v26 = vld [vmem:[%s3604_s8 + $0x10] sm:$0xff]  ;;  %v2731_v54 = vpack.c.bf16 %v1933_v51, %v1931_v50  ;;  %v2757_v42 = vpack.c.bf16 %v1956_v41, %v1954_v40  ;;  %v1971_v40 = vld [vmem:[%s3606_s10 + $0x60] sm:$0xff] }
 0xb30   : > { %v1887_v45 = vsel %vm849_vm6, %v1882_v44, 0.0  ;;  %v2729_v53 = vpack.c.bf16 %v1928_v26, %v1926_v47  ;;  %v1977_v47 = vld [vmem:[%s3606_s10 + $0x90] sm:$0xff] }
 0xb31   : > { %1885 = vadd.xlane.f32.xlu0 %v1881_v43  ;;  %v2763_v50 = vpack.c.bf16 %v1978_v49, %v1977_v47  ;;  %v1961_v51 = vld [vmem:[%s3606_s10 + $0x10] sm:$0xff] }
 0xb32   : > { %2730 = vmatpush1.bf16.msra.mxu1 %v2729_v53  ;;  %v1962_v53 = vld [vmem:[%s3606_s10 + $0x18] sm:$0xff] }
 0xb33   : > { %2732 = vmatprep.subr.bf16.mxu1 %v2731_v54  ;;  %v1979_v54 = vld [vmem:[%s3606_s10 + $0xa0] sm:$0xff]  ;;  %v2765_v56 = vpack.c.bf16 %v1962_v53, %v1961_v51 }
 0xb34   : > { %v2767_v57 = vpack.c.bf16 %v1980_v55, %v1979_v54 }
 0xb35   : > { %1888 = vadd.xlane.f32.xlu0 %v1887_v45  ;;  %v1959_v45 = vld [vmem:[%s3606_s10] sm:$0xff] }
 0xb36   : > { %2734 = vmatpush1.bf16.msra.mxu1 %v2733_v59  ;;  %v2761_v26 = vpack.c.bf16 %v1960_v46, %v1959_v45  ;;  %v1964_v59 = vld [vmem:[%s3606_s10 + $0x28] sm:$0xff] }
 0xb37   : > { %2736 = vmatprep.subr.bf16.mxu1 %v2735_v60  ;;  %v1981_v60 = vld [vmem:[%s3606_s10 + $0xb0] sm:$0xff]  ;;  %v2769_v63 = vpack.c.bf16 %v1964_v59, %v1963_v58 }
 0xb3a   : > { %2738 = vmatpush1.bf16.msra.mxu1 %v2737_v0  ;;  %v2771_v0 = vpack.c.bf16 %v1982_v62, %v1981_v60 }
 0xb3b   : > { %2740 = vmatprep.subr.bf16.mxu1 %v2739_v16  ;;  %v1986_v16 = vld [vmem:[%s3606_s10 + $0xd8] sm:$0xff] }
 0xb3c   : > { %v2779_v17 = vpack.c.bf16 %v1986_v16, %v1985_v15 }
 0xb3e   : > { %2742 = vmatpush1.bf16.msra.mxu1 %v2741_v18  ;;  %v1969_v18 = vld [vmem:[%s3606_s10 + $0x50] sm:$0xff] }
 0xb3f   : > { %2744 = vmatprep.subr.bf16.mxu1 %v2743_v25  ;;  %v1988_v25 = vld [vmem:[%s3606_s10 + $0xe8] sm:$0xff]  ;;  %v2781_v21 = vpack.c.bf16 %v1970_v31, %v1969_v18 }
 0xb40   : > { %v2783_v22 = vpack.c.bf16 %v1988_v25, %v1987_v19 }
 0xb42   : > { %2746 = vmatpush1.bf16.msra.mxu1 %v2745_v14 }
 0xb43   : > { %2748 = vmatprep.subr.bf16.mxu1 %v2747_v23 }
 0xb46   : > { %2750 = vmatpush1.bf16.msra.mxu1 %v2749_v29 }
 0xb47   : > { %2752 = vmatprep.subr.bf16.mxu1 %v2751_v36 }
 0xb4a   : > { %2754 = vmatpush1.bf16.msra.mxu1 %v2753_v38 }
 0xb4b   : > { %2756 = vmatprep.subr.bf16.mxu1 %v2755_v39 }
 0xb4e   : > { %2758 = vmatpush1.bf16.msra.mxu1 %v2757_v42 }
 0xbbe   : > { %v1886_v1 = vpop.xlane.xlu0 %1885 }
 0xbbf   : > { %v1891_v2 = vmul.f32 0.0078125, %v1886_v1  ;;  %v1965_v1 = vld [vmem:[%s3606_s10 + $0x30] sm:$0xff] }
 0xbc1   : > { %v3397_v4 = vsub.f32 %v1881_v43, %v1891_v2  ;;  %v1975_v43 = vld [vmem:[%s3606_s10 + $0x80] sm:$0xff]  ;;  %v1966_v2 = vld [vmem:[%s3606_s10 + $0x38] sm:$0xff] }
 0xbc2   : > { %v1889_v20 = vpop.xlane.xlu0 %1888 }
 0xbc3   : > { %v1892_v5 = vmul.f32 0.0078125, %v1889_v20  ;;  %v1895_v6 = vmul.f32 %v3397_v4, %v3397_v4  ;;  %v1983_v20 = vld [vmem:[%s3606_s10 + $0xc0] sm:$0xff] }
 0xbc5   : > { %v3401_v8 = vsub.f32 %v1882_v44, %v1892_v5  ;;  %1897 = vadd.xlane.f32.xlu0 %v1895_v6  ;;  %v1976_v44 = vld [vmem:[%s3606_s10 + $0x88] sm:$0xff]  ;;  %v2773_v6 = vpack.c.bf16 %v1966_v2, %v1965_v1 }
 0xbc6   : > { %v2759_v24 = vpack.c.bf16 %v1976_v44, %v1975_v43  ;;  %v1984_v5 = vld [vmem:[%s3606_s10 + $0xc8] sm:$0xff]  ;;  %v1973_v43 = vld [vmem:[%s3606_s10 + $0x70] sm:$0xff]  ;;  %v1974_v44 = vld [vmem:[%s3606_s10 + $0x78] sm:$0xff] }
 0xbc7   : > { %v1896_v10 = vmul.f32 %v3401_v8, %v3401_v8  ;;  %v2789_v45 = vpack.c.bf16 %v1974_v44, %v1973_v43 }
 0xbc8   : > { %2760 = vmatprep.subr.bf16.mxu0 %v2759_v24  ;;  %v1958_v24 = vld [vmem:[%s3605_s9] sm:$0x3] }
 0xbc9   : > { %v1899_v11 = vsel %vm849_vm6, %v1896_v10, 0.0  ;;  %2762 = vmatpush3.bf16.msra.mxu0 %v2761_v26  ;;  %v2775_v10 = vpack.c.bf16 %v1984_v5, %v1983_v20  ;;  %v1996_v46 = vrot.slane %v1958_v24, %v544_v61  ;;  %v2000_v47 = vrot.slane %v1958_v24, %v548_v3 }
 0xbca   : > { %1900 = vadd.xlane.f32.xlu0 %v1899_v11  ;;  %2764 = vmatprep.subr.bf16.mxu0 %v2763_v50  ;;  %v1967_v11 = vld [vmem:[%s3606_s10 + $0x40] sm:$0xff] }
 0xbcb   : > { %v2777_v33 = vpack.c.bf16 %v1968_v12, %v1967_v11 }
 0xbcd   : > { %2766 = vmatpush3.bf16.msra.mxu0 %v2765_v56 }
 0xbce   : > { %2768 = vmatprep.subr.bf16.mxu0 %v2767_v57 }
 0xbd1   : > { %2770 = vmatpush3.bf16.msra.mxu0 %v2769_v63 }
 0xbd2   : > { %2772 = vmatprep.subr.bf16.mxu0 %v2771_v0 }
 0xbd5   : > { %2774 = vmatpush3.bf16.msra.mxu0 %v2773_v6 }
 0xbd6   : > { %2776 = vmatprep.subr.bf16.mxu0 %v2775_v10 }
 0xbd9   : > { %2778 = vmatpush3.bf16.msra.mxu0 %v2777_v33 }
 0xbda   : > { %2780 = vmatprep.subr.bf16.mxu0 %v2779_v17 }
 0xbdd   : > { %2782 = vmatpush3.bf16.msra.mxu0 %v2781_v21 }
 0xbde   : > { %2784 = vmatprep.subr.bf16.mxu0 %v2783_v22 }
 0xc52   : > { %v1898_v14 = vpop.xlane.xlu0 %1897 }
 0xc53   : > { %v1902_v13 = vmul.f32 0.0078125, %v1898_v14 }
 0xc55   : > { %v1904_v48 = vadd.f32 1e-12, %v1902_v13 }
 0xc57   : > { %2872 = vrsqrt.f32 %v1904_v48  ;;  %v1901_v23 = vpop.xlane.xlu0 %1900 }
 0xc58   : > { %v1903_v27 = vmul.f32 0.0078125, %v1901_v23 }
 0xc5a   : > { %v1905_v28 = vadd.f32 1e-12, %v1903_v27  ;;  %v2329_v27 = vld [vmem:[%s3608_s12] ss:$0 sm:$0xff] }
 0xc5c   : > { %2874 = vrsqrt.f32 %v1905_v28 }
 0xc61   : > { %v2873_v29 = vpop.eup %2872 }
 0xc62   : > { %v1908_v34 = vmul.f32 %v2873_v29, %v3397_v4  ;;  %v1972_v4 = vld [vmem:[%s3606_s10 + $0x68] sm:$0xff]  ;;  %v2330_v29 = vld [vmem:[%s3609_s13] ss:$0 sm:$0xff] }
 0xc63   : > { %v2785_v41 = vpack.c.bf16 %v1972_v4, %v1971_v40 }
 0xc64   : > { %v1916_v36 = vmul.f32 %v2326_v32, %v1908_v34 }
 0xc65   : > { %2786 = vmatpush3.bf16.msra.mxu0 %v2785_v41 }
 0xc66   : > { %v2875_v37 = vpop.eup %2874  ;;  %v1924_v9 = vadd.f32 %v2327_v35, %v1916_v36 }
 0xc67   : > { %v1909_v30 = vmul.f32 %v2875_v37, %v3401_v8  ;;  %v1989_v8 = vld [vmem:[%s3606_s10 + $0xf0] sm:$0xff] }
 0xc68   : > { %2068 = vmatmul.mubr.f32.vlgmr.msra.gmra.mrb[16].mxu1 %v1924_v9 }
 0xc69   : > { %2073 = vmatprep.mubr.f32.mxu1 %v2888_v7  ;;  %v1917_v38 = vmul.f32 %v2326_v32, %v1909_v30  ;;  %v1990_v7 = vld [vmem:[%s3606_s10 + $0xf8] sm:$0xff] }
 0xc6a   : > { %v2787_v42 = vpack.c.bf16 %v1990_v7, %v1989_v8 }
 0xc6b   : > { %v1925_v39 = vadd.f32 %v2327_v35, %v1917_v38 }
 0xc6c   : > { %2788 = vmatprep.subr.bf16.mxu0 %v2787_v42 }
 0xc6d   : > { %2074 = vmatmul.mubr.f32.gmra.mrb[18].mxu1 %v1925_v39  ;;  %2790 = vmatpush3.bf16.msra.mxu0 %v2789_v45 }
 0xd3b   : > { %v2069_v49 = vpop.f32.mrb[16].mxu1 }
 0xd3c   : > { %v2070_v26 = vadd.f32 %v2069_v49, %v1996_v46  ;;  %v2071_v50 = vpop.f32.mrb[17].mxu1 }
 0xd3d   : > { %v2072_v51 = vadd.f32 %v2071_v50, %v2000_v47 }
 0xd3e   : > { %v2080_v54 = vmax.f32 %v2070_v26, 0.0 }
 0xd3f   : > { %v2081_v53 = vmax.f32 %v2072_v51, 0.0 }
 0xd40   : > { %v2075_v55 = vpop.f32.mrb[18].mxu1 }
 0xd41   : > { %v2076_v56 = vadd.f32 %v2075_v55, %v1996_v46  ;;  %v2077_v57 = vpop.f32.mrb[19].mxu1  ;;  %2154 = vmatprep.mubr.f32.mxu0 %v2081_v53 }
 0xd42   : > { %v2078_v58 = vadd.f32 %v2077_v57, %v2000_v47  ;;  %2155 = vmatmul.mubr.f32.vlgmr.msra.gmra.mrb[8].mxu0 %v2080_v54 }
 0xd43   : > { %v2082_v60 = vmax.f32 %v2076_v56, 0.0 }
 0xd44   : > { %v2083_v59 = vmax.f32 %v2078_v58, 0.0 }
 0xd46   : > { %2159 = vmatprep.mubr.f32.mxu0 %v2083_v59 }
 0xd47   : > { %2160 = vmatmul.mubr.f32.gmra.mrb[10].mxu0 %v2082_v60 }
 0xe15   : > { %v2442_v61 = vpop.f32.mrb[8].mxu0 }
 0xe16   : > { %v2443_v3 = vpop.f32.mrb[9].mxu0 }
 0xe17   : > { %v2444_v62 = vadd.f32 %v2443_v3, %v2442_v61 }
 0xe19   : > { %v2157_v63 = vadd.f32 %v2444_v62, %v2328_v52 }
 0xe1a   : > { %v2445_v0 = vpop.f32.mrb[10].mxu0 }
 0xe1b   : > { %v2446_v1 = vpop.f32.mrb[11].mxu0  ;;  %v2165_v2 = vadd.f32 %v2157_v63, %v1924_v9 }
 0xe1c   : > { %v2447_v20 = vadd.f32 %v2446_v1, %v2445_v0 }
 0xe1d   : > { %2169 = vadd.xlane.f32.xlu0 %v2165_v2 }
 0xe1e   : > { %v2162_v5 = vadd.f32 %v2447_v20, %v2328_v52 }
 0xe20   : > { %v2166_v6 = vadd.f32 %v2162_v5, %v1925_v39 }
 0xe22   : > { %v2171_v10 = vsel %vm849_vm6, %v2166_v6, 0.0 }
 0xe23   : > { %2172 = vadd.xlane.f32.xlu1 %v2171_v10 }
 0xeaa   : > { %v2170_v11 = vpop.xlane.xlu0 %2169 }
 0xeab   : > { %v2174_v12 = vmul.f32 0.0078125, %v2170_v11 }
 0xead   : > { %v2176_v15 = vsub.f32 %v2165_v2, %v2174_v12 }
 0xeaf   : > { %v2178_v16 = vmul.f32 %v2176_v15, %v2176_v15 }
 0xeb0   : > { %v2173_v33 = vpop.xlane.xlu1 %2172 }
 0xeb1   : > { %v2175_v17 = vmul.f32 0.0078125, %v2173_v33  ;;  %2180 = vadd.xlane.f32.xlu0 %v2178_v16 }
 0xeb3   : > { %v2177_v18 = vsub.f32 %v2166_v6, %v2175_v17 }
 0xeb5   : > { %v2179_v31 = vmul.f32 %v2177_v18, %v2177_v18 }
 0xeb7   : > { %v2182_v19 = vsel %vm849_vm6, %v2179_v31, 0.0 }
 0xeb8   : > { %2183 = vadd.xlane.f32.xlu0 %v2182_v19 }
 0xf3e   : > { %v2181_v25 = vpop.xlane.xlu0 %2180 }
 0xf3f   : > { %v2185_v21 = vmul.f32 0.0078125, %v2181_v25 }
 0xf41   : > { %v2187_v22 = vadd.f32 1e-12, %v2185_v21 }
 0xf43   : > { %2876 = vrsqrt.f32 %v2187_v22 }
 0xf45   : > { %v2184_v14 = vpop.xlane.xlu0 %2183 }
 0xf46   : > { %v2186_v13 = vmul.f32 0.0078125, %v2184_v14 }
 0xf48   : > { %v2188_v48 = vadd.f32 1e-12, %v2186_v13 }
 0xf4a   : > { %2878 = vrsqrt.f32 %v2188_v48 }
 0xf4d   : > { %v2877_v23 = vpop.eup %2876 }
 0xf4e   : > { %v2191_v28 = vmul.f32 %v2877_v23, %v2176_v15 }
 0xf50   : > { %v2199_v32 = vmul.f32 %v2329_v27, %v2191_v28 }
 0xf52   : > { %v2207_v34 = vadd.f32 %v2330_v29, %v2199_v32 }
 0xf54   : > { %v2879_v35 = vpop.eup %2878  ;;  %2209 = vst [vmem:[%s487_s17] sm:$0xff] %v2207_v34 }
 0xf55   : > { %v2192_v36 = vmul.f32 %v2879_v35, %v2177_v18 }
 0xf57   : > { %v2200_v37 = vmul.f32 %v2329_v27, %v2192_v36 }
 0xf59   : > { %v2208_v9 = vadd.f32 %v2330_v29, %v2200_v37 }
 0xf5b   : > { %2210 = vst [vmem:[%s487_s17 + $0x8] sm:$0x3] %v2208_v9 }
 0xf5c PF: > { %s24_s29 = sadd.s32 1, %s2886_s29  }
 0xf5d   : > { %p21_p4 = scmp.ge.s32.totalorder %s24_s29, 4  }
 0xf5f   :  { %23 = sbr.rel (!%p21_p4) target bundleno = 1 (0x1), region = 109 }

// kernel: _lambda_.7
= control target key start
LH: loop header
LB: loop body
LE: loop exit
PB: predicated region body
PF: predicated region fallthrough
CT: control target
= control target key end

     0   :  { %s6280_s0 = inlined_call_operand.vmem [shape: f32[2,8,128], index: 0, kind: input, shape index: {}]   ;;  %s6281_s1 = inlined_call_operand.vmem [shape: f32[2,10,128], index: 1, kind: input, shape index: {}]   ;;  %s6282_s2 = inlined_call_operand.vmem [shape: f32[2,8,8], index: 2, kind: input, shape index: {}]   ;;  %s6283_s3 = inlined_call_operand.vmem [shape: f32[2,8,10], index: 3, kind: input, shape index: {}]   ;;  %s6284_s4 = inlined_call_operand.vmem [shape: f32[128,384], index: 4, kind: input, shape index: {}]   ;;  %s6285_s5 = inlined_call_operand.vmem [shape: f32[1,384], index: 5, kind: input, shape index: {}]   ;;  %s6286_s6 = inlined_call_operand.vmem [shape: f32[128,128], index: 6, kind: input, shape index: {}]   ;;  %s6287_s7 = inlined_call_operand.vmem [shape: f32[1,128], index: 7, kind: input, shape index: {}]   ;;  %s6288_s8 = inlined_call_operand.hbm [shape: f32[1,128], index: 8, kind: input, shape index: {}]   ;;  %s6289_s9 = inlined_call_operand.hbm [shape: f32[1,128], index: 9, kind: input, shape index: {}]   ;;  %s6290_s10 = inlined_call_operand.vmem [shape: f32[128,128], index: 10, kind: input, shape index: {}]   ;;  %s6291_s11 = inlined_call_operand.hbm [shape: f32[1,128], index: 11, kind: input, shape index: {}]   ;;  %s6292_s12 = inlined_call_operand.vmem [shape: f32[128,256], index: 12, kind: input, shape index: {}]   ;;  %s6293_s13 = inlined_call_operand.vmem [shape: f32[1,256], index: 13, kind: input, shape index: {}]   ;;  %s6294_s14 = inlined_call_operand.vmem [shape: f32[128,128], index: 14, kind: input, shape index: {}]   ;;  %s6295_s15 = inlined_call_operand.hbm [shape: f32[1,128], index: 15, kind: input, shape index: {}]   ;;  %s6296_s16 = inlined_call_operand.hbm [shape: f32[1,128], index: 16, kind: input, shape index: {}]   ;;  %s6297_s17 = inlined_call_operand.hbm [shape: f32[1,128], index: 17, kind: input, shape index: {}]   ;;  %s6298_s18 = inlined_call_operand.vmem [shape: f32[128,256], index: 18, kind: input, shape index: {}]   ;;  %s6299_s19 = inlined_call_operand.vmem [shape: f32[1,256], index: 19, kind: input, shape index: {}]   ;;  %s6300_s20 = inlined_call_operand.vmem [shape: f32[256,128], index: 20, kind: input, shape index: {}]   ;;  %s6301_s21 = inlined_call_operand.hbm [shape: f32[1,128], index: 21, kind: input, shape index: {}]   ;;  %s6302_s22 = inlined_call_operand.hbm [shape: f32[1,128], index: 22, kind: input, shape index: {}]   ;;  %s6303_s23 = inlined_call_operand.hbm [shape: f32[1,128], index: 23, kind: input, shape index: {}]   ;;  %s6304_s24 = inlined_call_operand.vmem [shape: f32[2,8,128], index: 24, kind: output, shape index: {}]  }
   0x1   :  { %6313 = sst [smem:[#allocation22_spill]] %s6280_s0 }
   0x2   :  { %6314 = sst [smem:[#allocation23_spill]] %s6281_s1 }
   0x3   :  { %6315 = sst [smem:[#allocation24_spill]] %s6282_s2 }
   0x4   :  { %6316 = sst [smem:[#allocation25_spill]] %s6283_s3 }
   0x5   :  { %6317 = sst [smem:[#allocation26_spill]] %s6284_s4 }
   0x6   :  { %6318 = sst [smem:[#allocation27_spill]] %s6285_s5 }
   0x7   :  { %6319 = sst [smem:[#allocation28_spill]] %s6286_s6 }
   0x8   :  { %6320 = sst [smem:[#allocation29_spill]] %s6287_s7 }
   0x9   :  { %6321 = sst [smem:[#allocation30_spill]] %s6288_s8 }
   0xa   :  { %6322 = sst [smem:[#allocation31_spill]] %s6289_s9 }
   0xb   :  { %6323 = sst [smem:[#allocation32_spill]] %s6299_s19 }
   0xc   :  { %6324 = sst [smem:[#allocation33_spill]] %s6304_s24 }
   0xd   :  { %29 = vsyncpa [#allocation3], 0 }
   0xe   :  { %30 = vsyncpa [#allocation5], 0 }
   0xf   :  { %31 = vsyncpa [#allocation8], 0 }
  0x10   :  { %32 = vsyncpa [#allocation11], 0 }
  0x11   :  { %33 = vsyncpa [#allocation14], 0  ;;  %s5150_s5 = smov 0  }
  0x12 LB: > { %6325 = sst [smem:[#allocation21_spill]] %s5007_s5  ;;  %s5009_s26 = smov [#allocation4]   ;;  %s5007_s5 = sphi %s5150_s5, %s39_s5  }
  0x13   : > { %s630_s27 = sshll.u32 %s5009_s26, 4  ;;  %s5156_s28 = sadd.s32 4294967295, %s5007_s5   ;;  %s5161_s27 = int_to_ptr.vmem [resolvable:$true] %s630_s27 }
  0x14   : > { %p3816_p0 = scmp.ge.s32.totalorder %s5007_s5, 1  ;;  %p594_p1 = scmp.lt.s32.totalorder %s5007_s5, 3 }
  0x15   : > { %p6309_p2 = scmp.eq.s32.totalorder %s5156_s28, 0  ;;  %s5010_s2 = smov [#allocation7]  }
  0x16   : > { %p5163_p3 = pnand %p3816_p0, %p594_p1  ;;  %s664_s29 = sshll.u32 %s5010_s2, 4  ;;  %s5169_s29 = int_to_ptr.vmem [resolvable:$true] %s664_s29 }
  0x17   : > { %s5011_s0 = smov [#allocation10]   ;;  %s5012_s3 = smov [#allocation13]  }
  0x18   : > { %s6326_s6 = scalar_select %p5163_p3, 1, 0 }
  0x19   : > { %p4591_p4 = pneg %p5163_p3  ;;  %s686_s7 = sshll.u32 %s5011_s0, 4  ;;  %s5177_s7 = int_to_ptr.vmem [resolvable:$true] %s686_s7 }
  0x1a   : > { %s717_s25 = sshll.u32 %s5012_s3, 4  ;;  %s6328_s9 = sld [smem:[#allocation31_spill]]  ;;  %s5179_s25 = int_to_ptr.vmem [resolvable:$true] %s717_s25 }
  0x1b   : > { %p5173_p5 = pnand %p6309_p2, %p4591_p4 }
  0x1d   : > { %p5189_p7 = pneg %p5173_p5 }
  0x20   : > { %s4729_s1 = scalar_lea.hbm %s6328_s9, 16 }
  0x21   : > { %p4730_p6 = scmp.ne.s32.totalorder %s6328_s9, %s4729_s1  ;;  %p4736_p10 = scmp.lt.u32.totalorder %s4729_s1, %s6328_s9 }
  0x23   : > { %p4732_p8 = pnand %p5189_p7, %p4730_p6 }
  0x25   : > { %p4733_p9 = pneg %p4732_p8 }
  0x27   : > { %p4738_p11 = pnand %p4736_p10, %p4733_p9 }
  0x29   : > { %4741 = shalt.err (!%p4738_p11)
}
  0x2a   : > { %s4742_s8 = scalar_lea.vmem %s5161_s27, 16  ;;  %s4749_s4 = scalar_lea.vmem %s5161_s27, 32 }
  0x2b   : > { %p4743_p12 = scmp.ne.s32.totalorder %s5161_s27, %s4742_s8  ;;  %p4750_p1 = scmp.lt.s32.totalorder %s5161_s27, %s5161_s27 }
  0x2c   : > { %p4751_p4 = scmp.lt.s32.totalorder %s4749_s4, %s4742_s8 }
  0x2d   : > { %p4745_p13 = pnand %p4743_p12, %p5189_p7 }
  0x2e   : > { %p4752_p6 = por %p4751_p4, %p4750_p1 }
  0x2f   : > { %p4746_p0 = pneg %p4745_p13 }
  0x31   : > { %p4753_p8 = pnand %p4752_p6, %p4746_p0 }
  0x33   : > { %4756 = shalt.err (!%p4753_p8)
}
  0x34   : > { %4597 = dma.hbm_to_vmem [thread:$0]  (!%p5173_p5), %s6328_s9, 16, %s5161_s27, [#allocation5]  }
  0x35   : > { %s4757_s3 = scalar_lea.hbm %s6295_s15, 16 }
  0x36   : > { %p4758_p9 = scmp.ne.s32.totalorder %s6295_s15, %s4757_s3  ;;  %p4764_p12 = scmp.lt.u32.totalorder %s4757_s3, %s6295_s15 }
  0x38   : > { %p4760_p10 = pnand %p4758_p9, %p5189_p7 }
  0x3a   : > { %p4761_p11 = pneg %p4760_p10 }
  0x3c   : > { %p4766_p13 = pnand %p4764_p12, %p4761_p11 }
  0x3e   : > { %4769 = shalt.err (!%p4766_p13)
}
  0x3f   : > { %s4770_s27 = scalar_lea.vmem %s5169_s29, 16  ;;  %s4777_s19 = scalar_lea.vmem %s5169_s29, 32 }
  0x40   : > { %p4771_p0 = scmp.ne.s32.totalorder %s5169_s29, %s4770_s27  ;;  %p4778_p6 = scmp.lt.s32.totalorder %s5169_s29, %s5169_s29 }
  0x41   : > { %p4779_p8 = scmp.lt.s32.totalorder %s4777_s19, %s4770_s27 }
  0x42   : > { %p4773_p1 = pnand %p4771_p0, %p5189_p7 }
  0x43   : > { %p4780_p9 = por %p4779_p8, %p4778_p6 }
  0x44   : > { %p4774_p4 = pneg %p4773_p1 }
  0x46   : > { %p4781_p10 = pnand %p4780_p9, %p4774_p4 }
  0x48   : > { %4784 = shalt.err (!%p4781_p10)
}
  0x49   : > { %4603 = dma.hbm_to_vmem [thread:$0]  (!%p5173_p5), %s6295_s15, 16, %s5169_s29, [#allocation8]  }
  0x4a   : > { %s4785_s2 = scalar_lea.hbm %s6297_s17, 16 }
  0x4b   : > { %p4786_p11 = scmp.ne.s32.totalorder %s6297_s17, %s4785_s2  ;;  %p4792_p0 = scmp.lt.u32.totalorder %s4785_s2, %s6297_s17 }
  0x4d   : > { %p4788_p12 = pnand %p4786_p11, %p5189_p7 }
  0x4f   : > { %p4789_p13 = pneg %p4788_p12 }
  0x51   : > { %p4794_p1 = pnand %p4792_p0, %p4789_p13 }
  0x53   : > { %4797 = shalt.err (!%p4794_p1)
}
  0x54   : > { %s4798_s29 = scalar_lea.vmem %s5177_s7, 16  ;;  %s4805_s19 = scalar_lea.vmem %s5177_s7, 32 }
  0x55   : > { %p4799_p4 = scmp.ne.s32.totalorder %s5177_s7, %s4798_s29  ;;  %p4806_p9 = scmp.lt.s32.totalorder %s5177_s7, %s5177_s7 }
  0x56   : > { %p4807_p10 = scmp.lt.s32.totalorder %s4805_s19, %s4798_s29 }
  0x57   : > { %p4801_p6 = pnand %p4799_p4, %p5189_p7 }
  0x58   : > { %p4808_p11 = por %p4807_p10, %p4806_p9 }
  0x59   : > { %p4802_p8 = pneg %p4801_p6 }
  0x5b   : > { %p4809_p12 = pnand %p4808_p11, %p4802_p8 }
  0x5d   : > { %4812 = shalt.err (!%p4809_p12)
}
  0x5e   : > { %4609 = dma.hbm_to_vmem [thread:$0]  (!%p5173_p5), %s6297_s17, 16, %s5177_s7, [#allocation11]  }
  0x5f   : > { %s4813_s2 = scalar_lea.hbm %s6302_s22, 16 }
  0x60   : > { %p4814_p13 = scmp.ne.s32.totalorder %s6302_s22, %s4813_s2  ;;  %p4820_p4 = scmp.lt.u32.totalorder %s4813_s2, %s6302_s22 }
  0x62   : > { %p4816_p0 = pnand %p4814_p13, %p5189_p7 }
  0x64   : > { %p4817_p1 = pneg %p4816_p0 }
  0x66   : > { %p4822_p6 = pnand %p4820_p4, %p4817_p1 }
  0x68   : > { %4825 = shalt.err (!%p4822_p6)
}
  0x69   : > { %s4826_s7 = scalar_lea.vmem %s5179_s25, 16  ;;  %s4833_s29 = scalar_lea.vmem %s5179_s25, 32 }
  0x6a   : > { %p4827_p8 = scmp.ne.s32.totalorder %s5179_s25, %s4826_s7  ;;  %p4834_p11 = scmp.lt.s32.totalorder %s5179_s25, %s5179_s25 }
  0x6b   : > { %p4835_p12 = scmp.lt.s32.totalorder %s4833_s29, %s4826_s7 }
  0x6c   : > { %p4829_p9 = pnand %p4827_p8, %p5189_p7 }
  0x6d   : > { %p4836_p13 = por %p4835_p12, %p4834_p11 }
  0x6e   : > { %p4830_p10 = pneg %p4829_p9 }
  0x70   : > { %p4837_p0 = pnand %p4836_p13, %p4830_p10 }
  0x72   : > { %4840 = shalt.err (!%p4837_p0)
}
  0x73   : > { %4615 = dma.hbm_to_vmem [thread:$0]  (!%p5173_p5), %s6302_s22, 16, %s5179_s25, [#allocation14]  }
  0x74   : > { %s5013_s5 = smov [#allocation2]   ;;  %s5014_s26 = smov [#allocation6]  }
  0x75   : > { %s619_s1 = sshll.u32 %s5013_s5, 4  ;;  %s644_s2 = sshll.u32 %s5014_s26, 4  ;;  %s620_s1 = int_to_ptr.vmem [resolvable:$true] %s619_s1  ;;  %s645_s2 = int_to_ptr.vmem [resolvable:$true] %s644_s2 }
  0x76   : > { %s6330_s4 = sld [smem:[#allocation30_spill]] }
  0x7c   : > { %s4841_s27 = scalar_lea.hbm %s6330_s4, 16 }
  0x7d   : > { %p4842_p1 = scmp.ne.s32.totalorder %s6330_s4, %s4841_s27  ;;  %p4848_p8 = scmp.lt.u32.totalorder %s4841_s27, %s6330_s4 }
  0x7f   : > { %p4844_p4 = pnand %p4842_p1, %p5189_p7 }
  0x81   : > { %p4845_p6 = pneg %p4844_p4 }
  0x83   : > { %p4850_p9 = pnand %p4848_p8, %p4845_p6 }
  0x85   : > { %4853 = shalt.err (!%p4850_p9)
}
  0x86   : > { %s4854_s25 = scalar_lea.vmem %s620_s1, 16  ;;  %s4861_s24 = scalar_lea.vmem %s620_s1, 32 }
  0x87   : > { %p4855_p10 = scmp.ne.s32.totalorder %s620_s1, %s4854_s25  ;;  %p4862_p13 = scmp.lt.s32.totalorder %s620_s1, %s620_s1 }
  0x88   : > { %p4863_p0 = scmp.lt.s32.totalorder %s4861_s24, %s4854_s25 }
  0x89   : > { %p4857_p11 = pnand %p4855_p10, %p5189_p7 }
  0x8a   : > { %p4864_p2 = por %p4863_p0, %p4862_p13 }
  0x8b   : > { %p4858_p12 = pneg %p4857_p11 }
  0x8d   : > { %p4865_p3 = pnand %p4864_p2, %p4858_p12 }
  0x8f   : > { %4868 = shalt.err (!%p4865_p3)
}
  0x90   : > { %4594 = dma.hbm_to_vmem [thread:$0]  (!%p5173_p5), %s6330_s4, 16, %s620_s1, [#allocation3]  }
  0x91   : > { %s4869_s8 = scalar_lea.hbm %s6291_s11, 16 }
  0x92   : > { %p4870_p1 = scmp.ne.s32.totalorder %s6291_s11, %s4869_s8  ;;  %p4876_p3 = scmp.lt.u32.totalorder %s4869_s8, %s6291_s11 }
  0x94   : > { %p4872_p4 = pnand %p4870_p1, %p5189_p7 }
  0x96   : > { %p4873_p2 = pneg %p4872_p4 }
  0x98   : > { %p4878_p6 = pnand %p4876_p3, %p4873_p2 }
  0x9a   : > { %4881 = shalt.err (!%p4878_p6)
}
  0x9b   : > { %s4882_s25 = scalar_lea.vmem %s645_s2, 16  ;;  %s4889_s1 = scalar_lea.vmem %s645_s2, 32 }
  0x9c   : > { %p4883_p8 = scmp.ne.s32.totalorder %s645_s2, %s4882_s25  ;;  %p4890_p11 = scmp.lt.s32.totalorder %s645_s2, %s645_s2 }
  0x9d   : > { %p4891_p12 = scmp.lt.s32.totalorder %s4889_s1, %s4882_s25 }
  0x9e   : > { %p4885_p9 = pnand %p4883_p8, %p5189_p7 }
  0x9f   : > { %p4892_p13 = por %p4891_p12, %p4890_p11 }
  0xa0   : > { %p4886_p10 = pneg %p4885_p9 }
  0xa2   : > { %p4893_p0 = pnand %p4892_p13, %p4886_p10 }
  0xa4   : > { %4896 = shalt.err (!%p4893_p0)
}
  0xa5   : > { %4600 = dma.hbm_to_vmem [thread:$0]  (!%p5173_p5), %s6291_s11, 16, %s645_s2, [#allocation5]  }
  0xa6   : > { %s5015_s26 = smov [#allocation9]   ;;  %s5016_s3 = smov [#allocation12]  }
  0xa7   : > { %s675_s9 = sshll.u32 %s5015_s26, 4  ;;  %s706_s8 = sshll.u32 %s5016_s3, 4  ;;  %s676_s9 = int_to_ptr.vmem [resolvable:$true] %s675_s9  ;;  %s707_s8 = int_to_ptr.vmem [resolvable:$true] %s706_s8 }
  0xa8   : > { %s4897_s29 = scalar_lea.hbm %s6296_s16, 16 }
  0xa9   : > { %p4898_p1 = scmp.ne.s32.totalorder %s6296_s16, %s4897_s29  ;;  %p4904_p3 = scmp.lt.u32.totalorder %s4897_s29, %s6296_s16 }
  0xab   : > { %p4900_p4 = pnand %p4898_p1, %p5189_p7 }
  0xad   : > { %p4901_p2 = pneg %p4900_p4 }
  0xaf   : > { %p4906_p6 = pnand %p4904_p3, %p4901_p2 }
  0xb1   : > { %4909 = shalt.err (!%p4906_p6)
}
  0xb2   : > { %s4910_s2 = scalar_lea.vmem %s676_s9, 16  ;;  %s4917_s5 = scalar_lea.vmem %s676_s9, 32 }
  0xb3   : > { %p4911_p8 = scmp.ne.s32.totalorder %s676_s9, %s4910_s2  ;;  %p4918_p11 = scmp.lt.s32.totalorder %s676_s9, %s676_s9 }
  0xb4   : > { %p4919_p12 = scmp.lt.s32.totalorder %s4917_s5, %s4910_s2 }
  0xb5   : > { %p4913_p9 = pnand %p4911_p8, %p5189_p7 }
  0xb6   : > { %p4920_p13 = por %p4919_p12, %p4918_p11 }
  0xb7   : > { %p4914_p10 = pneg %p4913_p9 }
  0xb9   : > { %p4921_p0 = pnand %p4920_p13, %p4914_p10 }
  0xbb   : > { %4924 = shalt.err (!%p4921_p0)
}
  0xbc   : > { %4606 = dma.hbm_to_vmem [thread:$0]  (!%p5173_p5), %s6296_s16, 16, %s676_s9, [#allocation8]  }
  0xbd   : > { %s4925_s29 = scalar_lea.hbm %s6301_s21, 16 }
  0xbe   : > { %p4926_p1 = scmp.ne.s32.totalorder %s6301_s21, %s4925_s29  ;;  %p4932_p3 = scmp.lt.u32.totalorder %s4925_s29, %s6301_s21 }
  0xc0   : > { %p4928_p4 = pnand %p4926_p1, %p5189_p7 }
  0xc2   : > { %p4929_p2 = pneg %p4928_p4 }
  0xc4   : > { %p4934_p6 = pnand %p4932_p3, %p4929_p2 }
  0xc6   : > { %4937 = shalt.err (!%p4934_p6)
}
  0xc7   : > { %s4938_s2 = scalar_lea.vmem %s707_s8, 16  ;;  %s4945_s9 = scalar_lea.vmem %s707_s8, 32 }
  0xc8   : > { %p4939_p8 = scmp.ne.s32.totalorder %s707_s8, %s4938_s2  ;;  %p4946_p11 = scmp.lt.s32.totalorder %s707_s8, %s707_s8 }
  0xc9   : > { %p4947_p12 = scmp.lt.s32.totalorder %s4945_s9, %s4938_s2 }
  0xca   : > { %p4941_p9 = pnand %p4939_p8, %p5189_p7 }
  0xcb   : > { %p4948_p13 = por %p4947_p12, %p4946_p11 }
  0xcc   : > { %p4942_p10 = pneg %p4941_p9 }
  0xce   : > { %p4949_p0 = pnand %p4948_p13, %p4942_p10 }
  0xd0   : > { %4952 = shalt.err (!%p4949_p0)
}
  0xd1   : > { %4612 = dma.hbm_to_vmem [thread:$0]  (!%p5173_p5), %s6301_s21, 16, %s707_s8, [#allocation11]  }
  0xd2   : > { %s5017_s3 = smov [#allocation15]   ;;  %s4953_s19 = scalar_lea.hbm %s6303_s23, 16 }
  0xd3   : > { %s728_s27 = sshll.u32 %s5017_s3, 4  ;;  %p4954_p1 = scmp.ne.s32.totalorder %s6303_s23, %s4953_s19  ;;  %s729_s27 = int_to_ptr.vmem [resolvable:$true] %s728_s27 }
  0xd4   : > { %p4960_p3 = scmp.lt.u32.totalorder %s4953_s19, %s6303_s23 }
  0xd5   : > { %p4956_p4 = pnand %p4954_p1, %p5189_p7 }
  0xd7   : > { %p4957_p2 = pneg %p4956_p4 }
  0xd9   : > { %p4962_p6 = pnand %p4960_p3, %p4957_p2 }
  0xdb   : > { %4965 = shalt.err (!%p4962_p6)
}
  0xdc   : > { %s4966_s8 = scalar_lea.vmem %s729_s27, 16  ;;  %s4973_s9 = scalar_lea.vmem %s729_s27, 32 }
  0xdd   : > { %p4967_p8 = scmp.ne.s32.totalorder %s729_s27, %s4966_s8  ;;  %p4974_p11 = scmp.lt.s32.totalorder %s729_s27, %s729_s27 }
  0xde   : > { %p4975_p12 = scmp.lt.s32.totalorder %s4973_s9, %s4966_s8 }
  0xdf   : > { %p4969_p9 = pnand %p4967_p8, %p5189_p7 }
  0xe0   : > { %p4976_p13 = por %p4975_p12, %p4974_p11 }
  0xe1   : > { %p4970_p10 = pneg %p4969_p9 }
  0xe3   : > { %p4977_p0 = pnand %p4976_p13, %p4970_p10 }
  0xe5   : > { %4980 = shalt.err (!%p4977_p0)
}
  0xe6   : > { %4618 = dma.hbm_to_vmem [thread:$0]  (!%p5173_p5), %s6303_s23, 16, %s729_s27, [#allocation14]  }
  0xe7   : > { %p6331_p1 = scmp.ne.s32.totalorder %s6326_s6, 0 }
  0xe8   : > { %p6332_p4 = scmp.eq.s32.totalorder (!%p6331_p1), %s5156_s28, 0 }
  0xe9   : > { %770 = sbr.rel (%p6331_p1) target bundleno = 6489 (0x1959), region = 116 }
  0xf0   : > { %4986 = dma.done.wait (%p6332_p4), [#allocation3], 16   ;;  %p6333_p7 = pmov %p6332_p4 }
  0xf1   : > { %p6334_p2 = pmov %p6332_p4 }
  0xf2   : > { %4988 = vsyncadd (%p6333_p7), [#allocation3], 4294967280 }
  0xf3   : > { %4990 = dma.done.wait (%p6334_p2), [#allocation5], 32   ;;  %p6335_p3 = pmov %p6334_p2 }
  0xf4   : > { %p6336_p6 = pmov %p6334_p2 }
  0xf5   : > { %4992 = vsyncadd (%p6335_p3), [#allocation5], 4294967264 }
  0xf6   : > { %4994 = dma.done.wait (%p6336_p6), [#allocation8], 32   ;;  %p6337_p5 = pmov %p6334_p2 }
  0xf7   : > { %p6338_p8 = pmov %p6334_p2 }
  0xf8   : > { %4996 = vsyncadd (%p6337_p5), [#allocation8], 4294967264 }
  0xf9   : > { %4998 = dma.done.wait (%p6338_p8), [#allocation11], 32   ;;  %p6339_p9 = pmov %p6334_p2 }
  0xfa   : > { %p6340_p10 = pmov %p6334_p2 }
  0xfb   : > { %5000 = vsyncadd (%p6339_p9), [#allocation11], 4294967264 }
  0xfc   : > { %5002 = dma.done.wait (%p6340_p10), [#allocation14], 32   ;;  %p6341_p11 = pmov %p6334_p2 }
  0xfd   : > { %v5018_v0 = vmov 0.0   ;;  %v5019_v1 = vmov 0.0|0.0   ;;  %s6342_s0 = sld [smem:[#allocation26_spill]]  ;;  %p879_p12 = scmp.lt.s32.totalorder %s5156_s28, 1  ;;  %vm5020_vm0 = vmmov 0   ;;  %vm1127_vm1 = vcmask 261120  }
  0xfe   : > { %5004 = vsyncadd (%p6341_p11), [#allocation14], 4294967264  ;;  %1034 = vmatprep.mubr.f32.mxu0 %v5018_v0  ;;  %4331 = vmatprep.subr.bf16.mxu1 %v5019_v1  ;;  %s6343_s30 = sld [smem:[#allocation22_spill]]  ;;  %s6344_s26 = sld [smem:[#allocation27_spill]]  ;;  %vm1207_vm3 = vcmask 64512   ;;  %vm2452_vm5 = vcmask 1041408  }
  0xff   : > { %s6359_s28 = smov (!%p879_p12, %s5156_s28), 1  ;;  %4077 = vmatprep.mubr.msk.f32.mxu1 %vm5020_vm0, %v5018_v0  ;;  %s5021_s6 = smov 96   ;;  %vm5911_vm4 = vmpackc.low %vm1127_vm1, %vm1127_vm1  ;;  %vm5024_vm6 = vmmov 1   ;;  %vm2437_vm9 = vcmask 80896  }
 0x100   : > { %s5533_s24 = sshll.u32 %s6359_s28, 3  ;;  %s6345_s27 = sld [smem:[#allocation24_spill]]  ;;  %vm5924_vm7 = vmpackc.low %vm2452_vm5, %vm5024_vm6 }
 0x101   : > { %s6311_s29 = smov 64   ;;  %s5023_s19 = smov 32  }
 0x102   : > { %s6346_s2 = sld [smem:[#allocation28_spill]]  ;;  %s6347_s5 = sld [smem:[#allocation29_spill]] }
 0x103   : > { %v906_v2 = vld [vmem:[%s6342_s0 + $0x8] sm:$0xff]  ;;  %v909_v3 = vld [vmem:[%s6342_s0 + $0x20] sm:$0xff]  ;;  %v908_v6 = vld [vmem:[%s6342_s0 + $0x18] sm:$0xff]  ;;  %s6354_s25 = smov 64  }
 0x104   : > { %v905_v4 = vld [vmem:[%s6342_s0] sm:$0xff]  ;;  %v4299_v5 = vpack.c.bf16 %v909_v3, %v906_v2  ;;  %v912_v7 = vld [vmem:[%s6342_s0 + $0x38] sm:$0xff]  ;;  %v915_v8 = vld [vmem:[%s6342_s0 + $0x50] sm:$0xff]  ;;  %s882_s3 = scalar_lea.vmem %s6343_s30, %s5533_s24 }
 0x105   : > { %v4301_v9 = vpack.c.bf16 %v908_v6, %v905_v4  ;;  %v4303_v10 = vpack.c.bf16 %v915_v8, %v912_v7  ;;  %v911_v11 = vld [vmem:[%s6342_s0 + $0x30] sm:$0xff]  ;;  %v914_v12 = vld [vmem:[%s6342_s0 + $0x48] sm:$0xff]  ;;  %v921_v14 = vld [vmem:[%s6342_s0 + $0x80] sm:$0xff] }
 0x106   : > { %v918_v13 = vld [vmem:[%s6342_s0 + $0x68] sm:$0xff]  ;;  %4300 = vmatprep.subr.bf16.mxu0 %v4299_v5  ;;  %v4305_v15 = vpack.c.bf16 %v914_v12, %v911_v11  ;;  %v917_v17 = vld [vmem:[%s6342_s0 + $0x60] sm:$0xff]  ;;  %v920_v18 = vld [vmem:[%s6342_s0 + $0x78] sm:$0xff]  ;;  %s891_s7 = scalar_lea.vmem %s6345_s27, %s5533_s24 }
 0x107   : > { %4302 = vmatpush1.bf16.msra.mxu0 %v4301_v9  ;;  %v4307_v16 = vpack.c.bf16 %v921_v14, %v918_v13  ;;  %v924_v19 = vld [vmem:[%s6342_s0 + $0x98] sm:$0xff]  ;;  %v927_v20 = vld [vmem:[%s6342_s0 + $0xb0] sm:$0xff]  ;;  %v4309_v21 = vpack.c.bf16 %v920_v18, %v917_v17  ;;  %v926_v24 = vld [vmem:[%s6342_s0 + $0xa8] sm:$0xff]  ;;  %v955_v13 = vlaneseq }
 0x108   : > { %4304 = vmatprep.subr.bf16.mxu0 %v4303_v10  ;;  %v4311_v22 = vpack.c.bf16 %v927_v20, %v924_v19  ;;  %v923_v23 = vld [vmem:[%s6342_s0 + $0x90] sm:$0xff]  ;;  %v930_v25 = vld [vmem:[%s6342_s0 + $0xc8] sm:$0xff]  ;;  %v933_v26 = vld [vmem:[%s6342_s0 + $0xe0] sm:$0xff] }
 0x109   : > { %v907_v27 = vld [vmem:[%s6342_s0 + $0x10] sm:$0xff]  ;;  %v910_v28 = vld [vmem:[%s6342_s0 + $0x28] sm:$0xff]  ;;  %v913_v29 = vld [vmem:[%s6342_s0 + $0x40] sm:$0xff]  ;;  %v4313_v30 = vpack.c.bf16 %v926_v24, %v923_v23  ;;  %v4315_v33 = vpack.c.bf16 %v933_v26, %v930_v25  ;;  %v956_v14 = vshrl.u32 %v955_v13, 7 }
 0x10a   : > { %v4332_v31 = vpack.c.bf16 %v910_v28, %v907_v27  ;;  %v916_v32 = vld [vmem:[%s6342_s0 + $0x58] sm:$0xff]  ;;  %v929_v34 = vld [vmem:[%s6342_s0 + $0xc0] sm:$0xff]  ;;  %v939_v37 = vld [vmem:[%s6342_s0 + $0x110] sm:$0xff] }
 0x10b   : > { %4306 = vmatpush1.bf16.msra.mxu0 %v4305_v15  ;;  %v932_v35 = vld [vmem:[%s6342_s0 + $0xd8] sm:$0xff]  ;;  %v4335_v38 = vpack.c.bf16 %v916_v32, %v913_v29  ;;  %v919_v39 = vld [vmem:[%s6342_s0 + $0x70] sm:$0xff]  ;;  %v922_v40 = vld [vmem:[%s6342_s0 + $0x88] sm:$0xff]  ;;  %v5573_v15 = vsub.s32 1, %v956_v14  ;;  %v5578_v17 = vsub.s32 0, %v956_v14  ;;  %v965_v24 = vsub.s32 2, %v956_v14 }
 0x10c   : > { %4308 = vmatprep.subr.bf16.mxu0 %v4307_v16  ;;  %v936_v36 = vld [vmem:[%s6342_s0 + $0xf8] sm:$0xff]  ;;  %4333 = vmatpush3.bf16.msra.mxu1 %v4332_v31  ;;  %v4317_v41 = vpack.c.bf16 %v932_v35, %v929_v34  ;;  %v935_v43 = vld [vmem:[%s6342_s0 + $0xf0] sm:$0xff]  ;;  %v938_v44 = vld [vmem:[%s6342_s0 + $0x108] sm:$0xff]  ;;  %v4338_v47 = vpack.c.bf16 %v922_v40, %v919_v39 }
 0x10d   : > { %4334 = vmatprep.subr.bf16.mxu1 %v5019_v1  ;;  %v4319_v42 = vpack.c.bf16 %v939_v37, %v936_v36  ;;  %v942_v45 = vld [vmem:[%s6342_s0 + $0x128] sm:$0xff]  ;;  %v945_v46 = vld [vmem:[%s6342_s0 + $0x140] sm:$0xff]  ;;  %v928_v49 = vld [vmem:[%s6342_s0 + $0xb8] sm:$0xff]  ;;  %v4321_v50 = vpack.c.bf16 %v938_v44, %v935_v43 }
 0x10e   : > { %v925_v48 = vld [vmem:[%s6342_s0 + $0xa0] sm:$0xff]  ;;  %v4323_v51 = vpack.c.bf16 %v945_v46, %v942_v45  ;;  %v944_v53 = vld [vmem:[%s6342_s0 + $0x138] sm:$0xff]  ;;  %v951_v55 = vld [vmem:[%s6342_s0 + $0x170] sm:$0xff] }
 0x10f   : > { %4310 = vmatpush1.bf16.msra.mxu0 %v4309_v21  ;;  %v941_v52 = vld [vmem:[%s6342_s0 + $0x120] sm:$0xff]  ;;  %v948_v54 = vld [vmem:[%s6342_s0 + $0x158] sm:$0xff]  ;;  %v4341_v56 = vpack.c.bf16 %v928_v49, %v925_v48  ;;  %v931_v57 = vld [vmem:[%s6342_s0 + $0xd0] sm:$0xff] }
 0x110   : > { %4312 = vmatprep.subr.bf16.mxu0 %v4311_v22  ;;  %4336 = vmatpush3.bf16.msra.mxu1 %v4335_v38  ;;  %v934_v58 = vld [vmem:[%s6342_s0 + $0xe8] sm:$0xff]  ;;  %v4325_v59 = vpack.c.bf16 %v944_v53, %v941_v52  ;;  %v4327_v60 = vpack.c.bf16 %v951_v55, %v948_v54  ;;  %v947_v61 = vld [vmem:[%s6342_s0 + $0x150] sm:$0xff]  ;;  %v937_v2 = vld [vmem:[%s6342_s0 + $0x100] sm:$0xff] }
 0x111   : > { %4337 = vmatprep.subr.bf16.mxu1 %v5019_v1  ;;  %v950_v62 = vld [vmem:[%s6342_s0 + $0x168] sm:$0xff]  ;;  %v4344_v63 = vpack.c.bf16 %v934_v58, %v931_v57  ;;  %v940_v3 = vld [vmem:[%s6342_s0 + $0x118] sm:$0xff]  ;;  %v943_v6 = vld [vmem:[%s6342_s0 + $0x130] sm:$0xff] }
 0x112   : > { %v4329_v4 = vpack.c.bf16 %v950_v62, %v947_v61  ;;  %v4347_v5 = vpack.c.bf16 %v940_v3, %v937_v2  ;;  %v946_v7 = vld [vmem:[%s6342_s0 + $0x148] sm:$0xff]  ;;  %v5553_v8 = vld [vmem:[%s882_s3] sm:$0xff]  ;;  %v952_v11 = vld [vmem:[%s6342_s0 + $0x178] sm:$0xff]  ;;  %s6348_s3 = sld [smem:[#allocation23_spill]] }
 0x113   : > { %4314 = vmatpush1.bf16.msra.mxu0 %v4313_v30  ;;  %v4350_v9 = vpack.c.bf16 %v946_v7, %v943_v6  ;;  %v949_v10 = vld [vmem:[%s6342_s0 + $0x160] sm:$0xff]  ;;  %v1117_v57 = vld [vmem:[%s6346_s2 + $0x30] sm:$0xff]  ;;  %v1112_v2 = vld [vmem:[%s6346_s2 + $0x8] sm:$0xff] }
 0x114   : > { %4316 = vmatprep.subr.bf16.mxu0 %v4315_v33  ;;  %4339 = vmatpush3.bf16.msra.mxu1 %v4338_v47  ;;  %v4353_v12 = vpack.c.bf16 %v952_v11, %v949_v10  ;;  %v953_v16 = vld [vmem:[%s6344_s26] sm:$0x7]  ;;  %v1113_v6 = vld [vmem:[%s6346_s2 + $0x10] sm:$0xff]  ;;  %v1114_v7 = vld [vmem:[%s6346_s2 + $0x18] sm:$0xff] }
 0x115   : > { %4340 = vmatprep.subr.bf16.mxu1 %v5019_v1  ;;  %v962_v18 = vrot.slane %v953_v16, %v5573_v15  ;;  %v958_v20 = vrot.slane %v953_v16, %v5578_v17  ;;  %v966_v25 = vrot.slane %v953_v16, %v965_v24  ;;  %v5606_v31 = vld [vmem:[%s891_s7] sm:$0xff] }
 0x116   : > { %vm1205_vm2 = vcmp.eq.f32.partialorder %v5606_v31, 0.0  ;;  %v1115_v55 = vld [vmem:[%s6346_s2 + $0x20] sm:$0xff]  ;;  %v1124_v31 = vld [vmem:[%s6346_s2 + $0x68] sm:$0xff] }
 0x117   : > { %4318 = vmatpush1.bf16.msra.mxu0 %v4317_v41 }
 0x118   : > { %4320 = vmatprep.subr.bf16.mxu0 %v4319_v42  ;;  %4342 = vmatpush3.bf16.msra.mxu1 %v4341_v56  ;;  %v1116_v56 = vld [vmem:[%s6346_s2 + $0x28] sm:$0xff] }
 0x119   : > { %4343 = vmatprep.subr.bf16.mxu1 %v5019_v1  ;;  %v4356_v58 = vpack.c.bf16 %v1116_v56, %v1115_v55 }
 0x11b   : > { %4322 = vmatpush1.bf16.msra.mxu0 %v4321_v50 }
 0x11c   : > { %4324 = vmatprep.subr.bf16.mxu0 %v4323_v51  ;;  %4345 = vmatpush3.bf16.msra.mxu1 %v4344_v63  ;;  %v1111_v63 = vld [vmem:[%s6346_s2] sm:$0xff] }
 0x11d   : > { %4346 = vmatprep.subr.bf16.mxu1 %v5019_v1 }
 0x11f   : > { %4326 = vmatpush1.bf16.msra.mxu0 %v4325_v59  ;;  %v1118_v59 = vld [vmem:[%s6346_s2 + $0x38] sm:$0xff] }
 0x120   : > { %4328 = vmatprep.subr.bf16.mxu0 %v4327_v60  ;;  %4348 = vmatpush3.bf16.msra.mxu1 %v4347_v5  ;;  %v4359_v60 = vpack.c.bf16 %v1118_v59, %v1117_v57  ;;  %v1123_v59 = vld [vmem:[%s6346_s2 + $0x60] sm:$0xff] }
 0x121   : > { %4349 = vmatprep.subr.bf16.mxu1 %v5019_v1 }
 0x123   : > { %4330 = vmatpush1.bf16.msra.mxu0 %v4329_v4  ;;  %v4362_v4 = vpack.c.bf16 %v1112_v2, %v1111_v63 }
 0x124   : > { %4090 = vmatprep.subr.mxu0 %v5018_v0  ;;  %4351 = vmatpush3.bf16.msra.mxu1 %v4350_v9  ;;  %v4365_v9 = vpack.c.bf16 %v1114_v7, %v1113_v6 }
 0x125   : > { %4352 = vmatprep.subr.bf16.mxu1 %v5019_v1 }
 0x126   : > { %1035 = vmatmul.mubr.f32.vlgmr.msra.gmra.mrb[0].mxu0 %v5553_v8 }
 0x127   : > { %4092 = vmatprep.mubr.msk.f32.mxu0 %vm5020_vm0, %v5018_v0 }
 0x128   : > { %4354 = vmatpush3.bf16.msra.mxu1 %v4353_v12 }
 0x129   : > { %4080 = vmatprep.subr.mxu1 %v5018_v0 }
 0x12b   : > { %4078 = vmatmul.mubr.f32.vlgmr.msra.gmra.mrb[0].mxu1 %v5553_v8 }
 0x12c   : > { %4082 = vmatprep.mubr.msk.f32.mxu1 %vm5020_vm0, %v5018_v0 }
 0x1f9   : > { %v1036_v19 = vpop.f32.mrb[0].mxu0 }
 0x1fa   : > { %v1038_v21 = vpop.f32.mrb[1].mxu0  ;;  %v5584_v23 = vadd.f32 %v1036_v19, %v958_v20 }
 0x1fb   : > { %v1039_v22 = vadd.f32 %v1038_v21, %v962_v18 }
 0x1fd   : > { %1294 = vrot.lane.b32.xlu0 %v1039_v22, %s5021_s6  ;;  %4081 = vmatpush3.xpose.msk.msra.mxu1 %vm1127_vm1, %v1039_v22 }
 0x1fe   : > { %4085 = vmatprep.subr.mxu1 %v5018_v0  ;;  %v1107_v26 = vpop.f32.mrb[0].mxu1 }
 0x1ff   : > { %v5593_v27 = vadd.f32 %v1107_v26, %v966_v25  ;;  %v4079_v28 = vpop.f32.mrb[1].mxu1 }
 0x200   : > { %4083 = vmatmul.mubr.msk.f32.vlgmr.msra.gmra.mrb[2].mxu1 %vm1127_vm1, %v5584_v23 }
 0x201   : > { %1292 = vrot.lane.b32.xlu0 %v5584_v23, %s5021_s6  ;;  %4087 = vmatprep.mubr.msk.f32.mxu1 %vm5020_vm0, %v5018_v0 }
 0x202   : > { %4086 = vmatpush3.msra.mxu1 %v5593_v27 }
 0x203   : > { %4095 = vmatprep.subr.mxu1 %v5018_v0 }
 0x26f   : > { %v1295_v29 = vpop.permute.xlu0 %1294 }
 0x270   : > { %4091 = vmatpush3.xpose.msk.msra.mxu0 %vm1127_vm1, %v1295_v29 }
 0x271   : > { %4355 = vmatprep.subr.bf16.mxu0 %v5019_v1 }
 0x273   : > { %v1293_v30 = vpop.permute.xlu0 %1292 }
 0x274   : > { %4093 = vmatmul.mubr.msk.f32.vlgmr.msra.gmra.mrb[2].mxu0 %vm1127_vm1, %v1293_v30 }
 0x275   : > { %4108 = vmatprep.mubr.msk.f32.mxu0 %vm5020_vm0, %v5018_v0  ;;  %4357 = vmatpush3.bf16.msra.mxu0 %v4356_v58 }
 0x276   : > { %4358 = vmatprep.subr.bf16.mxu0 %v5019_v1 }
 0x279   : > { %4360 = vmatpush3.bf16.msra.mxu0 %v4359_v60  ;;  %v1125_v60 = vld [vmem:[%s6346_s2 + $0x70] sm:$0xff] }
 0x27a   : > { %4122 = vmatprep.subr.mxu0 %v5018_v0 }
 0x2d3   : > { %v1200_v32 = vpop.f32.mrb[2].mxu1 }
 0x2d4   : > { %v1204_v33 = vmul.f32 0.17677669, %v1200_v32  ;;  %v4084_v34 = vpop.f32.mrb[3].mxu1 }
 0x2d6   : > { %v1206_v35 = vsel %vm1205_vm2, -10000.0, %v1204_v33 }
 0x2d7   : > { %v1208_v36 = vsel %vm1207_vm3, %v1206_v35, -inf }
 0x2d8   : > { %1209 = vmax.xlane.f32.xlu1 %v1208_v36 }
 0x347   : > { %v1366_v37 = vpop.f32.mrb[2].mxu0 }
 0x348   : > { %v1370_v38 = vmul.f32 0.17677669, %v1366_v37  ;;  %v4094_v39 = vpop.f32.mrb[3].mxu0  ;;  %v1119_v37 = vld [vmem:[%s6346_s2 + $0x40] sm:$0xff] }
 0x349   : > { %v1121_v39 = vld [vmem:[%s6346_s2 + $0x50] sm:$0xff] }
 0x34a   : > { %v1371_v40 = vsel %vm1205_vm2, -10000.0, %v1370_v38  ;;  %v1120_v38 = vld [vmem:[%s6346_s2 + $0x48] sm:$0xff] }
 0x34b   : > { %v1372_v41 = vsel %vm1207_vm3, %v1371_v40, -inf }
 0x34c   : > { %1373 = vmax.xlane.f32.xlu1 %v1372_v41  ;;  %v1122_v41 = vld [vmem:[%s6346_s2 + $0x58] sm:$0xff] }
 0x365   : > { %v1210_v42 = vpop.xlane.xlu1 %1209 }
 0x366   : > { %v1211_v43 = vsub.f32 %v1206_v35, %v1210_v42  ;;  %v4371_v42 = vpack.c.bf16 %v1122_v41, %v1121_v39  ;;  %v2233_v39 = vld [vmem:[%s6292_s12 + $0x78] sm:$0xff]  ;;  %v2125_v41 = vld [vmem:[%s6290_s10] sm:$0xff] }
 0x368   : > { %v1212_v44 = vmul.f32 1.442695, %v1211_v43 }
 0x36a   : > { %4691 = vpow2.f32 %v1212_v44 }
 0x374   : > { %v4692_v45 = vpop.eup %4691 }
 0x375   : > { %v1214_v46 = vsel %vm1207_vm3, %v4692_v45, 0.0 }
 0x376   : > { %1215 = vadd.xlane.f32.xlu0 %v1214_v46 }
 0x38c   : > { %1697 = vrot.lane.b32.xlu0 %v5593_v27, %s6311_s29 }
 0x390   : > { %1849 = vrot.lane.b32.xlu0 %v1039_v22, %s5023_s19 }
 0x3d9   : > { %v1374_v47 = vpop.xlane.xlu1 %1373 }
 0x3da   : > { %v1375_v48 = vsub.f32 %v1371_v40, %v1374_v47  ;;  %v4368_v40 = vpack.c.bf16 %v1120_v38, %v1119_v37  ;;  %v2228_v37 = vld [vmem:[%s6292_s12 + $0x50] sm:$0xff]  ;;  %v2231_v38 = vld [vmem:[%s6292_s12 + $0x68] sm:$0xff] }
 0x3dc   : > { %v1376_v49 = vmul.f32 1.442695, %v1375_v48 }
 0x3de   : > { %4693 = vpow2.f32 %v1376_v49 }
 0x3e8   : > { %v4694_v50 = vpop.eup %4693 }
 0x3e9   : > { %v1378_v51 = vsel %vm1207_vm3, %v4694_v50, 0.0 }
 0x3ea   : > { %1379 = vadd.xlane.f32.xlu1 %v1378_v51 }
 0x3fb   : > { %1384 = vrot.lane.b32.xlu1 %v5593_v27, %s5021_s6 }
 0x3ff   : > { %1608 = vrot.lane.b32.xlu1 %v1039_v22, %s6311_s29 }
 0x403   : > { %v1216_v52 = vpop.xlane.xlu0 %1215  ;;  %1606 = vrot.lane.b32.xlu1 %v5584_v23, %s6311_s29 }
 0x404   : > { %4695 = vrcp.f32 %v1216_v52 }
 0x407   : > { %v1698_v11 = vpop.permute.xlu0 %1697 }
 0x40e   : > { %v4696_v53 = vpop.eup %4695 }
 0x40f   : > { %v1218_v54 = vmul.f32 %v4696_v53, %v4692_v45 }
 0x411   : > { %4088 = vmatmul.mubr.msk.f32.vlgmr.msra.gmra.mrb[4].mxu1 %vm1207_vm3, %v1218_v54 }
 0x412   : > { %4097 = vmatprep.mubr.msk.f32.mxu1 %vm5020_vm0, %v5018_v0 }
 0x477   : > { %v1380_v61 = vpop.xlane.xlu1 %1379 }
 0x478   : > { %4697 = vrcp.f32 %v1380_v61  ;;  %v4374_v61 = vpack.c.bf16 %v1124_v31, %v1123_v59 }
 0x47b   : > { %v1385_v62 = vpop.permute.xlu1 %1384 }
 0x47c   : > { %4096 = vmatpush3.msra.mxu1 %v1385_v62  ;;  %v1126_v62 = vld [vmem:[%s6346_s2 + $0x78] sm:$0xff] }
 0x47d   : > { %4361 = vmatprep.subr.bf16.mxu1 %v5019_v1  ;;  %v4377_v63 = vpack.c.bf16 %v1126_v62, %v1125_v60  ;;  %v2240_v62 = vld [vmem:[%s6292_s12 + $0xb0] sm:$0xff] }
 0x47f   : > { %v1609_v13 = vpop.permute.xlu1 %1608 }
 0x482   : > { %v4698_v3 = vpop.eup %4697 }
 0x483   : > { %v1382_v5 = vmul.f32 %v4698_v3, %v4694_v50  ;;  %v1607_v18 = vpop.permute.xlu1 %1606 }
 0x485   : > { %4098 = vmatmul.mubr.msk.f32.vlgmr.msra.gmra.mrb[6].mxu1 %vm1207_vm3, %v1382_v5 }
 0x486   : > { %4363 = vmatpush3.bf16.msra.mxu1 %v4362_v4  ;;  %4119 = vmatprep.mubr.msk.f32.mxu1 %vm5020_vm0, %v5018_v0 }
 0x487   : > { %4364 = vmatprep.subr.bf16.mxu1 %v5019_v1 }
 0x48a   : > { %4366 = vmatpush3.bf16.msra.mxu1 %v4365_v9 }
 0x48b   : > { %4127 = vmatprep.subr.mxu1 %v5018_v0 }
 0x4e4   : > { %v1288_v10 = vpop.f32.mrb[4].mxu1 }
 0x4e5   : > { %v4089_v12 = vpop.f32.mrb[5].mxu1  ;;  %4120 = vmatmul.mubr.msk.f32.vlgmr.msra.gmra.mrb[8].mxu1 %vm1127_vm1, %v1288_v10 }
 0x4e6   : > { %4128 = vmatpush3.msra.mxu1 %v1698_v11  ;;  %4129 = vmatprep.mubr.msk.f32.mxu1 %vm5020_vm0, %v5018_v0  ;;  %v3859_v12 = vld [vmem:[%s6347_s5] ss:$0 sm:$0xff]  ;;  %s3895_s5 = sshll.u32 %s6359_s28, 4 }
 0x4e7   : > { %4143 = vmatprep.subr.mxu1 %v5018_v0  ;;  %s887_s27 = scalar_lea.vmem %s6348_s3, %s3895_s5  ;;  %s6355_s3 = sld [smem:[#allocation32_spill]] }
 0x558   : > { %v1456_v14 = vpop.f32.mrb[6].mxu1 }
 0x559   : > { %v4099_v16 = vpop.f32.mrb[7].mxu1  ;;  %4109 = vmatmul.mubr.msk.f32.vlgmr.msra.gmra.mrb[4].mxu0 %vm1127_vm1, %v1456_v14 }
 0x55a   : > { %4123 = vmatpush3.xpose.msk.msra.mxu0 %vm1127_vm1, %v1609_v13  ;;  %4124 = vmatprep.mubr.msk.f32.mxu0 %vm5020_vm0, %v5018_v0 }
 0x55b   : > { %4367 = vmatprep.subr.bf16.mxu0 %v5019_v1 }
 0x55d   : > { %4125 = vmatmul.mubr.msk.f32.vlgmr.msra.gmra.mrb[6].mxu0 %vm1127_vm1, %v1607_v18 }
 0x55e   : > { %4140 = vmatprep.mubr.msk.f32.mxu0 %vm5020_vm0, %v5018_v0  ;;  %4369 = vmatpush3.bf16.msra.mxu0 %v4368_v40 }
 0x55f   : > { %4370 = vmatprep.subr.bf16.mxu0 %v5019_v1 }
 0x562   : > { %4372 = vmatpush3.bf16.msra.mxu0 %v4371_v42  ;;  %v2126_v42 = vld [vmem:[%s6290_s10 + $0x8] sm:$0xff] }
 0x563   : > { %4373 = vmatprep.subr.bf16.mxu0 %v5019_v1 }
 0x5b8   : > { %v1602_v19 = vpop.f32.mrb[8].mxu1 }
 0x5b9   : > { %v4121_v20 = vpop.f32.mrb[9].mxu1 }
 0x5ba   : > { %v2221_v20 = vld [vmem:[%s6292_s12 + $0x18] sm:$0xff] }
 0x62c   : > { %v1529_v21 = vpop.f32.mrb[4].mxu0 }
 0x62d   : > { %v5672_v22 = vadd.f32 %v1602_v19, %v1529_v21  ;;  %v4110_v24 = vpop.f32.mrb[5].mxu0  ;;  %v2219_v19 = vld [vmem:[%s6292_s12 + $0x8] sm:$0xff]  ;;  %v2218_v21 = vld [vmem:[%s6292_s12] sm:$0xff] }
 0x62e   : > { %v2223_v24 = vld [vmem:[%s6292_s12 + $0x28] sm:$0xff] }
 0x630   : > { %v1680_v25 = vpop.f32.mrb[6].mxu0 }
 0x631   : > { %v1684_v26 = vmul.f32 0.17677669, %v1680_v25  ;;  %v4126_v28 = vpop.f32.mrb[7].mxu0  ;;  %v2225_v25 = vld [vmem:[%s6292_s12 + $0x38] sm:$0xff] }
 0x632   : > { %v4407_v28 = vpack.c.bf16 %v2225_v25, %v2223_v24  ;;  %v902_v25 = vld [vmem:[%s887_s27 + $0x8] sm:$0x3] }
 0x633   : > { %v1685_v29 = vsel %vm1205_vm2, -10000.0, %v1684_v26 }
 0x634   : > { %v1686_v30 = vsel %vm1207_vm3, %v1685_v29, -inf }
 0x635   : > { %1687 = vmax.xlane.f32.xlu1 %v1686_v30  ;;  %v2224_v30 = vld [vmem:[%s6292_s12 + $0x30] sm:$0xff] }
 0x6c2   : > { %v1688_v32 = vpop.xlane.xlu1 %1687 }
 0x6c3   : > { %v1689_v33 = vsub.f32 %v1685_v29, %v1688_v32  ;;  %v2222_v29 = vld [vmem:[%s6292_s12 + $0x20] sm:$0xff]  ;;  %v2227_v32 = vld [vmem:[%s6292_s12 + $0x48] sm:$0xff] }
 0x6c5   : > { %v1690_v34 = vmul.f32 1.442695, %v1689_v33  ;;  %v2229_v33 = vld [vmem:[%s6292_s12 + $0x58] sm:$0xff] }
 0x6c7   : > { %4699 = vpow2.f32 %v1690_v34  ;;  %v4409_v34 = vpack.c.bf16 %v2224_v30, %v2222_v29  ;;  %v2136_v30 = vld [vmem:[%s6290_s10 + $0x58] sm:$0xff] }
 0x6d1   : > { %v4700_v35 = vpop.eup %4699 }
 0x6d2   : > { %v1692_v36 = vsel %vm1207_vm3, %v4700_v35, 0.0 }
 0x6d3   : > { %1693 = vadd.xlane.f32.xlu0 %v1692_v36  ;;  %v2226_v36 = vld [vmem:[%s6292_s12 + $0x40] sm:$0xff] }
 0x6d4   : > { %v4413_v40 = vpack.c.bf16 %v2228_v37, %v2226_v36  ;;  %v2139_v36 = vld [vmem:[%s6290_s10 + $0x70] sm:$0xff]  ;;  %v2140_v37 = vld [vmem:[%s6290_s10 + $0x78] sm:$0xff] }
 0x6e9   : > { %1847 = vrot.lane.b32.xlu0 %v5584_v23, %s5023_s19  ;;  %v1850_v23 = vpop.permute.xlu0 %1849 }
 0x760   : > { %v1694_v43 = vpop.xlane.xlu0 %1693 }
 0x761   : > { %4701 = vrcp.f32 %v1694_v43  ;;  %v2230_v43 = vld [vmem:[%s6292_s12 + $0x60] sm:$0xff] }
 0x764   : > { %v1848_v46 = vpop.permute.xlu0 %1847 }
 0x76b   : > { %v4702_v44 = vpop.eup %4701 }
 0x76c   : > { %v1696_v45 = vmul.f32 %v4702_v44, %v4700_v35  ;;  %v4411_v35 = vpack.c.bf16 %v2229_v33, %v2227_v32  ;;  %v2232_v44 = vld [vmem:[%s6292_s12 + $0x70] sm:$0xff]  ;;  %v2137_v33 = vld [vmem:[%s6290_s10 + $0x60] sm:$0xff] }
 0x76e   : > { %4130 = vmatmul.mubr.msk.f32.vlgmr.msra.gmra.mrb[10].mxu1 %vm1207_vm3, %v1696_v45  ;;  %v2235_v45 = vld [vmem:[%s6292_s12 + $0x88] sm:$0xff] }
 0x76f   : > { %4144 = vmatpush3.xpose.msk.msra.mxu1 %vm1127_vm1, %v1850_v23  ;;  %4145 = vmatprep.mubr.msk.f32.mxu1 %vm5020_vm0, %v5018_v0  ;;  %v4415_v23 = vpack.c.bf16 %v2233_v39, %v2231_v38  ;;  %v4401_v38 = vpack.c.bf16 %v2140_v37, %v2139_v36  ;;  %v2250_v39 = vld [vmem:[%s6293_s13] sm:$0x3] }
 0x770   : > { %4148 = vmatprep.subr.mxu1 %v5018_v0 }
 0x772   : > { %4146 = vmatmul.mubr.msk.f32.vlgmr.msra.gmra.mrb[12].mxu1 %vm1127_vm1, %v1848_v46  ;;  %v4380_v46 = vpack.c.bf16 %v2126_v42, %v2125_v41 }
 0x773   : > { %4150 = vmatprep.mubr.msk.f32.mxu1 %vm5020_vm0, %v5018_v0 }
 0x841   : > { %v1769_v47 = vpop.f32.mrb[10].mxu1 }
 0x842   : > { %v4131_v48 = vpop.f32.mrb[11].mxu1  ;;  %4141 = vmatmul.mubr.msk.f32.vlgmr.msra.gmra.mrb[8].mxu0 %vm1127_vm1, %v1769_v47  ;;  %v2237_v47 = vld [vmem:[%s6292_s12 + $0x98] sm:$0xff] }
 0x843   : > { %4161 = vmatprep.mubr.msk.f32.mxu0 %vm5020_vm0, %v5018_v0  ;;  %4375 = vmatpush3.bf16.msra.mxu0 %v4374_v61  ;;  %v2127_v48 = vld [vmem:[%s6290_s10 + $0x10] sm:$0xff]  ;;  %v2238_v61 = vld [vmem:[%s6292_s12 + $0xa0] sm:$0xff] }
 0x844   : > { %4376 = vmatprep.subr.bf16.mxu0 %v5019_v1 }
 0x845   : > { %v1921_v49 = vpop.f32.mrb[12].mxu1 }
 0x846   : > { %v1925_v50 = vmul.f32 0.17677669, %v1921_v49  ;;  %v4147_v51 = vpop.f32.mrb[13].mxu1  ;;  %v2128_v49 = vld [vmem:[%s6290_s10 + $0x18] sm:$0xff] }
 0x847   : > { %4378 = vmatpush3.bf16.msra.mxu0 %v4377_v63  ;;  %v4417_v51 = vpack.c.bf16 %v2232_v44, %v2230_v43  ;;  %v2243_v63 = vld [vmem:[%s6292_s12 + $0xc8] sm:$0xff] }
 0x848   : > { %v1926_v52 = vsel %vm1205_vm2, -10000.0, %v1925_v50  ;;  %v4383_v50 = vpack.c.bf16 %v2128_v49, %v2127_v48  ;;  %v3861_v49 = vld [vmem:[#allocation4] ss:$0 sm:$0xff] }
 0x849   : > { %v1927_v53 = vsel %vm1207_vm3, %v1926_v52, -inf }
 0x84a   : > { %1928 = vmax.xlane.f32.xlu0 %v1927_v53  ;;  %v2130_v53 = vld [vmem:[%s6290_s10 + $0x28] sm:$0xff] }
 0x8d7   : > { %v1929_v54 = vpop.xlane.xlu0 %1928 }
 0x8d8   : > { %v1930_v55 = vsub.f32 %v1926_v52, %v1929_v54  ;;  %v2129_v52 = vld [vmem:[%s6290_s10 + $0x20] sm:$0xff]  ;;  %v4419_v54 = vpack.c.bf16 %v2237_v47, %v2235_v45 }
 0x8d9   : > { %v4386_v59 = vpack.c.bf16 %v2130_v53, %v2129_v52  ;;  %v3860_v47 = vld [vmem:[#allocation2] ss:$0 sm:$0xff]  ;;  %v2255_v52 = vrot.slane %v2250_v39, %v5578_v17 }
 0x8da   : > { %v1931_v56 = vmul.f32 1.442695, %v1930_v55  ;;  %v2234_v55 = vld [vmem:[%s6292_s12 + $0x80] sm:$0xff] }
 0x8dc   : > { %4703 = vpow2.f32 %v1931_v56  ;;  %v2236_v56 = vld [vmem:[%s6292_s12 + $0x90] sm:$0xff] }
 0x8dd   : > { %v4421_v31 = vpack.c.bf16 %v2236_v56, %v2234_v55 }
 0x8e6   : > { %v4704_v57 = vpop.eup %4703 }
 0x8e7   : > { %v1933_v58 = vsel %vm1207_vm3, %v4704_v57, 0.0 }
 0x8e8   : > { %1934 = vadd.xlane.f32.xlu1 %v1933_v58  ;;  %v2241_v58 = vld [vmem:[%s6292_s12 + $0xb8] sm:$0xff] }
 0x8f9   : > { %1938 = vrot.lane.b32.xlu1 %v5593_v27, %s5023_s19 }
 0x915   : > { %v1842_v27 = vpop.f32.mrb[8].mxu0 }
 0x916   : > { %v1846_v2 = vadd.f32 %v1842_v27, %v5672_v22  ;;  %v4142_v3 = vpop.f32.mrb[9].mxu0  ;;  %v4403_v22 = vpack.c.bf16 %v2221_v20, %v2219_v19  ;;  %v2245_v27 = vld [vmem:[%s6292_s12 + $0xd8] sm:$0xff] }
 0x917   : > { %v4427_v3 = vpack.c.bf16 %v2245_v27, %v2243_v63 }
 0x918   : > { %4404 = vmatprep.subr.bf16.mxu0 %v4403_v22  ;;  %v2131_v22 = vld [vmem:[%s6290_s10 + $0x30] sm:$0xff] }
 0x975   : > { %v1935_v4 = vpop.xlane.xlu1 %1934 }
 0x976   : > { %4705 = vrcp.f32 %v1935_v4  ;;  %v2242_v4 = vld [vmem:[%s6292_s12 + $0xc0] sm:$0xff] }
 0x979   : > { %v1939_v5 = vpop.permute.xlu1 %1938 }
 0x97a   : > { %4149 = vmatpush3.msra.mxu1 %v1939_v5  ;;  %v2244_v5 = vld [vmem:[%s6292_s12 + $0xd0] sm:$0xff] }
 0x97b   : > { %4379 = vmatprep.subr.bf16.mxu1 %v5019_v1 }
 0x980   : > { %v4706_v6 = vpop.eup %4705 }
 0x981   : > { %v1937_v7 = vmul.f32 %v4706_v6, %v4704_v57  ;;  %v2239_v57 = vld [vmem:[%s6292_s12 + $0xa8] sm:$0xff] }
 0x982   : > { %v4423_v60 = vpack.c.bf16 %v2241_v58, %v2239_v57  ;;  %v2247_v6 = vld [vmem:[%s6292_s12 + $0xe8] sm:$0xff] }
 0x983   : > { %4151 = vmatmul.mubr.msk.f32.vlgmr.msra.gmra.mrb[14].mxu1 %vm1207_vm3, %v1937_v7  ;;  %v2249_v7 = vld [vmem:[%s6292_s12 + $0xf8] sm:$0xff] }
 0x984   : > { %4196 = vmatprep.mubr.msk.f32.mxu1 %vm5020_vm0, %v5018_v0  ;;  %4381 = vmatpush3.bf16.msra.mxu1 %v4380_v46 }
 0x985   : > { %4382 = vmatprep.subr.bf16.mxu1 %v5019_v1 }
 0x988   : > { %4384 = vmatpush3.bf16.msra.mxu1 %v4383_v50 }
 0x989   : > { %4385 = vmatprep.subr.bf16.mxu1 %v5019_v1 }
 0x98c   : > { %4387 = vmatpush3.bf16.msra.mxu1 %v4386_v59 }
 0x98d   : > { %4388 = vmatprep.subr.bf16.mxu1 %v5019_v1 }
 0xa56   : > { %v2010_v9 = vpop.f32.mrb[14].mxu1 }
 0xa57   : > { %v4152_v10 = vpop.f32.mrb[15].mxu1  ;;  %4162 = vmatmul.mubr.msk.f32.vlgmr.msra.gmra.mrb[10].mxu0 %vm1127_vm1, %v2010_v9  ;;  %v4429_v9 = vpack.c.bf16 %v2244_v5, %v2242_v4 }
 0xa58   : > { %2326 = vmatprep.mubr.f32.mxu0 %v5018_v0  ;;  %v4431_v10 = vpack.c.bf16 %v2249_v7, %v2247_v6 }
 0xb2a   : > { %v2083_v11 = vpop.f32.mrb[10].mxu0 }
 0xb2b   : > { %v2087_v13 = vadd.f32 %v2083_v11, %v1846_v2  ;;  %v4163_v14 = vpop.f32.mrb[11].mxu0  ;;  %v4425_v2 = vpack.c.bf16 %v2240_v62, %v2238_v61  ;;  %v2246_v11 = vld [vmem:[%s6292_s12 + $0xe0] sm:$0xff] }
 0xb2c   : > { %v901_v14 = vld [vmem:[%s887_s27] sm:$0xff]  ;;  %s6353_s27 = sld [smem:[#allocation25_spill]] }
 0xb2d   : > { %v2095_v16 = vadd.f32 %v3859_v12, %v2087_v13  ;;  %v2248_v12 = vld [vmem:[%s6292_s12 + $0xf0] sm:$0xff] }
 0xb2e   : > { %v4433_v13 = vpack.c.bf16 %v2248_v12, %v2246_v11 }
 0xb2f   : > { %v5735_v18 = vadd.f32 %v2095_v16, %v5553_v8  ;;  %v2220_v8 = vld [vmem:[%s6292_s12 + $0x10] sm:$0xff] }
 0xb30   : > { %v4405_v26 = vpack.c.bf16 %v2220_v8, %v2218_v21  ;;  %v2132_v8 = vld [vmem:[%s6290_s10 + $0x38] sm:$0xff] }
 0xb31   : > { %2099 = vadd.xlane.f32.xlu1 %v5735_v18  ;;  %v4389_v24 = vpack.c.bf16 %v2132_v8, %v2131_v22 }
 0xb32   : > { %4406 = vmatpush1.bf16.msra.mxu0 %v4405_v26  ;;  %v2134_v26 = vld [vmem:[%s6290_s10 + $0x48] sm:$0xff]  ;;  %s895_s7 = scalar_lea.vmem %s6353_s27, %s5533_s24 }
 0xb33   : > { %4408 = vmatprep.subr.bf16.mxu0 %v4407_v28  ;;  %4390 = vmatpush3.bf16.msra.mxu1 %v4389_v24  ;;  %v2135_v28 = vld [vmem:[%s6290_s10 + $0x50] sm:$0xff] }
 0xb34   : > { %4391 = vmatprep.subr.bf16.mxu1 %v5019_v1  ;;  %v4395_v32 = vpack.c.bf16 %v2136_v30, %v2135_v28 }
 0xb36   : > { %4410 = vmatpush1.bf16.msra.mxu0 %v4409_v34  ;;  %v2138_v34 = vld [vmem:[%s6290_s10 + $0x68] sm:$0xff] }
 0xb37   : > { %4412 = vmatprep.subr.bf16.mxu0 %v4411_v35  ;;  %v4398_v35 = vpack.c.bf16 %v2138_v34, %v2137_v33 }
 0xb3a   : > { %4414 = vmatpush1.bf16.msra.mxu0 %v4413_v40  ;;  %v2259_v40 = vrot.slane %v2250_v39, %v5573_v15  ;;  %v2344_v39 = vld [vmem:[%s6294_s14 + $0x28] sm:$0xff] }
 0xb3b   : > { %4416 = vmatprep.subr.bf16.mxu0 %v4415_v23 }
 0xb3e   : > { %4418 = vmatpush1.bf16.msra.mxu0 %v4417_v51 }
 0xb3f   : > { %4420 = vmatprep.subr.bf16.mxu0 %v4419_v54 }
 0xb42   : > { %4422 = vmatpush1.bf16.msra.mxu0 %v4421_v31 }
 0xb43   : > { %4424 = vmatprep.subr.bf16.mxu0 %v4423_v60 }
 0xb46   : > { %4426 = vmatpush1.bf16.msra.mxu0 %v4425_v2 }
 0xb47   : > { %4428 = vmatprep.subr.bf16.mxu0 %v4427_v3  ;;  %v3862_v3 = vld [vmem:[#allocation6] ss:$0 sm:$0xff] }
 0xb4a   : > { %4430 = vmatpush1.bf16.msra.mxu0 %v4429_v9 }
 0xb4b   : > { %4432 = vmatprep.subr.bf16.mxu0 %v4431_v10  ;;  %v5942_v10 = vld [vmem:[%s895_s7] sm:$0xff]  ;;  %s6356_s7 = sld [smem:[#allocation33_spill]] }
 0xb4c   : > { %vm2435_vm8 = vcmp.eq.f32.partialorder %v5942_v10, 0.0 }
 0xb4e   : > { %4434 = vmatpush1.bf16.msra.mxu0 %v4433_v13 }
 0xb4f   : > { %4443 = vmatprep.subr.bf16.mxu0 %v5019_v1 }
 0xb51   : > { %2327 = vmatmul.mubr.f32.vlgmr.msra.gmra.mrb[12].mxu0 %v901_v14  ;;  %s899_s1 = scalar_lea.vmem %s6356_s7, %s5533_s24 }
 0xb52   : > { %2332 = vmatprep.mubr.f32.mxu0 %v5018_v0 }
 0xb55   : > { %2333 = vmatmul.mubr.f32.gmra.mrb[14].mxu0 %v902_v25 }
 0xb56   : > { %4217 = vmatprep.mubr.msk.f32.mxu0 %vm5020_vm0, %v5018_v0 }
 0xbbe   : > { %v2100_v16 = vpop.xlane.xlu1 %2099 }
 0xbbf   : > { %v2102_v19 = vmul.f32 0.0078125, %v2100_v16 }
 0xbc1   : > { %v2103_v20 = vsub.f32 %v5735_v18, %v2102_v19  ;;  %v2133_v18 = vld [vmem:[%s6290_s10 + $0x40] sm:$0xff] }
 0xbc2   : > { %v4392_v29 = vpack.c.bf16 %v2134_v26, %v2133_v18 }
 0xbc3   : > { %v2104_v21 = vmul.f32 %v2103_v20, %v2103_v20 }
 0xbc4   : > { %4393 = vmatpush3.bf16.msra.mxu1 %v4392_v29 }
 0xbc5   : > { %2105 = vadd.xlane.f32.xlu0 %v2104_v21  ;;  %4394 = vmatprep.subr.bf16.mxu1 %v5019_v1 }
 0xbc8   : > { %4396 = vmatpush3.bf16.msra.mxu1 %v4395_v32 }
 0xbc9   : > { %4397 = vmatprep.subr.bf16.mxu1 %v5019_v1 }
 0xbcc   : > { %4399 = vmatpush3.bf16.msra.mxu1 %v4398_v35 }
 0xbcd   : > { %4400 = vmatprep.subr.bf16.mxu1 %v5019_v1 }
 0xbd0   : > { %4402 = vmatpush3.bf16.msra.mxu1 %v4401_v38  ;;  %v2343_v38 = vld [vmem:[%s6294_s14 + $0x20] sm:$0xff] }
 0xbd1   : > { %4435 = vmatprep.subr.bf16.mxu1 %v5019_v1 }
 0xc24   : > { %v2328_v41 = vpop.f32.mrb[12].mxu0 }
 0xc25   : > { %v2330_v42 = vpop.f32.mrb[13].mxu0  ;;  %v2329_v53 = vadd.f32 %v2328_v41, %v2255_v52  ;;  %v4452_v41 = vpack.c.bf16 %v2344_v39, %v2343_v38 }
 0xc26   : > { %v2331_v23 = vadd.f32 %v2330_v42, %v2259_v40  ;;  %v2346_v42 = vld [vmem:[%s6294_s14 + $0x38] sm:$0xff] }
 0xc28   : > { %v2334_v54 = vpop.f32.mrb[14].mxu0 }
 0xc29   : > { %v2335_v55 = vadd.f32 %v2334_v54, %v2255_v52  ;;  %v2336_v56 = vpop.f32.mrb[15].mxu0  ;;  %v2341_v54 = vld [vmem:[%s6294_s14 + $0x10] sm:$0xff] }
 0xc2a   : > { %v2337_v57 = vadd.f32 %v2336_v56, %v2259_v40  ;;  %v2345_v40 = vld [vmem:[%s6294_s14 + $0x30] sm:$0xff] }
 0xc2b   : > { %v4436_v59 = vpack.c.bf16 %v2335_v55, %v2329_v53  ;;  %v4661_v31 = vpack.i.bf16 %v2335_v55, %v2329_v53  ;;  %v2342_v55 = vld [vmem:[%s6294_s14 + $0x18] sm:$0xff] }
 0xc2c   : > { %v4440_v60 = vpack.c.bf16 %v2337_v57, %v2331_v23  ;;  %v5915_v61 = vpack.i.bf16 %v2337_v57, %v2331_v23  ;;  %v4455_v23 = vpack.c.bf16 %v2346_v42, %v2345_v40  ;;  %v4461_v56 = vpack.c.bf16 %v2342_v55, %v2341_v54 }
 0xc2d   : > { %4662 = vrot.lane.b32.xlu0 %v4661_v31, %s5021_s6 }
 0xc52   : > { %v2106_v43 = vpop.xlane.xlu0 %2105 }
 0xc53   : > { %v2107_v44 = vmul.f32 0.0078125, %v2106_v43 }
 0xc55   : > { %v2108_v45 = vadd.f32 1e-12, %v2107_v44 }
 0xc57   : > { %4707 = vrsqrt.f32 %v2108_v45 }
 0xc61   : > { %v4708_v46 = vpop.eup %4707 }
 0xc62   : > { %v2110_v48 = vmul.f32 %v4708_v46, %v2103_v20 }
 0xc64   : > { %v2117_v50 = vmul.f32 %v3860_v47, %v2110_v48  ;;  %v2339_v48 = vld [vmem:[%s6294_s14] sm:$0xff] }
 0xc66   : > { %v5903_v51 = vadd.f32 %v3861_v49, %v2117_v50  ;;  %v2340_v49 = vld [vmem:[%s6294_s14 + $0x8] sm:$0xff] }
 0xc67   : > { %v4458_v52 = vpack.c.bf16 %v2340_v49, %v2339_v48  ;;  %v2350_v48 = vld [vmem:[%s6294_s14 + $0x58] sm:$0xff] }
 0xc68   : > { %4197 = vmatmul.mubr.f32.vlgmr.msra.gmra.mrb[16].mxu1 %v5903_v51 }
 0xc69   : > { %4203 = vmatprep.mubr.msk.f32.mxu1 %vm5020_vm0, %v5018_v0  ;;  %4438 = vmatpush3.bf16.xpose.msk.msra.mxu1 %vm5911_vm4, %v4436_v59 }
 0xc6a   : > { %4439 = vmatprep.subr.bf16.mxu1 %v5019_v1 }
 0xc9f   : > { %v4663_v62 = vpop.permute.xlu0 %4662 }
 0xca0   : > { %v4665_v63 = vunpack.i.h.bf16 %v4663_v62  ;;  %v4664_v27 = vunpack.i.l.bf16 %v4663_v62 }
 0xca2   : > { %v4444_v2 = vpack.c.bf16 %v4665_v63, %v4664_v27 }
 0xca4   : > { %4446 = vmatpush3.bf16.xpose.msk.msra.mxu0 %vm5911_vm4, %v4444_v2 }
 0xca5   : > { %4451 = vmatprep.subr.bf16.mxu0 %v5019_v1 }
 0xd3b   : > { %v2214_v4 = vpop.f32.mrb[16].mxu1 }
 0xd3c   : > { %v2215_v5 = vadd.f32 %v3862_v3, %v2214_v4  ;;  %v4198_v6 = vpop.f32.mrb[17].mxu1 }
 0xd3e   : > { %2526 = vrot.lane.b32.xlu0 %v2215_v5, %s5021_s6  ;;  %4204 = vmatmul.mubr.msk.f32.vlgmr.msra.gmra.mrb[18].mxu1 %vm1127_vm1, %v2215_v5 }
 0xd3f   : > { %4442 = vmatpush3.bf16.msk.msra.mxu1 %vm5924_vm7, %v4440_v60  ;;  %4210 = vmatprep.mubr.msk.f32.mxu1 %vm5020_vm0, %v5018_v0 }
 0xd40   : > { %4447 = vmatprep.subr.bf16.mxu1 %v5019_v1 }
 0xdb0   : > { %v2527_v9 = vpop.permute.xlu0 %2526 }
 0xdb1   : > { %4218 = vmatmul.mubr.msk.f32.vlgmr.msra.gmra.mrb[16].mxu0 %vm1127_vm1, %v2527_v9 }
 0xdb2   : > { %4235 = vmatprep.mubr.msk.f32.mxu0 %vm5020_vm0, %v5018_v0  ;;  %4453 = vmatpush3.bf16.msra.mxu0 %v4452_v41 }
 0xdb3   : > { %4454 = vmatprep.subr.bf16.mxu0 %v5019_v1 }
 0xdb6   : > { %4456 = vmatpush3.bf16.msra.mxu0 %v4455_v23 }
 0xdb7   : > { %4463 = vmatprep.subr.bf16.mxu0 %v5019_v1 }
 0xe11   : > { %v2430_v11 = vpop.f32.mrb[18].mxu1 }
 0xe12   : > { %v2434_v12 = vmul.f32 0.17677669, %v2430_v11  ;;  %v4205_v13 = vpop.f32.mrb[19].mxu1 }
 0xe14   : > { %v2436_v14 = vsel %vm2435_vm8, -10000.0, %v2434_v12 }
 0xe15   : > { %v2438_v16 = vsel %vm2437_vm9, %v2436_v14, -inf }
 0xe16   : > { %2439 = vmax.xlane.f32.xlu1 %v2438_v16 }
 0xe84   : > { %v2604_v19 = vpop.f32.mrb[16].mxu0 }
 0xe85   : > { %v2608_v20 = vmul.f32 0.17677669, %v2604_v19  ;;  %v4219_v21 = vpop.f32.mrb[17].mxu0 }
 0xe87   : > { %v2609_v22 = vsel %vm2435_vm8, -10000.0, %v2608_v20 }
 0xe88   : > { %v2610_v8 = vsel %vm2437_vm9, %v2609_v22, -inf }
 0xe89   : > { %2611 = vmax.xlane.f32.xlu0 %v2610_v8 }
 0xe9f   : > { %4677 = vrot.lane.b32.xlu0 %v4661_v31, %s5023_s19 }
 0xea3   : > { %v2440_v24 = vpop.xlane.xlu1 %2439 }
 0xea4   : > { %v2441_v25 = vsub.f32 %v2436_v14, %v2440_v24 }
 0xea6   : > { %v2442_v18 = vmul.f32 1.442695, %v2441_v25 }
 0xea8   : > { %4709 = vpow2.f32 %v2442_v18 }
 0xeb2   : > { %v4710_v26 = vpop.eup %4709 }
 0xeb3   : > { %v2444_v28 = vsel %vm2437_vm9, %v4710_v26, 0.0 }
 0xeb4   : > { %2445 = vadd.xlane.f32.xlu1 %v2444_v28 }
 0xf16   : > { %v2612_v29 = vpop.xlane.xlu0 %2611 }
 0xf17   : > { %v2613_v30 = vsub.f32 %v2609_v22, %v2612_v29 }
 0xf19   : > { %v2614_v32 = vmul.f32 1.442695, %v2613_v30 }
 0xf1a   : > { %v4678_v2 = vpop.permute.xlu0 %4677 }
 0xf1b   : > { %4711 = vpow2.f32 %v2614_v32  ;;  %v4680_v4 = vunpack.i.h.bf16 %v4678_v2 }
 0xf25   : > { %v4712_v33 = vpop.eup %4711 }
 0xf26   : > { %v2616_v34 = vsel %vm2437_vm9, %v4712_v33, 0.0 }
 0xf27   : > { %2617 = vadd.xlane.f32.xlu1 %v2616_v34 }
 0xf38   : > { %4667 = vrot.lane.b32.xlu1 %v5915_v61, %s5021_s6 }
 0xf3c   : > { %4672 = vrot.lane.b32.xlu1 %v4661_v31, %s6354_s25 }
 0xf40   : > { %2848 = vrot.lane.b32.xlu1 %v2215_v5, %s6354_s25 }
 0xf41   : > { %v2446_v35 = vpop.xlane.xlu1 %2445 }
 0xf42   : > { %4713 = vrcp.f32 %v2446_v35 }
 0xf44   : > { %3097 = vrot.lane.b32.xlu1 %v2215_v5, %s5023_s19  ;;  %v4679_v5 = vunpack.i.l.bf16 %v4678_v2 }
 0xf46   : > { %v4478_v6 = vpack.c.bf16 %v4680_v4, %v4679_v5 }
 0xf4c   : > { %v4714_v36 = vpop.eup %4713 }
 0xf4d   : > { %v2448_v37 = vmul.f32 %v4714_v36, %v4710_v26 }
 0xf4f   : > { %4211 = vmatmul.mubr.msk.f32.vlgmr.msra.gmra.mrb[20].mxu1 %vm2437_vm9, %v2448_v37 }
 0xf50   : > { %4224 = vmatprep.mubr.msk.f32.mxu1 %vm5020_vm0, %v5018_v0 }
 0xfb4   : > { %v2618_v43 = vpop.xlane.xlu1 %2617 }
 0xfb5   : > { %4715 = vrcp.f32 %v2618_v43 }
 0xfb8   : > { %v4668_v44 = vpop.permute.xlu1 %4667 }
 0xfb9   : > { %v4670_v45 = vunpack.i.h.bf16 %v4668_v44  ;;  %v4669_v46 = vunpack.i.l.bf16 %v4668_v44  ;;  %v2347_v44 = vld [vmem:[%s6294_s14 + $0x40] sm:$0xff] }
 0xfbb   : > { %v4448_v47 = vpack.c.bf16 %v4670_v45, %v4669_v46  ;;  %v2348_v45 = vld [vmem:[%s6294_s14 + $0x48] sm:$0xff]  ;;  %v2349_v46 = vld [vmem:[%s6294_s14 + $0x50] sm:$0xff] }
 0xfbc   : > { %v4673_v31 = vpop.permute.xlu1 %4672  ;;  %v4475_v49 = vpack.c.bf16 %v2350_v48, %v2349_v46  ;;  %v3400_v46 = vld [vmem:[%s6298_s18 + $0x90] sm:$0xff] }
 0xfbd   : > { %4450 = vmatpush3.bf16.msk.msra.mxu1 %vm5924_vm7, %v4448_v47  ;;  %v4675_v60 = vunpack.i.h.bf16 %v4673_v31  ;;  %v4674_v62 = vunpack.i.l.bf16 %v4673_v31  ;;  %v4472_v47 = vpack.c.bf16 %v2348_v45, %v2347_v44  ;;  %v3398_v45 = vld [vmem:[%s6298_s18 + $0x80] sm:$0xff] }
 0xfbe   : > { %4457 = vmatprep.subr.bf16.mxu1 %v5019_v1  ;;  %v4509_v48 = vpack.c.bf16 %v3400_v46, %v3398_v45 }
 0xfbf   : > { %v4716_v50 = vpop.eup %4715  ;;  %v4464_v63 = vpack.c.bf16 %v4675_v60, %v4674_v62 }
 0xfc0   : > { %v2620_v53 = vmul.f32 %v4716_v50, %v4712_v33  ;;  %v2849_v9 = vpop.permute.xlu1 %2848  ;;  %v2351_v50 = vld [vmem:[%s6294_s14 + $0x60] sm:$0xff] }
 0xfc2   : > { %4225 = vmatmul.mubr.msk.f32.vlgmr.msra.gmra.mrb[22].mxu1 %vm2437_vm9, %v2620_v53 }
 0xfc3   : > { %4459 = vmatpush3.bf16.msra.mxu1 %v4458_v52  ;;  %4246 = vmatprep.mubr.msk.f32.mxu1 %vm5020_vm0, %v5018_v0  ;;  %v2352_v52 = vld [vmem:[%s6294_s14 + $0x68] sm:$0xff] }
 0xfc4   : > { %4460 = vmatprep.subr.bf16.mxu1 %v5019_v1  ;;  %v3098_v11 = vpop.permute.xlu1 %3097  ;;  %v4486_v53 = vpack.c.bf16 %v2352_v52, %v2351_v50  ;;  %v3402_v50 = vld [vmem:[%s6298_s18 + $0xa0] sm:$0xff]  ;;  %v3404_v52 = vld [vmem:[%s6298_s18 + $0xb0] sm:$0xff] }
 0xfc7   : > { %4462 = vmatpush3.bf16.msra.mxu1 %v4461_v56 }
 0xfc8   : > { %4467 = vmatprep.subr.bf16.mxu1 %v5019_v1 }
0x1022   : > { %v2522_v57 = vpop.f32.mrb[20].mxu1 }
0x1023   : > { %v4212_v59 = vpop.f32.mrb[21].mxu1  ;;  %4247 = vmatmul.mubr.msk.f32.vlgmr.msra.gmra.mrb[24].mxu1 %vm1127_vm1, %v2522_v57 }
0x1024   : > { %4260 = vmatprep.mubr.msk.f32.mxu1 %vm5020_vm0, %v5018_v0 }
0x1095   : > { %v2698_v27 = vpop.f32.mrb[22].mxu1 }
0x1096   : > { %v4226_v3 = vpop.f32.mrb[23].mxu1  ;;  %4236 = vmatmul.mubr.msk.f32.vlgmr.msra.gmra.mrb[18].mxu0 %vm1127_vm1, %v2698_v27  ;;  %v2354_v27 = vld [vmem:[%s6294_s14 + $0x78] sm:$0xff] }
0x1097   : > { %4466 = vmatpush3.bf16.xpose.msk.msra.mxu0 %vm5911_vm4, %v4464_v63  ;;  %4253 = vmatprep.mubr.msk.f32.mxu0 %vm5020_vm0, %v5018_v0 }
0x1098   : > { %4477 = vmatprep.subr.bf16.mxu0 %v5019_v1 }
0x109e   : > { %4254 = vmatmul.mubr.msk.f32.vlgmr.msra.gmra.mrb[20].mxu0 %vm1127_vm1, %v2849_v9 }
0x109f   : > { %4480 = vmatpush3.bf16.xpose.msk.msra.mxu0 %vm5911_vm4, %v4478_v6  ;;  %4278 = vmatprep.mubr.msk.f32.mxu0 %vm5020_vm0, %v5018_v0 }
0x10a0   : > { %4485 = vmatprep.subr.bf16.mxu0 %v5019_v1 }
0x10a6   : > { %4279 = vmatmul.mubr.msk.f32.vlgmr.msra.gmra.mrb[22].mxu0 %vm1127_vm1, %v3098_v11 }
0x10a7   : > { %4296 = vmatprep.mubr.msk.f32.mxu0 %vm5020_vm0, %v5018_v0  ;;  %4487 = vmatpush3.bf16.msra.mxu0 %v4486_v53 }
0x10a8   : > { %4488 = vmatprep.subr.bf16.mxu0 %v5019_v1 }
0x10f6   : > { %v2844_v12 = vpop.f32.mrb[24].mxu1 }
0x10f7   : > { %v4248_v13 = vpop.f32.mrb[25].mxu1 }
0x1169   : > { %v2771_v14 = vpop.f32.mrb[18].mxu0 }
0x116a   : > { %v6014_v16 = vadd.f32 %v2844_v12, %v2771_v14  ;;  %v4237_v19 = vpop.f32.mrb[19].mxu0 }
0x116b   : > { %v3383_v19 = vld [vmem:[%s6298_s18 + $0x8] sm:$0xff] }
0x1171   : > { %v2926_v20 = vpop.f32.mrb[20].mxu0 }
0x1172   : > { %v2930_v58 = vmul.f32 0.17677669, %v2926_v20  ;;  %v4255_v21 = vpop.f32.mrb[21].mxu0  ;;  %v3382_v20 = vld [vmem:[%s6298_s18] sm:$0xff] }
0x1173   : > { %v3384_v21 = vld [vmem:[%s6298_s18 + $0x10] sm:$0xff] }
0x1174   : > { %v2931_v22 = vsel %vm2435_vm8, -10000.0, %v2930_v58 }
0x1175   : > { %v2932_v8 = vsel %vm2437_vm9, %v2931_v22, -inf }
0x1176   : > { %2933 = vmax.xlane.f32.xlu1 %v2932_v8  ;;  %v4493_v8 = vpack.c.bf16 %v3384_v21, %v3382_v20  ;;  %v3436_v20 = vld [vmem:[%s6300_s20 + $0xa8] sm:$0xff] }
0x1179   : > { %v3175_v24 = vpop.f32.mrb[22].mxu0 }
0x117a   : > { %v4280_v25 = vpop.f32.mrb[23].mxu0  ;;  %v3179_v34 = vmul.f32 0.17677669, %v3175_v24 }
0x117b   : > { %v3386_v25 = vld [vmem:[%s6298_s18 + $0x20] sm:$0xff] }
0x1187   : > { %4682 = vrot.lane.b32.xlu1 %v5915_v61, %s6354_s25 }
0x118b   : > { %4687 = vrot.lane.b32.xlu1 %v5915_v61, %s5023_s19  ;;  %v3180_v61 = vsel %vm2435_vm8, -10000.0, %v3179_v34 }
0x118c   : > { %v3181_v37 = vsel %vm2437_vm9, %v3180_v61, -inf }
0x1203   : > { %v2934_v18 = vpop.xlane.xlu1 %2933 }
0x1204   : > { %v2935_v26 = vsub.f32 %v2931_v22, %v2934_v18  ;;  %v3389_v22 = vld [vmem:[%s6298_s18 + $0x38] sm:$0xff]  ;;  %v3388_v18 = vld [vmem:[%s6298_s18 + $0x30] sm:$0xff] }
0x1206   : > { %v2936_v28 = vmul.f32 1.442695, %v2935_v26  ;;  %v3391_v26 = vld [vmem:[%s6298_s18 + $0x48] sm:$0xff] }
0x1207   : > { %v4683_v29 = vpop.permute.xlu1 %4682 }
0x1208   : > { %4717 = vpow2.f32 %v2936_v28  ;;  %v4685_v30 = vunpack.i.h.bf16 %v4683_v29  ;;  %v4684_v32 = vunpack.i.l.bf16 %v4683_v29  ;;  %v3393_v28 = vld [vmem:[%s6298_s18 + $0x58] sm:$0xff]  ;;  %v4497_v29 = vpack.c.bf16 %v3388_v18, %v3386_v25 }
0x120a   : > { %v4468_v33 = vpack.c.bf16 %v4685_v30, %v4684_v32  ;;  %v4499_v30 = vpack.c.bf16 %v3393_v28, %v3391_v26  ;;  %v3390_v32 = vld [vmem:[%s6298_s18 + $0x40] sm:$0xff]  ;;  %v3421_v26 = vld [vmem:[%s6300_s20 + $0x30] sm:$0xff]  ;;  %v3422_v28 = vld [vmem:[%s6300_s20 + $0x38] sm:$0xff] }
0x120b   : > { %v4688_v55 = vpop.permute.xlu1 %4687 }
0x120c   : > { %4470 = vmatpush3.bf16.msk.msra.mxu1 %vm5924_vm7, %v4468_v33  ;;  %v4690_v56 = vunpack.i.h.bf16 %v4688_v55  ;;  %v4689_v57 = vunpack.i.l.bf16 %v4688_v55  ;;  %v3392_v33 = vld [vmem:[%s6298_s18 + $0x50] sm:$0xff]  ;;  %v3409_v55 = vld [vmem:[%s6298_s18 + $0xd8] sm:$0xff] }
0x120d   : > { %4471 = vmatprep.subr.bf16.mxu1 %v5019_v1  ;;  %v4501_v34 = vpack.c.bf16 %v3392_v33, %v3390_v32  ;;  %v4537_v32 = vpack.c.bf16 %v3422_v28, %v3421_v26 }
0x120e   : > { %v4482_v31 = vpack.c.bf16 %v4690_v56, %v4689_v57  ;;  %v4513_v56 = vpack.c.bf16 %v3404_v52, %v3402_v50  ;;  %v3889_v50 = vld [vmem:[#allocation10] ss:$0 sm:$0xff] }
0x1212   : > { %v4718_v35 = vpop.eup %4717 }
0x1213   : > { %v2938_v36 = vsel %vm2437_vm9, %v4718_v35, 0.0 }
0x1214   : > { %2939 = vadd.xlane.f32.xlu0 %v2938_v36 }
0x1218   : > { %3182 = vmax.xlane.f32.xlu0 %v3181_v37 }
0x12a1   : > { %v2940_v38 = vpop.xlane.xlu0 %2939 }
0x12a2   : > { %4719 = vrcp.f32 %v2940_v38  ;;  %v3395_v38 = vld [vmem:[%s6298_s18 + $0x68] sm:$0xff] }
0x12a5   : > { %v3183_v39 = vpop.xlane.xlu0 %3182 }
0x12a6   : > { %v3184_v40 = vsub.f32 %v3180_v61, %v3183_v39  ;;  %v3397_v39 = vld [vmem:[%s6298_s18 + $0x78] sm:$0xff] }
0x12a8   : > { %v3185_v41 = vmul.f32 1.442695, %v3184_v40  ;;  %v4503_v40 = vpack.c.bf16 %v3397_v39, %v3395_v38 }
0x12aa   : > { %4721 = vpow2.f32 %v3185_v41  ;;  %v3394_v41 = vld [vmem:[%s6298_s18 + $0x60] sm:$0xff] }
0x12ac   : > { %v4720_v42 = vpop.eup %4719 }
0x12ad   : > { %v2942_v23 = vmul.f32 %v4720_v42, %v4718_v35  ;;  %v3396_v42 = vld [vmem:[%s6298_s18 + $0x70] sm:$0xff] }
0x12af   : > { %4261 = vmatmul.mubr.msk.f32.vlgmr.msra.gmra.mrb[26].mxu1 %vm2437_vm9, %v2942_v23  ;;  %v4505_v23 = vpack.c.bf16 %v3396_v42, %v3394_v41  ;;  %v3426_v41 = vld [vmem:[%s6300_s20 + $0x58] sm:$0xff]  ;;  %v3443_v42 = vld [vmem:[%s6300_s20 + $0xe0] sm:$0xff] }
0x12b0   : > { %4271 = vmatprep.mubr.msk.f32.mxu1 %vm5020_vm0, %v5018_v0  ;;  %4473 = vmatpush3.bf16.msra.mxu1 %v4472_v47  ;;  %v3403_v47 = vld [vmem:[%s6298_s18 + $0xa8] sm:$0xff] }
0x12b1   : > { %4474 = vmatprep.subr.bf16.mxu1 %v5019_v1 }
0x12b4   : > { %v4722_v43 = vpop.eup %4721  ;;  %4476 = vmatpush3.bf16.msra.mxu1 %v4475_v49  ;;  %v3405_v49 = vld [vmem:[%s6298_s18 + $0xb8] sm:$0xff] }
0x12b5   : > { %v3187_v10 = vsel %vm2437_vm9, %v4722_v43, 0.0  ;;  %4481 = vmatprep.subr.bf16.mxu1 %v5019_v1  ;;  %v2353_v1 = vld [vmem:[%s6294_s14 + $0x70] sm:$0xff]  ;;  %v4511_v53 = vpack.c.bf16 %v3405_v49, %v3403_v47 }
0x12b6   : > { %3188 = vadd.xlane.f32.xlu0 %v3187_v10  ;;  %v4489_v2 = vpack.c.bf16 %v2354_v27, %v2353_v1  ;;  %v3401_v10 = vld [vmem:[%s6298_s18 + $0x98] sm:$0xff]  ;;  %v3410_v27 = vld [vmem:[%s6298_s18 + $0xe0] sm:$0xff] }
0x12b8   : > { %4490 = vmatpush3.bf16.msra.mxu0 %v4489_v2  ;;  %v3412_v2 = vld [vmem:[%s6298_s18 + $0xf0] sm:$0xff] }
0x1343   : > { %v3189_v54 = vpop.xlane.xlu0 %3188 }
0x1344   : > { %4723 = vrcp.f32 %v3189_v54  ;;  %v3407_v54 = vld [vmem:[%s6298_s18 + $0xc8] sm:$0xff] }
0x1345   : > { %v4515_v57 = vpack.c.bf16 %v3409_v55, %v3407_v54  ;;  %v3427_v54 = vld [vmem:[%s6300_s20 + $0x60] sm:$0xff]  ;;  %v3428_v55 = vld [vmem:[%s6300_s20 + $0x68] sm:$0xff] }
0x134e   : > { %v4724_v59 = vpop.eup %4723 }
0x134f   : > { %v3191_v63 = vmul.f32 %v4724_v59, %v4722_v43  ;;  %v3399_v43 = vld [vmem:[%s6298_s18 + $0x88] sm:$0xff]  ;;  %v3406_v59 = vld [vmem:[%s6298_s18 + $0xc0] sm:$0xff] }
0x1350   : > { %v4507_v44 = vpack.c.bf16 %v3401_v10, %v3399_v43 }
0x1382   : > { %v3019_v60 = vpop.f32.mrb[26].mxu1 }
0x1383   : > { %v4262_v62 = vpop.f32.mrb[27].mxu1  ;;  %4272 = vmatmul.mubr.msk.f32.vlgmr.msra.gmra.mrb[28].mxu1 %vm1127_vm1, %v3019_v60  ;;  %v3411_v60 = vld [vmem:[%s6298_s18 + $0xe8] sm:$0xff] }
0x1384   : > { %4484 = vmatpush3.bf16.msk.msra.mxu1 %vm5924_vm7, %v4482_v31  ;;  %4285 = vmatprep.mubr.msk.f32.mxu1 %vm5020_vm0, %v5018_v0  ;;  %v3408_v31 = vld [vmem:[%s6298_s18 + $0xd0] sm:$0xff]  ;;  %v3413_v62 = vld [vmem:[%s6298_s18 + $0xf8] sm:$0xff] }
0x1385   : > { %v4519_v1 = vpack.c.bf16 %v3413_v62, %v3411_v60  ;;  %v3430_v60 = vld [vmem:[%s6300_s20 + $0x78] sm:$0xff] }
0x1387   : > { %4286 = vmatmul.mubr.msk.f32.vlgmr.msra.gmra.mrb[30].mxu1 %vm2437_vm9, %v3191_v63  ;;  %v4517_v63 = vpack.c.bf16 %v3408_v31, %v3406_v59  ;;  %v3429_v31 = vld [vmem:[%s6300_s20 + $0x70] sm:$0xff] }
0x1388   : > { %3523 = vmatprep.mubr.f32.mxu1 %v5018_v0  ;;  %v3887_v0 = vld [vmem:[#allocation7] ss:$0 sm:$0xff]  ;;  %v4553_v62 = vpack.c.bf16 %v3430_v60, %v3429_v31 }
0x1456   : > { %v3092_v7 = vpop.f32.mrb[28].mxu1 }
0x1457   : > { %v3096_v3 = vadd.f32 %v3092_v7, %v6014_v16  ;;  %v4273_v4 = vpop.f32.mrb[29].mxu1  ;;  %v3385_v16 = vld [vmem:[%s6298_s18 + $0x18] sm:$0xff]  ;;  %v4521_v7 = vpack.c.bf16 %v3412_v2, %v3410_v27 }
0x1458   : > { %v4491_v58 = vpack.c.bf16 %v3385_v16, %v3383_v19  ;;  %v3432_v4 = vld [vmem:[%s6300_s20 + $0x88] sm:$0xff]  ;;  %v3418_v19 = vld [vmem:[%s6300_s20 + $0x18] sm:$0xff]  ;;  %v3435_v16 = vld [vmem:[%s6300_s20 + $0xa0] sm:$0xff] }
0x1459   : > { %v4531_v21 = vpack.c.bf16 %v3436_v20, %v3435_v16 }
0x145a   : > { %v3268_v5 = vpop.f32.mrb[30].mxu1  ;;  %4492 = vmatprep.subr.bf16.mxu1 %v4491_v58 }
0x145b   : > { %v4287_v6 = vpop.f32.mrb[31].mxu1  ;;  %4297 = vmatmul.mubr.msk.f32.vlgmr.msra.gmra.mrb[24].mxu0 %vm1127_vm1, %v3268_v5  ;;  %4494 = vmatpush1.bf16.msra.mxu1 %v4493_v8  ;;  %v3415_v5 = vld [vmem:[%s6300_s20] sm:$0xff]  ;;  %v3437_v8 = vld [vmem:[%s6300_s20 + $0xb0] sm:$0xff] }
0x152e   : > { %v3341_v9 = vpop.f32.mrb[24].mxu0 }
0x152f   : > { %v3345_v11 = vadd.f32 %v3341_v9, %v3096_v3  ;;  %v4298_v12 = vpop.f32.mrb[25].mxu0  ;;  %v3431_v3 = vld [vmem:[%s6300_s20 + $0x80] sm:$0xff]  ;;  %v3416_v9 = vld [vmem:[%s6300_s20 + $0x8] sm:$0xff] }
0x1530   : > { %v4523_v6 = vpack.c.bf16 %v3432_v4, %v3431_v3  ;;  %v4525_v12 = vpack.c.bf16 %v3416_v9, %v3415_v5 }
0x1531   : > { %v3353_v13 = vadd.f32 %v3887_v0, %v3345_v11  ;;  %v3433_v0 = vld [vmem:[%s6300_s20 + $0x90] sm:$0xff]  ;;  %v3434_v11 = vld [vmem:[%s6300_s20 + $0x98] sm:$0xff] }
0x1532   : > { %4524 = vmatprep.subr.bf16.mxu0 %v4523_v6 }
0x1533   : > { %v3354_v14 = vadd.f32 %v3353_v13, %v5903_v51  ;;  %v3387_v51 = vld [vmem:[%s6298_s18 + $0x28] sm:$0xff]  ;;  %v4527_v13 = vpack.c.bf16 %v3434_v11, %v3433_v0  ;;  %4526 = vmatpush3.bf16.msra.mxu0 %v4525_v12 }
0x1534   : > { %v4495_v24 = vpack.c.bf16 %v3389_v22, %v3387_v51  ;;  %v3419_v51 = vld [vmem:[%s6300_s20 + $0x20] sm:$0xff]  ;;  %v3420_v22 = vld [vmem:[%s6300_s20 + $0x28] sm:$0xff] }
0x1535   : > { %3357 = vadd.xlane.f32.xlu0 %v3354_v14  ;;  %4528 = vmatprep.subr.bf16.mxu0 %v4527_v13  ;;  %v4533_v25 = vpack.c.bf16 %v3420_v22, %v3419_v51  ;;  %v3890_v0 = vld [vmem:[#allocation12] ss:$0 sm:$0xff]  ;;  %v3891_v22 = vld [vmem:[#allocation13] ss:$0 sm:$0xff] }
0x1536   : > { %4496 = vmatprep.subr.bf16.mxu1 %v4495_v24  ;;  %v3438_v24 = vld [vmem:[%s6300_s20 + $0xb8] sm:$0xff] }
0x1537   : > { %4498 = vmatpush1.bf16.msra.mxu1 %v4497_v29  ;;  %v4535_v18 = vpack.c.bf16 %v3438_v24, %v3437_v8  ;;  %v3439_v29 = vld [vmem:[%s6300_s20 + $0xc0] sm:$0xff]  ;;  %v3892_v24 = vld [vmem:[#allocation15] ss:$0 sm:$0xff] }
0x1538   : > { %4500 = vmatprep.subr.bf16.mxu1 %v4499_v30  ;;  %v3440_v30 = vld [vmem:[%s6300_s20 + $0xc8] sm:$0xff] }
0x1539   : > { %v4539_v33 = vpack.c.bf16 %v3440_v30, %v3439_v29 }
0x153b   : > { %4502 = vmatpush1.bf16.msra.mxu1 %v4501_v34  ;;  %v3423_v34 = vld [vmem:[%s6300_s20 + $0x40] sm:$0xff] }
0x153c   : > { %4504 = vmatprep.subr.bf16.mxu1 %v4503_v40  ;;  %v3425_v40 = vld [vmem:[%s6300_s20 + $0x50] sm:$0xff] }
0x153d   : > { %v4545_v43 = vpack.c.bf16 %v3426_v41, %v3425_v40 }
0x153f   : > { %4506 = vmatpush1.bf16.msra.mxu1 %v4505_v23  ;;  %v3444_v23 = vld [vmem:[%s6300_s20 + $0xe8] sm:$0xff] }
0x1540   : > { %4508 = vmatprep.subr.bf16.mxu1 %v4507_v44  ;;  %v4547_v10 = vpack.c.bf16 %v3444_v23, %v3443_v42 }
0x1543   : > { %4510 = vmatpush1.bf16.msra.mxu1 %v4509_v48  ;;  %v3888_v48 = vld [vmem:[#allocation9] ss:$0 sm:$0xff] }
0x1544   : > { %4512 = vmatprep.subr.bf16.mxu1 %v4511_v53 }
0x1547   : > { %4514 = vmatpush1.bf16.msra.mxu1 %v4513_v56  ;;  %v4549_v56 = vpack.c.bf16 %v3428_v55, %v3427_v54 }
0x1548   : > { %4516 = vmatprep.subr.bf16.mxu1 %v4515_v57  ;;  %v3445_v57 = vld [vmem:[%s6300_s20 + $0xf0] sm:$0xff] }
0x154b   : > { %4518 = vmatpush1.bf16.msra.mxu1 %v4517_v63  ;;  %v3414_v63 = vld [vmem:[%s6355_s3] sm:$0x3] }
0x154c   : > { %4520 = vmatprep.subr.bf16.mxu1 %v4519_v1  ;;  %v3452_v1 = vrot.slane %v3414_v63, %v5578_v17  ;;  %v3456_v27 = vrot.slane %v3414_v63, %v5573_v15 }
0x154f   : > { %4522 = vmatpush1.bf16.msra.mxu1 %v4521_v7 }
0x15c2   : > { %v3358_v35 = vpop.xlane.xlu0 %3357 }
0x15c3   : > { %v3359_v36 = vmul.f32 0.0078125, %v3358_v35  ;;  %v3424_v35 = vld [vmem:[%s6300_s20 + $0x48] sm:$0xff] }
0x15c4   : > { %v4541_v38 = vpack.c.bf16 %v3424_v35, %v3423_v34 }
0x15c5   : > { %v6107_v61 = vsub.f32 %v3354_v14, %v3359_v36  ;;  %v3417_v14 = vld [vmem:[%s6300_s20 + $0x10] sm:$0xff] }
0x15c6   : > { %v4529_v58 = vpack.c.bf16 %v3418_v19, %v3417_v14  ;;  %v3441_v36 = vld [vmem:[%s6300_s20 + $0xd0] sm:$0xff] }
0x15c7   : > { %v3361_v37 = vmul.f32 %v6107_v61, %v6107_v61 }
0x15c8   : > { %4530 = vmatpush3.bf16.msra.mxu0 %v4529_v58 }
0x15c9   : > { %3362 = vadd.xlane.f32.xlu1 %v3361_v37  ;;  %4532 = vmatprep.subr.bf16.mxu0 %v4531_v21  ;;  %v3442_v37 = vld [vmem:[%s6300_s20 + $0xd8] sm:$0xff] }
0x15ca   : > { %v4543_v39 = vpack.c.bf16 %v3442_v37, %v3441_v36 }
0x15cc   : > { %4534 = vmatpush3.bf16.msra.mxu0 %v4533_v25 }
0x15cd   : > { %4536 = vmatprep.subr.bf16.mxu0 %v4535_v18 }
0x15d0   : > { %4538 = vmatpush3.bf16.msra.mxu0 %v4537_v32 }
0x15d1   : > { %4540 = vmatprep.subr.bf16.mxu0 %v4539_v33 }
0x15d4   : > { %4542 = vmatpush3.bf16.msra.mxu0 %v4541_v38 }
0x15d5   : > { %4544 = vmatprep.subr.bf16.mxu0 %v4543_v39 }
0x15d8   : > { %4546 = vmatpush3.bf16.msra.mxu0 %v4545_v43 }
0x15d9   : > { %4548 = vmatprep.subr.bf16.mxu0 %v4547_v10 }
0x15dc   : > { %4550 = vmatpush3.bf16.msra.mxu0 %v4549_v56 }
0x1656   : > { %v3363_v44 = vpop.xlane.xlu1 %3362 }
0x1657   : > { %v3364_v45 = vmul.f32 0.0078125, %v3363_v44 }
0x1659   : > { %v3365_v46 = vadd.f32 1e-12, %v3364_v45 }
0x165b   : > { %4725 = vrsqrt.f32 %v3365_v46 }
0x1665   : > { %v4726_v47 = vpop.eup %4725 }
0x1666   : > { %v3367_v49 = vmul.f32 %v4726_v47, %v6107_v61  ;;  %v3446_v61 = vld [vmem:[%s6300_s20 + $0xf8] sm:$0xff] }
0x1667   : > { %v4551_v59 = vpack.c.bf16 %v3446_v61, %v3445_v57 }
0x1668   : > { %v3374_v52 = vmul.f32 %v3888_v48, %v3367_v49 }
0x1669   : > { %4552 = vmatprep.subr.bf16.mxu0 %v4551_v59 }
0x166a   : > { %v3381_v53 = vadd.f32 %v3889_v50, %v3374_v52  ;;  %4554 = vmatpush3.bf16.msra.mxu0 %v4553_v62 }
0x166c   : > { %3524 = vmatmul.mubr.f32.vlgmr.msra.gmra.mrb[32].mxu1 %v3381_v53 }
0x173f   : > { %v3525_v2 = vpop.f32.mrb[32].mxu1 }
0x1740   : > { %v3526_v7 = vadd.f32 %v3525_v2, %v3452_v1  ;;  %v3527_v3 = vpop.f32.mrb[33].mxu1 }
0x1741   : > { %v3528_v4 = vadd.f32 %v3527_v3, %v3456_v27 }
0x1742   : > { %v3530_v6 = vmax.f32 %v3526_v7, 0.0 }
0x1743   : > { %v3531_v5 = vmax.f32 %v3528_v4, 0.0 }
0x1745   : > { %3602 = vmatprep.mubr.f32.mxu0 %v3531_v5 }
0x1746   : > { %3603 = vmatmul.mubr.f32.vlgmr.msra.gmra.mrb[26].mxu0 %v3530_v6 }
0x1819   : > { %v4042_v9 = vpop.f32.mrb[26].mxu0 }
0x181a   : > { %v4043_v11 = vpop.f32.mrb[27].mxu0 }
0x181b   : > { %v4044_v12 = vadd.f32 %v4043_v11, %v4042_v9 }
0x181d   : > { %v3605_v13 = vadd.f32 %v4044_v12, %v3890_v0 }
0x181f   : > { %v3608_v14 = vadd.f32 %v3605_v13, %v3381_v53 }
0x1821   : > { %3611 = vadd.xlane.f32.xlu0 %v3608_v14 }
0x18ae   : > { %v3612_v19 = vpop.xlane.xlu0 %3611 }
0x18af   : > { %v3613_v17 = vmul.f32 0.0078125, %v3612_v19 }
0x18b1   : > { %v3614_v16 = vsub.f32 %v3608_v14, %v3613_v17 }
0x18b3   : > { %v3615_v15 = vmul.f32 %v3614_v16, %v3614_v16 }
0x18b5   : > { %3616 = vadd.xlane.f32.xlu0 %v3615_v15 }
0x1942   : > { %v3617_v20 = vpop.xlane.xlu0 %3616 }
0x1943   : > { %v3618_v58 = vmul.f32 0.0078125, %v3617_v20 }
0x1945   : > { %v3619_v21 = vadd.f32 1e-12, %v3618_v58 }
0x1947   : > { %4727 = vrsqrt.f32 %v3619_v21 }
0x1951   : > { %v4728_v51 = vpop.eup %4727 }
0x1952   : > { %v3621_v8 = vmul.f32 %v4728_v51, %v3614_v16 }
0x1954   : > { %v3628_v25 = vmul.f32 %v3891_v22, %v3621_v8 }
0x1956   : > { %v3635_v18 = vadd.f32 %v3892_v24, %v3628_v25 }
0x1958   : > { %3636 = vst [vmem:[%s899_s1] sm:$0xff] %v3635_v18 }
0x1959 PF: > { %s6357_s8 = sld [smem:[#allocation21_spill]] }
0x195f   : > { %s39_s5 = sadd.s32 1, %s6357_s8  }
0x1960   : > { %p36_p13 = scmp.ge.s32.totalorder %s39_s5, 4  }
0x1962   :  { %38 = sbr.rel (!%p36_p13) target bundleno = 18 (0x12), region = 192 }
0x1969   :  { %3656 = vsyncpa [#allocation3], 1 }
0x196a   :  { %3658 = vsyncpa [#allocation3 + $0x1], 1 }
0x196b   :  { %3659 = vsyncpa [#allocation5], 1 }
0x196c   :  { %3660 = vsyncpa [#allocation8], 1 }
0x196d   :  { %3661 = vsyncpa [#allocation11], 1 }
0x196e   :  { %3662 = vsyncpa [#allocation14], 1 }

// kernel: _lambda_.8
= control target key start
LH: loop header
LB: loop body
LE: loop exit
PB: predicated region body
PF: predicated region fallthrough
CT: control target
= control target key end

     0   :  { %s5485_s0 = inlined_call_operand.vmem [shape: f32[2,8,128], index: 0, kind: input, shape index: {}]   ;;  %s5486_s1 = inlined_call_operand.vmem [shape: f32[2,10,128], index: 1, kind: input, shape index: {}]   ;;  %s5487_s2 = inlined_call_operand.vmem [shape: f32[2,8,8], index: 2, kind: input, shape index: {}]   ;;  %s5488_s3 = inlined_call_operand.vmem [shape: f32[2,8,10], index: 3, kind: input, shape index: {}]   ;;  %s5489_s4 = inlined_call_operand.vmem [shape: f32[128,384], index: 4, kind: input, shape index: {}]   ;;  %s5490_s5 = inlined_call_operand.vmem [shape: f32[1,384], index: 5, kind: input, shape index: {}]   ;;  %s5491_s6 = inlined_call_operand.vmem [shape: f32[128,128], index: 6, kind: input, shape index: {}]   ;;  %s5492_s7 = inlined_call_operand.vmem [shape: f32[1,128], index: 7, kind: input, shape index: {}]   ;;  %s5493_s8 = inlined_call_operand.vmem [shape: f32[1,128], index: 8, kind: input, shape index: {}]   ;;  %s5494_s9 = inlined_call_operand.vmem [shape: f32[1,128], index: 9, kind: input, shape index: {}]   ;;  %s5495_s10 = inlined_call_operand.vmem [shape: f32[128,128], index: 10, kind: input, shape index: {}]   ;;  %s5496_s11 = inlined_call_operand.vmem [shape: f32[1,128], index: 11, kind: input, shape index: {}]   ;;  %s5497_s12 = inlined_call_operand.vmem [shape: f32[128,256], index: 12, kind: input, shape index: {}]   ;;  %s5498_s13 = inlined_call_operand.vmem [shape: f32[1,256], index: 13, kind: input, shape index: {}]   ;;  %s5499_s14 = inlined_call_operand.vmem [shape: f32[128,128], index: 14, kind: input, shape index: {}]   ;;  %s5500_s15 = inlined_call_operand.vmem [shape: f32[1,128], index: 15, kind: input, shape index: {}]   ;;  %s5501_s16 = inlined_call_operand.vmem [shape: f32[1,128], index: 16, kind: input, shape index: {}]   ;;  %s5502_s17 = inlined_call_operand.vmem [shape: f32[1,128], index: 17, kind: input, shape index: {}]   ;;  %s5503_s18 = inlined_call_operand.vmem [shape: f32[128,256], index: 18, kind: input, shape index: {}]   ;;  %s5504_s19 = inlined_call_operand.vmem [shape: f32[1,256], index: 19, kind: input, shape index: {}]   ;;  %s5505_s20 = inlined_call_operand.vmem [shape: f32[256,128], index: 20, kind: input, shape index: {}]   ;;  %s5506_s21 = inlined_call_operand.vmem [shape: f32[1,128], index: 21, kind: input, shape index: {}]   ;;  %s5507_s22 = inlined_call_operand.vmem [shape: f32[1,128], index: 22, kind: input, shape index: {}]   ;;  %s5508_s23 = inlined_call_operand.vmem [shape: f32[1,128], index: 23, kind: input, shape index: {}]   ;;  %s5509_s24 = inlined_call_operand.vmem [shape: f32[2,8,128], index: 24, kind: output, shape index: {}]  }
   0x1   :  { %5519 = sst [smem:[#allocation2_spill]] %s5485_s0 }
   0x2   :  { %5520 = sst [smem:[#allocation3_spill]] %s5486_s1 }
   0x3   :  { %5521 = sst [smem:[#allocation4_spill]] %s5487_s2 }
   0x4   :  { %5522 = sst [smem:[#allocation5_spill]] %s5488_s3 }
   0x5   :  { %5523 = sst [smem:[#allocation6_spill]] %s5489_s4 }
   0x6   :  { %5524 = sst [smem:[#allocation7_spill]] %s5490_s5  ;;  %s4559_s5 = smov 0  }
   0x7   :  { %5525 = sst [smem:[#allocation8_spill]] %s5491_s6 }
   0x8   :  { %5526 = sst [smem:[#allocation9_spill]] %s5492_s7 }
   0x9   :  { %5527 = sst [smem:[#allocation10_spill]] %s5493_s8 }
   0xa LB: > { %s3613_s26 = sadd.s32 4294967295, %s4425_s5   ;;  %p3617_p0 = scmp.ge.s32.totalorder %s4425_s5, 1  ;;  %s4425_s5 = sphi %s4559_s5, %s34_s5  }
   0xb   : > { %p689_p1 = scmp.lt.s32.totalorder %s4425_s5, 3 }
   0xd   : > { %p690_p2 = pnand %p3617_p0, %p689_p1 }
   0xe   : > { %s5528_s6 = sld [smem:[#allocation6_spill]] (!%p690_p2)  ;;  %v4427_v7 = vmov (!%p690_p2), 0.0   ;;  %v4428_v8 = vmov (!%p690_p2), 0.0|0.0   ;;  %p4668_p3 = scmp.lt.s32.totalorder (!%p690_p2), %s3613_s26, 1  ;;  %vm4429_vm0 = vmmov (!%p690_p2), 0   ;;  %vm1014_vm1 = vcmask (!%p690_p2), 261120  }
   0xf   : > { %693 = sbr.rel (%p690_p2) target bundleno = 6250 (0x186a), region = 116  ;;  %921 = vmatprep.mubr.f32.mxu0 (!%p690_p2), %v4427_v7  ;;  %4112 = vmatprep.subr.bf16.mxu1 (!%p690_p2), %v4428_v8  ;;  %s5530_s8 = sld [smem:[#allocation2_spill]] (!%p690_p2)  ;;  %vm1094_vm3 = vcmask (!%p690_p2), 64512   ;;  %vm5095_vm4 = vmpackc.low (!%p690_p2), %vm1014_vm1, %vm1014_vm1  ;;  %vm2339_vm5 = vcmask (!%p690_p2), 1041408   ;;  %vm4433_vm6 = vmmov (!%p690_p2), 1   ;;  %vm2324_vm9 = vcmask (!%p690_p2), 80896  }
  0x10   : > { %3858 = vmatprep.mubr.msk.f32.mxu1 (!%p690_p2), %vm4429_vm0, %v4427_v7  ;;  %s5516_s4 = smov (!%p690_p2), 96   ;;  %s5532_s2 = sld [smem:[#allocation4_spill]] (!%p690_p2)  ;;  %vm5111_vm7 = vmpackc.low (!%p690_p2), %vm2339_vm5, %vm4433_vm6 }
  0x11   : > { %s5512_s7 = smov (!%p690_p2), 64   ;;  %s5514_s30 = smov (!%p690_p2), 32  }
  0x12   : > { %s5535_s27 = sld [smem:[#allocation3_spill]] (!%p690_p2)  ;;  %s5539_s3 = smov (!%p690_p2), 96  }
  0x14   : > { %v793_v0 = vld [vmem:[%s5528_s6 + $0x8] sm:$0xff] (!%p690_p2)  ;;  %v796_v1 = vld [vmem:[%s5528_s6 + $0x20] sm:$0xff] (!%p690_p2)  ;;  %v795_v4 = vld [vmem:[%s5528_s6 + $0x18] sm:$0xff] (!%p690_p2) }
  0x15   : > { %v792_v2 = vld [vmem:[%s5528_s6] sm:$0xff] (!%p690_p2)  ;;  %v4080_v3 = vpack.c.bf16 (!%p690_p2), %v796_v1, %v793_v0  ;;  %v799_v5 = vld [vmem:[%s5528_s6 + $0x38] sm:$0xff] (!%p690_p2)  ;;  %v802_v6 = vld [vmem:[%s5528_s6 + $0x50] sm:$0xff] (!%p690_p2) }
  0x16   : > { %v4082_v9 = vpack.c.bf16 %v795_v4, %v792_v2  ;;  %v4084_v10 = vpack.c.bf16 %v802_v6, %v799_v5  ;;  %v798_v11 = vld [vmem:[%s5528_s6 + $0x30] sm:$0xff]  ;;  %v801_v12 = vld [vmem:[%s5528_s6 + $0x48] sm:$0xff]  ;;  %v808_v14 = vld [vmem:[%s5528_s6 + $0x80] sm:$0xff]  ;;  %s5546_s26 = smov (!%p4668_p3, %s3613_s26), 1 }
  0x17   : > { %v805_v13 = vld [vmem:[%s5528_s6 + $0x68] sm:$0xff]  ;;  %4081 = vmatprep.subr.bf16.mxu0 %v4080_v3  ;;  %v4086_v15 = vpack.c.bf16 %v801_v12, %v798_v11  ;;  %v804_v17 = vld [vmem:[%s5528_s6 + $0x60] sm:$0xff]  ;;  %v807_v18 = vld [vmem:[%s5528_s6 + $0x78] sm:$0xff]  ;;  %s4711_s28 = sshll.u32 %s5546_s26, 3 }
  0x18   : > { %4083 = vmatpush1.bf16.msra.mxu0 %v4082_v9  ;;  %v4088_v16 = vpack.c.bf16 %v808_v14, %v805_v13  ;;  %v811_v19 = vld [vmem:[%s5528_s6 + $0x98] sm:$0xff]  ;;  %v814_v20 = vld [vmem:[%s5528_s6 + $0xb0] sm:$0xff]  ;;  %v4090_v21 = vpack.c.bf16 %v807_v18, %v804_v17  ;;  %v813_v24 = vld [vmem:[%s5528_s6 + $0xa8] sm:$0xff]  ;;  %s769_s0 = scalar_lea.vmem %s5530_s8, %s4711_s28  ;;  %v842_v13 = vlaneseq  ;;  %s778_s29 = scalar_lea.vmem %s5532_s2, %s4711_s28 }
  0x19   : > { %4085 = vmatprep.subr.bf16.mxu0 %v4084_v10  ;;  %v4092_v22 = vpack.c.bf16 %v814_v20, %v811_v19  ;;  %v810_v23 = vld [vmem:[%s5528_s6 + $0x90] sm:$0xff]  ;;  %v817_v25 = vld [vmem:[%s5528_s6 + $0xc8] sm:$0xff]  ;;  %v820_v26 = vld [vmem:[%s5528_s6 + $0xe0] sm:$0xff]  ;;  %s5533_s8 = sld [smem:[#allocation8_spill]] }
  0x1a   : > { %v794_v27 = vld [vmem:[%s5528_s6 + $0x10] sm:$0xff]  ;;  %v797_v28 = vld [vmem:[%s5528_s6 + $0x28] sm:$0xff]  ;;  %v800_v29 = vld [vmem:[%s5528_s6 + $0x40] sm:$0xff]  ;;  %v4094_v30 = vpack.c.bf16 %v813_v24, %v810_v23  ;;  %v4096_v33 = vpack.c.bf16 %v820_v26, %v817_v25  ;;  %v843_v14 = vshrl.u32 %v842_v13, 7 }
  0x1b   : > { %v4113_v31 = vpack.c.bf16 %v797_v28, %v794_v27  ;;  %v803_v32 = vld [vmem:[%s5528_s6 + $0x58] sm:$0xff]  ;;  %v816_v34 = vld [vmem:[%s5528_s6 + $0xc0] sm:$0xff]  ;;  %v826_v37 = vld [vmem:[%s5528_s6 + $0x110] sm:$0xff] }
  0x1c   : > { %4087 = vmatpush1.bf16.msra.mxu0 %v4086_v15  ;;  %v819_v35 = vld [vmem:[%s5528_s6 + $0xd8] sm:$0xff]  ;;  %v4116_v38 = vpack.c.bf16 %v803_v32, %v800_v29  ;;  %v806_v39 = vld [vmem:[%s5528_s6 + $0x70] sm:$0xff]  ;;  %v809_v40 = vld [vmem:[%s5528_s6 + $0x88] sm:$0xff]  ;;  %v4751_v15 = vsub.s32 1, %v843_v14  ;;  %v4756_v17 = vsub.s32 0, %v843_v14  ;;  %v852_v24 = vsub.s32 2, %v843_v14 }
  0x1d   : > { %4089 = vmatprep.subr.bf16.mxu0 %v4088_v16  ;;  %v823_v36 = vld [vmem:[%s5528_s6 + $0xf8] sm:$0xff]  ;;  %4114 = vmatpush3.bf16.msra.mxu1 %v4113_v31  ;;  %v4098_v41 = vpack.c.bf16 %v819_v35, %v816_v34  ;;  %v822_v43 = vld [vmem:[%s5528_s6 + $0xf0] sm:$0xff]  ;;  %v825_v44 = vld [vmem:[%s5528_s6 + $0x108] sm:$0xff]  ;;  %v4119_v47 = vpack.c.bf16 %v809_v40, %v806_v39 }
  0x1e   : > { %4115 = vmatprep.subr.bf16.mxu1 %v4428_v8  ;;  %v4100_v42 = vpack.c.bf16 %v826_v37, %v823_v36  ;;  %v829_v45 = vld [vmem:[%s5528_s6 + $0x128] sm:$0xff]  ;;  %v832_v46 = vld [vmem:[%s5528_s6 + $0x140] sm:$0xff]  ;;  %v815_v49 = vld [vmem:[%s5528_s6 + $0xb8] sm:$0xff]  ;;  %v4102_v50 = vpack.c.bf16 %v825_v44, %v822_v43 }
  0x1f   : > { %v812_v48 = vld [vmem:[%s5528_s6 + $0xa0] sm:$0xff]  ;;  %v4104_v51 = vpack.c.bf16 %v832_v46, %v829_v45  ;;  %v831_v53 = vld [vmem:[%s5528_s6 + $0x138] sm:$0xff]  ;;  %v838_v55 = vld [vmem:[%s5528_s6 + $0x170] sm:$0xff] }
  0x20   : > { %4091 = vmatpush1.bf16.msra.mxu0 %v4090_v21  ;;  %v828_v52 = vld [vmem:[%s5528_s6 + $0x120] sm:$0xff]  ;;  %v835_v54 = vld [vmem:[%s5528_s6 + $0x158] sm:$0xff]  ;;  %v4122_v56 = vpack.c.bf16 %v815_v49, %v812_v48  ;;  %v818_v57 = vld [vmem:[%s5528_s6 + $0xd0] sm:$0xff] }
  0x21   : > { %4093 = vmatprep.subr.bf16.mxu0 %v4092_v22  ;;  %4117 = vmatpush3.bf16.msra.mxu1 %v4116_v38  ;;  %v821_v58 = vld [vmem:[%s5528_s6 + $0xe8] sm:$0xff]  ;;  %v4106_v59 = vpack.c.bf16 %v831_v53, %v828_v52  ;;  %v4108_v60 = vpack.c.bf16 %v838_v55, %v835_v54  ;;  %v834_v61 = vld [vmem:[%s5528_s6 + $0x150] sm:$0xff]  ;;  %v824_v0 = vld [vmem:[%s5528_s6 + $0x100] sm:$0xff] }
  0x22   : > { %4118 = vmatprep.subr.bf16.mxu1 %v4428_v8  ;;  %v837_v62 = vld [vmem:[%s5528_s6 + $0x168] sm:$0xff]  ;;  %v4125_v63 = vpack.c.bf16 %v821_v58, %v818_v57  ;;  %v827_v1 = vld [vmem:[%s5528_s6 + $0x118] sm:$0xff]  ;;  %v830_v4 = vld [vmem:[%s5528_s6 + $0x130] sm:$0xff] }
  0x23   : > { %v4110_v2 = vpack.c.bf16 %v837_v62, %v834_v61  ;;  %v4128_v3 = vpack.c.bf16 %v827_v1, %v824_v0  ;;  %v833_v5 = vld [vmem:[%s5528_s6 + $0x148] sm:$0xff]  ;;  %v4731_v6 = vld [vmem:[%s769_s0] sm:$0xff]  ;;  %v839_v11 = vld [vmem:[%s5528_s6 + $0x178] sm:$0xff]  ;;  %s5531_s0 = sld [smem:[#allocation7_spill]] }
  0x24   : > { %4095 = vmatpush1.bf16.msra.mxu0 %v4094_v30  ;;  %v4131_v9 = vpack.c.bf16 %v833_v5, %v830_v4  ;;  %v836_v10 = vld [vmem:[%s5528_s6 + $0x160] sm:$0xff]  ;;  %v1004_v57 = vld [vmem:[%s5533_s8 + $0x30] sm:$0xff]  ;;  %v999_v0 = vld [vmem:[%s5533_s8 + $0x8] sm:$0xff] }
  0x25   : > { %4097 = vmatprep.subr.bf16.mxu0 %v4096_v33  ;;  %4120 = vmatpush3.bf16.msra.mxu1 %v4119_v47  ;;  %v4134_v12 = vpack.c.bf16 %v839_v11, %v836_v10  ;;  %v4784_v31 = vld [vmem:[%s778_s29] sm:$0xff]  ;;  %v1000_v4 = vld [vmem:[%s5533_s8 + $0x10] sm:$0xff]  ;;  %v1001_v5 = vld [vmem:[%s5533_s8 + $0x18] sm:$0xff] }
  0x26   : > { %4121 = vmatprep.subr.bf16.mxu1 %v4428_v8  ;;  %vm1092_vm2 = vcmp.eq.f32.partialorder %v4784_v31, 0.0  ;;  %v1002_v55 = vld [vmem:[%s5533_s8 + $0x20] sm:$0xff]  ;;  %v1011_v31 = vld [vmem:[%s5533_s8 + $0x68] sm:$0xff] }
  0x28   : > { %4099 = vmatpush1.bf16.msra.mxu0 %v4098_v41 }
  0x29   : > { %4101 = vmatprep.subr.bf16.mxu0 %v4100_v42  ;;  %4123 = vmatpush3.bf16.msra.mxu1 %v4122_v56  ;;  %v840_v16 = vld [vmem:[%s5531_s0] sm:$0x7]  ;;  %v1003_v56 = vld [vmem:[%s5533_s8 + $0x28] sm:$0xff]  ;;  %s5534_s0 = sld [smem:[#allocation9_spill]] }
  0x2a   : > { %4124 = vmatprep.subr.bf16.mxu1 %v4428_v8  ;;  %v849_v18 = vrot.slane %v840_v16, %v4751_v15  ;;  %v845_v20 = vrot.slane %v840_v16, %v4756_v17  ;;  %v853_v25 = vrot.slane %v840_v16, %v852_v24  ;;  %v4137_v58 = vpack.c.bf16 %v1003_v56, %v1002_v55 }
  0x2c   : > { %4103 = vmatpush1.bf16.msra.mxu0 %v4102_v50 }
  0x2d   : > { %4105 = vmatprep.subr.bf16.mxu0 %v4104_v51  ;;  %4126 = vmatpush3.bf16.msra.mxu1 %v4125_v63  ;;  %v998_v63 = vld [vmem:[%s5533_s8] sm:$0xff] }
  0x2e   : > { %4127 = vmatprep.subr.bf16.mxu1 %v4428_v8 }
  0x30   : > { %4107 = vmatpush1.bf16.msra.mxu0 %v4106_v59  ;;  %v1005_v59 = vld [vmem:[%s5533_s8 + $0x38] sm:$0xff] }
  0x31   : > { %4109 = vmatprep.subr.bf16.mxu0 %v4108_v60  ;;  %4129 = vmatpush3.bf16.msra.mxu1 %v4128_v3  ;;  %v4140_v60 = vpack.c.bf16 %v1005_v59, %v1004_v57  ;;  %v1010_v59 = vld [vmem:[%s5533_s8 + $0x60] sm:$0xff] }
  0x32   : > { %4130 = vmatprep.subr.bf16.mxu1 %v4428_v8 }
  0x34   : > { %4111 = vmatpush1.bf16.msra.mxu0 %v4110_v2  ;;  %v4143_v2 = vpack.c.bf16 %v999_v0, %v998_v63 }
  0x35   : > { %3871 = vmatprep.subr.mxu0 %v4427_v7  ;;  %4132 = vmatpush3.bf16.msra.mxu1 %v4131_v9  ;;  %v4146_v9 = vpack.c.bf16 %v1001_v5, %v1000_v4 }
  0x36   : > { %4133 = vmatprep.subr.bf16.mxu1 %v4428_v8 }
  0x37   : > { %922 = vmatmul.mubr.f32.vlgmr.msra.gmra.mrb[0].mxu0 %v4731_v6 }
  0x38   : > { %3873 = vmatprep.mubr.msk.f32.mxu0 %vm4429_vm0, %v4427_v7 }
  0x39   : > { %4135 = vmatpush3.bf16.msra.mxu1 %v4134_v12 }
  0x3a   : > { %3861 = vmatprep.subr.mxu1 %v4427_v7 }
  0x3c   : > { %3859 = vmatmul.mubr.f32.vlgmr.msra.gmra.mrb[0].mxu1 %v4731_v6 }
  0x3d   : > { %3863 = vmatprep.mubr.msk.f32.mxu1 %vm4429_vm0, %v4427_v7 }
 0x10a   : > { %v923_v19 = vpop.f32.mrb[0].mxu0 }
 0x10b   : > { %v925_v21 = vpop.f32.mrb[1].mxu0  ;;  %v4762_v23 = vadd.f32 %v923_v19, %v845_v20 }
 0x10c   : > { %v926_v22 = vadd.f32 %v925_v21, %v849_v18 }
 0x10e   : > { %1181 = vrot.lane.b32.xlu0 %v926_v22, %s5516_s4  ;;  %3862 = vmatpush3.xpose.msk.msra.mxu1 %vm1014_vm1, %v926_v22 }
 0x10f   : > { %3866 = vmatprep.subr.mxu1 %v4427_v7  ;;  %v994_v26 = vpop.f32.mrb[0].mxu1 }
 0x110   : > { %v4771_v27 = vadd.f32 %v994_v26, %v853_v25  ;;  %v3860_v28 = vpop.f32.mrb[1].mxu1 }
 0x111   : > { %3864 = vmatmul.mubr.msk.f32.vlgmr.msra.gmra.mrb[2].mxu1 %vm1014_vm1, %v4762_v23 }
 0x112   : > { %1179 = vrot.lane.b32.xlu0 %v4762_v23, %s5516_s4  ;;  %3868 = vmatprep.mubr.msk.f32.mxu1 %vm4429_vm0, %v4427_v7 }
 0x113   : > { %3867 = vmatpush3.msra.mxu1 %v4771_v27 }
 0x114   : > { %3876 = vmatprep.subr.mxu1 %v4427_v7 }
 0x180   : > { %v1182_v29 = vpop.permute.xlu0 %1181 }
 0x181   : > { %3872 = vmatpush3.xpose.msk.msra.mxu0 %vm1014_vm1, %v1182_v29 }
 0x182   : > { %4136 = vmatprep.subr.bf16.mxu0 %v4428_v8 }
 0x184   : > { %v1180_v30 = vpop.permute.xlu0 %1179 }
 0x185   : > { %3874 = vmatmul.mubr.msk.f32.vlgmr.msra.gmra.mrb[2].mxu0 %vm1014_vm1, %v1180_v30 }
 0x186   : > { %3889 = vmatprep.mubr.msk.f32.mxu0 %vm4429_vm0, %v4427_v7  ;;  %4138 = vmatpush3.bf16.msra.mxu0 %v4137_v58 }
 0x187   : > { %4139 = vmatprep.subr.bf16.mxu0 %v4428_v8 }
 0x18a   : > { %4141 = vmatpush3.bf16.msra.mxu0 %v4140_v60  ;;  %v1012_v60 = vld [vmem:[%s5533_s8 + $0x70] sm:$0xff] }
 0x18b   : > { %3903 = vmatprep.subr.mxu0 %v4427_v7 }
 0x1e4   : > { %v1087_v32 = vpop.f32.mrb[2].mxu1 }
 0x1e5   : > { %v1091_v33 = vmul.f32 0.17677669, %v1087_v32  ;;  %v3865_v34 = vpop.f32.mrb[3].mxu1 }
 0x1e7   : > { %v1093_v35 = vsel %vm1092_vm2, -10000.0, %v1091_v33 }
 0x1e8   : > { %v1095_v36 = vsel %vm1094_vm3, %v1093_v35, -inf }
 0x1e9   : > { %1096 = vmax.xlane.f32.xlu1 %v1095_v36 }
 0x258   : > { %v1253_v37 = vpop.f32.mrb[2].mxu0 }
 0x259   : > { %v1257_v38 = vmul.f32 0.17677669, %v1253_v37  ;;  %v3875_v39 = vpop.f32.mrb[3].mxu0  ;;  %v1006_v37 = vld [vmem:[%s5533_s8 + $0x40] sm:$0xff] }
 0x25a   : > { %v1008_v39 = vld [vmem:[%s5533_s8 + $0x50] sm:$0xff] }
 0x25b   : > { %v1258_v40 = vsel %vm1092_vm2, -10000.0, %v1257_v38  ;;  %v1007_v38 = vld [vmem:[%s5533_s8 + $0x48] sm:$0xff] }
 0x25c   : > { %v1259_v41 = vsel %vm1094_vm3, %v1258_v40, -inf }
 0x25d   : > { %1260 = vmax.xlane.f32.xlu1 %v1259_v41  ;;  %v1009_v41 = vld [vmem:[%s5533_s8 + $0x58] sm:$0xff] }
 0x276   : > { %v1097_v42 = vpop.xlane.xlu1 %1096 }
 0x277   : > { %v1098_v43 = vsub.f32 %v1093_v35, %v1097_v42  ;;  %v4152_v42 = vpack.c.bf16 %v1009_v41, %v1008_v39  ;;  %v2120_v39 = vld [vmem:[%s5497_s12 + $0x78] sm:$0xff]  ;;  %v2012_v41 = vld [vmem:[%s5495_s10] sm:$0xff] }
 0x279   : > { %v1099_v44 = vmul.f32 1.442695, %v1098_v43 }
 0x27b   : > { %4381 = vpow2.f32 %v1099_v44 }
 0x285   : > { %v4382_v45 = vpop.eup %4381 }
 0x286   : > { %v1101_v46 = vsel %vm1094_vm3, %v4382_v45, 0.0 }
 0x287   : > { %1102 = vadd.xlane.f32.xlu0 %v1101_v46 }
 0x29d   : > { %1584 = vrot.lane.b32.xlu0 %v4771_v27, %s5512_s7 }
 0x2a1   : > { %1736 = vrot.lane.b32.xlu0 %v926_v22, %s5514_s30 }
 0x2ea   : > { %v1261_v47 = vpop.xlane.xlu1 %1260 }
 0x2eb   : > { %v1262_v48 = vsub.f32 %v1258_v40, %v1261_v47  ;;  %v4149_v40 = vpack.c.bf16 %v1007_v38, %v1006_v37  ;;  %v2115_v37 = vld [vmem:[%s5497_s12 + $0x50] sm:$0xff]  ;;  %v2118_v38 = vld [vmem:[%s5497_s12 + $0x68] sm:$0xff] }
 0x2ed   : > { %v1263_v49 = vmul.f32 1.442695, %v1262_v48 }
 0x2ef   : > { %4383 = vpow2.f32 %v1263_v49 }
 0x2f9   : > { %v4384_v50 = vpop.eup %4383 }
 0x2fa   : > { %v1265_v51 = vsel %vm1094_vm3, %v4384_v50, 0.0 }
 0x2fb   : > { %1266 = vadd.xlane.f32.xlu1 %v1265_v51 }
 0x30c   : > { %1271 = vrot.lane.b32.xlu1 %v4771_v27, %s5516_s4 }
 0x310   : > { %1495 = vrot.lane.b32.xlu1 %v926_v22, %s5512_s7 }
 0x314   : > { %v1103_v52 = vpop.xlane.xlu0 %1102  ;;  %1493 = vrot.lane.b32.xlu1 %v4762_v23, %s5512_s7  ;;  %s5542_s7 = sld [smem:[#allocation5_spill]] }
 0x315   : > { %4385 = vrcp.f32 %v1103_v52 }
 0x318   : > { %v1585_v11 = vpop.permute.xlu0 %1584 }
 0x31a   : > { %s782_s1 = scalar_lea.vmem %s5542_s7, %s4711_s28  ;;  %s786_s7 = scalar_lea.vmem %s5509_s24, %s4711_s28 }
 0x31f   : > { %v4386_v53 = vpop.eup %4385 }
 0x320   : > { %v1105_v54 = vmul.f32 %v4386_v53, %v4382_v45 }
 0x322   : > { %3869 = vmatmul.mubr.msk.f32.vlgmr.msra.gmra.mrb[4].mxu1 %vm1094_vm3, %v1105_v54 }
 0x323   : > { %3878 = vmatprep.mubr.msk.f32.mxu1 %vm4429_vm0, %v4427_v7 }
 0x388   : > { %v1267_v61 = vpop.xlane.xlu1 %1266 }
 0x389   : > { %4387 = vrcp.f32 %v1267_v61  ;;  %v4155_v61 = vpack.c.bf16 %v1011_v31, %v1010_v59 }
 0x38c   : > { %v1272_v62 = vpop.permute.xlu1 %1271 }
 0x38d   : > { %3877 = vmatpush3.msra.mxu1 %v1272_v62  ;;  %v1013_v62 = vld [vmem:[%s5533_s8 + $0x78] sm:$0xff] }
 0x38e   : > { %4142 = vmatprep.subr.bf16.mxu1 %v4428_v8  ;;  %v4158_v63 = vpack.c.bf16 %v1013_v62, %v1012_v60  ;;  %v2127_v62 = vld [vmem:[%s5497_s12 + $0xb0] sm:$0xff] }
 0x390   : > { %v1496_v13 = vpop.permute.xlu1 %1495 }
 0x393   : > { %v4388_v1 = vpop.eup %4387 }
 0x394   : > { %v1269_v3 = vmul.f32 %v4388_v1, %v4384_v50  ;;  %v1494_v18 = vpop.permute.xlu1 %1493 }
 0x396   : > { %3879 = vmatmul.mubr.msk.f32.vlgmr.msra.gmra.mrb[6].mxu1 %vm1094_vm3, %v1269_v3 }
 0x397   : > { %4144 = vmatpush3.bf16.msra.mxu1 %v4143_v2  ;;  %3900 = vmatprep.mubr.msk.f32.mxu1 %vm4429_vm0, %v4427_v7 }
 0x398   : > { %4145 = vmatprep.subr.bf16.mxu1 %v4428_v8 }
 0x39b   : > { %4147 = vmatpush3.bf16.msra.mxu1 %v4146_v9 }
 0x39c   : > { %3908 = vmatprep.subr.mxu1 %v4427_v7 }
 0x3f5   : > { %v1175_v10 = vpop.f32.mrb[4].mxu1 }
 0x3f6   : > { %v3870_v12 = vpop.f32.mrb[5].mxu1  ;;  %3901 = vmatmul.mubr.msk.f32.vlgmr.msra.gmra.mrb[8].mxu1 %vm1014_vm1, %v1175_v10 }
 0x3f7   : > { %3909 = vmatpush3.msra.mxu1 %v1585_v11  ;;  %3910 = vmatprep.mubr.msk.f32.mxu1 %vm4429_vm0, %v4427_v7  ;;  %v3640_v12 = vld [vmem:[%s5534_s0] ss:$0 sm:$0xff]  ;;  %s3676_s0 = sshll.u32 %s5546_s26, 4  ;;  %s5544_s26 = smov 64  }
 0x3f8   : > { %3924 = vmatprep.subr.mxu1 %v4427_v7 }
 0x469   : > { %v1343_v14 = vpop.f32.mrb[6].mxu1 }
 0x46a   : > { %v3880_v16 = vpop.f32.mrb[7].mxu1  ;;  %3890 = vmatmul.mubr.msk.f32.vlgmr.msra.gmra.mrb[4].mxu0 %vm1014_vm1, %v1343_v14 }
 0x46b   : > { %3904 = vmatpush3.xpose.msk.msra.mxu0 %vm1014_vm1, %v1496_v13  ;;  %3905 = vmatprep.mubr.msk.f32.mxu0 %vm4429_vm0, %v4427_v7 }
 0x46c   : > { %4148 = vmatprep.subr.bf16.mxu0 %v4428_v8 }
 0x46e   : > { %3906 = vmatmul.mubr.msk.f32.vlgmr.msra.gmra.mrb[6].mxu0 %vm1014_vm1, %v1494_v18 }
 0x46f   : > { %3921 = vmatprep.mubr.msk.f32.mxu0 %vm4429_vm0, %v4427_v7  ;;  %4150 = vmatpush3.bf16.msra.mxu0 %v4149_v40 }
 0x470   : > { %4151 = vmatprep.subr.bf16.mxu0 %v4428_v8 }
 0x473   : > { %4153 = vmatpush3.bf16.msra.mxu0 %v4152_v42  ;;  %v2013_v42 = vld [vmem:[%s5495_s10 + $0x8] sm:$0xff] }
 0x474   : > { %4154 = vmatprep.subr.bf16.mxu0 %v4428_v8 }
 0x4c9   : > { %v1489_v19 = vpop.f32.mrb[8].mxu1 }
 0x4ca   : > { %v3902_v20 = vpop.f32.mrb[9].mxu1 }
 0x4cb   : > { %v2108_v20 = vld [vmem:[%s5497_s12 + $0x18] sm:$0xff] }
 0x53d   : > { %v1416_v21 = vpop.f32.mrb[4].mxu0 }
 0x53e   : > { %v4850_v22 = vadd.f32 %v1489_v19, %v1416_v21  ;;  %v3891_v24 = vpop.f32.mrb[5].mxu0  ;;  %v2106_v19 = vld [vmem:[%s5497_s12 + $0x8] sm:$0xff]  ;;  %v2105_v21 = vld [vmem:[%s5497_s12] sm:$0xff] }
 0x53f   : > { %v2110_v24 = vld [vmem:[%s5497_s12 + $0x28] sm:$0xff] }
 0x541   : > { %v1567_v25 = vpop.f32.mrb[6].mxu0 }
 0x542   : > { %v1571_v26 = vmul.f32 0.17677669, %v1567_v25  ;;  %v3907_v28 = vpop.f32.mrb[7].mxu0  ;;  %v2112_v25 = vld [vmem:[%s5497_s12 + $0x38] sm:$0xff] }
 0x543   : > { %v4188_v28 = vpack.c.bf16 %v2112_v25, %v2110_v24 }
 0x544   : > { %v1572_v29 = vsel %vm1092_vm2, -10000.0, %v1571_v26 }
 0x545   : > { %v1573_v30 = vsel %vm1094_vm3, %v1572_v29, -inf }
 0x546   : > { %1574 = vmax.xlane.f32.xlu1 %v1573_v30  ;;  %v2111_v30 = vld [vmem:[%s5497_s12 + $0x30] sm:$0xff] }
 0x5d3   : > { %v1575_v32 = vpop.xlane.xlu1 %1574 }
 0x5d4   : > { %v1576_v33 = vsub.f32 %v1572_v29, %v1575_v32  ;;  %v2109_v29 = vld [vmem:[%s5497_s12 + $0x20] sm:$0xff]  ;;  %v2114_v32 = vld [vmem:[%s5497_s12 + $0x48] sm:$0xff] }
 0x5d6   : > { %v1577_v34 = vmul.f32 1.442695, %v1576_v33  ;;  %v2116_v33 = vld [vmem:[%s5497_s12 + $0x58] sm:$0xff] }
 0x5d8   : > { %4389 = vpow2.f32 %v1577_v34  ;;  %v4190_v34 = vpack.c.bf16 %v2111_v30, %v2109_v29  ;;  %v2023_v30 = vld [vmem:[%s5495_s10 + $0x58] sm:$0xff] }
 0x5e2   : > { %v4390_v35 = vpop.eup %4389 }
 0x5e3   : > { %v1579_v36 = vsel %vm1094_vm3, %v4390_v35, 0.0 }
 0x5e4   : > { %1580 = vadd.xlane.f32.xlu0 %v1579_v36  ;;  %v2113_v36 = vld [vmem:[%s5497_s12 + $0x40] sm:$0xff] }
 0x5e5   : > { %v4194_v40 = vpack.c.bf16 %v2115_v37, %v2113_v36  ;;  %v2026_v36 = vld [vmem:[%s5495_s10 + $0x70] sm:$0xff]  ;;  %v2027_v37 = vld [vmem:[%s5495_s10 + $0x78] sm:$0xff] }
 0x5fa   : > { %1734 = vrot.lane.b32.xlu0 %v4762_v23, %s5514_s30  ;;  %v1737_v23 = vpop.permute.xlu0 %1736 }
 0x671   : > { %v1581_v43 = vpop.xlane.xlu0 %1580 }
 0x672   : > { %4391 = vrcp.f32 %v1581_v43  ;;  %v2117_v43 = vld [vmem:[%s5497_s12 + $0x60] sm:$0xff] }
 0x675   : > { %v1735_v46 = vpop.permute.xlu0 %1734 }
 0x67c   : > { %v4392_v44 = vpop.eup %4391 }
 0x67d   : > { %v1583_v45 = vmul.f32 %v4392_v44, %v4390_v35  ;;  %v4192_v35 = vpack.c.bf16 %v2116_v33, %v2114_v32  ;;  %v2119_v44 = vld [vmem:[%s5497_s12 + $0x70] sm:$0xff]  ;;  %v2024_v33 = vld [vmem:[%s5495_s10 + $0x60] sm:$0xff] }
 0x67f   : > { %3911 = vmatmul.mubr.msk.f32.vlgmr.msra.gmra.mrb[10].mxu1 %vm1094_vm3, %v1583_v45  ;;  %v2122_v45 = vld [vmem:[%s5497_s12 + $0x88] sm:$0xff] }
 0x680   : > { %3925 = vmatpush3.xpose.msk.msra.mxu1 %vm1014_vm1, %v1737_v23  ;;  %3926 = vmatprep.mubr.msk.f32.mxu1 %vm4429_vm0, %v4427_v7  ;;  %v4196_v23 = vpack.c.bf16 %v2120_v39, %v2118_v38  ;;  %v4182_v38 = vpack.c.bf16 %v2027_v37, %v2026_v36  ;;  %v2137_v39 = vld [vmem:[%s5498_s13] sm:$0x3] }
 0x681   : > { %3929 = vmatprep.subr.mxu1 %v4427_v7 }
 0x683   : > { %3927 = vmatmul.mubr.msk.f32.vlgmr.msra.gmra.mrb[12].mxu1 %vm1014_vm1, %v1735_v46  ;;  %v4161_v46 = vpack.c.bf16 %v2013_v42, %v2012_v41 }
 0x684   : > { %3931 = vmatprep.mubr.msk.f32.mxu1 %vm4429_vm0, %v4427_v7 }
 0x752   : > { %v1656_v47 = vpop.f32.mrb[10].mxu1 }
 0x753   : > { %v3912_v48 = vpop.f32.mrb[11].mxu1  ;;  %3922 = vmatmul.mubr.msk.f32.vlgmr.msra.gmra.mrb[8].mxu0 %vm1014_vm1, %v1656_v47  ;;  %v2124_v47 = vld [vmem:[%s5497_s12 + $0x98] sm:$0xff] }
 0x754   : > { %3942 = vmatprep.mubr.msk.f32.mxu0 %vm4429_vm0, %v4427_v7  ;;  %4156 = vmatpush3.bf16.msra.mxu0 %v4155_v61  ;;  %v2014_v48 = vld [vmem:[%s5495_s10 + $0x10] sm:$0xff]  ;;  %v2125_v61 = vld [vmem:[%s5497_s12 + $0xa0] sm:$0xff] }
 0x755   : > { %4157 = vmatprep.subr.bf16.mxu0 %v4428_v8 }
 0x756   : > { %v1808_v49 = vpop.f32.mrb[12].mxu1 }
 0x757   : > { %v1812_v50 = vmul.f32 0.17677669, %v1808_v49  ;;  %v3928_v51 = vpop.f32.mrb[13].mxu1  ;;  %v2015_v49 = vld [vmem:[%s5495_s10 + $0x18] sm:$0xff] }
 0x758   : > { %4159 = vmatpush3.bf16.msra.mxu0 %v4158_v63  ;;  %v4198_v51 = vpack.c.bf16 %v2119_v44, %v2117_v43  ;;  %v2130_v63 = vld [vmem:[%s5497_s12 + $0xc8] sm:$0xff] }
 0x759   : > { %v1813_v52 = vsel %vm1092_vm2, -10000.0, %v1812_v50  ;;  %v4164_v50 = vpack.c.bf16 %v2015_v49, %v2014_v48  ;;  %v3642_v49 = vld [vmem:[%s5494_s9] ss:$0 sm:$0xff] }
 0x75a   : > { %v1814_v53 = vsel %vm1094_vm3, %v1813_v52, -inf }
 0x75b   : > { %1815 = vmax.xlane.f32.xlu0 %v1814_v53  ;;  %v2017_v53 = vld [vmem:[%s5495_s10 + $0x28] sm:$0xff] }
 0x7e8   : > { %v1816_v54 = vpop.xlane.xlu0 %1815 }
 0x7e9   : > { %v1817_v55 = vsub.f32 %v1813_v52, %v1816_v54  ;;  %v2016_v52 = vld [vmem:[%s5495_s10 + $0x20] sm:$0xff]  ;;  %v4200_v54 = vpack.c.bf16 %v2124_v47, %v2122_v45 }
 0x7ea   : > { %v4167_v59 = vpack.c.bf16 %v2017_v53, %v2016_v52  ;;  %v2142_v52 = vrot.slane %v2137_v39, %v4756_v17 }
 0x7eb   : > { %v1818_v56 = vmul.f32 1.442695, %v1817_v55  ;;  %v2121_v55 = vld [vmem:[%s5497_s12 + $0x80] sm:$0xff] }
 0x7ed   : > { %4393 = vpow2.f32 %v1818_v56  ;;  %v2123_v56 = vld [vmem:[%s5497_s12 + $0x90] sm:$0xff] }
 0x7ee   : > { %v4202_v31 = vpack.c.bf16 %v2123_v56, %v2121_v55 }
 0x7f7   : > { %v4394_v57 = vpop.eup %4393 }
 0x7f8   : > { %v1820_v58 = vsel %vm1094_vm3, %v4394_v57, 0.0 }
 0x7f9   : > { %1821 = vadd.xlane.f32.xlu1 %v1820_v58  ;;  %v2128_v58 = vld [vmem:[%s5497_s12 + $0xb8] sm:$0xff] }
 0x80a   : > { %1825 = vrot.lane.b32.xlu1 %v4771_v27, %s5514_s30  ;;  %s774_s30 = scalar_lea.vmem %s5535_s27, %s3676_s0  ;;  %s5543_s27 = smov 32  }
 0x80b   : > { %v789_v25 = vld [vmem:[%s774_s30 + $0x8] sm:$0x3] }
 0x826   : > { %v1729_v27 = vpop.f32.mrb[8].mxu0 }
 0x827   : > { %v1733_v0 = vadd.f32 %v1729_v27, %v4850_v22  ;;  %v3923_v1 = vpop.f32.mrb[9].mxu0  ;;  %v4184_v22 = vpack.c.bf16 %v2108_v20, %v2106_v19  ;;  %v2132_v27 = vld [vmem:[%s5497_s12 + $0xd8] sm:$0xff] }
 0x828   : > { %v4208_v1 = vpack.c.bf16 %v2132_v27, %v2130_v63 }
 0x829   : > { %4185 = vmatprep.subr.bf16.mxu0 %v4184_v22  ;;  %v2018_v22 = vld [vmem:[%s5495_s10 + $0x30] sm:$0xff] }
 0x886   : > { %v1822_v2 = vpop.xlane.xlu1 %1821 }
 0x887   : > { %4395 = vrcp.f32 %v1822_v2  ;;  %v2129_v2 = vld [vmem:[%s5497_s12 + $0xc0] sm:$0xff] }
 0x88a   : > { %v1826_v3 = vpop.permute.xlu1 %1825 }
 0x88b   : > { %3930 = vmatpush3.msra.mxu1 %v1826_v3  ;;  %v2131_v3 = vld [vmem:[%s5497_s12 + $0xd0] sm:$0xff] }
 0x88c   : > { %4160 = vmatprep.subr.bf16.mxu1 %v4428_v8 }
 0x891   : > { %v4396_v4 = vpop.eup %4395 }
 0x892   : > { %v1824_v5 = vmul.f32 %v4396_v4, %v4394_v57  ;;  %v2126_v57 = vld [vmem:[%s5497_s12 + $0xa8] sm:$0xff] }
 0x893   : > { %v4204_v60 = vpack.c.bf16 %v2128_v58, %v2126_v57  ;;  %v2134_v4 = vld [vmem:[%s5497_s12 + $0xe8] sm:$0xff] }
 0x894   : > { %3932 = vmatmul.mubr.msk.f32.vlgmr.msra.gmra.mrb[14].mxu1 %vm1094_vm3, %v1824_v5  ;;  %v2136_v5 = vld [vmem:[%s5497_s12 + $0xf8] sm:$0xff] }
 0x895   : > { %3977 = vmatprep.mubr.msk.f32.mxu1 %vm4429_vm0, %v4427_v7  ;;  %4162 = vmatpush3.bf16.msra.mxu1 %v4161_v46 }
 0x896   : > { %4163 = vmatprep.subr.bf16.mxu1 %v4428_v8 }
 0x899   : > { %4165 = vmatpush3.bf16.msra.mxu1 %v4164_v50 }
 0x89a   : > { %4166 = vmatprep.subr.bf16.mxu1 %v4428_v8 }
 0x89d   : > { %4168 = vmatpush3.bf16.msra.mxu1 %v4167_v59 }
 0x89e   : > { %4169 = vmatprep.subr.bf16.mxu1 %v4428_v8 }
 0x967   : > { %v1897_v9 = vpop.f32.mrb[14].mxu1 }
 0x968   : > { %v3933_v10 = vpop.f32.mrb[15].mxu1  ;;  %3943 = vmatmul.mubr.msk.f32.vlgmr.msra.gmra.mrb[10].mxu0 %vm1014_vm1, %v1897_v9  ;;  %v4210_v9 = vpack.c.bf16 %v2131_v3, %v2129_v2 }
 0x969   : > { %2213 = vmatprep.mubr.f32.mxu0 %v4427_v7  ;;  %v4212_v10 = vpack.c.bf16 %v2136_v5, %v2134_v4 }
 0xa3b   : > { %v1970_v11 = vpop.f32.mrb[10].mxu0 }
 0xa3c   : > { %v1974_v13 = vadd.f32 %v1970_v11, %v1733_v0  ;;  %v3944_v14 = vpop.f32.mrb[11].mxu0  ;;  %v4206_v0 = vpack.c.bf16 %v2127_v62, %v2125_v61  ;;  %v2133_v11 = vld [vmem:[%s5497_s12 + $0xe0] sm:$0xff] }
 0xa3d   : > { %v788_v14 = vld [vmem:[%s774_s30] sm:$0xff]  ;;  %s5536_s30 = sld [smem:[#allocation10_spill]] }
 0xa3e   : > { %v1982_v16 = vadd.f32 %v3640_v12, %v1974_v13  ;;  %v2135_v12 = vld [vmem:[%s5497_s12 + $0xf0] sm:$0xff] }
 0xa3f   : > { %v4214_v13 = vpack.c.bf16 %v2135_v12, %v2133_v11 }
 0xa40   : > { %v4913_v18 = vadd.f32 %v1982_v16, %v4731_v6  ;;  %v2107_v6 = vld [vmem:[%s5497_s12 + $0x10] sm:$0xff] }
 0xa41   : > { %v4186_v26 = vpack.c.bf16 %v2107_v6, %v2105_v21  ;;  %v2019_v6 = vld [vmem:[%s5495_s10 + $0x38] sm:$0xff] }
 0xa42   : > { %1986 = vadd.xlane.f32.xlu1 %v4913_v18  ;;  %v4170_v24 = vpack.c.bf16 %v2019_v6, %v2018_v22 }
 0xa43   : > { %4187 = vmatpush1.bf16.msra.mxu0 %v4186_v26  ;;  %v2021_v26 = vld [vmem:[%s5495_s10 + $0x48] sm:$0xff]  ;;  %v3641_v47 = vld [vmem:[%s5536_s30] ss:$0 sm:$0xff] }
 0xa44   : > { %4189 = vmatprep.subr.bf16.mxu0 %v4188_v28  ;;  %4171 = vmatpush3.bf16.msra.mxu1 %v4170_v24  ;;  %v2022_v28 = vld [vmem:[%s5495_s10 + $0x50] sm:$0xff] }
 0xa45   : > { %4172 = vmatprep.subr.bf16.mxu1 %v4428_v8  ;;  %v4176_v32 = vpack.c.bf16 %v2023_v30, %v2022_v28 }
 0xa47   : > { %4191 = vmatpush1.bf16.msra.mxu0 %v4190_v34  ;;  %v2025_v34 = vld [vmem:[%s5495_s10 + $0x68] sm:$0xff] }
 0xa48   : > { %4193 = vmatprep.subr.bf16.mxu0 %v4192_v35  ;;  %v4179_v35 = vpack.c.bf16 %v2025_v34, %v2024_v33 }
 0xa4b   : > { %4195 = vmatpush1.bf16.msra.mxu0 %v4194_v40  ;;  %v2146_v40 = vrot.slane %v2137_v39, %v4751_v15  ;;  %v2231_v39 = vld [vmem:[%s5499_s14 + $0x28] sm:$0xff] }
 0xa4c   : > { %4197 = vmatprep.subr.bf16.mxu0 %v4196_v23 }
 0xa4f   : > { %4199 = vmatpush1.bf16.msra.mxu0 %v4198_v51 }
 0xa50   : > { %4201 = vmatprep.subr.bf16.mxu0 %v4200_v54 }
 0xa53   : > { %4203 = vmatpush1.bf16.msra.mxu0 %v4202_v31 }
 0xa54   : > { %4205 = vmatprep.subr.bf16.mxu0 %v4204_v60 }
 0xa57   : > { %4207 = vmatpush1.bf16.msra.mxu0 %v4206_v0 }
 0xa58   : > { %4209 = vmatprep.subr.bf16.mxu0 %v4208_v1  ;;  %v3643_v1 = vld [vmem:[%s5496_s11] ss:$0 sm:$0xff] }
 0xa5b   : > { %4211 = vmatpush1.bf16.msra.mxu0 %v4210_v9 }
 0xa5c   : > { %4213 = vmatprep.subr.bf16.mxu0 %v4212_v10  ;;  %v5129_v10 = vld [vmem:[%s782_s1] sm:$0xff] }
 0xa5d   : > { %vm2322_vm8 = vcmp.eq.f32.partialorder %v5129_v10, 0.0 }
 0xa5f   : > { %4215 = vmatpush1.bf16.msra.mxu0 %v4214_v13 }
 0xa60   : > { %4224 = vmatprep.subr.bf16.mxu0 %v4428_v8 }
 0xa62   : > { %2214 = vmatmul.mubr.f32.vlgmr.msra.gmra.mrb[12].mxu0 %v788_v14 }
 0xa63   : > { %2219 = vmatprep.mubr.f32.mxu0 %v4427_v7 }
 0xa66   : > { %2220 = vmatmul.mubr.f32.gmra.mrb[14].mxu0 %v789_v25 }
 0xa67   : > { %3998 = vmatprep.mubr.msk.f32.mxu0 %vm4429_vm0, %v4427_v7 }
 0xacf   : > { %v1987_v16 = vpop.xlane.xlu1 %1986 }
 0xad0   : > { %v1989_v19 = vmul.f32 0.0078125, %v1987_v16 }
 0xad2   : > { %v1990_v20 = vsub.f32 %v4913_v18, %v1989_v19  ;;  %v2020_v18 = vld [vmem:[%s5495_s10 + $0x40] sm:$0xff] }
 0xad3   : > { %v4173_v29 = vpack.c.bf16 %v2021_v26, %v2020_v18 }
 0xad4   : > { %v1991_v21 = vmul.f32 %v1990_v20, %v1990_v20 }
 0xad5   : > { %4174 = vmatpush3.bf16.msra.mxu1 %v4173_v29 }
 0xad6   : > { %1992 = vadd.xlane.f32.xlu0 %v1991_v21  ;;  %4175 = vmatprep.subr.bf16.mxu1 %v4428_v8 }
 0xad9   : > { %4177 = vmatpush3.bf16.msra.mxu1 %v4176_v32 }
 0xada   : > { %4178 = vmatprep.subr.bf16.mxu1 %v4428_v8 }
 0xadd   : > { %4180 = vmatpush3.bf16.msra.mxu1 %v4179_v35 }
 0xade   : > { %4181 = vmatprep.subr.bf16.mxu1 %v4428_v8 }
 0xae1   : > { %4183 = vmatpush3.bf16.msra.mxu1 %v4182_v38  ;;  %v2230_v38 = vld [vmem:[%s5499_s14 + $0x20] sm:$0xff] }
 0xae2   : > { %4216 = vmatprep.subr.bf16.mxu1 %v4428_v8 }
 0xb35   : > { %v2215_v41 = vpop.f32.mrb[12].mxu0 }
 0xb36   : > { %v2217_v42 = vpop.f32.mrb[13].mxu0  ;;  %v2216_v53 = vadd.f32 %v2215_v41, %v2142_v52  ;;  %v4233_v41 = vpack.c.bf16 %v2231_v39, %v2230_v38 }
 0xb37   : > { %v2218_v23 = vadd.f32 %v2217_v42, %v2146_v40  ;;  %v2233_v42 = vld [vmem:[%s5499_s14 + $0x38] sm:$0xff] }
 0xb39   : > { %v2221_v54 = vpop.f32.mrb[14].mxu0 }
 0xb3a   : > { %v2222_v55 = vadd.f32 %v2221_v54, %v2142_v52  ;;  %v2223_v56 = vpop.f32.mrb[15].mxu0  ;;  %v2228_v54 = vld [vmem:[%s5499_s14 + $0x10] sm:$0xff] }
 0xb3b   : > { %v2224_v57 = vadd.f32 %v2223_v56, %v2146_v40  ;;  %v2232_v40 = vld [vmem:[%s5499_s14 + $0x30] sm:$0xff] }
 0xb3c   : > { %v4217_v59 = vpack.c.bf16 %v2222_v55, %v2216_v53  ;;  %v4351_v31 = vpack.i.bf16 %v2222_v55, %v2216_v53  ;;  %v2229_v55 = vld [vmem:[%s5499_s14 + $0x18] sm:$0xff] }
 0xb3d   : > { %v4221_v60 = vpack.c.bf16 %v2224_v57, %v2218_v23  ;;  %v5099_v61 = vpack.i.bf16 %v2224_v57, %v2218_v23  ;;  %v4236_v23 = vpack.c.bf16 %v2233_v42, %v2232_v40  ;;  %v4242_v56 = vpack.c.bf16 %v2229_v55, %v2228_v54 }
 0xb3e   : > { %4352 = vrot.lane.b32.xlu0 %v4351_v31, %s5539_s3 }
 0xb63   : > { %v1993_v43 = vpop.xlane.xlu0 %1992 }
 0xb64   : > { %v1994_v44 = vmul.f32 0.0078125, %v1993_v43 }
 0xb66   : > { %v1995_v45 = vadd.f32 1e-12, %v1994_v44 }
 0xb68   : > { %4397 = vrsqrt.f32 %v1995_v45 }
 0xb72   : > { %v4398_v46 = vpop.eup %4397 }
 0xb73   : > { %v1997_v48 = vmul.f32 %v4398_v46, %v1990_v20 }
 0xb75   : > { %v2004_v50 = vmul.f32 %v3641_v47, %v1997_v48  ;;  %v2226_v48 = vld [vmem:[%s5499_s14] sm:$0xff] }
 0xb77   : > { %v5087_v51 = vadd.f32 %v3642_v49, %v2004_v50  ;;  %v2227_v49 = vld [vmem:[%s5499_s14 + $0x8] sm:$0xff] }
 0xb78   : > { %v4239_v52 = vpack.c.bf16 %v2227_v49, %v2226_v48  ;;  %v2237_v48 = vld [vmem:[%s5499_s14 + $0x58] sm:$0xff] }
 0xb79   : > { %3978 = vmatmul.mubr.f32.vlgmr.msra.gmra.mrb[16].mxu1 %v5087_v51 }
 0xb7a   : > { %3984 = vmatprep.mubr.msk.f32.mxu1 %vm4429_vm0, %v4427_v7  ;;  %4219 = vmatpush3.bf16.xpose.msk.msra.mxu1 %vm5095_vm4, %v4217_v59 }
 0xb7b   : > { %4220 = vmatprep.subr.bf16.mxu1 %v4428_v8 }
 0xbb0   : > { %v4353_v62 = vpop.permute.xlu0 %4352 }
 0xbb1   : > { %v4355_v63 = vunpack.i.h.bf16 %v4353_v62  ;;  %v4354_v27 = vunpack.i.l.bf16 %v4353_v62 }
 0xbb3   : > { %v4225_v0 = vpack.c.bf16 %v4355_v63, %v4354_v27 }
 0xbb5   : > { %4227 = vmatpush3.bf16.xpose.msk.msra.mxu0 %vm5095_vm4, %v4225_v0 }
 0xbb6   : > { %4232 = vmatprep.subr.bf16.mxu0 %v4428_v8 }
 0xc4c   : > { %v2101_v2 = vpop.f32.mrb[16].mxu1 }
 0xc4d   : > { %v2102_v3 = vadd.f32 %v3643_v1, %v2101_v2  ;;  %v3979_v4 = vpop.f32.mrb[17].mxu1 }
 0xc4f   : > { %2413 = vrot.lane.b32.xlu0 %v2102_v3, %s5539_s3  ;;  %3985 = vmatmul.mubr.msk.f32.vlgmr.msra.gmra.mrb[18].mxu1 %vm1014_vm1, %v2102_v3 }
 0xc50   : > { %4223 = vmatpush3.bf16.msk.msra.mxu1 %vm5111_vm7, %v4221_v60  ;;  %3991 = vmatprep.mubr.msk.f32.mxu1 %vm4429_vm0, %v4427_v7 }
 0xc51   : > { %4228 = vmatprep.subr.bf16.mxu1 %v4428_v8 }
 0xcc1   : > { %v2414_v9 = vpop.permute.xlu0 %2413 }
 0xcc2   : > { %3999 = vmatmul.mubr.msk.f32.vlgmr.msra.gmra.mrb[16].mxu0 %vm1014_vm1, %v2414_v9 }
 0xcc3   : > { %4016 = vmatprep.mubr.msk.f32.mxu0 %vm4429_vm0, %v4427_v7  ;;  %4234 = vmatpush3.bf16.msra.mxu0 %v4233_v41 }
 0xcc4   : > { %4235 = vmatprep.subr.bf16.mxu0 %v4428_v8 }
 0xcc7   : > { %4237 = vmatpush3.bf16.msra.mxu0 %v4236_v23 }
 0xcc8   : > { %4244 = vmatprep.subr.bf16.mxu0 %v4428_v8 }
 0xd22   : > { %v2317_v11 = vpop.f32.mrb[18].mxu1 }
 0xd23   : > { %v2321_v12 = vmul.f32 0.17677669, %v2317_v11  ;;  %v3986_v13 = vpop.f32.mrb[19].mxu1 }
 0xd25   : > { %v2323_v14 = vsel %vm2322_vm8, -10000.0, %v2321_v12 }
 0xd26   : > { %v2325_v16 = vsel %vm2324_vm9, %v2323_v14, -inf }
 0xd27   : > { %2326 = vmax.xlane.f32.xlu1 %v2325_v16 }
 0xd95   : > { %v2491_v19 = vpop.f32.mrb[16].mxu0 }
 0xd96   : > { %v2495_v20 = vmul.f32 0.17677669, %v2491_v19  ;;  %v4000_v21 = vpop.f32.mrb[17].mxu0 }
 0xd98   : > { %v2496_v22 = vsel %vm2322_vm8, -10000.0, %v2495_v20 }
 0xd99   : > { %v2497_v6 = vsel %vm2324_vm9, %v2496_v22, -inf }
 0xd9a   : > { %2498 = vmax.xlane.f32.xlu0 %v2497_v6 }
 0xdb0   : > { %4367 = vrot.lane.b32.xlu0 %v4351_v31, %s5543_s27 }
 0xdb4   : > { %v2327_v24 = vpop.xlane.xlu1 %2326 }
 0xdb5   : > { %v2328_v25 = vsub.f32 %v2323_v14, %v2327_v24 }
 0xdb7   : > { %v2329_v18 = vmul.f32 1.442695, %v2328_v25 }
 0xdb9   : > { %4399 = vpow2.f32 %v2329_v18 }
 0xdc3   : > { %v4400_v26 = vpop.eup %4399 }
 0xdc4   : > { %v2331_v28 = vsel %vm2324_vm9, %v4400_v26, 0.0 }
 0xdc5   : > { %2332 = vadd.xlane.f32.xlu1 %v2331_v28 }
 0xe27   : > { %v2499_v29 = vpop.xlane.xlu0 %2498 }
 0xe28   : > { %v2500_v30 = vsub.f32 %v2496_v22, %v2499_v29 }
 0xe2a   : > { %v2501_v32 = vmul.f32 1.442695, %v2500_v30 }
 0xe2b   : > { %v4368_v0 = vpop.permute.xlu0 %4367 }
 0xe2c   : > { %4401 = vpow2.f32 %v2501_v32  ;;  %v4370_v2 = vunpack.i.h.bf16 %v4368_v0 }
 0xe36   : > { %v4402_v33 = vpop.eup %4401 }
 0xe37   : > { %v2503_v34 = vsel %vm2324_vm9, %v4402_v33, 0.0 }
 0xe38   : > { %2504 = vadd.xlane.f32.xlu1 %v2503_v34 }
 0xe49   : > { %4357 = vrot.lane.b32.xlu1 %v5099_v61, %s5539_s3 }
 0xe4d   : > { %4362 = vrot.lane.b32.xlu1 %v4351_v31, %s5544_s26 }
 0xe51   : > { %2735 = vrot.lane.b32.xlu1 %v2102_v3, %s5544_s26 }
 0xe52   : > { %v2333_v35 = vpop.xlane.xlu1 %2332 }
 0xe53   : > { %4403 = vrcp.f32 %v2333_v35 }
 0xe55   : > { %2984 = vrot.lane.b32.xlu1 %v2102_v3, %s5543_s27  ;;  %v4369_v3 = vunpack.i.l.bf16 %v4368_v0 }
 0xe57   : > { %v4259_v4 = vpack.c.bf16 %v4370_v2, %v4369_v3 }
 0xe5d   : > { %v4404_v36 = vpop.eup %4403 }
 0xe5e   : > { %v2335_v37 = vmul.f32 %v4404_v36, %v4400_v26 }
 0xe60   : > { %3992 = vmatmul.mubr.msk.f32.vlgmr.msra.gmra.mrb[20].mxu1 %vm2324_vm9, %v2335_v37 }
 0xe61   : > { %4005 = vmatprep.mubr.msk.f32.mxu1 %vm4429_vm0, %v4427_v7 }
 0xec5   : > { %v2505_v43 = vpop.xlane.xlu1 %2504 }
 0xec6   : > { %4405 = vrcp.f32 %v2505_v43 }
 0xec9   : > { %v4358_v44 = vpop.permute.xlu1 %4357 }
 0xeca   : > { %v4360_v45 = vunpack.i.h.bf16 %v4358_v44  ;;  %v4359_v46 = vunpack.i.l.bf16 %v4358_v44  ;;  %v2234_v44 = vld [vmem:[%s5499_s14 + $0x40] sm:$0xff] }
 0xecc   : > { %v4229_v47 = vpack.c.bf16 %v4360_v45, %v4359_v46  ;;  %v2235_v45 = vld [vmem:[%s5499_s14 + $0x48] sm:$0xff]  ;;  %v2236_v46 = vld [vmem:[%s5499_s14 + $0x50] sm:$0xff] }
 0xecd   : > { %v4363_v31 = vpop.permute.xlu1 %4362  ;;  %v4256_v49 = vpack.c.bf16 %v2237_v48, %v2236_v46  ;;  %v3287_v46 = vld [vmem:[%s5503_s18 + $0x90] sm:$0xff] }
 0xece   : > { %4231 = vmatpush3.bf16.msk.msra.mxu1 %vm5111_vm7, %v4229_v47  ;;  %v4365_v60 = vunpack.i.h.bf16 %v4363_v31  ;;  %v4364_v62 = vunpack.i.l.bf16 %v4363_v31  ;;  %v4253_v47 = vpack.c.bf16 %v2235_v45, %v2234_v44  ;;  %v3285_v45 = vld [vmem:[%s5503_s18 + $0x80] sm:$0xff] }
 0xecf   : > { %4238 = vmatprep.subr.bf16.mxu1 %v4428_v8  ;;  %v4290_v48 = vpack.c.bf16 %v3287_v46, %v3285_v45 }
 0xed0   : > { %v4406_v50 = vpop.eup %4405  ;;  %v4245_v63 = vpack.c.bf16 %v4365_v60, %v4364_v62 }
 0xed1   : > { %v2507_v53 = vmul.f32 %v4406_v50, %v4402_v33  ;;  %v2736_v9 = vpop.permute.xlu1 %2735  ;;  %v2238_v50 = vld [vmem:[%s5499_s14 + $0x60] sm:$0xff] }
 0xed3   : > { %4006 = vmatmul.mubr.msk.f32.vlgmr.msra.gmra.mrb[22].mxu1 %vm2324_vm9, %v2507_v53 }
 0xed4   : > { %4240 = vmatpush3.bf16.msra.mxu1 %v4239_v52  ;;  %4027 = vmatprep.mubr.msk.f32.mxu1 %vm4429_vm0, %v4427_v7  ;;  %v2239_v52 = vld [vmem:[%s5499_s14 + $0x68] sm:$0xff] }
 0xed5   : > { %4241 = vmatprep.subr.bf16.mxu1 %v4428_v8  ;;  %v2985_v11 = vpop.permute.xlu1 %2984  ;;  %v4267_v53 = vpack.c.bf16 %v2239_v52, %v2238_v50  ;;  %v3289_v50 = vld [vmem:[%s5503_s18 + $0xa0] sm:$0xff]  ;;  %v3291_v52 = vld [vmem:[%s5503_s18 + $0xb0] sm:$0xff] }
 0xed8   : > { %4243 = vmatpush3.bf16.msra.mxu1 %v4242_v56 }
 0xed9   : > { %4248 = vmatprep.subr.bf16.mxu1 %v4428_v8 }
 0xf33   : > { %v2409_v57 = vpop.f32.mrb[20].mxu1 }
 0xf34   : > { %v3993_v59 = vpop.f32.mrb[21].mxu1  ;;  %4028 = vmatmul.mubr.msk.f32.vlgmr.msra.gmra.mrb[24].mxu1 %vm1014_vm1, %v2409_v57 }
 0xf35   : > { %4041 = vmatprep.mubr.msk.f32.mxu1 %vm4429_vm0, %v4427_v7 }
 0xfa6   : > { %v2585_v27 = vpop.f32.mrb[22].mxu1 }
 0xfa7   : > { %v4007_v1 = vpop.f32.mrb[23].mxu1  ;;  %4017 = vmatmul.mubr.msk.f32.vlgmr.msra.gmra.mrb[18].mxu0 %vm1014_vm1, %v2585_v27  ;;  %v2241_v27 = vld [vmem:[%s5499_s14 + $0x78] sm:$0xff] }
 0xfa8   : > { %4247 = vmatpush3.bf16.xpose.msk.msra.mxu0 %vm5095_vm4, %v4245_v63  ;;  %4034 = vmatprep.mubr.msk.f32.mxu0 %vm4429_vm0, %v4427_v7 }
 0xfa9   : > { %4258 = vmatprep.subr.bf16.mxu0 %v4428_v8 }
 0xfaf   : > { %4035 = vmatmul.mubr.msk.f32.vlgmr.msra.gmra.mrb[20].mxu0 %vm1014_vm1, %v2736_v9 }
 0xfb0   : > { %4261 = vmatpush3.bf16.xpose.msk.msra.mxu0 %vm5095_vm4, %v4259_v4  ;;  %4059 = vmatprep.mubr.msk.f32.mxu0 %vm4429_vm0, %v4427_v7 }
 0xfb1   : > { %4266 = vmatprep.subr.bf16.mxu0 %v4428_v8 }
 0xfb7   : > { %4060 = vmatmul.mubr.msk.f32.vlgmr.msra.gmra.mrb[22].mxu0 %vm1014_vm1, %v2985_v11 }
 0xfb8   : > { %4077 = vmatprep.mubr.msk.f32.mxu0 %vm4429_vm0, %v4427_v7  ;;  %4268 = vmatpush3.bf16.msra.mxu0 %v4267_v53 }
 0xfb9   : > { %4269 = vmatprep.subr.bf16.mxu0 %v4428_v8 }
0x1007   : > { %v2731_v12 = vpop.f32.mrb[24].mxu1 }
0x1008   : > { %v4029_v13 = vpop.f32.mrb[25].mxu1 }
0x107a   : > { %v2658_v14 = vpop.f32.mrb[18].mxu0 }
0x107b   : > { %v5201_v16 = vadd.f32 %v2731_v12, %v2658_v14  ;;  %v4018_v19 = vpop.f32.mrb[19].mxu0 }
0x107c   : > { %v3272_v19 = vld [vmem:[%s5503_s18 + $0x18] sm:$0xff] }
0x1082   : > { %v2813_v20 = vpop.f32.mrb[20].mxu0 }
0x1083   : > { %v2817_v58 = vmul.f32 0.17677669, %v2813_v20  ;;  %v4036_v21 = vpop.f32.mrb[21].mxu0  ;;  %v3269_v20 = vld [vmem:[%s5503_s18] sm:$0xff] }
0x1084   : > { %v3271_v21 = vld [vmem:[%s5503_s18 + $0x10] sm:$0xff] }
0x1085   : > { %v2818_v22 = vsel %vm2322_vm8, -10000.0, %v2817_v58 }
0x1086   : > { %v2819_v6 = vsel %vm2324_vm9, %v2818_v22, -inf }
0x1087   : > { %2820 = vmax.xlane.f32.xlu1 %v2819_v6  ;;  %v4274_v6 = vpack.c.bf16 %v3271_v21, %v3269_v20  ;;  %v3323_v20 = vld [vmem:[%s5505_s20 + $0xa8] sm:$0xff] }
0x108a   : > { %v3062_v24 = vpop.f32.mrb[22].mxu0 }
0x108b   : > { %v4061_v25 = vpop.f32.mrb[23].mxu0  ;;  %v3066_v34 = vmul.f32 0.17677669, %v3062_v24 }
0x108c   : > { %v3273_v25 = vld [vmem:[%s5503_s18 + $0x20] sm:$0xff] }
0x1098   : > { %4372 = vrot.lane.b32.xlu1 %v5099_v61, %s5544_s26 }
0x109c   : > { %4377 = vrot.lane.b32.xlu1 %v5099_v61, %s5543_s27  ;;  %v3067_v61 = vsel %vm2322_vm8, -10000.0, %v3066_v34 }
0x109d   : > { %v3068_v37 = vsel %vm2324_vm9, %v3067_v61, -inf }
0x1114   : > { %v2821_v18 = vpop.xlane.xlu1 %2820 }
0x1115   : > { %v2822_v26 = vsub.f32 %v2818_v22, %v2821_v18  ;;  %v3276_v22 = vld [vmem:[%s5503_s18 + $0x38] sm:$0xff]  ;;  %v3275_v18 = vld [vmem:[%s5503_s18 + $0x30] sm:$0xff] }
0x1117   : > { %v2823_v28 = vmul.f32 1.442695, %v2822_v26  ;;  %v3278_v26 = vld [vmem:[%s5503_s18 + $0x48] sm:$0xff] }
0x1118   : > { %v4373_v29 = vpop.permute.xlu1 %4372 }
0x1119   : > { %4407 = vpow2.f32 %v2823_v28  ;;  %v4375_v30 = vunpack.i.h.bf16 %v4373_v29  ;;  %v4374_v32 = vunpack.i.l.bf16 %v4373_v29  ;;  %v3280_v28 = vld [vmem:[%s5503_s18 + $0x58] sm:$0xff]  ;;  %v4278_v29 = vpack.c.bf16 %v3275_v18, %v3273_v25 }
0x111b   : > { %v4249_v33 = vpack.c.bf16 %v4375_v30, %v4374_v32  ;;  %v4280_v30 = vpack.c.bf16 %v3280_v28, %v3278_v26  ;;  %v3277_v32 = vld [vmem:[%s5503_s18 + $0x40] sm:$0xff]  ;;  %v3308_v26 = vld [vmem:[%s5505_s20 + $0x30] sm:$0xff]  ;;  %v3309_v28 = vld [vmem:[%s5505_s20 + $0x38] sm:$0xff] }
0x111c   : > { %v4378_v55 = vpop.permute.xlu1 %4377 }
0x111d   : > { %4251 = vmatpush3.bf16.msk.msra.mxu1 %vm5111_vm7, %v4249_v33  ;;  %v4380_v56 = vunpack.i.h.bf16 %v4378_v55  ;;  %v4379_v57 = vunpack.i.l.bf16 %v4378_v55  ;;  %v3279_v33 = vld [vmem:[%s5503_s18 + $0x50] sm:$0xff]  ;;  %v3296_v55 = vld [vmem:[%s5503_s18 + $0xd8] sm:$0xff] }
0x111e   : > { %4252 = vmatprep.subr.bf16.mxu1 %v4428_v8  ;;  %v4282_v34 = vpack.c.bf16 %v3279_v33, %v3277_v32  ;;  %v4318_v32 = vpack.c.bf16 %v3309_v28, %v3308_v26 }
0x111f   : > { %v4263_v31 = vpack.c.bf16 %v4380_v56, %v4379_v57  ;;  %v4294_v56 = vpack.c.bf16 %v3291_v52, %v3289_v50  ;;  %v3670_v50 = vld [vmem:[%s5502_s17] ss:$0 sm:$0xff] }
0x1123   : > { %v4408_v35 = vpop.eup %4407 }
0x1124   : > { %v2825_v36 = vsel %vm2324_vm9, %v4408_v35, 0.0 }
0x1125   : > { %2826 = vadd.xlane.f32.xlu0 %v2825_v36 }
0x1129   : > { %3069 = vmax.xlane.f32.xlu0 %v3068_v37 }
0x11b2   : > { %v2827_v38 = vpop.xlane.xlu0 %2826 }
0x11b3   : > { %4409 = vrcp.f32 %v2827_v38  ;;  %v3282_v38 = vld [vmem:[%s5503_s18 + $0x68] sm:$0xff] }
0x11b6   : > { %v3070_v39 = vpop.xlane.xlu0 %3069 }
0x11b7   : > { %v3071_v40 = vsub.f32 %v3067_v61, %v3070_v39  ;;  %v3284_v39 = vld [vmem:[%s5503_s18 + $0x78] sm:$0xff] }
0x11b9   : > { %v3072_v41 = vmul.f32 1.442695, %v3071_v40  ;;  %v4284_v40 = vpack.c.bf16 %v3284_v39, %v3282_v38 }
0x11bb   : > { %4411 = vpow2.f32 %v3072_v41  ;;  %v3281_v41 = vld [vmem:[%s5503_s18 + $0x60] sm:$0xff] }
0x11bd   : > { %v4410_v42 = vpop.eup %4409 }
0x11be   : > { %v2829_v23 = vmul.f32 %v4410_v42, %v4408_v35  ;;  %v3283_v42 = vld [vmem:[%s5503_s18 + $0x70] sm:$0xff] }
0x11c0   : > { %4042 = vmatmul.mubr.msk.f32.vlgmr.msra.gmra.mrb[26].mxu1 %vm2324_vm9, %v2829_v23  ;;  %v4286_v23 = vpack.c.bf16 %v3283_v42, %v3281_v41  ;;  %v3313_v41 = vld [vmem:[%s5505_s20 + $0x58] sm:$0xff]  ;;  %v3330_v42 = vld [vmem:[%s5505_s20 + $0xe0] sm:$0xff] }
0x11c1   : > { %4052 = vmatprep.mubr.msk.f32.mxu1 %vm4429_vm0, %v4427_v7  ;;  %4254 = vmatpush3.bf16.msra.mxu1 %v4253_v47  ;;  %v3290_v47 = vld [vmem:[%s5503_s18 + $0xa8] sm:$0xff] }
0x11c2   : > { %4255 = vmatprep.subr.bf16.mxu1 %v4428_v8 }
0x11c5   : > { %v4412_v43 = vpop.eup %4411  ;;  %4257 = vmatpush3.bf16.msra.mxu1 %v4256_v49  ;;  %v3292_v49 = vld [vmem:[%s5503_s18 + $0xb8] sm:$0xff] }
0x11c6   : > { %v3074_v10 = vsel %vm2324_vm9, %v4412_v43, 0.0  ;;  %4262 = vmatprep.subr.bf16.mxu1 %v4428_v8  ;;  %v2240_v8 = vld [vmem:[%s5499_s14 + $0x70] sm:$0xff]  ;;  %v4292_v53 = vpack.c.bf16 %v3292_v49, %v3290_v47 }
0x11c7   : > { %3075 = vadd.xlane.f32.xlu0 %v3074_v10  ;;  %v4270_v0 = vpack.c.bf16 %v2241_v27, %v2240_v8  ;;  %v3288_v10 = vld [vmem:[%s5503_s18 + $0x98] sm:$0xff]  ;;  %v3297_v27 = vld [vmem:[%s5503_s18 + $0xe0] sm:$0xff] }
0x11c9   : > { %4271 = vmatpush3.bf16.msra.mxu0 %v4270_v0  ;;  %v3299_v0 = vld [vmem:[%s5503_s18 + $0xf0] sm:$0xff] }
0x1254   : > { %v3076_v54 = vpop.xlane.xlu0 %3075 }
0x1255   : > { %4413 = vrcp.f32 %v3076_v54  ;;  %v3294_v54 = vld [vmem:[%s5503_s18 + $0xc8] sm:$0xff] }
0x1256   : > { %v4296_v57 = vpack.c.bf16 %v3296_v55, %v3294_v54  ;;  %v3314_v54 = vld [vmem:[%s5505_s20 + $0x60] sm:$0xff]  ;;  %v3315_v55 = vld [vmem:[%s5505_s20 + $0x68] sm:$0xff] }
0x125f   : > { %v4414_v59 = vpop.eup %4413 }
0x1260   : > { %v3078_v63 = vmul.f32 %v4414_v59, %v4412_v43  ;;  %v3286_v43 = vld [vmem:[%s5503_s18 + $0x88] sm:$0xff]  ;;  %v3293_v59 = vld [vmem:[%s5503_s18 + $0xc0] sm:$0xff] }
0x1261   : > { %v4288_v44 = vpack.c.bf16 %v3288_v10, %v3286_v43 }
0x1293   : > { %v2906_v60 = vpop.f32.mrb[26].mxu1 }
0x1294   : > { %v4043_v62 = vpop.f32.mrb[27].mxu1  ;;  %4053 = vmatmul.mubr.msk.f32.vlgmr.msra.gmra.mrb[28].mxu1 %vm1014_vm1, %v2906_v60  ;;  %v3298_v60 = vld [vmem:[%s5503_s18 + $0xe8] sm:$0xff] }
0x1295   : > { %4265 = vmatpush3.bf16.msk.msra.mxu1 %vm5111_vm7, %v4263_v31  ;;  %4066 = vmatprep.mubr.msk.f32.mxu1 %vm4429_vm0, %v4427_v7  ;;  %v3295_v31 = vld [vmem:[%s5503_s18 + $0xd0] sm:$0xff]  ;;  %v3300_v62 = vld [vmem:[%s5503_s18 + $0xf8] sm:$0xff] }
0x1296   : > { %v4300_v8 = vpack.c.bf16 %v3300_v62, %v3298_v60  ;;  %v3317_v60 = vld [vmem:[%s5505_s20 + $0x78] sm:$0xff] }
0x1298   : > { %4067 = vmatmul.mubr.msk.f32.vlgmr.msra.gmra.mrb[30].mxu1 %vm2324_vm9, %v3078_v63  ;;  %v4298_v63 = vpack.c.bf16 %v3295_v31, %v3293_v59  ;;  %v3316_v31 = vld [vmem:[%s5505_s20 + $0x70] sm:$0xff] }
0x1299   : > { %3410 = vmatprep.mubr.f32.mxu1 %v4427_v7  ;;  %v3668_v7 = vld [vmem:[%s5500_s15] ss:$0 sm:$0xff]  ;;  %v4334_v62 = vpack.c.bf16 %v3317_v60, %v3316_v31 }
0x1367   : > { %v2979_v5 = vpop.f32.mrb[28].mxu1 }
0x1368   : > { %v2983_v1 = vadd.f32 %v2979_v5, %v5201_v16  ;;  %v4054_v2 = vpop.f32.mrb[29].mxu1  ;;  %v3270_v16 = vld [vmem:[%s5503_s18 + $0x8] sm:$0xff]  ;;  %v4302_v5 = vpack.c.bf16 %v3299_v0, %v3297_v27 }
0x1369   : > { %v4272_v58 = vpack.c.bf16 %v3272_v19, %v3270_v16  ;;  %v3319_v2 = vld [vmem:[%s5505_s20 + $0x88] sm:$0xff]  ;;  %v3305_v16 = vld [vmem:[%s5505_s20 + $0x18] sm:$0xff]  ;;  %v3322_v19 = vld [vmem:[%s5505_s20 + $0xa0] sm:$0xff] }
0x136a   : > { %v4312_v21 = vpack.c.bf16 %v3323_v20, %v3322_v19 }
0x136b   : > { %v3155_v3 = vpop.f32.mrb[30].mxu1  ;;  %4273 = vmatprep.subr.bf16.mxu1 %v4272_v58 }
0x136c   : > { %v4068_v4 = vpop.f32.mrb[31].mxu1  ;;  %4078 = vmatmul.mubr.msk.f32.vlgmr.msra.gmra.mrb[24].mxu0 %vm1014_vm1, %v3155_v3  ;;  %4275 = vmatpush1.bf16.msra.mxu1 %v4274_v6  ;;  %v3302_v3 = vld [vmem:[%s5505_s20] sm:$0xff]  ;;  %v3324_v6 = vld [vmem:[%s5505_s20 + $0xb0] sm:$0xff] }
0x143f   : > { %v3228_v9 = vpop.f32.mrb[24].mxu0 }
0x1440   : > { %v3232_v11 = vadd.f32 %v3228_v9, %v2983_v1  ;;  %v4079_v12 = vpop.f32.mrb[25].mxu0  ;;  %v3318_v1 = vld [vmem:[%s5505_s20 + $0x80] sm:$0xff]  ;;  %v3303_v9 = vld [vmem:[%s5505_s20 + $0x8] sm:$0xff] }
0x1441   : > { %v4304_v4 = vpack.c.bf16 %v3319_v2, %v3318_v1  ;;  %v4306_v12 = vpack.c.bf16 %v3303_v9, %v3302_v3 }
0x1442   : > { %v3240_v13 = vadd.f32 %v3668_v7, %v3232_v11  ;;  %v3320_v7 = vld [vmem:[%s5505_s20 + $0x90] sm:$0xff]  ;;  %v3321_v11 = vld [vmem:[%s5505_s20 + $0x98] sm:$0xff] }
0x1443   : > { %4305 = vmatprep.subr.bf16.mxu0 %v4304_v4 }
0x1444   : > { %v3241_v14 = vadd.f32 %v3240_v13, %v5087_v51  ;;  %v3274_v51 = vld [vmem:[%s5503_s18 + $0x28] sm:$0xff]  ;;  %v4308_v13 = vpack.c.bf16 %v3321_v11, %v3320_v7  ;;  %4307 = vmatpush3.bf16.msra.mxu0 %v4306_v12  ;;  %v3671_v7 = vld [vmem:[%s5506_s21] ss:$0 sm:$0xff] }
0x1445   : > { %v4276_v24 = vpack.c.bf16 %v3276_v22, %v3274_v51  ;;  %v3306_v51 = vld [vmem:[%s5505_s20 + $0x20] sm:$0xff]  ;;  %v3307_v22 = vld [vmem:[%s5505_s20 + $0x28] sm:$0xff] }
0x1446   : > { %3244 = vadd.xlane.f32.xlu0 %v3241_v14  ;;  %4309 = vmatprep.subr.bf16.mxu0 %v4308_v13  ;;  %v4314_v25 = vpack.c.bf16 %v3307_v22, %v3306_v51  ;;  %v3672_v22 = vld [vmem:[%s5507_s22] ss:$0 sm:$0xff] }
0x1447   : > { %4277 = vmatprep.subr.bf16.mxu1 %v4276_v24  ;;  %v3325_v24 = vld [vmem:[%s5505_s20 + $0xb8] sm:$0xff] }
0x1448   : > { %4279 = vmatpush1.bf16.msra.mxu1 %v4278_v29  ;;  %v4316_v18 = vpack.c.bf16 %v3325_v24, %v3324_v6  ;;  %v3326_v29 = vld [vmem:[%s5505_s20 + $0xc0] sm:$0xff] }
0x1449   : > { %4281 = vmatprep.subr.bf16.mxu1 %v4280_v30  ;;  %v3327_v30 = vld [vmem:[%s5505_s20 + $0xc8] sm:$0xff]  ;;  %v3673_v24 = vld [vmem:[%s5508_s23] ss:$0 sm:$0xff] }
0x144a   : > { %v4320_v33 = vpack.c.bf16 %v3327_v30, %v3326_v29 }
0x144c   : > { %4283 = vmatpush1.bf16.msra.mxu1 %v4282_v34  ;;  %v3310_v34 = vld [vmem:[%s5505_s20 + $0x40] sm:$0xff] }
0x144d   : > { %4285 = vmatprep.subr.bf16.mxu1 %v4284_v40  ;;  %v3312_v40 = vld [vmem:[%s5505_s20 + $0x50] sm:$0xff] }
0x144e   : > { %v4326_v43 = vpack.c.bf16 %v3313_v41, %v3312_v40 }
0x1450   : > { %4287 = vmatpush1.bf16.msra.mxu1 %v4286_v23  ;;  %v3331_v23 = vld [vmem:[%s5505_s20 + $0xe8] sm:$0xff] }
0x1451   : > { %4289 = vmatprep.subr.bf16.mxu1 %v4288_v44  ;;  %v4328_v10 = vpack.c.bf16 %v3331_v23, %v3330_v42 }
0x1454   : > { %4291 = vmatpush1.bf16.msra.mxu1 %v4290_v48  ;;  %v3669_v48 = vld [vmem:[%s5501_s16] ss:$0 sm:$0xff] }
0x1455   : > { %4293 = vmatprep.subr.bf16.mxu1 %v4292_v53 }
0x1458   : > { %4295 = vmatpush1.bf16.msra.mxu1 %v4294_v56  ;;  %v4330_v56 = vpack.c.bf16 %v3315_v55, %v3314_v54 }
0x1459   : > { %4297 = vmatprep.subr.bf16.mxu1 %v4296_v57  ;;  %v3333_v57 = vld [vmem:[%s5505_s20 + $0xf8] sm:$0xff] }
0x145c   : > { %4299 = vmatpush1.bf16.msra.mxu1 %v4298_v63  ;;  %v3301_v63 = vld [vmem:[%s5504_s19] sm:$0x3] }
0x145d   : > { %4301 = vmatprep.subr.bf16.mxu1 %v4300_v8  ;;  %v3339_v8 = vrot.slane %v3301_v63, %v4756_v17  ;;  %v3343_v27 = vrot.slane %v3301_v63, %v4751_v15 }
0x1460   : > { %4303 = vmatpush1.bf16.msra.mxu1 %v4302_v5 }
0x14d3   : > { %v3245_v35 = vpop.xlane.xlu0 %3244 }
0x14d4   : > { %v3246_v36 = vmul.f32 0.0078125, %v3245_v35  ;;  %v3311_v35 = vld [vmem:[%s5505_s20 + $0x48] sm:$0xff] }
0x14d5   : > { %v4322_v38 = vpack.c.bf16 %v3311_v35, %v3310_v34 }
0x14d6   : > { %v5297_v61 = vsub.f32 %v3241_v14, %v3246_v36  ;;  %v3304_v14 = vld [vmem:[%s5505_s20 + $0x10] sm:$0xff] }
0x14d7   : > { %v4310_v58 = vpack.c.bf16 %v3305_v16, %v3304_v14  ;;  %v3328_v36 = vld [vmem:[%s5505_s20 + $0xd0] sm:$0xff] }
0x14d8   : > { %v3248_v37 = vmul.f32 %v5297_v61, %v5297_v61 }
0x14d9   : > { %4311 = vmatpush3.bf16.msra.mxu0 %v4310_v58 }
0x14da   : > { %3249 = vadd.xlane.f32.xlu1 %v3248_v37  ;;  %4313 = vmatprep.subr.bf16.mxu0 %v4312_v21  ;;  %v3329_v37 = vld [vmem:[%s5505_s20 + $0xd8] sm:$0xff] }
0x14db   : > { %v4324_v39 = vpack.c.bf16 %v3329_v37, %v3328_v36 }
0x14dd   : > { %4315 = vmatpush3.bf16.msra.mxu0 %v4314_v25 }
0x14de   : > { %4317 = vmatprep.subr.bf16.mxu0 %v4316_v18 }
0x14e1   : > { %4319 = vmatpush3.bf16.msra.mxu0 %v4318_v32 }
0x14e2   : > { %4321 = vmatprep.subr.bf16.mxu0 %v4320_v33 }
0x14e5   : > { %4323 = vmatpush3.bf16.msra.mxu0 %v4322_v38 }
0x14e6   : > { %4325 = vmatprep.subr.bf16.mxu0 %v4324_v39 }
0x14e9   : > { %4327 = vmatpush3.bf16.msra.mxu0 %v4326_v43 }
0x14ea   : > { %4329 = vmatprep.subr.bf16.mxu0 %v4328_v10 }
0x14ed   : > { %4331 = vmatpush3.bf16.msra.mxu0 %v4330_v56 }
0x1567   : > { %v3250_v44 = vpop.xlane.xlu1 %3249 }
0x1568   : > { %v3251_v45 = vmul.f32 0.0078125, %v3250_v44 }
0x156a   : > { %v3252_v46 = vadd.f32 1e-12, %v3251_v45 }
0x156c   : > { %4415 = vrsqrt.f32 %v3252_v46 }
0x1576   : > { %v4416_v47 = vpop.eup %4415 }
0x1577   : > { %v3254_v49 = vmul.f32 %v4416_v47, %v5297_v61  ;;  %v3332_v61 = vld [vmem:[%s5505_s20 + $0xf0] sm:$0xff] }
0x1578   : > { %v4332_v59 = vpack.c.bf16 %v3333_v57, %v3332_v61 }
0x1579   : > { %v3261_v52 = vmul.f32 %v3669_v48, %v3254_v49 }
0x157a   : > { %4333 = vmatprep.subr.bf16.mxu0 %v4332_v59 }
0x157b   : > { %v3268_v53 = vadd.f32 %v3670_v50, %v3261_v52  ;;  %4335 = vmatpush3.bf16.msra.mxu0 %v4334_v62 }
0x157d   : > { %3411 = vmatmul.mubr.f32.vlgmr.msra.gmra.mrb[32].mxu1 %v3268_v53 }
0x1650   : > { %v3412_v0 = vpop.f32.mrb[32].mxu1 }
0x1651   : > { %v3413_v5 = vadd.f32 %v3412_v0, %v3339_v8  ;;  %v3414_v1 = vpop.f32.mrb[33].mxu1 }
0x1652   : > { %v3415_v2 = vadd.f32 %v3414_v1, %v3343_v27 }
0x1653   : > { %v3417_v4 = vmax.f32 %v3413_v5, 0.0 }
0x1654   : > { %v3418_v3 = vmax.f32 %v3415_v2, 0.0 }
0x1656   : > { %3489 = vmatprep.mubr.f32.mxu0 %v3418_v3 }
0x1657   : > { %3490 = vmatmul.mubr.f32.vlgmr.msra.gmra.mrb[26].mxu0 %v3417_v4 }
0x172a   : > { %v3823_v9 = vpop.f32.mrb[26].mxu0 }
0x172b   : > { %v3824_v11 = vpop.f32.mrb[27].mxu0 }
0x172c   : > { %v3825_v12 = vadd.f32 %v3824_v11, %v3823_v9 }
0x172e   : > { %v3492_v13 = vadd.f32 %v3825_v12, %v3671_v7 }
0x1730   : > { %v3495_v14 = vadd.f32 %v3492_v13, %v3268_v53 }
0x1732   : > { %3498 = vadd.xlane.f32.xlu0 %v3495_v14 }
0x17bf   : > { %v3499_v15 = vpop.xlane.xlu0 %3498 }
0x17c0   : > { %v3500_v17 = vmul.f32 0.0078125, %v3499_v15 }
0x17c2   : > { %v3501_v16 = vsub.f32 %v3495_v14, %v3500_v17 }
0x17c4   : > { %v3502_v19 = vmul.f32 %v3501_v16, %v3501_v16 }
0x17c6   : > { %3503 = vadd.xlane.f32.xlu0 %v3502_v19 }
0x1853   : > { %v3504_v20 = vpop.xlane.xlu0 %3503 }
0x1854   : > { %v3505_v58 = vmul.f32 0.0078125, %v3504_v20 }
0x1856   : > { %v3506_v21 = vadd.f32 1e-12, %v3505_v58 }
0x1858   : > { %4417 = vrsqrt.f32 %v3506_v21 }
0x1862   : > { %v4418_v51 = vpop.eup %4417 }
0x1863   : > { %v3508_v6 = vmul.f32 %v4418_v51, %v3501_v16 }
0x1865   : > { %v3515_v25 = vmul.f32 %v3672_v22, %v3508_v6 }
0x1867   : > { %v3522_v18 = vadd.f32 %v3673_v24, %v3515_v25 }
0x1869   : > { %3523 = vst [vmem:[%s786_s7] sm:$0xff] %v3522_v18 }
0x186a PF: > { %s34_s5 = sadd.s32 1, %s4425_s5  }
0x186b   : > { %p31_p4 = scmp.ge.s32.totalorder %s34_s5, 4  }
0x186d   :  { %33 = sbr.rel (!%p31_p4) target bundleno = 10 (0xa), region = 155 }

// kernel: _lambda_.9
= control target key start
LH: loop header
LB: loop body
LE: loop exit
PB: predicated region body
PF: predicated region fallthrough
CT: control target
= control target key end

     0   :  { %s338_s0 = inlined_call_operand.vmem [shape: f32[16,128], index: 0, kind: input, shape index: {}]   ;;  %s339_s1 = inlined_call_operand.vmem [shape: f32[128,128], index: 1, kind: input, shape index: {}]   ;;  %s340_s2 = inlined_call_operand.vmem [shape: f32[1,128], index: 2, kind: input, shape index: {}]   ;;  %s341_s3 = inlined_call_operand.hbm [shape: f32[16,128], index: 3, kind: output, shape index: {}]  }
   0x1   :  { %v17_v0 = vld [vmem:[%s339_s1] sm:$0xff]  ;;  %v18_v1 = vld [vmem:[%s339_s1 + $0x8] sm:$0xff]  ;;  %v19_v2 = vld [vmem:[%s339_s1 + $0x10] sm:$0xff] }
   0x2   :  { %v187_v3 = vpack.c.bf16 %v18_v1, %v17_v0  ;;  %v20_v4 = vld [vmem:[%s339_s1 + $0x18] sm:$0xff]  ;;  %v21_v6 = vld [vmem:[%s339_s1 + $0x20] sm:$0xff]  ;;  %v22_v7 = vld [vmem:[%s339_s1 + $0x28] sm:$0xff] }
   0x3   :  { %v191_v5 = vpack.c.bf16 %v20_v4, %v19_v2  ;;  %v195_v8 = vpack.c.bf16 %v22_v7, %v21_v6  ;;  %v15_v9 = vld [vmem:[%s338_s0] sm:$0xff]  ;;  %v23_v10 = vld [vmem:[%s339_s1 + $0x30] sm:$0xff]  ;;  %v24_v11 = vld [vmem:[%s339_s1 + $0x38] sm:$0xff] }
   0x4   :  { %188 = vmatprep.subr.bf16.mxu0 %v187_v3  ;;  %184 = vmatprep.mubr.f32.mxu0 %v15_v9 }
   0x5   :  { %190 = vmatpush3.bf16.msra.mxu0 %v187_v3 }
   0x6   :  { %192 = vmatprep.subr.bf16.mxu0 %v191_v5 }
   0x7   :  { %8 = vsyncpa [#allocation3], 0  ;;  %v199_v12 = vpack.c.bf16 %v24_v11, %v23_v10  ;;  %v25_v13 = vld [vmem:[%s339_s1 + $0x40] sm:$0xff]  ;;  %v26_v14 = vld [vmem:[%s339_s1 + $0x48] sm:$0xff]  ;;  %s246_s23 = smov [#allocation2]  }
   0x8   :  { %v203_v15 = vpack.c.bf16 %v26_v14, %v25_v13  ;;  %v27_v16 = vld [vmem:[%s339_s1 + $0x50] sm:$0xff]  ;;  %v28_v17 = vld [vmem:[%s339_s1 + $0x58] sm:$0xff]  ;;  %v29_v19 = vld [vmem:[%s339_s1 + $0x60] sm:$0xff]  ;;  %s122_s24 = sshll.u32 %s246_s23, 4  ;;  %s123_s24 = int_to_ptr.vmem [resolvable:$true] %s122_s24 }
   0x9   :  { %194 = vmatpush3.bf16.msra.mxu0 %v191_v5  ;;  %v207_v18 = vpack.c.bf16 %v28_v17, %v27_v16  ;;  %v30_v20 = vld [vmem:[%s339_s1 + $0x68] sm:$0xff]  ;;  %v31_v22 = vld [vmem:[%s339_s1 + $0x70] sm:$0xff]  ;;  %v32_v23 = vld [vmem:[%s339_s1 + $0x78] sm:$0xff]  ;;  %s222_s1 = scalar_lea.vmem %s123_s24, 256  ;;  %p227_p1 = scmp.lt.s32.totalorder %s123_s24, %s123_s24 }
   0xa   :  { %196 = vmatprep.subr.bf16.mxu0 %v195_v8  ;;  %v211_v21 = vpack.c.bf16 %v30_v20, %v29_v19  ;;  %v215_v24 = vpack.c.bf16 %v32_v23, %v31_v22  ;;  %v16_v25 = vld [vmem:[%s338_s0 + $0x8] sm:$0xff]  ;;  %v133_v26 = vld [vmem:[%s340_s2] ss:$0 sm:$0xff]  ;;  %p223_p0 = scmp.ne.s32.totalorder %s123_s24, %s222_s1  ;;  %p228_p2 = scmp.lt.s32.totalorder %s222_s1, %s222_s1 }
   0xc   :  { %p229_p3 = por %p228_p2, %p227_p1 }
   0xd   :  { %198 = vmatpush3.bf16.msra.mxu0 %v195_v8 }
   0xe   :  { %200 = vmatprep.subr.bf16.mxu0 %v199_v12  ;;  %p230_p4 = pnand %p229_p3, %p223_p0 }
  0x11   :  { %202 = vmatpush3.bf16.msra.mxu0 %v199_v12 }
  0x12   :  { %204 = vmatprep.subr.bf16.mxu0 %v203_v15 }
  0x15   :  { %206 = vmatpush3.bf16.msra.mxu0 %v203_v15 }
  0x16   :  { %208 = vmatprep.subr.bf16.mxu0 %v207_v18 }
  0x19   :  { %210 = vmatpush3.bf16.msra.mxu0 %v207_v18 }
  0x1a   :  { %212 = vmatprep.subr.bf16.mxu0 %v211_v21 }
  0x1d   :  { %214 = vmatpush3.bf16.msra.mxu0 %v211_v21 }
  0x1e   :  { %216 = vmatprep.subr.bf16.mxu0 %v215_v24 }
  0x21   :  { %218 = vmatpush3.bf16.msra.mxu0 %v215_v24 }
  0x24   :  { %185 = vmatmul.mubr.f32.vlgmr.msra.gmra.mrb[0].mxu0 %v16_v25 }
  0xf7   :  { %v186_v27 = vpop.f32.mrb[0].mxu0 }
  0xf8   :  { %v112_v28 = vadd.f32 %v186_v27, %v133_v26  ;;  %v106_v29 = vpop.f32.mrb[1].mxu0 }
  0xf9   :  { %v107_v30 = vadd.f32 %v133_v26, %v106_v29 }
  0xfa   :  { %116 = vst [vmem:[#allocation2 + $0x8] sm:$0xff] %v112_v28 }
  0xfb   :  { %115 = vst [vmem:[#allocation2] sm:$0xff] %v107_v30 }
  0xfc   :  { %233 = shalt.err (!%p230_p4)
}
  0xfd   :  { %s234_s2 = scalar_lea.hbm %s341_s3, 256 }
  0xfe   :  { %p235_p5 = scmp.ne.s32.totalorder %s341_s3, %s234_s2  ;;  %p238_p6 = scmp.lt.u32.totalorder %s234_s2, %s341_s3 }
 0x100   :  { %p240_p7 = pnand %p238_p6, %p235_p5 }
 0x102   :  { %243 = shalt.err (!%p240_p7)
}
 0x103   :  { %s247_s30 = smov 128   ;;  %s248_s4 = smov 8  }
 0x104   :  { %128 = dma.vmem_to_hbm [thread:$0]  %s123_s24, 256, %s341_s3, [#allocation3], %s247_s30, %s247_s30, %s248_s4  }
 0x105   :  { %244 = dma.done.wait [#allocation3], 256  }
 0x106   :  { %245 = vsyncadd [#allocation3], 4294967040 }
 0x107   :  { %132 = vsyncpa [#allocation3], 1 }

</bundles_post_ra>
